<compile_context>
chip_gen: v7x
topology: tpu7x:2x2x1
jax: 0.10.0
libtpu: 0.0.40
codegen_flags: <defaults>
</compile_context>

<pallas_src>
import functools

import numpy as np

import jax
import jax.numpy as jnp
from jax.experimental import pallas as pl
from jax.experimental.pallas import tpu as pltpu

MXU_DTYPE = jnp.bfloat16  # MXU operand dtype for network matmuls (f32 accumulate).


def _vmem():
    return pl.BlockSpec(memory_space=pltpu.MemorySpace.VMEM)


def _smem():
    return pl.BlockSpec(memory_space=pltpu.MemorySpace.SMEM)


def _mxu(x):
    return x.astype(MXU_DTYPE)


# ----------------------------------------------------------------------------
# Pallas kernels
# ----------------------------------------------------------------------------
def _mm_kernel(a_ref, b_ref, o_ref):
    o_ref[...] = jnp.dot(_mxu(a_ref[...]), _mxu(b_ref[...]),
                         preferred_element_type=jnp.float32)


def _mm_bias_kernel(a_ref, b_ref, bias_ref, o_ref, *, act):
    y = jnp.dot(_mxu(a_ref[...]), _mxu(b_ref[...]),
                preferred_element_type=jnp.float32) + bias_ref[...]
    if act == "sigmoid":
        y = jax.nn.sigmoid(y)
    o_ref[...] = y


def _conv_kernel(*refs, glu, norm):
    # One fused conv kernel: matmul (+bias) [+GLU gating] [+InstanceNorm+PReLU].
    # Input rows are time-tap im2col; frequency taps / stride live in the banded
    # weight built at prep time, so the output is already the lane-dense
    # (B*T, F_out*Cout) slab the IN epilogue needs.
    if glu:
        a_ref, wm_ref, bm_ref, wg_ref, bg_ref = refs[:5]
        rest = refs[5:]
    else:
        a_ref, wm_ref, bm_ref = refs[:3]
        rest = refs[3:]
    if norm:
        g_ref, bt_ref, alpha_ref, o_ref = rest
    else:
        (o_ref,) = rest
    a = a_ref[...]
    y = jnp.dot(a, wm_ref[...], preferred_element_type=jnp.float32) + bm_ref[...]
    if glu:
        yg = jnp.dot(a, wg_ref[...], preferred_element_type=jnp.float32) + bg_ref[...]
        y = y * jax.nn.sigmoid(yg)
    if norm:
        mu = jnp.mean(y, axis=-1, keepdims=True)
        var = jnp.mean(jnp.square(y - mu), axis=-1, keepdims=True)
        y = (y - mu) * jax.lax.rsqrt(var + 1e-8) * g_ref[...] + bt_ref[...]
        alpha = alpha_ref[0]
        y = jnp.where(y >= 0, y, alpha * y)
    o_ref[...] = y


def _lstm_kernel(x_ref, wih_ref, whh_ref, b_ref, o_ref, gx_ref, *, L, N):
    # Fused (block-diagonal) LSTM recurrence.
    #   x_ref:  (L*N, D)   bf16, sequence-major rows
    #   gates_x = x @ W_ih + b computed ONCE (hoisted input projection)
    #   per step: gates = gates_x[t] + h @ W_hh ; gate layout [i|f|g|o] * Ht.
    Ht = whh_ref.shape[0]
    gx_ref[...] = (jnp.dot(x_ref[...], wih_ref[...],
                           preferred_element_type=jnp.float32) + b_ref[...])
    whh = whh_ref[...]

    def step(t, carry):
        h, c = carry
        r0 = t * N
        gates = (gx_ref[pl.ds(r0, N), :]
                 + jnp.dot(h.astype(whh.dtype), whh,
                           preferred_element_type=jnp.float32))
        i = jax.nn.sigmoid(gates[:, 0 * Ht:1 * Ht])
        f = jax.nn.sigmoid(gates[:, 1 * Ht:2 * Ht])
        g = jnp.tanh(gates[:, 2 * Ht:3 * Ht])
        o = jax.nn.sigmoid(gates[:, 3 * Ht:4 * Ht])
        c = f * c + i * g
        h = o * jnp.tanh(c)
        o_ref[pl.ds(r0, N), :] = h
        return (h, c)

    carry = (jnp.zeros((N, Ht), jnp.float32), jnp.zeros((N, Ht), jnp.float32))
    if L <= 8:
        for t in range(L):            # tiny static unroll (demo shapes)
            carry = step(t, carry)
    else:
        jax.lax.fori_loop(0, L, step, carry)   # bounded vregs at production L


def _fc_ln_res2_kernel(a_ref, w_ref, b_ref, g_ref, bt_ref, r_ref, o_ref):
    # Paired (real, imag) FC + LayerNorm + residual, one launch, two dots.
    for p in range(2):
        y = jnp.dot(a_ref[p], w_ref[p],
                    preferred_element_type=jnp.float32) + b_ref[p]
        mu = jnp.mean(y, axis=-1, keepdims=True)
        var = jnp.mean(jnp.square(y - mu), axis=-1, keepdims=True)
        y = (y - mu) * jax.lax.rsqrt(var + 1e-5) * g_ref[p] + bt_ref[p]
        o_ref[p] = y + r_ref[p]


def _refine_kernel(x_ref, s_ref, w_ref, b_ref, o_ref):
    # 1x1 complex conv (scalar weights from SMEM) + Linear + Sigmoid, fused.
    # real / imag ride the leading axis -> no in-kernel sublane concat.
    wr, wi, br, bi = s_ref[0], s_ref[1], s_ref[2], s_ref[3]
    xr = x_ref[0]
    xi = x_ref[1]
    ur = wr * xr - wi * xi + br
    ui = wi * xr + wr * xi + bi
    w = w_ref[...]
    b = b_ref[...]
    o_ref[0] = jax.nn.sigmoid(
        jnp.dot(ur.astype(w.dtype), w, preferred_element_type=jnp.float32) + b)
    o_ref[1] = jax.nn.sigmoid(
        jnp.dot(ui.astype(w.dtype), w, preferred_element_type=jnp.float32) + b)


def _mask_apply_kernel(m_ref, w_ref, s_ref, o_ref):
    # Weighted channel sum + complex mask application, lane-dense (B, C, T*F).
    # NOTE: split at C//2 on the interleaved [r,i,r,i,...] channel order mirrors
    # torch's masks.chunk(2, dim=1) in the reference exactly.
    mw = m_ref[...] * w_ref[...]
    half = m_ref.shape[1] // 2
    mr = jnp.sum(mw[:, :half, :], axis=1)
    mi = jnp.sum(mw[:, half:, :], axis=1)
    sr = s_ref[:, 0, :]
    si = s_ref[:, 1, :]
    out_r = sr * mr - si * mi
    out_i = sr * mi + si * mr
    o_ref[...] = jnp.stack([out_r, out_i], axis=1)


def _win_dft_kernel(a_ref, win_ref, b_ref, o_ref):
    # (frames * window) @ DFT — f32 to preserve reconstruction accuracy.
    # TODO(synk): at production nframe consider bf16 DFT operands (v6e/v7x).
    o_ref[...] = jnp.dot(a_ref[...] * win_ref[...], b_ref[...],
                         preferred_element_type=jnp.float32)


def _idft_win_kernel(a_ref, b_ref, win_ref, o_ref):
    o_ref[...] = jnp.dot(a_ref[...], b_ref[...],
                         preferred_element_type=jnp.float32) * win_ref[...]


# ----------------------------------------------------------------------------
# Kernel wrappers
# ----------------------------------------------------------------------------
def _pick_block_m(M):
    if M < 1024:
        return None
    for bm in (512, 256, 128):
        if M % bm == 0:
            return bm
    return None


def pallas_matmul(a, b, bias=None, act="none"):
    """(M,K)@(K,N) [+bias] [+sigmoid], fused in one Pallas kernel."""
    a = a.astype(jnp.float32)
    b = b.astype(jnp.float32)
    M, K = a.shape
    _, N = b.shape
    if bias is None:
        kern, ops = _mm_kernel, (a, b)
    else:
        kern = functools.partial(_mm_bias_kernel, act=act)
        ops = (a, b, bias.reshape(1, N).astype(jnp.float32))
    bm = _pick_block_m(M)
    if bm is None:
        return pl.pallas_call(
            kern, out_shape=jax.ShapeDtypeStruct((M, N), jnp.float32))(*ops)
    # Row-tiled, megacore-parallel path (dormant at toy shapes).
    in_specs = [pl.BlockSpec((bm, K), lambda i: (i, 0)),
                pl.BlockSpec((K, N), lambda i: (0, 0))]
    if bias is not None:
        in_specs.append(pl.BlockSpec((1, N), lambda i: (0, 0)))
    return pl.pallas_call(
        kern,
        out_shape=jax.ShapeDtypeStruct((M, N), jnp.float32),
        grid=(M // bm,),
        in_specs=in_specs,
        out_specs=pl.BlockSpec((bm, N), lambda i: (i, 0)),
        compiler_params=pltpu.CompilerParams(
            dimension_semantics=("parallel",), vmem_limit_bytes=64 << 20),
    )(*ops)


def lstm_pallas(x_flat, wihT, whhT, b, L, N):
    Ht = whhT.shape[0]
    G = 4 * Ht
    kern = functools.partial(_lstm_kernel, L=L, N=N)
    return pl.pallas_call(
        kern,
        out_shape=jax.ShapeDtypeStruct((L * N, Ht), jnp.float32),
        scratch_shapes=[pltpu.VMEM((L * N, G), jnp.float32)],
    )(x_flat.astype(MXU_DTYPE), wihT, whhT, b)


def fc_ln_res2(a, fc, res):
    rows = a.shape[1]
    C = fc['wT'].shape[-1]
    return pl.pallas_call(
        _fc_ln_res2_kernel,
        out_shape=jax.ShapeDtypeStruct((2, rows, C), jnp.float32),
    )(a.astype(MXU_DTYPE), fc['wT'], fc['b'], fc['g'], fc['bt'],
      res.astype(jnp.float32))


def conv_block(x, lp):
    """Conv (+ dilation for transposed convs) as kt-tap im2col + one fused
    Pallas kernel (matmul + bias [+GLU] [+InstanceNorm+PReLU])."""
    B, Cin, T, F = x.shape
    s = lp['dilate']
    if s > 1:  # zero-dilation for the transposed-conv-as-conv equivalence
        Fd = (F - 1) * s + 1
        x = jnp.zeros((B, Cin, T, Fd), x.dtype).at[:, :, :, ::s].set(x)
        F = Fd
    xp = jnp.pad(x, ((0, 0), (0, 0), (lp['pad_t'], 0),
                     (lp['pad_f'], lp['pad_f'])))
    Tp = T + lp['pad_t']
    Fp = F + 2 * lp['pad_f']
    kt = lp['kt']
    T_out = Tp - kt + 1
    if kt == 1:
        rows = xp.transpose(0, 2, 1, 3).reshape(B * T_out, Cin * Fp)
    else:
        t_idx = jnp.arange(T_out)[:, None] + jnp.arange(kt)[None, :]
        rows = xp[:, :, t_idx, :].transpose(0, 2, 1, 3, 4).reshape(
            B * T_out, Cin * kt * Fp)
    rows = rows.astype(MXU_DTYPE)     # halve DMA bytes into the kernel (v5e)
    F_out, Cout = lp['F_out'], lp['Cout']
    ops = [rows, lp['Wm'], lp['bm']]
    in_specs = [_vmem(), _vmem(), _vmem()]
    if lp['glu']:
        ops += [lp['Wg'], lp['bg']]
        in_specs += [_vmem(), _vmem()]
    if lp['norm']:
        ops += [lp['g'], lp['bt'], lp['alpha']]
        in_specs += [_vmem(), _vmem(), _smem()]
    kern = functools.partial(_conv_kernel, glu=lp['glu'], norm=lp['norm'])
    y = pl.pallas_call(
        kern,
        out_shape=jax.ShapeDtypeStruct((B * T_out, F_out * Cout), jnp.float32),
        in_specs=in_specs,
        out_specs=_vmem(),
    )(*ops)
    return y.reshape(B, T_out, F_out, Cout).transpose(0, 3, 1, 2)


def ftlstm_resnet_pair(x_r, x_i, blk):
    # TODO(synk): FTLSTM_RESNET reconstructed: (BiLSTM over F + FC + LN + res)
    #             then (LSTM over T + FC + LN + res); r/i paths fused.
    B, C, T, F = x_r.shape
    H = blk['H']
    # ---- frequency BiLSTM (fwd_r / bwd_r / fwd_i / bwd_i fused) ----
    xr_tfc = x_r.transpose(0, 2, 3, 1)                       # (B,T,F,C)
    xi_tfc = x_i.transpose(0, 2, 3, 1)
    xr_seq = xr_tfc.reshape(B * T, F, C).transpose(1, 0, 2)  # (F,BT,C)
    xi_seq = xi_tfc.reshape(B * T, F, C).transpose(1, 0, 2)
    x_fused = jnp.concatenate([xr_seq, jnp.flip(xr_seq, 0),
                               xi_seq, jnp.flip(xi_seq, 0)], axis=-1)
    hs = lstm_pallas(x_fused.reshape(F * B * T, 4 * C),
                     blk['f_wihT'], blk['f_whhT'], blk['f_b'], L=F, N=B * T)
    hs = hs.reshape(F, B * T, 4 * H)
    hcat_r = jnp.concatenate([hs[..., 0 * H:1 * H],
                              jnp.flip(hs[..., 1 * H:2 * H], 0)], axis=-1)
    hcat_i = jnp.concatenate([hs[..., 2 * H:3 * H],
                              jnp.flip(hs[..., 3 * H:4 * H], 0)], axis=-1)
    a = jnp.stack([hcat_r.transpose(1, 0, 2).reshape(B * T * F, 2 * H),
                   hcat_i.transpose(1, 0, 2).reshape(B * T * F, 2 * H)], axis=0)
    res = jnp.stack([xr_tfc.reshape(B * T * F, C),
                     xi_tfc.reshape(B * T * F, C)], axis=0)
    y = fc_ln_res2(a, blk['f_fc'], res)                      # (2, BTF, C)
    xr_tfc = y[0].reshape(B, T, F, C)
    xi_tfc = y[1].reshape(B, T, F, C)
    # ---- time LSTM (r / i fused) ----
    xr_ftc = xr_tfc.transpose(0, 2, 1, 3).reshape(B * F, T, C)   # (BF,T,C)
    xi_ftc = xi_tfc.transpose(0, 2, 1, 3).reshape(B * F, T, C)
    xt_fused = jnp.concatenate([xr_ftc.transpose(1, 0, 2),
                                xi_ftc.transpose(1, 0, 2)], axis=-1)  # (T,BF,2C)
    ht = lstm_pallas(xt_fused.reshape(T * B * F, 2 * C),
                     blk['t_wihT'], blk['t_whhT'], blk['t_b'], L=T, N=B * F)
    ht = ht.reshape(T, B * F, 2 * H)
    a_t = jnp.stack([ht[..., :H].transpose(1, 0, 2).reshape(B * F * T, H),
                     ht[..., H:].transpose(1, 0, 2).reshape(B * F * T, H)],
                    axis=0)
    res_t = jnp.stack([xr_ftc.reshape(B * F * T, C),
                       xi_ftc.reshape(B * F * T, C)], axis=0)
    y_t = fc_ln_res2(a_t, blk['t_fc'], res_t)                # (2, BFT, C)
    x_r_out = y_t[0].reshape(B, F, T, C).transpose(0, 3, 2, 1)
    x_i_out = y_t[1].reshape(B, F, T, C).transpose(0, 3, 2, 1)
    return x_r_out, x_i_out


def rnn_dense_both(x_r, x_i, dp):
    # Reference applies rnn_dense_r to BOTH paths -> one fused matmul+sigmoid.
    B, C, T, F = x_r.shape
    a = jnp.concatenate(
        [x_r.transpose(0, 2, 1, 3).reshape(B * T, C * F),
         x_i.transpose(0, 2, 1, 3).reshape(B * T, C * F)], axis=0)
    y = pallas_matmul(a, dp['WT'], bias=dp['b'], act="sigmoid")
    return y.reshape(2, B, T, -1).transpose(1, 0, 2, 3)      # (B,2,T,fft)


def refine_fn(x, rp):
    B, C, T, F = x.shape
    c = C // 2
    y = x.reshape(B, 2, c, T, F).transpose(0, 1, 3, 2, 4).reshape(B, 2, T, c * F)
    a = jnp.stack([y[:, 0].reshape(B * T, c * F),
                   y[:, 1].reshape(B * T, c * F)], axis=0)
    N = rp['W'].shape[-1]
    z = pl.pallas_call(
        _refine_kernel,
        out_shape=jax.ShapeDtypeStruct((2, B * T, N), jnp.float32),
        in_specs=[_vmem(), _smem(), _vmem(), _vmem()],
        out_specs=_vmem(),
    )(a, rp['scal'], rp['W'], rp['b'])
    return z.reshape(2, B, T, N).transpose(1, 0, 2, 3)       # (B,2,T,fft)


def mask_apply(masks, mask_w, spec_mic):
    B, C, T, F = masks.shape
    out = pl.pallas_call(
        _mask_apply_kernel,
        out_shape=jax.ShapeDtypeStruct((B, 2, T * F), jnp.float32),
    )(masks.reshape(B, C, T * F).astype(jnp.float32),
      mask_w,
      spec_mic.reshape(B, 2, T * F).astype(jnp.float32))
    return out.reshape(B, 2, T, F)


def complex_cat(a, b):
    ar, ai = jnp.split(a, 2, axis=1)
    br, bi = jnp.split(b, 2, axis=1)
    return jnp.concatenate([ar, br, ai, bi], axis=1)


# ----------------------------------------------------------------------------
# STFT / iSTFT (DFT matmuls run in Pallas, window multiply fused in-kernel)
# ----------------------------------------------------------------------------
def make_stft_mats(nframe):
    # TODO(synk): STFT module reconstructed as windowed rDFT / overlap-add iDFT.
    fft_dim = nframe // 2 + 1
    n = jnp.arange(nframe, dtype=jnp.float32)
    k = jnp.arange(fft_dim, dtype=jnp.float32)
    ang = 2.0 * jnp.pi * jnp.outer(n, k) / nframe
    dft = jnp.concatenate([jnp.cos(ang), -jnp.sin(ang)], axis=1)     # (nframe,2F)
    ck = jnp.where((k == 0) | (k == nframe // 2), 1.0, 2.0)
    inv_r = (ck / nframe)[:, None] * jnp.cos(ang).T
    inv_i = -(ck / nframe)[:, None] * jnp.sin(ang).T
    idft = jnp.concatenate([inv_r, inv_i], axis=0)                   # (2F,nframe)
    window = 0.5 - 0.5 * jnp.cos(2.0 * jnp.pi * jnp.arange(nframe) / nframe)
    return (window.astype(jnp.float32), dft.astype(jnp.float32),
            idft.astype(jnp.float32))


def stft_transform_pair(mic, ref, window, dft_mat, nframe, nhop, fft_dim):
    """mic & ref STFT in one fused (window * frames) @ DFT Pallas matmul."""
    B, L = mic.shape
    T = (L - nframe) // nhop + 1
    idx = jnp.arange(T)[:, None] * nhop + jnp.arange(nframe)[None, :]
    frames = jnp.stack([mic, ref], axis=0)[:, :, idx]                # (2,B,T,nf)
    frames = frames.reshape(2 * B * T, nframe).astype(jnp.float32)
    spec = pl.pallas_call(
        _win_dft_kernel,
        out_shape=jax.ShapeDtypeStruct((2 * B * T, 2 * fft_dim), jnp.float32),
    )(frames, window.reshape(1, nframe), dft_mat)
    spec = spec.reshape(2, B, T, 2, fft_dim).transpose(0, 1, 3, 2, 4)
    return spec[0], spec[1]                                          # (B,2,T,F)


def stft_inverse(spec, window, idft_mat, nframe, nhop):
    B, _, T, F = spec.shape
    s2 = spec.transpose(0, 2, 1, 3).reshape(B * T, 2 * F)
    frames = pl.pallas_call(
        _idft_win_kernel,
        out_shape=jax.ShapeDtypeStruct((B * T, nframe), jnp.float32),
    )(s2, idft_mat, window.reshape(1, nframe))
    frames = frames.reshape(B, T, nframe)
    L = (T - 1) * nhop + nframe
    idx = jnp.arange(T)[:, None] * nhop + jnp.arange(nframe)[None, :]
    out = jnp.zeros((B, L), jnp.float32).at[:, idx].add(frames)
    wsum = jnp.zeros((L,), jnp.float32).at[idx].add(
        jnp.broadcast_to(window ** 2, (T, nframe)))
    # TODO(synk): overlap-add edge normalization may differ from torch.istft.
    out = out / jnp.maximum(wsum, 1e-8)[None, :]
    return out[:, None, :]


# ----------------------------------------------------------------------------
# Parameter construction (deterministic, synthetic)
# ----------------------------------------------------------------------------
class KeyGen:
    def __init__(self, seed):
        self.key = jax.random.PRNGKey(seed)

    def __call__(self):
        self.key, sub = jax.random.split(self.key)
        return sub


def _w(kg, shape, scale=0.05):
    return scale * jax.random.normal(kg(), shape, dtype=jnp.float32)


def init_params(kg, nframe, cnn_num, stride, rnn_hidden):
    fft_dim = nframe // 2 + 1
    cnn = [4] + list(cnn_num)
    n_layer = len(cnn) - 1
    nbin = fft_dim
    nbinT = (fft_dim >> stride.count(2)) + 1
    P = {'encoder': [], 'decoder': [], 'refine': []}
    for idx in range(n_layer):
        nbin = (nbin >> 1) + 1 if stride[idx] == 2 else nbin
        nbinT = (nbinT << 1) - 1 if stride[-1 - idx] == 2 else nbinT
        ci, co = cnn[idx], cnn[idx + 1]
        P['encoder'].append({
            'conv': {'Wr': _w(kg, (co // 2, ci // 2, 3, 5)),
                     'Wi': _w(kg, (co // 2, ci // 2, 3, 5)),
                     'br': jnp.zeros((co // 2,), jnp.float32),
                     'bi': jnp.zeros((co // 2,), jnp.float32)},
            'in_g': jnp.ones((co * nbin,), jnp.float32),
            'in_b': jnp.zeros((co * nbin,), jnp.float32),
            'prelu': jnp.float32(0.25),
        })
        din = 2 * cnn[-1 - idx]
        dout = cnn[-2 - idx] if idx != n_layer - 1 else 2

        def tconv():
            return {'Wr': _w(kg, (din // 2, dout // 2, 1, 5)),
                    'Wi': _w(kg, (din // 2, dout // 2, 1, 5)),
                    'br': jnp.zeros((dout // 2,), jnp.float32),
                    'bi': jnp.zeros((dout // 2,), jnp.float32)}

        dec = {'main': tconv(), 'gate': tconv()}
        if idx != n_layer - 1:
            dec['in_g'] = jnp.ones((dout * nbinT,), jnp.float32)
            dec['in_b'] = jnp.zeros((dout * nbinT,), jnp.float32)
            dec['prelu'] = jnp.float32(0.25)
        P['decoder'].append(dec)

        lin_in = nbinT * cnn[-2 - idx] // 2 if idx != n_layer - 1 else nbinT
        P['refine'].append({
            'conv1x1': {'Wr': _w(kg, (1, 1, 1, 1)), 'Wi': _w(kg, (1, 1, 1, 1)),
                        'br': jnp.zeros((1,), jnp.float32),
                        'bi': jnp.zeros((1,), jnp.float32)},
            'lin_W': _w(kg, (fft_dim, lin_in)),
            'lin_b': jnp.zeros((fft_dim,), jnp.float32),
        })

    cin = cnn_num[-1] // 2

    def lstm_p(in_dim, h):
        return {'W_ih': _w(kg, (4 * h, in_dim)), 'W_hh': _w(kg, (4 * h, h)),
                'b_ih': jnp.zeros((4 * h,), jnp.float32),
                'b_hh': jnp.zeros((4 * h,), jnp.float32)}

    def ftlstm_p():
        h = rnn_hidden
        return {'f_lstm_fwd': lstm_p(cin, h), 'f_lstm_bwd': lstm_p(cin, h),
                'f_fc_W': _w(kg, (cin, 2 * h)),
                'f_fc_b': jnp.zeros((cin,), jnp.float32),
                'f_ln_g': jnp.ones((cin,), jnp.float32),
                'f_ln_b': jnp.zeros((cin,), jnp.float32),
                't_lstm': lstm_p(cin, h),
                't_fc_W': _w(kg, (cin, h)),
                't_fc_b': jnp.zeros((cin,), jnp.float32),
                't_ln_g': jnp.ones((cin,), jnp.float32),
                't_ln_b': jnp.zeros((cin,), jnp.float32)}

    P['rnns_r'] = [ftlstm_p(), ftlstm_p()]
    P['rnns_i'] = [ftlstm_p(), ftlstm_p()]
    dense_in = nbin * cnn_num[-1] // 2
    P['rnn_dense_r'] = {'W': _w(kg, (fft_dim, dense_in)),
                        'b': jnp.zeros((fft_dim,), jnp.float32)}
    P['rnn_dense_i'] = {'W': _w(kg, (fft_dim, dense_in)),
                        'b': jnp.zeros((fft_dim,), jnp.float32)}
    P['mask_w'] = jnp.ones((2 * (len(cnn_num) + 1), 1, 1), jnp.float32)
    return P, fft_dim


# ----------------------------------------------------------------------------
# Eager weight preparation (fused / lowered / transposed weights, built once)
# ----------------------------------------------------------------------------
def _complex_conv_weight_np(p):
    Wr, Wi = np.asarray(p['Wr']), np.asarray(p['Wi'])
    W = np.concatenate([np.concatenate([Wr, -Wi], 1),
                        np.concatenate([Wi, Wr], 1)], 0)
    b = np.concatenate([np.asarray(p['br']), np.asarray(p['bi'])], 0)
    return W.astype(np.float32), b.astype(np.float32)


def _tconv_eq_weight_np(p):
    # TODO(synk): causal/transposed-conv conventions reconstructed.
    Wr = np.flip(np.asarray(p['Wr']), -1).transpose(1, 0, 2, 3)
    Wi = np.flip(np.asarray(p['Wi']), -1).transpose(1, 0, 2, 3)
    W = np.concatenate([np.concatenate([Wr, -Wi], 1),
                        np.concatenate([Wi, Wr], 1)], 0)
    b = np.concatenate([np.asarray(p['br']), np.asarray(p['bi'])], 0)
    return W.astype(np.float32), b.astype(np.float32)


def _lower_conv_weight(W, b, Fp, stride_f):
    """(Cout,Cin,kt,kf) conv -> banded (Cin*kt*Fp, F_out*Cout) weight;
    columns are (f, c)-ordered so the output is a lane-dense (B*T, F*C) slab."""
    Cout, Cin, kt, kf = W.shape
    F_out = (Fp - kf) // stride_f + 1
    Wb = np.zeros((Cin, kt, Fp, F_out, Cout), np.float32)
    for fo in range(F_out):
        for df in range(kf):
            Wb[:, :, fo * stride_f + df, fo, :] = W[:, :, :, df].transpose(1, 2, 0)
    Wb = Wb.reshape(Cin * kt * Fp, F_out * Cout)
    bb = np.tile(b[None, :], (F_out, 1)).reshape(1, F_out * Cout)
    return Wb, bb


def _fuse_lstms_np(plist):
    """Block-diagonal fusion of several LSTMs; gate layout [i|f|g|o]*Ht, each
    gate block sub-LSTM-major."""
    H = int(np.asarray(plist[0]['W_hh']).shape[1])
    Ds = [int(np.asarray(p['W_ih']).shape[1]) for p in plist]
    K = len(plist)
    Ht = K * H
    G = 4 * Ht
    Dtot = int(sum(Ds))
    wihT = np.zeros((Dtot, G), np.float32)
    whhT = np.zeros((Ht, G), np.float32)
    bias = np.zeros((G,), np.float32)
    doff = 0
    for k, p in enumerate(plist):
        Wih = np.asarray(p['W_ih']).reshape(4, H, Ds[k])
        Whh = np.asarray(p['W_hh']).reshape(4, H, H)
        bb = (np.asarray(p['b_ih']) + np.asarray(p['b_hh'])).reshape(4, H)
        for gI in range(4):
            c0 = gI * Ht + k * H
            wihT[doff:doff + Ds[k], c0:c0 + H] = Wih[gI].T
            whhT[k * H:(k + 1) * H, c0:c0 + H] = Whh[gI].T
            bias[c0:c0 + H] = bb[gI]
        doff += Ds[k]
    return (jnp.asarray(wihT, MXU_DTYPE), jnp.asarray(whhT, MXU_DTYPE),
            jnp.asarray(bias.reshape(1, G), jnp.float32))


def _stack_fc_np(pr, pi, w_key, b_key, g_key, bt_key):
    wT = np.stack([np.asarray(pr[w_key]).T, np.asarray(pi[w_key]).T], 0)
    b = np.stack([np.asarray(pr[b_key]).reshape(1, -1),
                  np.asarray(pi[b_key]).reshape(1, -1)], 0)
    g = np.stack([np.asarray(pr[g_key]).reshape(1, -1),
                  np.asarray(pi[g_key]).reshape(1, -1)], 0)
    bt = np.stack([np.asarray(pr[bt_key]).reshape(1, -1),
                   np.asarray(pi[bt_key]).reshape(1, -1)], 0)
    return dict(wT=jnp.asarray(wT, MXU_DTYPE),
                b=jnp.asarray(b, jnp.float32),
                g=jnp.asarray(g, jnp.float32),
                bt=jnp.asarray(bt, jnp.float32))


def prepare_params(P, nframe, nhop, stride, rnn_hidden, fft_dim):
    window, dft_mat, idft_mat = make_stft_mats(nframe)
    prep = {'window': window, 'dft': dft_mat, 'idft': idft_mat,
            'cfg': {'nframe': nframe, 'nhop': nhop, 'fft_dim': fft_dim}}

    # ----- encoder convs (IN gamma/beta permuted to the (f, c) lane order) ----
    F = fft_dim
    enc = []
    for idx, lp in enumerate(P['encoder']):
        W, b = _complex_conv_weight_np(lp['conv'])
        s = stride[idx]
        Fp = F + 2 * 2
        Cout = W.shape[0]
        Wb, bb = _lower_conv_weight(W, b, Fp, s)
        F_out = (Fp - 5) // s + 1
        g = np.asarray(lp['in_g']).reshape(Cout, F_out).T.reshape(1, F_out * Cout)
        bt = np.asarray(lp['in_b']).reshape(Cout, F_out).T.reshape(1, F_out * Cout)
        enc.append(dict(
            kt=3, pad_t=2, pad_f=2, dilate=1, F_out=F_out, Cout=Cout,
            glu=False, norm=True,
            Wm=jnp.asarray(Wb, MXU_DTYPE), bm=jnp.asarray(bb, jnp.float32),
            g=jnp.asarray(g, jnp.float32), bt=jnp.asarray(bt, jnp.float32),
            alpha=jnp.asarray([float(lp['prelu'])], jnp.float32)))
        F = F_out
    prep['encoder'] = enc

    # ----- decoder (GLU) convs ------------------------------------------------
    FT = F
    dec = []
    n_layer = len(P['decoder'])
    for idx, lp in enumerate(P['decoder']):
        s = stride[-1 - idx]
        Wm, bm = _tconv_eq_weight_np(lp['main'])
        Wg, bg = _tconv_eq_weight_np(lp['gate'])
        Fd = (FT - 1) * s + 1 if s > 1 else FT
        pad_eq = 5 - 1 - 2
        Fp = Fd + 2 * pad_eq
        Cout = Wm.shape[0]
        Wbm, bbm = _lower_conv_weight(Wm, bm, Fp, 1)
        Wbg, bbg = _lower_conv_weight(Wg, bg, Fp, 1)
        F_out = Fp - 5 + 1
        d = dict(kt=1, pad_t=0, pad_f=pad_eq, dilate=s, F_out=F_out, Cout=Cout,
                 glu=True, norm=(idx != n_layer - 1),
                 Wm=jnp.asarray(Wbm, MXU_DTYPE), bm=jnp.asarray(bbm, jnp.float32),
                 Wg=jnp.asarray(Wbg, MXU_DTYPE), bg=jnp.asarray(bbg, jnp.float32))
        if d['norm']:
            g = np.asarray(lp['in_g']).reshape(Cout, F_out).T.reshape(
                1, F_out * Cout)
            bt = np.asarray(lp['in_b']).reshape(Cout, F_out).T.reshape(
                1, F_out * Cout)
            d.update(g=jnp.asarray(g, jnp.float32),
                     bt=jnp.asarray(bt, jnp.float32),
                     alpha=jnp.asarray([float(lp['prelu'])], jnp.float32))
        dec.append(d)
        FT = F_out
    prep['decoder'] = dec

    # ----- refine layers ------------------------------------------------------
    refs = []
    for lp in P['refine']:
        scal = np.array([float(np.asarray(lp['conv1x1']['Wr']).reshape(())),
                         float(np.asarray(lp['conv1x1']['Wi']).reshape(())),
                         float(np.asarray(lp['conv1x1']['br']).reshape(())),
                         float(np.asarray(lp['conv1x1']['bi']).reshape(()))],
                        np.float32)
        refs.append(dict(
            scal=jnp.asarray(scal),
            W=jnp.asarray(np.asarray(lp['lin_W']).T, MXU_DTYPE),
            b=jnp.asarray(np.asarray(lp['lin_b']).reshape(1, -1), jnp.float32)))
    prep['refine'] = refs

    # ----- FTLSTM blocks: fuse (fwd_r, bwd_r, fwd_i, bwd_i) and (t_r, t_i) ----
    blocks = []
    for pr, pi in zip(P['rnns_r'], P['rnns_i']):
        f_wihT, f_whhT, f_b = _fuse_lstms_np(
            [pr['f_lstm_fwd'], pr['f_lstm_bwd'],
             pi['f_lstm_fwd'], pi['f_lstm_bwd']])
        t_wihT, t_whhT, t_b = _fuse_lstms_np([pr['t_lstm'], pi['t_lstm']])
        blocks.append(dict(
            H=rnn_hidden,
            f_wihT=f_wihT, f_whhT=f_whhT, f_b=f_b,
            t_wihT=t_wihT, t_whhT=t_whhT, t_b=t_b,
            f_fc=_stack_fc_np(pr, pi, 'f_fc_W', 'f_fc_b', 'f_ln_g', 'f_ln_b'),
            t_fc=_stack_fc_np(pr, pi, 't_fc_W', 't_fc_b', 't_ln_g', 't_ln_b')))
    prep['ftlstm'] = blocks

    prep['rnn_dense'] = dict(
        WT=jnp.asarray(np.asarray(P['rnn_dense_r']['W']).T, jnp.float32),
        b=jnp.asarray(np.asarray(P['rnn_dense_r']['b']), jnp.float32))
    prep['mask_w'] = jnp.asarray(
        np.asarray(P['mask_w']).reshape(1, -1, 1), jnp.float32)
    return prep


# ----------------------------------------------------------------------------
# Forward pass (mirrors DPCRN_REFINEMENT.forward)
# ----------------------------------------------------------------------------
def forward(prep, mic, ref):
    cfg = prep['cfg']
    nframe, nhop, fft_dim = cfg['nframe'], cfg['nhop'], cfg['fft_dim']

    spec_mic, spec_ref = stft_transform_pair(
        mic, ref, prep['window'], prep['dft'], nframe, nhop, fft_dim)
    x = jnp.concatenate([spec_mic[:, 0:1], spec_ref[:, 0:1],
                         spec_mic[:, 1:2], spec_ref[:, 1:2]], axis=1)  # (B,4,T,F)

    spec_store = []
    for lp in prep['encoder']:
        x = conv_block(x, lp)                     # conv + IN + PReLU fused
        spec_store.append(x)

    x_r, x_i = jnp.split(x, 2, axis=1)
    for blk in prep['ftlstm']:
        x_r, x_i = ftlstm_resnet_pair(x_r, x_i, blk)

    mask_rnn = rnn_dense_both(x_r, x_i, prep['rnn_dense'])  # reuses rnn_dense_r

    x = jnp.concatenate([x_r, x_i], axis=1)
    masks = [mask_rnn]
    for idx, lp in enumerate(prep['decoder']):
        x = complex_cat(x, spec_store[-idx - 1])
        x = conv_block(x, lp)                     # tconv + GLU (+IN+PReLU) fused
        masks.append(refine_fn(x, prep['refine'][idx]))

    masks = jnp.concatenate(masks, axis=1)        # (B, 2*(n_layer+1), T, F)
    out_spec = mask_apply(masks, prep['mask_w'], spec_mic)
    wav = stft_inverse(out_spec, prep['window'], prep['idft'], nframe, nhop)
    wav = jnp.squeeze(wav, 1)
    return jnp.clip(wav, -1.0, 1.0)


# ----------------------------------------------------------------------------
if __name__ == "__main__":
    nframe, nhop = 32, 16
    cnn_num = [8, 8, 16, 16]
    stride = [2, 2, 2, 2]
    rnn_hidden = 16

    kg = KeyGen(1234)
    P, fft_dim = init_params(kg, nframe, cnn_num, stride, rnn_hidden)
    prep = prepare_params(P, nframe, nhop, stride, rnn_hidden, fft_dim)

    B, L = 2, 128   # -> 7 STFT frames of 17 freq bins
    key = jax.random.PRNGKey(0)
    k1, k2 = jax.random.split(key)
    mic = 0.1 * jax.random.normal(k1, (B, L), jnp.float32)
    ref = 0.1 * jax.random.normal(k2, (B, L), jnp.float32)

    run = jax.jit(functools.partial(forward, prep))
    out = run(mic, ref)
    jax.block_until_ready(out)
    assert out.shape == (B, L), out.shape
    assert bool(jnp.all(jnp.isfinite(out)))
    print("KERNEL_OK")
</pallas_src>

<mosaic_0001>
module attributes {stable_mosaic.version = 11 : i64} {
  func.func private @main(%arg0: i32) attributes {dimension_semantics = [#tpu.dimension_semantics<core_parallel>], iteration_bounds = array<i64: 2>, tpu.core_type = #tpu.core_type<sc_scalar_subcore>, window_params = []} {
    return
  }
}

module attributes {stable_mosaic.version = 11 : i64} {
  func.func private @main(%arg0: i32) attributes {dimension_semantics = [#tpu.dimension_semantics<core_parallel>], iteration_bounds = array<i64: 2>, tpu.core_type = #tpu.core_type<sc_scalar_subcore>, window_params = []} {
    return
  }
}

module attributes {stable_mosaic.version = 11 : i64} {
  func.func @_win_dft_kernel(%arg0: memref<28x32xf32, #tpu.memory_space<vmem>>, %arg1: memref<1x32xf32, #tpu.memory_space<vmem>>, %arg2: memref<32x34xf32, #tpu.memory_space<vmem>>, %arg3: memref<28x34xf32, #tpu.memory_space<vmem>>) attributes {dimension_semantics = [], scalar_prefetch = 0 : i64, scratch_operands = 0 : i64, tpu.core_type = #tpu.core_type<tc>} {
    %c0 = arith.constant 0 : index
    %c0_0 = arith.constant 0 : index
    %0 = vector.load %arg0[%c0, %c0_0] : memref<28x32xf32, #tpu.memory_space<vmem>>, vector<28x32xf32>
    %c0_1 = arith.constant 0 : index
    %c0_2 = arith.constant 0 : index
    %1 = vector.load %arg1[%c0_1, %c0_2] : memref<1x32xf32, #tpu.memory_space<vmem>>, vector<1x32xf32>
    %2 = vector.broadcast %1 : vector<1x32xf32> to vector<28x32xf32>
    %3 = arith.mulf %0, %2 : vector<28x32xf32>
    %c0_3 = arith.constant 0 : index
    %c0_4 = arith.constant 0 : index
    %4 = vector.load %arg2[%c0_3, %c0_4] : memref<32x34xf32, #tpu.memory_space<vmem>>, vector<32x34xf32>
    %cst = arith.constant dense<0.000000e+00> : vector<28x34xf32>
    %5 = tpu.matmul %3, %4, %cst {dimension_numbers = #tpu.dot_dimension_numbers<[1], [0], [0], [1], [0, 0, 1, 1], [], []>} : vector<28x32xf32>, vector<32x34xf32>, vector<28x34xf32> -> vector<28x34xf32>
    %c0_5 = arith.constant 0 : index
    %c0_6 = arith.constant 0 : index
    %6 = vector.load %arg3[%c0_5, %c0_6] : memref<28x34xf32, #tpu.memory_space<vmem>>, vector<28x34xf32>
    tpu.vector_store %arg3[%c0_5, %c0_6], %5 {strides = array<i32>} : memref<28x34xf32, #tpu.memory_space<vmem>>, vector<28x34xf32>,
    return
  }
}

module attributes {stable_mosaic.version = 11 : i64} {
  func.func @_conv_kernel(%arg0: memref<14x252xbf16, #tpu.memory_space<vmem>>, %arg1: memref<252x72xbf16, #tpu.memory_space<vmem>>, %arg2: memref<1x72xf32, #tpu.memory_space<vmem>>, %arg3: memref<1x72xf32, #tpu.memory_space<vmem>>, %arg4: memref<1x72xf32, #tpu.memory_space<vmem>>, %arg5: memref<1xf32, #tpu.memory_space<smem>>, %arg6: memref<14x72xf32, #tpu.memory_space<vmem>>) attributes {dimension_semantics = [], scalar_prefetch = 0 : i64, scratch_operands = 0 : i64, tpu.core_type = #tpu.core_type<tc>} {
    %c0 = arith.constant 0 : index
    %c0_0 = arith.constant 0 : index
    %0 = vector.load %arg0[%c0, %c0_0] : memref<14x252xbf16, #tpu.memory_space<vmem>>, vector<14x252xbf16>
    %c0_1 = arith.constant 0 : index
    %c0_2 = arith.constant 0 : index
    %1 = vector.load %arg1[%c0_1, %c0_2] : memref<252x72xbf16, #tpu.memory_space<vmem>>, vector<252x72xbf16>
    %cst = arith.constant dense<0.000000e+00> : vector<14x72xf32>
    %2 = tpu.matmul %0, %1, %cst {dimension_numbers = #tpu.dot_dimension_numbers<[1], [0], [0], [1], [0, 0, 1, 1], [], []>} : vector<14x252xbf16>, vector<252x72xbf16>, vector<14x72xf32> -> vector<14x72xf32>
    %c0_3 = arith.constant 0 : index
    %c0_4 = arith.constant 0 : index
    %3 = vector.load %arg2[%c0_3, %c0_4] : memref<1x72xf32, #tpu.memory_space<vmem>>, vector<1x72xf32>
    %4 = vector.broadcast %3 : vector<1x72xf32> to vector<14x72xf32>
    %5 = arith.addf %2, %4 : vector<14x72xf32>
    %cst_5 = arith.constant dense<0.000000e+00> : vector<14xf32>
    %6 = vector.multi_reduction <add>, %5, %cst_5 [1] : vector<14x72xf32> to vector<14xf32>
    %7 = vector.shape_cast %6 : vector<14xf32> to vector<14x1xf32>
    %cst_6 = arith.constant 7.200000e+01 : f32
    %8 = vector.broadcast %cst_6 : f32 to vector<14x1xf32>
    %9 = arith.divf %7, %8 : vector<14x1xf32>
    %10 = vector.broadcast %9 : vector<14x1xf32> to vector<14x72xf32>
    %11 = arith.subf %5, %10 : vector<14x72xf32>
    %12 = arith.mulf %11, %11 : vector<14x72xf32>
    %cst_7 = arith.constant dense<0.000000e+00> : vector<14xf32>
    %13 = vector.multi_reduction <add>, %12, %cst_7 [1] : vector<14x72xf32> to vector<14xf32>
    %14 = vector.shape_cast %13 : vector<14xf32> to vector<14x1xf32>
    %cst_8 = arith.constant 7.200000e+01 : f32
    %15 = vector.broadcast %cst_8 : f32 to vector<14x1xf32>
    %16 = arith.divf %14, %15 : vector<14x1xf32>
    %17 = vector.broadcast %9 : vector<14x1xf32> to vector<14x72xf32>
    %18 = arith.subf %5, %17 : vector<14x72xf32>
    %cst_9 = arith.constant 9.99999993E-9 : f32
    %19 = vector.broadcast %cst_9 : f32 to vector<14x1xf32>
    %20 = arith.addf %16, %19 : vector<14x1xf32>
    %21 = math.rsqrt %20 : vector<14x1xf32>
    %22 = vector.broadcast %21 : vector<14x1xf32> to vector<14x72xf32>
    %23 = arith.mulf %18, %22 : vector<14x72xf32>
    %c0_10 = arith.constant 0 : index
    %c0_11 = arith.constant 0 : index
    %24 = vector.load %arg3[%c0_10, %c0_11] : memref<1x72xf32, #tpu.memory_space<vmem>>, vector<1x72xf32>
    %25 = vector.broadcast %24 : vector<1x72xf32> to vector<14x72xf32>
    %26 = arith.mulf %23, %25 : vector<14x72xf32>
    %c0_12 = arith.constant 0 : index
    %c0_13 = arith.constant 0 : index
    %27 = vector.load %arg4[%c0_12, %c0_13] : memref<1x72xf32, #tpu.memory_space<vmem>>, vector<1x72xf32>
    %28 = vector.broadcast %27 : vector<1x72xf32> to vector<14x72xf32>
    %29 = arith.addf %26, %28 : vector<14x72xf32>
    %c0_14 = arith.constant 0 : index
    %30 = memref.load %arg5[%c0_14] : memref<1xf32, #tpu.memory_space<smem>>
    %cst_15 = arith.constant 0.000000e+00 : f32
    %31 = vector.broadcast %cst_15 : f32 to vector<14x72xf32>
    %32 = arith.cmpf oge, %29, %31 : vector<14x72xf32>
    %33 = vector.broadcast %30 : f32 to vector<14x72xf32>
    %34 = arith.mulf %33, %29 : vector<14x72xf32>
    %35 = arith.select %32, %29, %34 : vector<14x72xi1>, vector<14x72xf32>
    %c0_16 = arith.constant 0 : index
    %c0_17 = arith.constant 0 : index
    %36 = vector.load %arg6[%c0_16, %c0_17] : memref<14x72xf32, #tpu.memory_space<vmem>>, vector<14x72xf32>
    tpu.vector_store %arg6[%c0_16, %c0_17], %35 {strides = array<i32>} : memref<14x72xf32, #tpu.memory_space<vmem>>, vector<14x72xf32>,
    return
  }
}

module attributes {stable_mosaic.version = 11 : i64} {
  func.func @_conv_kernel(%arg0: memref<14x312xbf16, #tpu.memory_space<vmem>>, %arg1: memref<312x40xbf16, #tpu.memory_space<vmem>>, %arg2: memref<1x40xf32, #tpu.memory_space<vmem>>, %arg3: memref<1x40xf32, #tpu.memory_space<vmem>>, %arg4: memref<1x40xf32, #tpu.memory_space<vmem>>, %arg5: memref<1xf32, #tpu.memory_space<smem>>, %arg6: memref<14x40xf32, #tpu.memory_space<vmem>>) attributes {dimension_semantics = [], scalar_prefetch = 0 : i64, scratch_operands = 0 : i64, tpu.core_type = #tpu.core_type<tc>} {
    %c0 = arith.constant 0 : index
    %c0_0 = arith.constant 0 : index
    %0 = vector.load %arg0[%c0, %c0_0] : memref<14x312xbf16, #tpu.memory_space<vmem>>, vector<14x312xbf16>
    %c0_1 = arith.constant 0 : index
    %c0_2 = arith.constant 0 : index
    %1 = vector.load %arg1[%c0_1, %c0_2] : memref<312x40xbf16, #tpu.memory_space<vmem>>, vector<312x40xbf16>
    %cst = arith.constant dense<0.000000e+00> : vector<14x40xf32>
    %2 = tpu.matmul %0, %1, %cst {dimension_numbers = #tpu.dot_dimension_numbers<[1], [0], [0], [1], [0, 0, 1, 1], [], []>} : vector<14x312xbf16>, vector<312x40xbf16>, vector<14x40xf32> -> vector<14x40xf32>
    %c0_3 = arith.constant 0 : index
    %c0_4 = arith.constant 0 : index
    %3 = vector.load %arg2[%c0_3, %c0_4] : memref<1x40xf32, #tpu.memory_space<vmem>>, vector<1x40xf32>
    %4 = vector.broadcast %3 : vector<1x40xf32> to vector<14x40xf32>
    %5 = arith.addf %2, %4 : vector<14x40xf32>
    %cst_5 = arith.constant dense<0.000000e+00> : vector<14xf32>
    %6 = vector.multi_reduction <add>, %5, %cst_5 [1] : vector<14x40xf32> to vector<14xf32>
    %7 = vector.shape_cast %6 : vector<14xf32> to vector<14x1xf32>
    %cst_6 = arith.constant 4.000000e+01 : f32
    %8 = vector.broadcast %cst_6 : f32 to vector<14x1xf32>
    %9 = arith.divf %7, %8 : vector<14x1xf32>
    %10 = vector.broadcast %9 : vector<14x1xf32> to vector<14x40xf32>
    %11 = arith.subf %5, %10 : vector<14x40xf32>
    %12 = arith.mulf %11, %11 : vector<14x40xf32>
    %cst_7 = arith.constant dense<0.000000e+00> : vector<14xf32>
    %13 = vector.multi_reduction <add>, %12, %cst_7 [1] : vector<14x40xf32> to vector<14xf32>
    %14 = vector.shape_cast %13 : vector<14xf32> to vector<14x1xf32>
    %cst_8 = arith.constant 4.000000e+01 : f32
    %15 = vector.broadcast %cst_8 : f32 to vector<14x1xf32>
    %16 = arith.divf %14, %15 : vector<14x1xf32>
    %17 = vector.broadcast %9 : vector<14x1xf32> to vector<14x40xf32>
    %18 = arith.subf %5, %17 : vector<14x40xf32>
    %cst_9 = arith.constant 9.99999993E-9 : f32
    %19 = vector.broadcast %cst_9 : f32 to vector<14x1xf32>
    %20 = arith.addf %16, %19 : vector<14x1xf32>
    %21 = math.rsqrt %20 : vector<14x1xf32>
    %22 = vector.broadcast %21 : vector<14x1xf32> to vector<14x40xf32>
    %23 = arith.mulf %18, %22 : vector<14x40xf32>
    %c0_10 = arith.constant 0 : index
    %c0_11 = arith.constant 0 : index
    %24 = vector.load %arg3[%c0_10, %c0_11] : memref<1x40xf32, #tpu.memory_space<vmem>>, vector<1x40xf32>
    %25 = vector.broadcast %24 : vector<1x40xf32> to vector<14x40xf32>
    %26 = arith.mulf %23, %25 : vector<14x40xf32>
    %c0_12 = arith.constant 0 : index
    %c0_13 = arith.constant 0 : index
    %27 = vector.load %arg4[%c0_12, %c0_13] : memref<1x40xf32, #tpu.memory_space<vmem>>, vector<1x40xf32>
    %28 = vector.broadcast %27 : vector<1x40xf32> to vector<14x40xf32>
    %29 = arith.addf %26, %28 : vector<14x40xf32>
    %c0_14 = arith.constant 0 : index
    %30 = memref.load %arg5[%c0_14] : memref<1xf32, #tpu.memory_space<smem>>
    %cst_15 = arith.constant 0.000000e+00 : f32
    %31 = vector.broadcast %cst_15 : f32 to vector<14x40xf32>
    %32 = arith.cmpf oge, %29, %31 : vector<14x40xf32>
    %33 = vector.broadcast %30 : f32 to vector<14x40xf32>
    %34 = arith.mulf %33, %29 : vector<14x40xf32>
    %35 = arith.select %32, %29, %34 : vector<14x40xi1>, vector<14x40xf32>
    %c0_16 = arith.constant 0 : index
    %c0_17 = arith.constant 0 : index
    %36 = vector.load %arg6[%c0_16, %c0_17] : memref<14x40xf32, #tpu.memory_space<vmem>>, vector<14x40xf32>
    tpu.vector_store %arg6[%c0_16, %c0_17], %35 {strides = array<i32>} : memref<14x40xf32, #tpu.memory_space<vmem>>, vector<14x40xf32>,
    return
  }
}

module attributes {stable_mosaic.version = 11 : i64} {
  func.func @_conv_kernel(%arg0: memref<14x216xbf16, #tpu.memory_space<vmem>>, %arg1: memref<216x48xbf16, #tpu.memory_space<vmem>>, %arg2: memref<1x48xf32, #tpu.memory_space<vmem>>, %arg3: memref<1x48xf32, #tpu.memory_space<vmem>>, %arg4: memref<1x48xf32, #tpu.memory_space<vmem>>, %arg5: memref<1xf32, #tpu.memory_space<smem>>, %arg6: memref<14x48xf32, #tpu.memory_space<vmem>>) attributes {dimension_semantics = [], scalar_prefetch = 0 : i64, scratch_operands = 0 : i64, tpu.core_type = #tpu.core_type<tc>} {
    %c0 = arith.constant 0 : index
    %c0_0 = arith.constant 0 : index
    %0 = vector.load %arg0[%c0, %c0_0] : memref<14x216xbf16, #tpu.memory_space<vmem>>, vector<14x216xbf16>
    %c0_1 = arith.constant 0 : index
    %c0_2 = arith.constant 0 : index
    %1 = vector.load %arg1[%c0_1, %c0_2] : memref<216x48xbf16, #tpu.memory_space<vmem>>, vector<216x48xbf16>
    %cst = arith.constant dense<0.000000e+00> : vector<14x48xf32>
    %2 = tpu.matmul %0, %1, %cst {dimension_numbers = #tpu.dot_dimension_numbers<[1], [0], [0], [1], [0, 0, 1, 1], [], []>} : vector<14x216xbf16>, vector<216x48xbf16>, vector<14x48xf32> -> vector<14x48xf32>
    %c0_3 = arith.constant 0 : index
    %c0_4 = arith.constant 0 : index
    %3 = vector.load %arg2[%c0_3, %c0_4] : memref<1x48xf32, #tpu.memory_space<vmem>>, vector<1x48xf32>
    %4 = vector.broadcast %3 : vector<1x48xf32> to vector<14x48xf32>
    %5 = arith.addf %2, %4 : vector<14x48xf32>
    %cst_5 = arith.constant dense<0.000000e+00> : vector<14xf32>
    %6 = vector.multi_reduction <add>, %5, %cst_5 [1] : vector<14x48xf32> to vector<14xf32>
    %7 = vector.shape_cast %6 : vector<14xf32> to vector<14x1xf32>
    %cst_6 = arith.constant 4.800000e+01 : f32
    %8 = vector.broadcast %cst_6 : f32 to vector<14x1xf32>
    %9 = arith.divf %7, %8 : vector<14x1xf32>
    %10 = vector.broadcast %9 : vector<14x1xf32> to vector<14x48xf32>
    %11 = arith.subf %5, %10 : vector<14x48xf32>
    %12 = arith.mulf %11, %11 : vector<14x48xf32>
    %cst_7 = arith.constant dense<0.000000e+00> : vector<14xf32>
    %13 = vector.multi_reduction <add>, %12, %cst_7 [1] : vector<14x48xf32> to vector<14xf32>
    %14 = vector.shape_cast %13 : vector<14xf32> to vector<14x1xf32>
    %cst_8 = arith.constant 4.800000e+01 : f32
    %15 = vector.broadcast %cst_8 : f32 to vector<14x1xf32>
    %16 = arith.divf %14, %15 : vector<14x1xf32>
    %17 = vector.broadcast %9 : vector<14x1xf32> to vector<14x48xf32>
    %18 = arith.subf %5, %17 : vector<14x48xf32>
    %cst_9 = arith.constant 9.99999993E-9 : f32
    %19 = vector.broadcast %cst_9 : f32 to vector<14x1xf32>
    %20 = arith.addf %16, %19 : vector<14x1xf32>
    %21 = math.rsqrt %20 : vector<14x1xf32>
    %22 = vector.broadcast %21 : vector<14x1xf32> to vector<14x48xf32>
    %23 = arith.mulf %18, %22 : vector<14x48xf32>
    %c0_10 = arith.constant 0 : index
    %c0_11 = arith.constant 0 : index
    %24 = vector.load %arg3[%c0_10, %c0_11] : memref<1x48xf32, #tpu.memory_space<vmem>>, vector<1x48xf32>
    %25 = vector.broadcast %24 : vector<1x48xf32> to vector<14x48xf32>
    %26 = arith.mulf %23, %25 : vector<14x48xf32>
    %c0_12 = arith.constant 0 : index
    %c0_13 = arith.constant 0 : index
    %27 = vector.load %arg4[%c0_12, %c0_13] : memref<1x48xf32, #tpu.memory_space<vmem>>, vector<1x48xf32>
    %28 = vector.broadcast %27 : vector<1x48xf32> to vector<14x48xf32>
    %29 = arith.addf %26, %28 : vector<14x48xf32>
    %c0_14 = arith.constant 0 : index
    %30 = memref.load %arg5[%c0_14] : memref<1xf32, #tpu.memory_space<smem>>
    %cst_15 = arith.constant 0.000000e+00 : f32
    %31 = vector.broadcast %cst_15 : f32 to vector<14x48xf32>
    %32 = arith.cmpf oge, %29, %31 : vector<14x48xf32>
    %33 = vector.broadcast %30 : f32 to vector<14x48xf32>
    %34 = arith.mulf %33, %29 : vector<14x48xf32>
    %35 = arith.select %32, %29, %34 : vector<14x48xi1>, vector<14x48xf32>
    %c0_16 = arith.constant 0 : index
    %c0_17 = arith.constant 0 : index
    %36 = vector.load %arg6[%c0_16, %c0_17] : memref<14x48xf32, #tpu.memory_space<vmem>>, vector<14x48xf32>
    tpu.vector_store %arg6[%c0_16, %c0_17], %35 {strides = array<i32>} : memref<14x48xf32, #tpu.memory_space<vmem>>, vector<14x48xf32>,
    return
  }
}

module attributes {stable_mosaic.version = 11 : i64} {
  func.func @_conv_kernel(%arg0: memref<14x336xbf16, #tpu.memory_space<vmem>>, %arg1: memref<336x32xbf16, #tpu.memory_space<vmem>>, %arg2: memref<1x32xf32, #tpu.memory_space<vmem>>, %arg3: memref<1x32xf32, #tpu.memory_space<vmem>>, %arg4: memref<1x32xf32, #tpu.memory_space<vmem>>, %arg5: memref<1xf32, #tpu.memory_space<smem>>, %arg6: memref<14x32xf32, #tpu.memory_space<vmem>>) attributes {dimension_semantics = [], scalar_prefetch = 0 : i64, scratch_operands = 0 : i64, tpu.core_type = #tpu.core_type<tc>} {
    %c0 = arith.constant 0 : index
    %c0_0 = arith.constant 0 : index
    %0 = vector.load %arg0[%c0, %c0_0] : memref<14x336xbf16, #tpu.memory_space<vmem>>, vector<14x336xbf16>
    %c0_1 = arith.constant 0 : index
    %c0_2 = arith.constant 0 : index
    %1 = vector.load %arg1[%c0_1, %c0_2] : memref<336x32xbf16, #tpu.memory_space<vmem>>, vector<336x32xbf16>
    %cst = arith.constant dense<0.000000e+00> : vector<14x32xf32>
    %2 = tpu.matmul %0, %1, %cst {dimension_numbers = #tpu.dot_dimension_numbers<[1], [0], [0], [1], [0, 0, 1, 1], [], []>} : vector<14x336xbf16>, vector<336x32xbf16>, vector<14x32xf32> -> vector<14x32xf32>
    %c0_3 = arith.constant 0 : index
    %c0_4 = arith.constant 0 : index
    %3 = vector.load %arg2[%c0_3, %c0_4] : memref<1x32xf32, #tpu.memory_space<vmem>>, vector<1x32xf32>
    %4 = vector.broadcast %3 : vector<1x32xf32> to vector<14x32xf32>
    %5 = arith.addf %2, %4 : vector<14x32xf32>
    %cst_5 = arith.constant dense<0.000000e+00> : vector<14xf32>
    %6 = vector.multi_reduction <add>, %5, %cst_5 [1] : vector<14x32xf32> to vector<14xf32>
    %7 = vector.shape_cast %6 : vector<14xf32> to vector<14x1xf32>
    %cst_6 = arith.constant 3.200000e+01 : f32
    %8 = vector.broadcast %cst_6 : f32 to vector<14x1xf32>
    %9 = arith.divf %7, %8 : vector<14x1xf32>
    %10 = vector.broadcast %9 : vector<14x1xf32> to vector<14x32xf32>
    %11 = arith.subf %5, %10 : vector<14x32xf32>
    %12 = arith.mulf %11, %11 : vector<14x32xf32>
    %cst_7 = arith.constant dense<0.000000e+00> : vector<14xf32>
    %13 = vector.multi_reduction <add>, %12, %cst_7 [1] : vector<14x32xf32> to vector<14xf32>
    %14 = vector.shape_cast %13 : vector<14xf32> to vector<14x1xf32>
    %cst_8 = arith.constant 3.200000e+01 : f32
    %15 = vector.broadcast %cst_8 : f32 to vector<14x1xf32>
    %16 = arith.divf %14, %15 : vector<14x1xf32>
    %17 = vector.broadcast %9 : vector<14x1xf32> to vector<14x32xf32>
    %18 = arith.subf %5, %17 : vector<14x32xf32>
    %cst_9 = arith.constant 9.99999993E-9 : f32
    %19 = vector.broadcast %cst_9 : f32 to vector<14x1xf32>
    %20 = arith.addf %16, %19 : vector<14x1xf32>
    %21 = math.rsqrt %20 : vector<14x1xf32>
    %22 = vector.broadcast %21 : vector<14x1xf32> to vector<14x32xf32>
    %23 = arith.mulf %18, %22 : vector<14x32xf32>
    %c0_10 = arith.constant 0 : index
    %c0_11 = arith.constant 0 : index
    %24 = vector.load %arg3[%c0_10, %c0_11] : memref<1x32xf32, #tpu.memory_space<vmem>>, vector<1x32xf32>
    %25 = vector.broadcast %24 : vector<1x32xf32> to vector<14x32xf32>
    %26 = arith.mulf %23, %25 : vector<14x32xf32>
    %c0_12 = arith.constant 0 : index
    %c0_13 = arith.constant 0 : index
    %27 = vector.load %arg4[%c0_12, %c0_13] : memref<1x32xf32, #tpu.memory_space<vmem>>, vector<1x32xf32>
    %28 = vector.broadcast %27 : vector<1x32xf32> to vector<14x32xf32>
    %29 = arith.addf %26, %28 : vector<14x32xf32>
    %c0_14 = arith.constant 0 : index
    %30 = memref.load %arg5[%c0_14] : memref<1xf32, #tpu.memory_space<smem>>
    %cst_15 = arith.constant 0.000000e+00 : f32
    %31 = vector.broadcast %cst_15 : f32 to vector<14x32xf32>
    %32 = arith.cmpf oge, %29, %31 : vector<14x32xf32>
    %33 = vector.broadcast %30 : f32 to vector<14x32xf32>
    %34 = arith.mulf %33, %29 : vector<14x32xf32>
    %35 = arith.select %32, %29, %34 : vector<14x32xi1>, vector<14x32xf32>
    %c0_16 = arith.constant 0 : index
    %c0_17 = arith.constant 0 : index
    %36 = vector.load %arg6[%c0_16, %c0_17] : memref<14x32xf32, #tpu.memory_space<vmem>>, vector<14x32xf32>
    tpu.vector_store %arg6[%c0_16, %c0_17], %35 {strides = array<i32>} : memref<14x32xf32, #tpu.memory_space<vmem>>, vector<14x32xf32>,
    return
  }
}

module attributes {stable_mosaic.version = 11 : i64} {
  func.func @_lstm_kernel(%arg0: memref<28x32xbf16, #tpu.memory_space<vmem>>, %arg1: memref<32x256xbf16, #tpu.memory_space<vmem>>, %arg2: memref<64x256xbf16, #tpu.memory_space<vmem>>, %arg3: memref<1x256xf32, #tpu.memory_space<vmem>>, %arg4: memref<28x64xf32, #tpu.memory_space<vmem>>, %arg5: memref<28x256xf32, #tpu.memory_space<vmem>>) attributes {dimension_semantics = [], scalar_prefetch = 0 : i64, scratch_operands = 1 : i64, tpu.core_type = #tpu.core_type<tc>} {
    %c0 = arith.constant 0 : index
    %c0_0 = arith.constant 0 : index
    %0 = vector.load %arg0[%c0, %c0_0] : memref<28x32xbf16, #tpu.memory_space<vmem>>, vector<28x32xbf16>
    %c0_1 = arith.constant 0 : index
    %c0_2 = arith.constant 0 : index
    %1 = vector.load %arg1[%c0_1, %c0_2] : memref<32x256xbf16, #tpu.memory_space<vmem>>, vector<32x256xbf16>
    %cst = arith.constant dense<0.000000e+00> : vector<28x256xf32>
    %2 = tpu.matmul %0, %1, %cst {dimension_numbers = #tpu.dot_dimension_numbers<[1], [0], [0], [1], [0, 0, 1, 1], [], []>} : vector<28x32xbf16>, vector<32x256xbf16>, vector<28x256xf32> -> vector<28x256xf32>
    %c0_3 = arith.constant 0 : index
    %c0_4 = arith.constant 0 : index
    %3 = vector.load %arg3[%c0_3, %c0_4] : memref<1x256xf32, #tpu.memory_space<vmem>>, vector<1x256xf32>
    %4 = vector.broadcast %3 : vector<1x256xf32> to vector<28x256xf32>
    %5 = arith.addf %2, %4 : vector<28x256xf32>
    %c0_5 = arith.constant 0 : index
    %c0_6 = arith.constant 0 : index
    %6 = vector.load %arg5[%c0_5, %c0_6] : memref<28x256xf32, #tpu.memory_space<vmem>>, vector<28x256xf32>
    tpu.vector_store %arg5[%c0_5, %c0_6], %5 {strides = array<i32>} : memref<28x256xf32, #tpu.memory_space<vmem>>, vector<28x256xf32>,
    %c0_7 = arith.constant 0 : index
    %c0_8 = arith.constant 0 : index
    %7 = vector.load %arg2[%c0_7, %c0_8] : memref<64x256xbf16, #tpu.memory_space<vmem>>, vector<64x256xbf16>
    %cst_9 = arith.constant 0.000000e+00 : f32
    %8 = vector.broadcast %cst_9 : f32 to vector<14x64xf32>
    %cst_10 = arith.constant 0.000000e+00 : f32
    %9 = vector.broadcast %cst_10 : f32 to vector<14x64xf32>
    %c0_11 = arith.constant 0 : index
    %c0_12 = arith.constant 0 : index
    %10 = vector.load %arg5[%c0_11, %c0_12] : memref<28x256xf32, #tpu.memory_space<vmem>>, vector<14x256xf32>
    %11 = arith.truncf %8 : vector<14x64xf32> to vector<14x64xbf16>
    %cst_13 = arith.constant dense<0.000000e+00> : vector<14x256xf32>
    %12 = tpu.matmul %11, %7, %cst_13 {dimension_numbers = #tpu.dot_dimension_numbers<[1], [0], [0], [1], [0, 0, 1, 1], [], []>} : vector<14x64xbf16>, vector<64x256xbf16>, vector<14x256xf32> -> vector<14x256xf32>
    %13 = arith.addf %10, %12 : vector<14x256xf32>
    %14 = vector.extract_strided_slice %13 {offsets = [0, 0], sizes = [14, 64], strides = [1, 1]} : vector<14x256xf32> to vector<14x64xf32>
    %15 = arith.negf %14 : vector<14x64xf32>
    %16 = math.exp %15 : vector<14x64xf32>
    %cst_14 = arith.constant 1.000000e+00 : f32
    %17 = vector.broadcast %cst_14 : f32 to vector<14x64xf32>
    %18 = arith.addf %17, %16 : vector<14x64xf32>
    %19 = arith.divf %17, %18 : vector<14x64xf32>
    %20 = vector.extract_strided_slice %13 {offsets = [0, 64], sizes = [14, 64], strides = [1, 1]} : vector<14x256xf32> to vector<14x64xf32>
    %21 = arith.negf %20 : vector<14x64xf32>
    %22 = math.exp %21 : vector<14x64xf32>
    %cst_15 = arith.constant 1.000000e+00 : f32
    %23 = vector.broadcast %cst_15 : f32 to vector<14x64xf32>
    %24 = arith.addf %23, %22 : vector<14x64xf32>
    %25 = arith.divf %23, %24 : vector<14x64xf32>
    %26 = vector.extract_strided_slice %13 {offsets = [0, 128], sizes = [14, 64], strides = [1, 1]} : vector<14x256xf32> to vector<14x64xf32>
    %27 = math.tanh %26 : vector<14x64xf32>
    %28 = vector.extract_strided_slice %13 {offsets = [0, 192], sizes = [14, 64], strides = [1, 1]} : vector<14x256xf32> to vector<14x64xf32>
    %29 = arith.negf %28 : vector<14x64xf32>
    %30 = math.exp %29 : vector<14x64xf32>
    %cst_16 = arith.constant 1.000000e+00 : f32
    %31 = vector.broadcast %cst_16 : f32 to vector<14x64xf32>
    %32 = arith.addf %31, %30 : vector<14x64xf32>
    %33 = arith.divf %31, %32 : vector<14x64xf32>
    %34 = arith.mulf %25, %9 : vector<14x64xf32>
    %35 = arith.mulf %19, %27 : vector<14x64xf32>
    %36 = arith.addf %34, %35 : vector<14x64xf32>
    %37 = math.tanh %36 : vector<14x64xf32>
    %38 = arith.mulf %33, %37 : vector<14x64xf32>
    %c0_17 = arith.constant 0 : index
    %c0_18 = arith.constant 0 : index
    %39 = vector.load %arg4[%c0_17, %c0_18] : memref<28x64xf32, #tpu.memory_space<vmem>>, vector<14x64xf32>
    tpu.vector_store %arg4[%c0_17, %c0_18], %38 {strides = array<i32>} : memref<28x64xf32, #tpu.memory_space<vmem>>, vector<14x64xf32>,
    %c14 = arith.constant 14 : index
    %c0_19 = arith.constant 0 : index
    %40 = vector.load %arg5[%c14, %c0_19] : memref<28x256xf32, #tpu.memory_space<vmem>>, vector<14x256xf32>
    %41 = arith.truncf %38 : vector<14x64xf32> to vector<14x64xbf16>
    %cst_20 = arith.constant dense<0.000000e+00> : vector<14x256xf32>
    %42 = tpu.matmul %41, %7, %cst_20 {dimension_numbers = #tpu.dot_dimension_numbers<[1], [0], [0], [1], [0, 0, 1, 1], [], []>} : vector<14x64xbf16>, vector<64x256xbf16>, vector<14x256xf32> -> vector<14x256xf32>
    %43 = arith.addf %40, %42 : vector<14x256xf32>
    %44 = vector.extract_strided_slice %43 {offsets = [0, 0], sizes = [14, 64], strides = [1, 1]} : vector<14x256xf32> to vector<14x64xf32>
    %45 = arith.negf %44 : vector<14x64xf32>
    %46 = math.exp %45 : vector<14x64xf32>
    %cst_21 = arith.constant 1.000000e+00 : f32
    %47 = vector.broadcast %cst_21 : f32 to vector<14x64xf32>
    %48 = arith.addf %47, %46 : vector<14x64xf32>
    %49 = arith.divf %47, %48 : vector<14x64xf32>
    %50 = vector.extract_strided_slice %43 {offsets = [0, 64], sizes = [14, 64], strides = [1, 1]} : vector<14x256xf32> to vector<14x64xf32>
    %51 = arith.negf %50 : vector<14x64xf32>
    %52 = math.exp %51 : vector<14x64xf32>
    %cst_22 = arith.constant 1.000000e+00 : f32
    %53 = vector.broadcast %cst_22 : f32 to vector<14x64xf32>
    %54 = arith.addf %53, %52 : vector<14x64xf32>
    %55 = arith.divf %53, %54 : vector<14x64xf32>
    %56 = vector.extract_strided_slice %43 {offsets = [0, 128], sizes = [14, 64], strides = [1, 1]} : vector<14x256xf32> to vector<14x64xf32>
    %57 = math.tanh %56 : vector<14x64xf32>
    %58 = vector.extract_strided_slice %43 {offsets = [0, 192], sizes = [14, 64], strides = [1, 1]} : vector<14x256xf32> to vector<14x64xf32>
    %59 = arith.negf %58 : vector<14x64xf32>
    %60 = math.exp %59 : vector<14x64xf32>
    %cst_23 = arith.constant 1.000000e+00 : f32
    %61 = vector.broadcast %cst_23 : f32 to vector<14x64xf32>
    %62 = arith.addf %61, %60 : vector<14x64xf32>
    %63 = arith.divf %61, %62 : vector<14x64xf32>
    %64 = arith.mulf %55, %36 : vector<14x64xf32>
    %65 = arith.mulf %49, %57 : vector<14x64xf32>
    %66 = arith.addf %64, %65 : vector<14x64xf32>
    %67 = math.tanh %66 : vector<14x64xf32>
    %68 = arith.mulf %63, %67 : vector<14x64xf32>
    %c14_24 = arith.constant 14 : index
    %c0_25 = arith.constant 0 : index
    %69 = vector.load %arg4[%c14_24, %c0_25] : memref<28x64xf32, #tpu.memory_space<vmem>>, vector<14x64xf32>
    tpu.vector_store %arg4[%c14_24, %c0_25], %68 {strides = array<i32>} : memref<28x64xf32, #tpu.memory_space<vmem>>, vector<14x64xf32>,
    return
  }
}

module attributes {stable_mosaic.version = 11 : i64} {
  func.func @_fc_ln_res2_kernel(%arg0: memref<2x28x32xbf16, #tpu.memory_space<vmem>>, %arg1: memref<2x32x8xbf16, #tpu.memory_space<vmem>>, %arg2: memref<2x1x8xf32, #tpu.memory_space<vmem>>, %arg3: memref<2x1x8xf32, #tpu.memory_space<vmem>>, %arg4: memref<2x1x8xf32, #tpu.memory_space<vmem>>, %arg5: memref<2x28x8xf32, #tpu.memory_space<vmem>>, %arg6: memref<2x28x8xf32, #tpu.memory_space<vmem>>) attributes {dimension_semantics = [], scalar_prefetch = 0 : i64, scratch_operands = 0 : i64, tpu.core_type = #tpu.core_type<tc>} {
    %c0 = arith.constant 0 : index
    %c0_0 = arith.constant 0 : index
    %c0_1 = arith.constant 0 : index
    %0 = vector.load %arg0[%c0, %c0_0, %c0_1] : memref<2x28x32xbf16, #tpu.memory_space<vmem>>, vector<1x28x32xbf16>
    %1 = vector.shape_cast %0 : vector<1x28x32xbf16> to vector<28x32xbf16>
    %c0_2 = arith.constant 0 : index
    %c0_3 = arith.constant 0 : index
    %c0_4 = arith.constant 0 : index
    %2 = vector.load %arg1[%c0_2, %c0_3, %c0_4] : memref<2x32x8xbf16, #tpu.memory_space<vmem>>, vector<1x32x8xbf16>
    %3 = vector.shape_cast %2 : vector<1x32x8xbf16> to vector<32x8xbf16>
    %cst = arith.constant dense<0.000000e+00> : vector<28x8xf32>
    %4 = tpu.matmul %1, %3, %cst {dimension_numbers = #tpu.dot_dimension_numbers<[1], [0], [0], [1], [0, 0, 1, 1], [], []>} : vector<28x32xbf16>, vector<32x8xbf16>, vector<28x8xf32> -> vector<28x8xf32>
    %c0_5 = arith.constant 0 : index
    %c0_6 = arith.constant 0 : index
    %c0_7 = arith.constant 0 : index
    %5 = vector.load %arg2[%c0_5, %c0_6, %c0_7] : memref<2x1x8xf32, #tpu.memory_space<vmem>>, vector<1x1x8xf32>
    %6 = vector.shape_cast %5 : vector<1x1x8xf32> to vector<1x8xf32>
    %7 = vector.broadcast %6 : vector<1x8xf32> to vector<28x8xf32>
    %8 = arith.addf %4, %7 : vector<28x8xf32>
    %cst_8 = arith.constant dense<0.000000e+00> : vector<28xf32>
    %9 = vector.multi_reduction <add>, %8, %cst_8 [1] : vector<28x8xf32> to vector<28xf32>
    %10 = vector.shape_cast %9 : vector<28xf32> to vector<28x1xf32>
    %cst_9 = arith.constant 8.000000e+00 : f32
    %11 = vector.broadcast %cst_9 : f32 to vector<28x1xf32>
    %12 = arith.divf %10, %11 : vector<28x1xf32>
    %13 = vector.broadcast %12 : vector<28x1xf32> to vector<28x8xf32>
    %14 = arith.subf %8, %13 : vector<28x8xf32>
    %15 = arith.mulf %14, %14 : vector<28x8xf32>
    %cst_10 = arith.constant dense<0.000000e+00> : vector<28xf32>
    %16 = vector.multi_reduction <add>, %15, %cst_10 [1] : vector<28x8xf32> to vector<28xf32>
    %17 = vector.shape_cast %16 : vector<28xf32> to vector<28x1xf32>
    %cst_11 = arith.constant 8.000000e+00 : f32
    %18 = vector.broadcast %cst_11 : f32 to vector<28x1xf32>
    %19 = arith.divf %17, %18 : vector<28x1xf32>
    %20 = vector.broadcast %12 : vector<28x1xf32> to vector<28x8xf32>
    %21 = arith.subf %8, %20 : vector<28x8xf32>
    %cst_12 = arith.constant 9.99999974E-6 : f32
    %22 = vector.broadcast %cst_12 : f32 to vector<28x1xf32>
    %23 = arith.addf %19, %22 : vector<28x1xf32>
    %24 = math.rsqrt %23 : vector<28x1xf32>
    %25 = vector.broadcast %24 : vector<28x1xf32> to vector<28x8xf32>
    %26 = arith.mulf %21, %25 : vector<28x8xf32>
    %c0_13 = arith.constant 0 : index
    %c0_14 = arith.constant 0 : index
    %c0_15 = arith.constant 0 : index
    %27 = vector.load %arg3[%c0_13, %c0_14, %c0_15] : memref<2x1x8xf32, #tpu.memory_space<vmem>>, vector<1x1x8xf32>
    %28 = vector.shape_cast %27 : vector<1x1x8xf32> to vector<1x8xf32>
    %29 = vector.broadcast %28 : vector<1x8xf32> to vector<28x8xf32>
    %30 = arith.mulf %26, %29 : vector<28x8xf32>
    %c0_16 = arith.constant 0 : index
    %c0_17 = arith.constant 0 : index
    %c0_18 = arith.constant 0 : index
    %31 = vector.load %arg4[%c0_16, %c0_17, %c0_18] : memref<2x1x8xf32, #tpu.memory_space<vmem>>, vector<1x1x8xf32>
    %32 = vector.shape_cast %31 : vector<1x1x8xf32> to vector<1x8xf32>
    %33 = vector.broadcast %32 : vector<1x8xf32> to vector<28x8xf32>
    %34 = arith.addf %30, %33 : vector<28x8xf32>
    %c0_19 = arith.constant 0 : index
    %c0_20 = arith.constant 0 : index
    %c0_21 = arith.constant 0 : index
    %35 = vector.load %arg5[%c0_19, %c0_20, %c0_21] : memref<2x28x8xf32, #tpu.memory_space<vmem>>, vector<1x28x8xf32>
    %36 = vector.shape_cast %35 : vector<1x28x8xf32> to vector<28x8xf32>
    %37 = arith.addf %34, %36 : vector<28x8xf32>
    %c0_22 = arith.constant 0 : index
    %c0_23 = arith.constant 0 : index
    %c0_24 = arith.constant 0 : index
    %38 = vector.load %arg6[%c0_22, %c0_23, %c0_24] : memref<2x28x8xf32, #tpu.memory_space<vmem>>, vector<1x28x8xf32>
    %39 = vector.shape_cast %38 : vector<1x28x8xf32> to vector<28x8xf32>
    %40 = vector.shape_cast %37 : vector<28x8xf32> to vector<1x28x8xf32>
    tpu.vector_store %arg6[%c0_22, %c0_23, %c0_24], %40 {strides = array<i32>} : memref<2x28x8xf32, #tpu.memory_space<vmem>>, vector<1x28x8xf32>,
    %c1 = arith.constant 1 : index
    %c0_25 = arith.constant 0 : index
    %c0_26 = arith.constant 0 : index
    %41 = vector.load %arg0[%c1, %c0_25, %c0_26] : memref<2x28x32xbf16, #tpu.memory_space<vmem>>, vector<1x28x32xbf16>
    %42 = vector.shape_cast %41 : vector<1x28x32xbf16> to vector<28x32xbf16>
    %c1_27 = arith.constant 1 : index
    %c0_28 = arith.constant 0 : index
    %c0_29 = arith.constant 0 : index
    %43 = vector.load %arg1[%c1_27, %c0_28, %c0_29] : memref<2x32x8xbf16, #tpu.memory_space<vmem>>, vector<1x32x8xbf16>
    %44 = vector.shape_cast %43 : vector<1x32x8xbf16> to vector<32x8xbf16>
    %cst_30 = arith.constant dense<0.000000e+00> : vector<28x8xf32>
    %45 = tpu.matmul %42, %44, %cst_30 {dimension_numbers = #tpu.dot_dimension_numbers<[1], [0], [0], [1], [0, 0, 1, 1], [], []>} : vector<28x32xbf16>, vector<32x8xbf16>, vector<28x8xf32> -> vector<28x8xf32>
    %c1_31 = arith.constant 1 : index
    %c0_32 = arith.constant 0 : index
    %c0_33 = arith.constant 0 : index
    %46 = vector.load %arg2[%c1_31, %c0_32, %c0_33] : memref<2x1x8xf32, #tpu.memory_space<vmem>>, vector<1x1x8xf32>
    %47 = vector.shape_cast %46 : vector<1x1x8xf32> to vector<1x8xf32>
    %48 = vector.broadcast %47 : vector<1x8xf32> to vector<28x8xf32>
    %49 = arith.addf %45, %48 : vector<28x8xf32>
    %cst_34 = arith.constant dense<0.000000e+00> : vector<28xf32>
    %50 = vector.multi_reduction <add>, %49, %cst_34 [1] : vector<28x8xf32> to vector<28xf32>
    %51 = vector.shape_cast %50 : vector<28xf32> to vector<28x1xf32>
    %cst_35 = arith.constant 8.000000e+00 : f32
    %52 = vector.broadcast %cst_35 : f32 to vector<28x1xf32>
    %53 = arith.divf %51, %52 : vector<28x1xf32>
    %54 = vector.broadcast %53 : vector<28x1xf32> to vector<28x8xf32>
    %55 = arith.subf %49, %54 : vector<28x8xf32>
    %56 = arith.mulf %55, %55 : vector<28x8xf32>
    %cst_36 = arith.constant dense<0.000000e+00> : vector<28xf32>
    %57 = vector.multi_reduction <add>, %56, %cst_36 [1] : vector<28x8xf32> to vector<28xf32>
    %58 = vector.shape_cast %57 : vector<28xf32> to vector<28x1xf32>
    %cst_37 = arith.constant 8.000000e+00 : f32
    %59 = vector.broadcast %cst_37 : f32 to vector<28x1xf32>
    %60 = arith.divf %58, %59 : vector<28x1xf32>
    %61 = vector.broadcast %53 : vector<28x1xf32> to vector<28x8xf32>
    %62 = arith.subf %49, %61 : vector<28x8xf32>
    %cst_38 = arith.constant 9.99999974E-6 : f32
    %63 = vector.broadcast %cst_38 : f32 to vector<28x1xf32>
    %64 = arith.addf %60, %63 : vector<28x1xf32>
    %65 = math.rsqrt %64 : vector<28x1xf32>
    %66 = vector.broadcast %65 : vector<28x1xf32> to vector<28x8xf32>
    %67 = arith.mulf %62, %66 : vector<28x8xf32>
    %c1_39 = arith.constant 1 : index
    %c0_40 = arith.constant 0 : index
    %c0_41 = arith.constant 0 : index
    %68 = vector.load %arg3[%c1_39, %c0_40, %c0_41] : memref<2x1x8xf32, #tpu.memory_space<vmem>>, vector<1x1x8xf32>
    %69 = vector.shape_cast %68 : vector<1x1x8xf32> to vector<1x8xf32>
    %70 = vector.broadcast %69 : vector<1x8xf32> to vector<28x8xf32>
    %71 = arith.mulf %67, %70 : vector<28x8xf32>
    %c1_42 = arith.constant 1 : index
    %c0_43 = arith.constant 0 : index
    %c0_44 = arith.constant 0 : index
    %72 = vector.load %arg4[%c1_42, %c0_43, %c0_44] : memref<2x1x8xf32, #tpu.memory_space<vmem>>, vector<1x1x8xf32>
    %73 = vector.shape_cast %72 : vector<1x1x8xf32> to vector<1x8xf32>
    %74 = vector.broadcast %73 : vector<1x8xf32> to vector<28x8xf32>
    %75 = arith.addf %71, %74 : vector<28x8xf32>
    %c1_45 = arith.constant 1 : index
    %c0_46 = arith.constant 0 : index
    %c0_47 = arith.constant 0 : index
    %76 = vector.load %arg5[%c1_45, %c0_46, %c0_47] : memref<2x28x8xf32, #tpu.memory_space<vmem>>, vector<1x28x8xf32>
    %77 = vector.shape_cast %76 : vector<1x28x8xf32> to vector<28x8xf32>
    %78 = arith.addf %75, %77 : vector<28x8xf32>
    %c1_48 = arith.constant 1 : index
    %c0_49 = arith.constant 0 : index
    %c0_50 = arith.constant 0 : index
    %79 = vector.load %arg6[%c1_48, %c0_49, %c0_50] : memref<2x28x8xf32, #tpu.memory_space<vmem>>, vector<1x28x8xf32>
    %80 = vector.shape_cast %79 : vector<1x28x8xf32> to vector<28x8xf32>
    %81 = vector.shape_cast %78 : vector<28x8xf32> to vector<1x28x8xf32>
    tpu.vector_store %arg6[%c1_48, %c0_49, %c0_50], %81 {strides = array<i32>} : memref<2x28x8xf32, #tpu.memory_space<vmem>>, vector<1x28x8xf32>,
    return
  }
}

module attributes {stable_mosaic.version = 11 : i64} {
  func.func @_lstm_kernel(%arg0: memref<28x16xbf16, #tpu.memory_space<vmem>>, %arg1: memref<16x128xbf16, #tpu.memory_space<vmem>>, %arg2: memref<32x128xbf16, #tpu.memory_space<vmem>>, %arg3: memref<1x128xf32, #tpu.memory_space<vmem>>, %arg4: memref<28x32xf32, #tpu.memory_space<vmem>>, %arg5: memref<28x128xf32, #tpu.memory_space<vmem>>) attributes {dimension_semantics = [], scalar_prefetch = 0 : i64, scratch_operands = 1 : i64, tpu.core_type = #tpu.core_type<tc>} {
    %c0 = arith.constant 0 : index
    %c0_0 = arith.constant 0 : index
    %0 = vector.load %arg0[%c0, %c0_0] : memref<28x16xbf16, #tpu.memory_space<vmem>>, vector<28x16xbf16>
    %c0_1 = arith.constant 0 : index
    %c0_2 = arith.constant 0 : index
    %1 = vector.load %arg1[%c0_1, %c0_2] : memref<16x128xbf16, #tpu.memory_space<vmem>>, vector<16x128xbf16>
    %cst = arith.constant dense<0.000000e+00> : vector<28x128xf32>
    %2 = tpu.matmul %0, %1, %cst {dimension_numbers = #tpu.dot_dimension_numbers<[1], [0], [0], [1], [0, 0, 1, 1], [], []>} : vector<28x16xbf16>, vector<16x128xbf16>, vector<28x128xf32> -> vector<28x128xf32>
    %c0_3 = arith.constant 0 : index
    %c0_4 = arith.constant 0 : index
    %3 = vector.load %arg3[%c0_3, %c0_4] : memref<1x128xf32, #tpu.memory_space<vmem>>, vector<1x128xf32>
    %4 = vector.broadcast %3 : vector<1x128xf32> to vector<28x128xf32>
    %5 = arith.addf %2, %4 : vector<28x128xf32>
    %c0_5 = arith.constant 0 : index
    %c0_6 = arith.constant 0 : index
    %6 = vector.load %arg5[%c0_5, %c0_6] : memref<28x128xf32, #tpu.memory_space<vmem>>, vector<28x128xf32>
    tpu.vector_store %arg5[%c0_5, %c0_6], %5 {strides = array<i32>} : memref<28x128xf32, #tpu.memory_space<vmem>>, vector<28x128xf32>,
    %c0_7 = arith.constant 0 : index
    %c0_8 = arith.constant 0 : index
    %7 = vector.load %arg2[%c0_7, %c0_8] : memref<32x128xbf16, #tpu.memory_space<vmem>>, vector<32x128xbf16>
    %cst_9 = arith.constant 0.000000e+00 : f32
    %8 = vector.broadcast %cst_9 : f32 to vector<4x32xf32>
    %cst_10 = arith.constant 0.000000e+00 : f32
    %9 = vector.broadcast %cst_10 : f32 to vector<4x32xf32>
    %c0_11 = arith.constant 0 : index
    %c0_12 = arith.constant 0 : index
    %10 = vector.load %arg5[%c0_11, %c0_12] : memref<28x128xf32, #tpu.memory_space<vmem>>, vector<4x128xf32>
    %11 = arith.truncf %8 : vector<4x32xf32> to vector<4x32xbf16>
    %cst_13 = arith.constant dense<0.000000e+00> : vector<4x128xf32>
    %12 = tpu.matmul %11, %7, %cst_13 {dimension_numbers = #tpu.dot_dimension_numbers<[1], [0], [0], [1], [0, 0, 1, 1], [], []>} : vector<4x32xbf16>, vector<32x128xbf16>, vector<4x128xf32> -> vector<4x128xf32>
    %13 = arith.addf %10, %12 : vector<4x128xf32>
    %14 = vector.extract_strided_slice %13 {offsets = [0, 0], sizes = [4, 32], strides = [1, 1]} : vector<4x128xf32> to vector<4x32xf32>
    %15 = arith.negf %14 : vector<4x32xf32>
    %16 = math.exp %15 : vector<4x32xf32>
    %cst_14 = arith.constant 1.000000e+00 : f32
    %17 = vector.broadcast %cst_14 : f32 to vector<4x32xf32>
    %18 = arith.addf %17, %16 : vector<4x32xf32>
    %19 = arith.divf %17, %18 : vector<4x32xf32>
    %20 = vector.extract_strided_slice %13 {offsets = [0, 32], sizes = [4, 32], strides = [1, 1]} : vector<4x128xf32> to vector<4x32xf32>
    %21 = arith.negf %20 : vector<4x32xf32>
    %22 = math.exp %21 : vector<4x32xf32>
    %cst_15 = arith.constant 1.000000e+00 : f32
    %23 = vector.broadcast %cst_15 : f32 to vector<4x32xf32>
    %24 = arith.addf %23, %22 : vector<4x32xf32>
    %25 = arith.divf %23, %24 : vector<4x32xf32>
    %26 = vector.extract_strided_slice %13 {offsets = [0, 64], sizes = [4, 32], strides = [1, 1]} : vector<4x128xf32> to vector<4x32xf32>
    %27 = math.tanh %26 : vector<4x32xf32>
    %28 = vector.extract_strided_slice %13 {offsets = [0, 96], sizes = [4, 32], strides = [1, 1]} : vector<4x128xf32> to vector<4x32xf32>
    %29 = arith.negf %28 : vector<4x32xf32>
    %30 = math.exp %29 : vector<4x32xf32>
    %cst_16 = arith.constant 1.000000e+00 : f32
    %31 = vector.broadcast %cst_16 : f32 to vector<4x32xf32>
    %32 = arith.addf %31, %30 : vector<4x32xf32>
    %33 = arith.divf %31, %32 : vector<4x32xf32>
    %34 = arith.mulf %25, %9 : vector<4x32xf32>
    %35 = arith.mulf %19, %27 : vector<4x32xf32>
    %36 = arith.addf %34, %35 : vector<4x32xf32>
    %37 = math.tanh %36 : vector<4x32xf32>
    %38 = arith.mulf %33, %37 : vector<4x32xf32>
    %c0_17 = arith.constant 0 : index
    %c0_18 = arith.constant 0 : index
    %39 = vector.load %arg4[%c0_17, %c0_18] : memref<28x32xf32, #tpu.memory_space<vmem>>, vector<4x32xf32>
    tpu.vector_store %arg4[%c0_17, %c0_18], %38 {strides = array<i32>} : memref<28x32xf32, #tpu.memory_space<vmem>>, vector<4x32xf32>,
    %c4 = arith.constant 4 : index
    %c0_19 = arith.constant 0 : index
    %40 = vector.load %arg5[%c4, %c0_19] : memref<28x128xf32, #tpu.memory_space<vmem>>, vector<4x128xf32>
    %41 = arith.truncf %38 : vector<4x32xf32> to vector<4x32xbf16>
    %cst_20 = arith.constant dense<0.000000e+00> : vector<4x128xf32>
    %42 = tpu.matmul %41, %7, %cst_20 {dimension_numbers = #tpu.dot_dimension_numbers<[1], [0], [0], [1], [0, 0, 1, 1], [], []>} : vector<4x32xbf16>, vector<32x128xbf16>, vector<4x128xf32> -> vector<4x128xf32>
    %43 = arith.addf %40, %42 : vector<4x128xf32>
    %44 = vector.extract_strided_slice %43 {offsets = [0, 0], sizes = [4, 32], strides = [1, 1]} : vector<4x128xf32> to vector<4x32xf32>
    %45 = arith.negf %44 : vector<4x32xf32>
    %46 = math.exp %45 : vector<4x32xf32>
    %cst_21 = arith.constant 1.000000e+00 : f32
    %47 = vector.broadcast %cst_21 : f32 to vector<4x32xf32>
    %48 = arith.addf %47, %46 : vector<4x32xf32>
    %49 = arith.divf %47, %48 : vector<4x32xf32>
    %50 = vector.extract_strided_slice %43 {offsets = [0, 32], sizes = [4, 32], strides = [1, 1]} : vector<4x128xf32> to vector<4x32xf32>
    %51 = arith.negf %50 : vector<4x32xf32>
    %52 = math.exp %51 : vector<4x32xf32>
    %cst_22 = arith.constant 1.000000e+00 : f32
    %53 = vector.broadcast %cst_22 : f32 to vector<4x32xf32>
    %54 = arith.addf %53, %52 : vector<4x32xf32>
    %55 = arith.divf %53, %54 : vector<4x32xf32>
    %56 = vector.extract_strided_slice %43 {offsets = [0, 64], sizes = [4, 32], strides = [1, 1]} : vector<4x128xf32> to vector<4x32xf32>
    %57 = math.tanh %56 : vector<4x32xf32>
    %58 = vector.extract_strided_slice %43 {offsets = [0, 96], sizes = [4, 32], strides = [1, 1]} : vector<4x128xf32> to vector<4x32xf32>
    %59 = arith.negf %58 : vector<4x32xf32>
    %60 = math.exp %59 : vector<4x32xf32>
    %cst_23 = arith.constant 1.000000e+00 : f32
    %61 = vector.broadcast %cst_23 : f32 to vector<4x32xf32>
    %62 = arith.addf %61, %60 : vector<4x32xf32>
    %63 = arith.divf %61, %62 : vector<4x32xf32>
    %64 = arith.mulf %55, %36 : vector<4x32xf32>
    %65 = arith.mulf %49, %57 : vector<4x32xf32>
    %66 = arith.addf %64, %65 : vector<4x32xf32>
    %67 = math.tanh %66 : vector<4x32xf32>
    %68 = arith.mulf %63, %67 : vector<4x32xf32>
    %c4_24 = arith.constant 4 : index
    %c0_25 = arith.constant 0 : index
    %69 = vector.load %arg4[%c4_24, %c0_25] : memref<28x32xf32, #tpu.memory_space<vmem>>, vector<4x32xf32>
    tpu.vector_store %arg4[%c4_24, %c0_25], %68 {strides = array<i32>} : memref<28x32xf32, #tpu.memory_space<vmem>>, vector<4x32xf32>,
    %c8 = arith.constant 8 : index
    %c0_26 = arith.constant 0 : index
    %70 = vector.load %arg5[%c8, %c0_26] : memref<28x128xf32, #tpu.memory_space<vmem>>, vector<4x128xf32>
    %71 = arith.truncf %68 : vector<4x32xf32> to vector<4x32xbf16>
    %cst_27 = arith.constant dense<0.000000e+00> : vector<4x128xf32>
    %72 = tpu.matmul %71, %7, %cst_27 {dimension_numbers = #tpu.dot_dimension_numbers<[1], [0], [0], [1], [0, 0, 1, 1], [], []>} : vector<4x32xbf16>, vector<32x128xbf16>, vector<4x128xf32> -> vector<4x128xf32>
    %73 = arith.addf %70, %72 : vector<4x128xf32>
    %74 = vector.extract_strided_slice %73 {offsets = [0, 0], sizes = [4, 32], strides = [1, 1]} : vector<4x128xf32> to vector<4x32xf32>
    %75 = arith.negf %74 : vector<4x32xf32>
    %76 = math.exp %75 : vector<4x32xf32>
    %cst_28 = arith.constant 1.000000e+00 : f32
    %77 = vector.broadcast %cst_28 : f32 to vector<4x32xf32>
    %78 = arith.addf %77, %76 : vector<4x32xf32>
    %79 = arith.divf %77, %78 : vector<4x32xf32>
    %80 = vector.extract_strided_slice %73 {offsets = [0, 32], sizes = [4, 32], strides = [1, 1]} : vector<4x128xf32> to vector<4x32xf32>
    %81 = arith.negf %80 : vector<4x32xf32>
    %82 = math.exp %81 : vector<4x32xf32>
    %cst_29 = arith.constant 1.000000e+00 : f32
    %83 = vector.broadcast %cst_29 : f32 to vector<4x32xf32>
    %84 = arith.addf %83, %82 : vector<4x32xf32>
    %85 = arith.divf %83, %84 : vector<4x32xf32>
    %86 = vector.extract_strided_slice %73 {offsets = [0, 64], sizes = [4, 32], strides = [1, 1]} : vector<4x128xf32> to vector<4x32xf32>
    %87 = math.tanh %86 : vector<4x32xf32>
    %88 = vector.extract_strided_slice %73 {offsets = [0, 96], sizes = [4, 32], strides = [1, 1]} : vector<4x128xf32> to vector<4x32xf32>
    %89 = arith.negf %88 : vector<4x32xf32>
    %90 = math.exp %89 : vector<4x32xf32>
    %cst_30 = arith.constant 1.000000e+00 : f32
    %91 = vector.broadcast %cst_30 : f32 to vector<4x32xf32>
    %92 = arith.addf %91, %90 : vector<4x32xf32>
    %93 = arith.divf %91, %92 : vector<4x32xf32>
    %94 = arith.mulf %85, %66 : vector<4x32xf32>
    %95 = arith.mulf %79, %87 : vector<4x32xf32>
    %96 = arith.addf %94, %95 : vector<4x32xf32>
    %97 = math.tanh %96 : vector<4x32xf32>
    %98 = arith.mulf %93, %97 : vector<4x32xf32>
    %c8_31 = arith.constant 8 : index
    %c0_32 = arith.constant 0 : index
    %99 = vector.load %arg4[%c8_31, %c0_32] : memref<28x32xf32, #tpu.memory_space<vmem>>, vector<4x32xf32>
    tpu.vector_store %arg4[%c8_31, %c0_32], %98 {strides = array<i32>} : memref<28x32xf32, #tpu.memory_space<vmem>>, vector<4x32xf32>,
    %c12 = arith.constant 12 : index
    %c0_33 = arith.constant 0 : index
    %100 = vector.load %arg5[%c12, %c0_33] : memref<28x128xf32, #tpu.memory_space<vmem>>, vector<4x128xf32>
    %101 = arith.truncf %98 : vector<4x32xf32> to vector<4x32xbf16>
    %cst_34 = arith.constant dense<0.000000e+00> : vector<4x128xf32>
    %102 = tpu.matmul %101, %7, %cst_34 {dimension_numbers = #tpu.dot_dimension_numbers<[1], [0], [0], [1], [0, 0, 1, 1], [], []>} : vector<4x32xbf16>, vector<32x128xbf16>, vector<4x128xf32> -> vector<4x128xf32>
    %103 = arith.addf %100, %102 : vector<4x128xf32>
    %104 = vector.extract_strided_slice %103 {offsets = [0, 0], sizes = [4, 32], strides = [1, 1]} : vector<4x128xf32> to vector<4x32xf32>
    %105 = arith.negf %104 : vector<4x32xf32>
    %106 = math.exp %105 : vector<4x32xf32>
    %cst_35 = arith.constant 1.000000e+00 : f32
    %107 = vector.broadcast %cst_35 : f32 to vector<4x32xf32>
    %108 = arith.addf %107, %106 : vector<4x32xf32>
    %109 = arith.divf %107, %108 : vector<4x32xf32>
    %110 = vector.extract_strided_slice %103 {offsets = [0, 32], sizes = [4, 32], strides = [1, 1]} : vector<4x128xf32> to vector<4x32xf32>
    %111 = arith.negf %110 : vector<4x32xf32>
    %112 = math.exp %111 : vector<4x32xf32>
    %cst_36 = arith.constant 1.000000e+00 : f32
    %113 = vector.broadcast %cst_36 : f32 to vector<4x32xf32>
    %114 = arith.addf %113, %112 : vector<4x32xf32>
    %115 = arith.divf %113, %114 : vector<4x32xf32>
    %116 = vector.extract_strided_slice %103 {offsets = [0, 64], sizes = [4, 32], strides = [1, 1]} : vector<4x128xf32> to vector<4x32xf32>
    %117 = math.tanh %116 : vector<4x32xf32>
    %118 = vector.extract_strided_slice %103 {offsets = [0, 96], sizes = [4, 32], strides = [1, 1]} : vector<4x128xf32> to vector<4x32xf32>
    %119 = arith.negf %118 : vector<4x32xf32>
    %120 = math.exp %119 : vector<4x32xf32>
    %cst_37 = arith.constant 1.000000e+00 : f32
    %121 = vector.broadcast %cst_37 : f32 to vector<4x32xf32>
    %122 = arith.addf %121, %120 : vector<4x32xf32>
    %123 = arith.divf %121, %122 : vector<4x32xf32>
    %124 = arith.mulf %115, %96 : vector<4x32xf32>
    %125 = arith.mulf %109, %117 : vector<4x32xf32>
    %126 = arith.addf %124, %125 : vector<4x32xf32>
    %127 = math.tanh %126 : vector<4x32xf32>
    %128 = arith.mulf %123, %127 : vector<4x32xf32>
    %c12_38 = arith.constant 12 : index
    %c0_39 = arith.constant 0 : index
    %129 = vector.load %arg4[%c12_38, %c0_39] : memref<28x32xf32, #tpu.memory_space<vmem>>, vector<4x32xf32>
    tpu.vector_store %arg4[%c12_38, %c0_39], %128 {strides = array<i32>} : memref<28x32xf32, #tpu.memory_space<vmem>>, vector<4x32xf32>,
    %c16 = arith.constant 16 : index
    %c0_40 = arith.constant 0 : index
    %130 = vector.load %arg5[%c16, %c0_40] : memref<28x128xf32, #tpu.memory_space<vmem>>, vector<4x128xf32>
    %131 = arith.truncf %128 : vector<4x32xf32> to vector<4x32xbf16>
    %cst_41 = arith.constant dense<0.000000e+00> : vector<4x128xf32>
    %132 = tpu.matmul %131, %7, %cst_41 {dimension_numbers = #tpu.dot_dimension_numbers<[1], [0], [0], [1], [0, 0, 1, 1], [], []>} : vector<4x32xbf16>, vector<32x128xbf16>, vector<4x128xf32> -> vector<4x128xf32>
    %133 = arith.addf %130, %132 : vector<4x128xf32>
    %134 = vector.extract_strided_slice %133 {offsets = [0, 0], sizes = [4, 32], strides = [1, 1]} : vector<4x128xf32> to vector<4x32xf32>
    %135 = arith.negf %134 : vector<4x32xf32>
    %136 = math.exp %135 : vector<4x32xf32>
    %cst_42 = arith.constant 1.000000e+00 : f32
    %137 = vector.broadcast %cst_42 : f32 to vector<4x32xf32>
    %138 = arith.addf %137, %136 : vector<4x32xf32>
    %139 = arith.divf %137, %138 : vector<4x32xf32>
    %140 = vector.extract_strided_slice %133 {offsets = [0, 32], sizes = [4, 32], strides = [1, 1]} : vector<4x128xf32> to vector<4x32xf32>
    %141 = arith.negf %140 : vector<4x32xf32>
    %142 = math.exp %141 : vector<4x32xf32>
    %cst_43 = arith.constant 1.000000e+00 : f32
    %143 = vector.broadcast %cst_43 : f32 to vector<4x32xf32>
    %144 = arith.addf %143, %142 : vector<4x32xf32>
    %145 = arith.divf %143, %144 : vector<4x32xf32>
    %146 = vector.extract_strided_slice %133 {offsets = [0, 64], sizes = [4, 32], strides = [1, 1]} : vector<4x128xf32> to vector<4x32xf32>
    %147 = math.tanh %146 : vector<4x32xf32>
    %148 = vector.extract_strided_slice %133 {offsets = [0, 96], sizes = [4, 32], strides = [1, 1]} : vector<4x128xf32> to vector<4x32xf32>
    %149 = arith.negf %148 : vector<4x32xf32>
    %150 = math.exp %149 : vector<4x32xf32>
    %cst_44 = arith.constant 1.000000e+00 : f32
    %151 = vector.broadcast %cst_44 : f32 to vector<4x32xf32>
    %152 = arith.addf %151, %150 : vector<4x32xf32>
    %153 = arith.divf %151, %152 : vector<4x32xf32>
    %154 = arith.mulf %145, %126 : vector<4x32xf32>
    %155 = arith.mulf %139, %147 : vector<4x32xf32>
    %156 = arith.addf %154, %155 : vector<4x32xf32>
    %157 = math.tanh %156 : vector<4x32xf32>
    %158 = arith.mulf %153, %157 : vector<4x32xf32>
    %c16_45 = arith.constant 16 : index
    %c0_46 = arith.constant 0 : index
    %159 = vector.load %arg4[%c16_45, %c0_46] : memref<28x32xf32, #tpu.memory_space<vmem>>, vector<4x32xf32>
    tpu.vector_store %arg4[%c16_45, %c0_46], %158 {strides = array<i32>} : memref<28x32xf32, #tpu.memory_space<vmem>>, vector<4x32xf32>,
    %c20 = arith.constant 20 : index
    %c0_47 = arith.constant 0 : index
    %160 = vector.load %arg5[%c20, %c0_47] : memref<28x128xf32, #tpu.memory_space<vmem>>, vector<4x128xf32>
    %161 = arith.truncf %158 : vector<4x32xf32> to vector<4x32xbf16>
    %cst_48 = arith.constant dense<0.000000e+00> : vector<4x128xf32>
    %162 = tpu.matmul %161, %7, %cst_48 {dimension_numbers = #tpu.dot_dimension_numbers<[1], [0], [0], [1], [0, 0, 1, 1], [], []>} : vector<4x32xbf16>, vector<32x128xbf16>, vector<4x128xf32> -> vector<4x128xf32>
    %163 = arith.addf %160, %162 : vector<4x128xf32>
    %164 = vector.extract_strided_slice %163 {offsets = [0, 0], sizes = [4, 32], strides = [1, 1]} : vector<4x128xf32> to vector<4x32xf32>
    %165 = arith.negf %164 : vector<4x32xf32>
    %166 = math.exp %165 : vector<4x32xf32>
    %cst_49 = arith.constant 1.000000e+00 : f32
    %167 = vector.broadcast %cst_49 : f32 to vector<4x32xf32>
    %168 = arith.addf %167, %166 : vector<4x32xf32>
    %169 = arith.divf %167, %168 : vector<4x32xf32>
    %170 = vector.extract_strided_slice %163 {offsets = [0, 32], sizes = [4, 32], strides = [1, 1]} : vector<4x128xf32> to vector<4x32xf32>
    %171 = arith.negf %170 : vector<4x32xf32>
    %172 = math.exp %171 : vector<4x32xf32>
    %cst_50 = arith.constant 1.000000e+00 : f32
    %173 = vector.broadcast %cst_50 : f32 to vector<4x32xf32>
    %174 = arith.addf %173, %172 : vector<4x32xf32>
    %175 = arith.divf %173, %174 : vector<4x32xf32>
    %176 = vector.extract_strided_slice %163 {offsets = [0, 64], sizes = [4, 32], strides = [1, 1]} : vector<4x128xf32> to vector<4x32xf32>
    %177 = math.tanh %176 : vector<4x32xf32>
    %178 = vector.extract_strided_slice %163 {offsets = [0, 96], sizes = [4, 32], strides = [1, 1]} : vector<4x128xf32> to vector<4x32xf32>
    %179 = arith.negf %178 : vector<4x32xf32>
    %180 = math.exp %179 : vector<4x32xf32>
    %cst_51 = arith.constant 1.000000e+00 : f32
    %181 = vector.broadcast %cst_51 : f32 to vector<4x32xf32>
    %182 = arith.addf %181, %180 : vector<4x32xf32>
    %183 = arith.divf %181, %182 : vector<4x32xf32>
    %184 = arith.mulf %175, %156 : vector<4x32xf32>
    %185 = arith.mulf %169, %177 : vector<4x32xf32>
    %186 = arith.addf %184, %185 : vector<4x32xf32>
    %187 = math.tanh %186 : vector<4x32xf32>
    %188 = arith.mulf %183, %187 : vector<4x32xf32>
    %c20_52 = arith.constant 20 : index
    %c0_53 = arith.constant 0 : index
    %189 = vector.load %arg4[%c20_52, %c0_53] : memref<28x32xf32, #tpu.memory_space<vmem>>, vector<4x32xf32>
    tpu.vector_store %arg4[%c20_52, %c0_53], %188 {strides = array<i32>} : memref<28x32xf32, #tpu.memory_space<vmem>>, vector<4x32xf32>,
    %c24 = arith.constant 24 : index
    %c0_54 = arith.constant 0 : index
    %190 = vector.load %arg5[%c24, %c0_54] : memref<28x128xf32, #tpu.memory_space<vmem>>, vector<4x128xf32>
    %191 = arith.truncf %188 : vector<4x32xf32> to vector<4x32xbf16>
    %cst_55 = arith.constant dense<0.000000e+00> : vector<4x128xf32>
    %192 = tpu.matmul %191, %7, %cst_55 {dimension_numbers = #tpu.dot_dimension_numbers<[1], [0], [0], [1], [0, 0, 1, 1], [], []>} : vector<4x32xbf16>, vector<32x128xbf16>, vector<4x128xf32> -> vector<4x128xf32>
    %193 = arith.addf %190, %192 : vector<4x128xf32>
    %194 = vector.extract_strided_slice %193 {offsets = [0, 0], sizes = [4, 32], strides = [1, 1]} : vector<4x128xf32> to vector<4x32xf32>
    %195 = arith.negf %194 : vector<4x32xf32>
    %196 = math.exp %195 : vector<4x32xf32>
    %cst_56 = arith.constant 1.000000e+00 : f32
    %197 = vector.broadcast %cst_56 : f32 to vector<4x32xf32>
    %198 = arith.addf %197, %196 : vector<4x32xf32>
    %199 = arith.divf %197, %198 : vector<4x32xf32>
    %200 = vector.extract_strided_slice %193 {offsets = [0, 32], sizes = [4, 32], strides = [1, 1]} : vector<4x128xf32> to vector<4x32xf32>
    %201 = arith.negf %200 : vector<4x32xf32>
    %202 = math.exp %201 : vector<4x32xf32>
    %cst_57 = arith.constant 1.000000e+00 : f32
    %203 = vector.broadcast %cst_57 : f32 to vector<4x32xf32>
    %204 = arith.addf %203, %202 : vector<4x32xf32>
    %205 = arith.divf %203, %204 : vector<4x32xf32>
    %206 = vector.extract_strided_slice %193 {offsets = [0, 64], sizes = [4, 32], strides = [1, 1]} : vector<4x128xf32> to vector<4x32xf32>
    %207 = math.tanh %206 : vector<4x32xf32>
    %208 = vector.extract_strided_slice %193 {offsets = [0, 96], sizes = [4, 32], strides = [1, 1]} : vector<4x128xf32> to vector<4x32xf32>
    %209 = arith.negf %208 : vector<4x32xf32>
    %210 = math.exp %209 : vector<4x32xf32>
    %cst_58 = arith.constant 1.000000e+00 : f32
    %211 = vector.broadcast %cst_58 : f32 to vector<4x32xf32>
    %212 = arith.addf %211, %210 : vector<4x32xf32>
    %213 = arith.divf %211, %212 : vector<4x32xf32>
    %214 = arith.mulf %205, %186 : vector<4x32xf32>
    %215 = arith.mulf %199, %207 : vector<4x32xf32>
    %216 = arith.addf %214, %215 : vector<4x32xf32>
    %217 = math.tanh %216 : vector<4x32xf32>
    %218 = arith.mulf %213, %217 : vector<4x32xf32>
    %c24_59 = arith.constant 24 : index
    %c0_60 = arith.constant 0 : index
    %219 = vector.load %arg4[%c24_59, %c0_60] : memref<28x32xf32, #tpu.memory_space<vmem>>, vector<4x32xf32>
    tpu.vector_store %arg4[%c24_59, %c0_60], %218 {strides = array<i32>} : memref<28x32xf32, #tpu.memory_space<vmem>>, vector<4x32xf32>,
    return
  }
}

module attributes {stable_mosaic.version = 11 : i64} {
  func.func @_fc_ln_res2_kernel(%arg0: memref<2x28x16xbf16, #tpu.memory_space<vmem>>, %arg1: memref<2x16x8xbf16, #tpu.memory_space<vmem>>, %arg2: memref<2x1x8xf32, #tpu.memory_space<vmem>>, %arg3: memref<2x1x8xf32, #tpu.memory_space<vmem>>, %arg4: memref<2x1x8xf32, #tpu.memory_space<vmem>>, %arg5: memref<2x28x8xf32, #tpu.memory_space<vmem>>, %arg6: memref<2x28x8xf32, #tpu.memory_space<vmem>>) attributes {dimension_semantics = [], scalar_prefetch = 0 : i64, scratch_operands = 0 : i64, tpu.core_type = #tpu.core_type<tc>} {
    %c0 = arith.constant 0 : index
    %c0_0 = arith.constant 0 : index
    %c0_1 = arith.constant 0 : index
    %0 = vector.load %arg0[%c0, %c0_0, %c0_1] : memref<2x28x16xbf16, #tpu.memory_space<vmem>>, vector<1x28x16xbf16>
    %1 = vector.shape_cast %0 : vector<1x28x16xbf16> to vector<28x16xbf16>
    %c0_2 = arith.constant 0 : index
    %c0_3 = arith.constant 0 : index
    %c0_4 = arith.constant 0 : index
    %2 = vector.load %arg1[%c0_2, %c0_3, %c0_4] : memref<2x16x8xbf16, #tpu.memory_space<vmem>>, vector<1x16x8xbf16>
    %3 = vector.shape_cast %2 : vector<1x16x8xbf16> to vector<16x8xbf16>
    %cst = arith.constant dense<0.000000e+00> : vector<28x8xf32>
    %4 = tpu.matmul %1, %3, %cst {dimension_numbers = #tpu.dot_dimension_numbers<[1], [0], [0], [1], [0, 0, 1, 1], [], []>} : vector<28x16xbf16>, vector<16x8xbf16>, vector<28x8xf32> -> vector<28x8xf32>
    %c0_5 = arith.constant 0 : index
    %c0_6 = arith.constant 0 : index
    %c0_7 = arith.constant 0 : index
    %5 = vector.load %arg2[%c0_5, %c0_6, %c0_7] : memref<2x1x8xf32, #tpu.memory_space<vmem>>, vector<1x1x8xf32>
    %6 = vector.shape_cast %5 : vector<1x1x8xf32> to vector<1x8xf32>
    %7 = vector.broadcast %6 : vector<1x8xf32> to vector<28x8xf32>
    %8 = arith.addf %4, %7 : vector<28x8xf32>
    %cst_8 = arith.constant dense<0.000000e+00> : vector<28xf32>
    %9 = vector.multi_reduction <add>, %8, %cst_8 [1] : vector<28x8xf32> to vector<28xf32>
    %10 = vector.shape_cast %9 : vector<28xf32> to vector<28x1xf32>
    %cst_9 = arith.constant 8.000000e+00 : f32
    %11 = vector.broadcast %cst_9 : f32 to vector<28x1xf32>
    %12 = arith.divf %10, %11 : vector<28x1xf32>
    %13 = vector.broadcast %12 : vector<28x1xf32> to vector<28x8xf32>
    %14 = arith.subf %8, %13 : vector<28x8xf32>
    %15 = arith.mulf %14, %14 : vector<28x8xf32>
    %cst_10 = arith.constant dense<0.000000e+00> : vector<28xf32>
    %16 = vector.multi_reduction <add>, %15, %cst_10 [1] : vector<28x8xf32> to vector<28xf32>
    %17 = vector.shape_cast %16 : vector<28xf32> to vector<28x1xf32>
    %cst_11 = arith.constant 8.000000e+00 : f32
    %18 = vector.broadcast %cst_11 : f32 to vector<28x1xf32>
    %19 = arith.divf %17, %18 : vector<28x1xf32>
    %20 = vector.broadcast %12 : vector<28x1xf32> to vector<28x8xf32>
    %21 = arith.subf %8, %20 : vector<28x8xf32>
    %cst_12 = arith.constant 9.99999974E-6 : f32
    %22 = vector.broadcast %cst_12 : f32 to vector<28x1xf32>
    %23 = arith.addf %19, %22 : vector<28x1xf32>
    %24 = math.rsqrt %23 : vector<28x1xf32>
    %25 = vector.broadcast %24 : vector<28x1xf32> to vector<28x8xf32>
    %26 = arith.mulf %21, %25 : vector<28x8xf32>
    %c0_13 = arith.constant 0 : index
    %c0_14 = arith.constant 0 : index
    %c0_15 = arith.constant 0 : index
    %27 = vector.load %arg3[%c0_13, %c0_14, %c0_15] : memref<2x1x8xf32, #tpu.memory_space<vmem>>, vector<1x1x8xf32>
    %28 = vector.shape_cast %27 : vector<1x1x8xf32> to vector<1x8xf32>
    %29 = vector.broadcast %28 : vector<1x8xf32> to vector<28x8xf32>
    %30 = arith.mulf %26, %29 : vector<28x8xf32>
    %c0_16 = arith.constant 0 : index
    %c0_17 = arith.constant 0 : index
    %c0_18 = arith.constant 0 : index
    %31 = vector.load %arg4[%c0_16, %c0_17, %c0_18] : memref<2x1x8xf32, #tpu.memory_space<vmem>>, vector<1x1x8xf32>
    %32 = vector.shape_cast %31 : vector<1x1x8xf32> to vector<1x8xf32>
    %33 = vector.broadcast %32 : vector<1x8xf32> to vector<28x8xf32>
    %34 = arith.addf %30, %33 : vector<28x8xf32>
    %c0_19 = arith.constant 0 : index
    %c0_20 = arith.constant 0 : index
    %c0_21 = arith.constant 0 : index
    %35 = vector.load %arg5[%c0_19, %c0_20, %c0_21] : memref<2x28x8xf32, #tpu.memory_space<vmem>>, vector<1x28x8xf32>
    %36 = vector.shape_cast %35 : vector<1x28x8xf32> to vector<28x8xf32>
    %37 = arith.addf %34, %36 : vector<28x8xf32>
    %c0_22 = arith.constant 0 : index
    %c0_23 = arith.constant 0 : index
    %c0_24 = arith.constant 0 : index
    %38 = vector.load %arg6[%c0_22, %c0_23, %c0_24] : memref<2x28x8xf32, #tpu.memory_space<vmem>>, vector<1x28x8xf32>
    %39 = vector.shape_cast %38 : vector<1x28x8xf32> to vector<28x8xf32>
    %40 = vector.shape_cast %37 : vector<28x8xf32> to vector<1x28x8xf32>
    tpu.vector_store %arg6[%c0_22, %c0_23, %c0_24], %40 {strides = array<i32>} : memref<2x28x8xf32, #tpu.memory_space<vmem>>, vector<1x28x8xf32>,
    %c1 = arith.constant 1 : index
    %c0_25 = arith.constant 0 : index
    %c0_26 = arith.constant 0 : index
    %41 = vector.load %arg0[%c1, %c0_25, %c0_26] : memref<2x28x16xbf16, #tpu.memory_space<vmem>>, vector<1x28x16xbf16>
    %42 = vector.shape_cast %41 : vector<1x28x16xbf16> to vector<28x16xbf16>
    %c1_27 = arith.constant 1 : index
    %c0_28 = arith.constant 0 : index
    %c0_29 = arith.constant 0 : index
    %43 = vector.load %arg1[%c1_27, %c0_28, %c0_29] : memref<2x16x8xbf16, #tpu.memory_space<vmem>>, vector<1x16x8xbf16>
    %44 = vector.shape_cast %43 : vector<1x16x8xbf16> to vector<16x8xbf16>
    %cst_30 = arith.constant dense<0.000000e+00> : vector<28x8xf32>
    %45 = tpu.matmul %42, %44, %cst_30 {dimension_numbers = #tpu.dot_dimension_numbers<[1], [0], [0], [1], [0, 0, 1, 1], [], []>} : vector<28x16xbf16>, vector<16x8xbf16>, vector<28x8xf32> -> vector<28x8xf32>
    %c1_31 = arith.constant 1 : index
    %c0_32 = arith.constant 0 : index
    %c0_33 = arith.constant 0 : index
    %46 = vector.load %arg2[%c1_31, %c0_32, %c0_33] : memref<2x1x8xf32, #tpu.memory_space<vmem>>, vector<1x1x8xf32>
    %47 = vector.shape_cast %46 : vector<1x1x8xf32> to vector<1x8xf32>
    %48 = vector.broadcast %47 : vector<1x8xf32> to vector<28x8xf32>
    %49 = arith.addf %45, %48 : vector<28x8xf32>
    %cst_34 = arith.constant dense<0.000000e+00> : vector<28xf32>
    %50 = vector.multi_reduction <add>, %49, %cst_34 [1] : vector<28x8xf32> to vector<28xf32>
    %51 = vector.shape_cast %50 : vector<28xf32> to vector<28x1xf32>
    %cst_35 = arith.constant 8.000000e+00 : f32
    %52 = vector.broadcast %cst_35 : f32 to vector<28x1xf32>
    %53 = arith.divf %51, %52 : vector<28x1xf32>
    %54 = vector.broadcast %53 : vector<28x1xf32> to vector<28x8xf32>
    %55 = arith.subf %49, %54 : vector<28x8xf32>
    %56 = arith.mulf %55, %55 : vector<28x8xf32>
    %cst_36 = arith.constant dense<0.000000e+00> : vector<28xf32>
    %57 = vector.multi_reduction <add>, %56, %cst_36 [1] : vector<28x8xf32> to vector<28xf32>
    %58 = vector.shape_cast %57 : vector<28xf32> to vector<28x1xf32>
    %cst_37 = arith.constant 8.000000e+00 : f32
    %59 = vector.broadcast %cst_37 : f32 to vector<28x1xf32>
    %60 = arith.divf %58, %59 : vector<28x1xf32>
    %61 = vector.broadcast %53 : vector<28x1xf32> to vector<28x8xf32>
    %62 = arith.subf %49, %61 : vector<28x8xf32>
    %cst_38 = arith.constant 9.99999974E-6 : f32
    %63 = vector.broadcast %cst_38 : f32 to vector<28x1xf32>
    %64 = arith.addf %60, %63 : vector<28x1xf32>
    %65 = math.rsqrt %64 : vector<28x1xf32>
    %66 = vector.broadcast %65 : vector<28x1xf32> to vector<28x8xf32>
    %67 = arith.mulf %62, %66 : vector<28x8xf32>
    %c1_39 = arith.constant 1 : index
    %c0_40 = arith.constant 0 : index
    %c0_41 = arith.constant 0 : index
    %68 = vector.load %arg3[%c1_39, %c0_40, %c0_41] : memref<2x1x8xf32, #tpu.memory_space<vmem>>, vector<1x1x8xf32>
    %69 = vector.shape_cast %68 : vector<1x1x8xf32> to vector<1x8xf32>
    %70 = vector.broadcast %69 : vector<1x8xf32> to vector<28x8xf32>
    %71 = arith.mulf %67, %70 : vector<28x8xf32>
    %c1_42 = arith.constant 1 : index
    %c0_43 = arith.constant 0 : index
    %c0_44 = arith.constant 0 : index
    %72 = vector.load %arg4[%c1_42, %c0_43, %c0_44] : memref<2x1x8xf32, #tpu.memory_space<vmem>>, vector<1x1x8xf32>
    %73 = vector.shape_cast %72 : vector<1x1x8xf32> to vector<1x8xf32>
    %74 = vector.broadcast %73 : vector<1x8xf32> to vector<28x8xf32>
    %75 = arith.addf %71, %74 : vector<28x8xf32>
    %c1_45 = arith.constant 1 : index
    %c0_46 = arith.constant 0 : index
    %c0_47 = arith.constant 0 : index
    %76 = vector.load %arg5[%c1_45, %c0_46, %c0_47] : memref<2x28x8xf32, #tpu.memory_space<vmem>>, vector<1x28x8xf32>
    %77 = vector.shape_cast %76 : vector<1x28x8xf32> to vector<28x8xf32>
    %78 = arith.addf %75, %77 : vector<28x8xf32>
    %c1_48 = arith.constant 1 : index
    %c0_49 = arith.constant 0 : index
    %c0_50 = arith.constant 0 : index
    %79 = vector.load %arg6[%c1_48, %c0_49, %c0_50] : memref<2x28x8xf32, #tpu.memory_space<vmem>>, vector<1x28x8xf32>
    %80 = vector.shape_cast %79 : vector<1x28x8xf32> to vector<28x8xf32>
    %81 = vector.shape_cast %78 : vector<28x8xf32> to vector<1x28x8xf32>
    tpu.vector_store %arg6[%c1_48, %c0_49, %c0_50], %81 {strides = array<i32>} : memref<2x28x8xf32, #tpu.memory_space<vmem>>, vector<1x28x8xf32>,
    return
  }
}

module attributes {stable_mosaic.version = 11 : i64} {
  func.func @_conv_kernel(%arg0: memref<14x224xbf16, #tpu.memory_space<vmem>>, %arg1: memref<224x48xbf16, #tpu.memory_space<vmem>>, %arg2: memref<1x48xf32, #tpu.memory_space<vmem>>, %arg3: memref<224x48xbf16, #tpu.memory_space<vmem>>, %arg4: memref<1x48xf32, #tpu.memory_space<vmem>>, %arg5: memref<1x48xf32, #tpu.memory_space<vmem>>, %arg6: memref<1x48xf32, #tpu.memory_space<vmem>>, %arg7: memref<1xf32, #tpu.memory_space<smem>>, %arg8: memref<14x48xf32, #tpu.memory_space<vmem>>) attributes {dimension_semantics = [], scalar_prefetch = 0 : i64, scratch_operands = 0 : i64, tpu.core_type = #tpu.core_type<tc>} {
    %c0 = arith.constant 0 : index
    %c0_0 = arith.constant 0 : index
    %0 = vector.load %arg0[%c0, %c0_0] : memref<14x224xbf16, #tpu.memory_space<vmem>>, vector<14x224xbf16>
    %c0_1 = arith.constant 0 : index
    %c0_2 = arith.constant 0 : index
    %1 = vector.load %arg1[%c0_1, %c0_2] : memref<224x48xbf16, #tpu.memory_space<vmem>>, vector<224x48xbf16>
    %cst = arith.constant dense<0.000000e+00> : vector<14x48xf32>
    %2 = tpu.matmul %0, %1, %cst {dimension_numbers = #tpu.dot_dimension_numbers<[1], [0], [0], [1], [0, 0, 1, 1], [], []>} : vector<14x224xbf16>, vector<224x48xbf16>, vector<14x48xf32> -> vector<14x48xf32>
    %c0_3 = arith.constant 0 : index
    %c0_4 = arith.constant 0 : index
    %3 = vector.load %arg2[%c0_3, %c0_4] : memref<1x48xf32, #tpu.memory_space<vmem>>, vector<1x48xf32>
    %4 = vector.broadcast %3 : vector<1x48xf32> to vector<14x48xf32>
    %5 = arith.addf %2, %4 : vector<14x48xf32>
    %c0_5 = arith.constant 0 : index
    %c0_6 = arith.constant 0 : index
    %6 = vector.load %arg3[%c0_5, %c0_6] : memref<224x48xbf16, #tpu.memory_space<vmem>>, vector<224x48xbf16>
    %cst_7 = arith.constant dense<0.000000e+00> : vector<14x48xf32>
    %7 = tpu.matmul %0, %6, %cst_7 {dimension_numbers = #tpu.dot_dimension_numbers<[1], [0], [0], [1], [0, 0, 1, 1], [], []>} : vector<14x224xbf16>, vector<224x48xbf16>, vector<14x48xf32> -> vector<14x48xf32>
    %c0_8 = arith.constant 0 : index
    %c0_9 = arith.constant 0 : index
    %8 = vector.load %arg4[%c0_8, %c0_9] : memref<1x48xf32, #tpu.memory_space<vmem>>, vector<1x48xf32>
    %9 = vector.broadcast %8 : vector<1x48xf32> to vector<14x48xf32>
    %10 = arith.addf %7, %9 : vector<14x48xf32>
    %11 = arith.negf %10 : vector<14x48xf32>
    %12 = math.exp %11 : vector<14x48xf32>
    %cst_10 = arith.constant 1.000000e+00 : f32
    %13 = vector.broadcast %cst_10 : f32 to vector<14x48xf32>
    %14 = arith.addf %13, %12 : vector<14x48xf32>
    %15 = arith.divf %13, %14 : vector<14x48xf32>
    %16 = arith.mulf %5, %15 : vector<14x48xf32>
    %cst_11 = arith.constant dense<0.000000e+00> : vector<14xf32>
    %17 = vector.multi_reduction <add>, %16, %cst_11 [1] : vector<14x48xf32> to vector<14xf32>
    %18 = vector.shape_cast %17 : vector<14xf32> to vector<14x1xf32>
    %cst_12 = arith.constant 4.800000e+01 : f32
    %19 = vector.broadcast %cst_12 : f32 to vector<14x1xf32>
    %20 = arith.divf %18, %19 : vector<14x1xf32>
    %21 = vector.broadcast %20 : vector<14x1xf32> to vector<14x48xf32>
    %22 = arith.subf %16, %21 : vector<14x48xf32>
    %23 = arith.mulf %22, %22 : vector<14x48xf32>
    %cst_13 = arith.constant dense<0.000000e+00> : vector<14xf32>
    %24 = vector.multi_reduction <add>, %23, %cst_13 [1] : vector<14x48xf32> to vector<14xf32>
    %25 = vector.shape_cast %24 : vector<14xf32> to vector<14x1xf32>
    %cst_14 = arith.constant 4.800000e+01 : f32
    %26 = vector.broadcast %cst_14 : f32 to vector<14x1xf32>
    %27 = arith.divf %25, %26 : vector<14x1xf32>
    %28 = vector.broadcast %20 : vector<14x1xf32> to vector<14x48xf32>
    %29 = arith.subf %16, %28 : vector<14x48xf32>
    %cst_15 = arith.constant 9.99999993E-9 : f32
    %30 = vector.broadcast %cst_15 : f32 to vector<14x1xf32>
    %31 = arith.addf %27, %30 : vector<14x1xf32>
    %32 = math.rsqrt %31 : vector<14x1xf32>
    %33 = vector.broadcast %32 : vector<14x1xf32> to vector<14x48xf32>
    %34 = arith.mulf %29, %33 : vector<14x48xf32>
    %c0_16 = arith.constant 0 : index
    %c0_17 = arith.constant 0 : index
    %35 = vector.load %arg5[%c0_16, %c0_17] : memref<1x48xf32, #tpu.memory_space<vmem>>, vector<1x48xf32>
    %36 = vector.broadcast %35 : vector<1x48xf32> to vector<14x48xf32>
    %37 = arith.mulf %34, %36 : vector<14x48xf32>
    %c0_18 = arith.constant 0 : index
    %c0_19 = arith.constant 0 : index
    %38 = vector.load %arg6[%c0_18, %c0_19] : memref<1x48xf32, #tpu.memory_space<vmem>>, vector<1x48xf32>
    %39 = vector.broadcast %38 : vector<1x48xf32> to vector<14x48xf32>
    %40 = arith.addf %37, %39 : vector<14x48xf32>
    %c0_20 = arith.constant 0 : index
    %41 = memref.load %arg7[%c0_20] : memref<1xf32, #tpu.memory_space<smem>>
    %cst_21 = arith.constant 0.000000e+00 : f32
    %42 = vector.broadcast %cst_21 : f32 to vector<14x48xf32>
    %43 = arith.cmpf oge, %40, %42 : vector<14x48xf32>
    %44 = vector.broadcast %41 : f32 to vector<14x48xf32>
    %45 = arith.mulf %44, %40 : vector<14x48xf32>
    %46 = arith.select %43, %40, %45 : vector<14x48xi1>, vector<14x48xf32>
    %c0_22 = arith.constant 0 : index
    %c0_23 = arith.constant 0 : index
    %47 = vector.load %arg8[%c0_22, %c0_23] : memref<14x48xf32, #tpu.memory_space<vmem>>, vector<14x48xf32>
    tpu.vector_store %arg8[%c0_22, %c0_23], %46 {strides = array<i32>} : memref<14x48xf32, #tpu.memory_space<vmem>>, vector<14x48xf32>,
    return
  }
}

module attributes {stable_mosaic.version = 11 : i64} {
  func.func @_conv_kernel(%arg0: memref<14x288xbf16, #tpu.memory_space<vmem>>, %arg1: memref<288x40xbf16, #tpu.memory_space<vmem>>, %arg2: memref<1x40xf32, #tpu.memory_space<vmem>>, %arg3: memref<288x40xbf16, #tpu.memory_space<vmem>>, %arg4: memref<1x40xf32, #tpu.memory_space<vmem>>, %arg5: memref<1x40xf32, #tpu.memory_space<vmem>>, %arg6: memref<1x40xf32, #tpu.memory_space<vmem>>, %arg7: memref<1xf32, #tpu.memory_space<smem>>, %arg8: memref<14x40xf32, #tpu.memory_space<vmem>>) attributes {dimension_semantics = [], scalar_prefetch = 0 : i64, scratch_operands = 0 : i64, tpu.core_type = #tpu.core_type<tc>} {
    %c0 = arith.constant 0 : index
    %c0_0 = arith.constant 0 : index
    %0 = vector.load %arg0[%c0, %c0_0] : memref<14x288xbf16, #tpu.memory_space<vmem>>, vector<14x288xbf16>
    %c0_1 = arith.constant 0 : index
    %c0_2 = arith.constant 0 : index
    %1 = vector.load %arg1[%c0_1, %c0_2] : memref<288x40xbf16, #tpu.memory_space<vmem>>, vector<288x40xbf16>
    %cst = arith.constant dense<0.000000e+00> : vector<14x40xf32>
    %2 = tpu.matmul %0, %1, %cst {dimension_numbers = #tpu.dot_dimension_numbers<[1], [0], [0], [1], [0, 0, 1, 1], [], []>} : vector<14x288xbf16>, vector<288x40xbf16>, vector<14x40xf32> -> vector<14x40xf32>
    %c0_3 = arith.constant 0 : index
    %c0_4 = arith.constant 0 : index
    %3 = vector.load %arg2[%c0_3, %c0_4] : memref<1x40xf32, #tpu.memory_space<vmem>>, vector<1x40xf32>
    %4 = vector.broadcast %3 : vector<1x40xf32> to vector<14x40xf32>
    %5 = arith.addf %2, %4 : vector<14x40xf32>
    %c0_5 = arith.constant 0 : index
    %c0_6 = arith.constant 0 : index
    %6 = vector.load %arg3[%c0_5, %c0_6] : memref<288x40xbf16, #tpu.memory_space<vmem>>, vector<288x40xbf16>
    %cst_7 = arith.constant dense<0.000000e+00> : vector<14x40xf32>
    %7 = tpu.matmul %0, %6, %cst_7 {dimension_numbers = #tpu.dot_dimension_numbers<[1], [0], [0], [1], [0, 0, 1, 1], [], []>} : vector<14x288xbf16>, vector<288x40xbf16>, vector<14x40xf32> -> vector<14x40xf32>
    %c0_8 = arith.constant 0 : index
    %c0_9 = arith.constant 0 : index
    %8 = vector.load %arg4[%c0_8, %c0_9] : memref<1x40xf32, #tpu.memory_space<vmem>>, vector<1x40xf32>
    %9 = vector.broadcast %8 : vector<1x40xf32> to vector<14x40xf32>
    %10 = arith.addf %7, %9 : vector<14x40xf32>
    %11 = arith.negf %10 : vector<14x40xf32>
    %12 = math.exp %11 : vector<14x40xf32>
    %cst_10 = arith.constant 1.000000e+00 : f32
    %13 = vector.broadcast %cst_10 : f32 to vector<14x40xf32>
    %14 = arith.addf %13, %12 : vector<14x40xf32>
    %15 = arith.divf %13, %14 : vector<14x40xf32>
    %16 = arith.mulf %5, %15 : vector<14x40xf32>
    %cst_11 = arith.constant dense<0.000000e+00> : vector<14xf32>
    %17 = vector.multi_reduction <add>, %16, %cst_11 [1] : vector<14x40xf32> to vector<14xf32>
    %18 = vector.shape_cast %17 : vector<14xf32> to vector<14x1xf32>
    %cst_12 = arith.constant 4.000000e+01 : f32
    %19 = vector.broadcast %cst_12 : f32 to vector<14x1xf32>
    %20 = arith.divf %18, %19 : vector<14x1xf32>
    %21 = vector.broadcast %20 : vector<14x1xf32> to vector<14x40xf32>
    %22 = arith.subf %16, %21 : vector<14x40xf32>
    %23 = arith.mulf %22, %22 : vector<14x40xf32>
    %cst_13 = arith.constant dense<0.000000e+00> : vector<14xf32>
    %24 = vector.multi_reduction <add>, %23, %cst_13 [1] : vector<14x40xf32> to vector<14xf32>
    %25 = vector.shape_cast %24 : vector<14xf32> to vector<14x1xf32>
    %cst_14 = arith.constant 4.000000e+01 : f32
    %26 = vector.broadcast %cst_14 : f32 to vector<14x1xf32>
    %27 = arith.divf %25, %26 : vector<14x1xf32>
    %28 = vector.broadcast %20 : vector<14x1xf32> to vector<14x40xf32>
    %29 = arith.subf %16, %28 : vector<14x40xf32>
    %cst_15 = arith.constant 9.99999993E-9 : f32
    %30 = vector.broadcast %cst_15 : f32 to vector<14x1xf32>
    %31 = arith.addf %27, %30 : vector<14x1xf32>
    %32 = math.rsqrt %31 : vector<14x1xf32>
    %33 = vector.broadcast %32 : vector<14x1xf32> to vector<14x40xf32>
    %34 = arith.mulf %29, %33 : vector<14x40xf32>
    %c0_16 = arith.constant 0 : index
    %c0_17 = arith.constant 0 : index
    %35 = vector.load %arg5[%c0_16, %c0_17] : memref<1x40xf32, #tpu.memory_space<vmem>>, vector<1x40xf32>
    %36 = vector.broadcast %35 : vector<1x40xf32> to vector<14x40xf32>
    %37 = arith.mulf %34, %36 : vector<14x40xf32>
    %c0_18 = arith.constant 0 : index
    %c0_19 = arith.constant 0 : index
    %38 = vector.load %arg6[%c0_18, %c0_19] : memref<1x40xf32, #tpu.memory_space<vmem>>, vector<1x40xf32>
    %39 = vector.broadcast %38 : vector<1x40xf32> to vector<14x40xf32>
    %40 = arith.addf %37, %39 : vector<14x40xf32>
    %c0_20 = arith.constant 0 : index
    %41 = memref.load %arg7[%c0_20] : memref<1xf32, #tpu.memory_space<smem>>
    %cst_21 = arith.constant 0.000000e+00 : f32
    %42 = vector.broadcast %cst_21 : f32 to vector<14x40xf32>
    %43 = arith.cmpf oge, %40, %42 : vector<14x40xf32>
    %44 = vector.broadcast %41 : f32 to vector<14x40xf32>
    %45 = arith.mulf %44, %40 : vector<14x40xf32>
    %46 = arith.select %43, %40, %45 : vector<14x40xi1>, vector<14x40xf32>
    %c0_22 = arith.constant 0 : index
    %c0_23 = arith.constant 0 : index
    %47 = vector.load %arg8[%c0_22, %c0_23] : memref<14x40xf32, #tpu.memory_space<vmem>>, vector<14x40xf32>
    tpu.vector_store %arg8[%c0_22, %c0_23], %46 {strides = array<i32>} : memref<14x40xf32, #tpu.memory_space<vmem>>, vector<14x40xf32>,
    return
  }
}

module attributes {stable_mosaic.version = 11 : i64} {
  func.func @_mm_bias_kernel(%arg0: memref<28x16xf32, #tpu.memory_space<vmem>>, %arg1: memref<16x17xf32, #tpu.memory_space<vmem>>, %arg2: memref<1x17xf32, #tpu.memory_space<vmem>>, %arg3: memref<28x17xf32, #tpu.memory_space<vmem>>) attributes {dimension_semantics = [], scalar_prefetch = 0 : i64, scratch_operands = 0 : i64, tpu.core_type = #tpu.core_type<tc>} {
    %c0 = arith.constant 0 : index
    %c0_0 = arith.constant 0 : index
    %0 = vector.load %arg0[%c0, %c0_0] : memref<28x16xf32, #tpu.memory_space<vmem>>, vector<28x16xf32>
    %1 = arith.truncf %0 : vector<28x16xf32> to vector<28x16xbf16>
    %c0_1 = arith.constant 0 : index
    %c0_2 = arith.constant 0 : index
    %2 = vector.load %arg1[%c0_1, %c0_2] : memref<16x17xf32, #tpu.memory_space<vmem>>, vector<16x17xf32>
    %3 = arith.truncf %2 : vector<16x17xf32> to vector<16x17xbf16>
    %cst = arith.constant dense<0.000000e+00> : vector<28x17xf32>
    %4 = tpu.matmul %1, %3, %cst {dimension_numbers = #tpu.dot_dimension_numbers<[1], [0], [0], [1], [0, 0, 1, 1], [], []>} : vector<28x16xbf16>, vector<16x17xbf16>, vector<28x17xf32> -> vector<28x17xf32>
    %c0_3 = arith.constant 0 : index
    %c0_4 = arith.constant 0 : index
    %5 = vector.load %arg2[%c0_3, %c0_4] : memref<1x17xf32, #tpu.memory_space<vmem>>, vector<1x17xf32>
    %6 = vector.broadcast %5 : vector<1x17xf32> to vector<28x17xf32>
    %7 = arith.addf %4, %6 : vector<28x17xf32>
    %8 = arith.negf %7 : vector<28x17xf32>
    %9 = math.exp %8 : vector<28x17xf32>
    %cst_5 = arith.constant 1.000000e+00 : f32
    %10 = vector.broadcast %cst_5 : f32 to vector<28x17xf32>
    %11 = arith.addf %10, %9 : vector<28x17xf32>
    %12 = arith.divf %10, %11 : vector<28x17xf32>
    %c0_6 = arith.constant 0 : index
    %c0_7 = arith.constant 0 : index
    %13 = vector.load %arg3[%c0_6, %c0_7] : memref<28x17xf32, #tpu.memory_space<vmem>>, vector<28x17xf32>
    tpu.vector_store %arg3[%c0_6, %c0_7], %12 {strides = array<i32>} : memref<28x17xf32, #tpu.memory_space<vmem>>, vector<28x17xf32>,
    return
  }
}

module attributes {stable_mosaic.version = 11 : i64} {
  func.func @_refine_kernel(%arg0: memref<2x14x24xf32, #tpu.memory_space<vmem>>, %arg1: memref<4xf32, #tpu.memory_space<smem>>, %arg2: memref<24x17xbf16, #tpu.memory_space<vmem>>, %arg3: memref<1x17xf32, #tpu.memory_space<vmem>>, %arg4: memref<2x14x17xf32, #tpu.memory_space<vmem>>) attributes {dimension_semantics = [], scalar_prefetch = 0 : i64, scratch_operands = 0 : i64, tpu.core_type = #tpu.core_type<tc>} {
    %c0 = arith.constant 0 : index
    %0 = memref.load %arg1[%c0] : memref<4xf32, #tpu.memory_space<smem>>
    %c1 = arith.constant 1 : index
    %1 = memref.load %arg1[%c1] : memref<4xf32, #tpu.memory_space<smem>>
    %c2 = arith.constant 2 : index
    %2 = memref.load %arg1[%c2] : memref<4xf32, #tpu.memory_space<smem>>
    %c3 = arith.constant 3 : index
    %3 = memref.load %arg1[%c3] : memref<4xf32, #tpu.memory_space<smem>>
    %c0_0 = arith.constant 0 : index
    %c0_1 = arith.constant 0 : index
    %c0_2 = arith.constant 0 : index
    %4 = vector.load %arg0[%c0_0, %c0_1, %c0_2] : memref<2x14x24xf32, #tpu.memory_space<vmem>>, vector<1x14x24xf32>
    %5 = vector.shape_cast %4 : vector<1x14x24xf32> to vector<14x24xf32>
    %c1_3 = arith.constant 1 : index
    %c0_4 = arith.constant 0 : index
    %c0_5 = arith.constant 0 : index
    %6 = vector.load %arg0[%c1_3, %c0_4, %c0_5] : memref<2x14x24xf32, #tpu.memory_space<vmem>>, vector<1x14x24xf32>
    %7 = vector.shape_cast %6 : vector<1x14x24xf32> to vector<14x24xf32>
    %8 = vector.broadcast %0 : f32 to vector<14x24xf32>
    %9 = arith.mulf %8, %5 : vector<14x24xf32>
    %10 = vector.broadcast %1 : f32 to vector<14x24xf32>
    %11 = arith.mulf %10, %7 : vector<14x24xf32>
    %12 = arith.subf %9, %11 : vector<14x24xf32>
    %13 = vector.broadcast %2 : f32 to vector<14x24xf32>
    %14 = arith.addf %12, %13 : vector<14x24xf32>
    %15 = vector.broadcast %1 : f32 to vector<14x24xf32>
    %16 = arith.mulf %15, %5 : vector<14x24xf32>
    %17 = vector.broadcast %0 : f32 to vector<14x24xf32>
    %18 = arith.mulf %17, %7 : vector<14x24xf32>
    %19 = arith.addf %16, %18 : vector<14x24xf32>
    %20 = vector.broadcast %3 : f32 to vector<14x24xf32>
    %21 = arith.addf %19, %20 : vector<14x24xf32>
    %c0_6 = arith.constant 0 : index
    %c0_7 = arith.constant 0 : index
    %22 = vector.load %arg2[%c0_6, %c0_7] : memref<24x17xbf16, #tpu.memory_space<vmem>>, vector<24x17xbf16>
    %c0_8 = arith.constant 0 : index
    %c0_9 = arith.constant 0 : index
    %23 = vector.load %arg3[%c0_8, %c0_9] : memref<1x17xf32, #tpu.memory_space<vmem>>, vector<1x17xf32>
    %24 = arith.truncf %14 : vector<14x24xf32> to vector<14x24xbf16>
    %cst = arith.constant dense<0.000000e+00> : vector<14x17xf32>
    %25 = tpu.matmul %24, %22, %cst {dimension_numbers = #tpu.dot_dimension_numbers<[1], [0], [0], [1], [0, 0, 1, 1], [], []>} : vector<14x24xbf16>, vector<24x17xbf16>, vector<14x17xf32> -> vector<14x17xf32>
    %26 = vector.broadcast %23 : vector<1x17xf32> to vector<14x17xf32>
    %27 = arith.addf %25, %26 : vector<14x17xf32>
    %28 = arith.negf %27 : vector<14x17xf32>
    %29 = math.exp %28 : vector<14x17xf32>
    %cst_10 = arith.constant 1.000000e+00 : f32
    %30 = vector.broadcast %cst_10 : f32 to vector<14x17xf32>
    %31 = arith.addf %30, %29 : vector<14x17xf32>
    %32 = arith.divf %30, %31 : vector<14x17xf32>
    %c0_11 = arith.constant 0 : index
    %c0_12 = arith.constant 0 : index
    %c0_13 = arith.constant 0 : index
    %33 = vector.load %arg4[%c0_11, %c0_12, %c0_13] : memref<2x14x17xf32, #tpu.memory_space<vmem>>, vector<1x14x17xf32>
    %34 = vector.shape_cast %33 : vector<1x14x17xf32> to vector<14x17xf32>
    %35 = vector.shape_cast %32 : vector<14x17xf32> to vector<1x14x17xf32>
    tpu.vector_store %arg4[%c0_11, %c0_12, %c0_13], %35 {strides = array<i32>} : memref<2x14x17xf32, #tpu.memory_space<vmem>>, vector<1x14x17xf32>,
    %36 = arith.truncf %21 : vector<14x24xf32> to vector<14x24xbf16>
    %cst_14 = arith.constant dense<0.000000e+00> : vector<14x17xf32>
    %37 = tpu.matmul %36, %22, %cst_14 {dimension_numbers = #tpu.dot_dimension_numbers<[1], [0], [0], [1], [0, 0, 1, 1], [], []>} : vector<14x24xbf16>, vector<24x17xbf16>, vector<14x17xf32> -> vector<14x17xf32>
    %38 = vector.broadcast %23 : vector<1x17xf32> to vector<14x17xf32>
    %39 = arith.addf %37, %38 : vector<14x17xf32>
    %40 = arith.negf %39 : vector<14x17xf32>
    %41 = math.exp %40 : vector<14x17xf32>
    %cst_15 = arith.constant 1.000000e+00 : f32
    %42 = vector.broadcast %cst_15 : f32 to vector<14x17xf32>
    %43 = arith.addf %42, %41 : vector<14x17xf32>
    %44 = arith.divf %42, %43 : vector<14x17xf32>
    %c1_16 = arith.constant 1 : index
    %c0_17 = arith.constant 0 : index
    %c0_18 = arith.constant 0 : index
    %45 = vector.load %arg4[%c1_16, %c0_17, %c0_18] : memref<2x14x17xf32, #tpu.memory_space<vmem>>, vector<1x14x17xf32>
    %46 = vector.shape_cast %45 : vector<1x14x17xf32> to vector<14x17xf32>
    %47 = vector.shape_cast %44 : vector<14x17xf32> to vector<1x14x17xf32>
    tpu.vector_store %arg4[%c1_16, %c0_17, %c0_18], %47 {strides = array<i32>} : memref<2x14x17xf32, #tpu.memory_space<vmem>>, vector<1x14x17xf32>,
    return
  }
}

module attributes {stable_mosaic.version = 11 : i64} {
  func.func @_refine_kernel(%arg0: memref<2x14x20xf32, #tpu.memory_space<vmem>>, %arg1: memref<4xf32, #tpu.memory_space<smem>>, %arg2: memref<20x17xbf16, #tpu.memory_space<vmem>>, %arg3: memref<1x17xf32, #tpu.memory_space<vmem>>, %arg4: memref<2x14x17xf32, #tpu.memory_space<vmem>>) attributes {dimension_semantics = [], scalar_prefetch = 0 : i64, scratch_operands = 0 : i64, tpu.core_type = #tpu.core_type<tc>} {
    %c0 = arith.constant 0 : index
    %0 = memref.load %arg1[%c0] : memref<4xf32, #tpu.memory_space<smem>>
    %c1 = arith.constant 1 : index
    %1 = memref.load %arg1[%c1] : memref<4xf32, #tpu.memory_space<smem>>
    %c2 = arith.constant 2 : index
    %2 = memref.load %arg1[%c2] : memref<4xf32, #tpu.memory_space<smem>>
    %c3 = arith.constant 3 : index
    %3 = memref.load %arg1[%c3] : memref<4xf32, #tpu.memory_space<smem>>
    %c0_0 = arith.constant 0 : index
    %c0_1 = arith.constant 0 : index
    %c0_2 = arith.constant 0 : index
    %4 = vector.load %arg0[%c0_0, %c0_1, %c0_2] : memref<2x14x20xf32, #tpu.memory_space<vmem>>, vector<1x14x20xf32>
    %5 = vector.shape_cast %4 : vector<1x14x20xf32> to vector<14x20xf32>
    %c1_3 = arith.constant 1 : index
    %c0_4 = arith.constant 0 : index
    %c0_5 = arith.constant 0 : index
    %6 = vector.load %arg0[%c1_3, %c0_4, %c0_5] : memref<2x14x20xf32, #tpu.memory_space<vmem>>, vector<1x14x20xf32>
    %7 = vector.shape_cast %6 : vector<1x14x20xf32> to vector<14x20xf32>
    %8 = vector.broadcast %0 : f32 to vector<14x20xf32>
    %9 = arith.mulf %8, %5 : vector<14x20xf32>
    %10 = vector.broadcast %1 : f32 to vector<14x20xf32>
    %11 = arith.mulf %10, %7 : vector<14x20xf32>
    %12 = arith.subf %9, %11 : vector<14x20xf32>
    %13 = vector.broadcast %2 : f32 to vector<14x20xf32>
    %14 = arith.addf %12, %13 : vector<14x20xf32>
    %15 = vector.broadcast %1 : f32 to vector<14x20xf32>
    %16 = arith.mulf %15, %5 : vector<14x20xf32>
    %17 = vector.broadcast %0 : f32 to vector<14x20xf32>
    %18 = arith.mulf %17, %7 : vector<14x20xf32>
    %19 = arith.addf %16, %18 : vector<14x20xf32>
    %20 = vector.broadcast %3 : f32 to vector<14x20xf32>
    %21 = arith.addf %19, %20 : vector<14x20xf32>
    %c0_6 = arith.constant 0 : index
    %c0_7 = arith.constant 0 : index
    %22 = vector.load %arg2[%c0_6, %c0_7] : memref<20x17xbf16, #tpu.memory_space<vmem>>, vector<20x17xbf16>
    %c0_8 = arith.constant 0 : index
    %c0_9 = arith.constant 0 : index
    %23 = vector.load %arg3[%c0_8, %c0_9] : memref<1x17xf32, #tpu.memory_space<vmem>>, vector<1x17xf32>
    %24 = arith.truncf %14 : vector<14x20xf32> to vector<14x20xbf16>
    %cst = arith.constant dense<0.000000e+00> : vector<14x17xf32>
    %25 = tpu.matmul %24, %22, %cst {dimension_numbers = #tpu.dot_dimension_numbers<[1], [0], [0], [1], [0, 0, 1, 1], [], []>} : vector<14x20xbf16>, vector<20x17xbf16>, vector<14x17xf32> -> vector<14x17xf32>
    %26 = vector.broadcast %23 : vector<1x17xf32> to vector<14x17xf32>
    %27 = arith.addf %25, %26 : vector<14x17xf32>
    %28 = arith.negf %27 : vector<14x17xf32>
    %29 = math.exp %28 : vector<14x17xf32>
    %cst_10 = arith.constant 1.000000e+00 : f32
    %30 = vector.broadcast %cst_10 : f32 to vector<14x17xf32>
    %31 = arith.addf %30, %29 : vector<14x17xf32>
    %32 = arith.divf %30, %31 : vector<14x17xf32>
    %c0_11 = arith.constant 0 : index
    %c0_12 = arith.constant 0 : index
    %c0_13 = arith.constant 0 : index
    %33 = vector.load %arg4[%c0_11, %c0_12, %c0_13] : memref<2x14x17xf32, #tpu.memory_space<vmem>>, vector<1x14x17xf32>
    %34 = vector.shape_cast %33 : vector<1x14x17xf32> to vector<14x17xf32>
    %35 = vector.shape_cast %32 : vector<14x17xf32> to vector<1x14x17xf32>
    tpu.vector_store %arg4[%c0_11, %c0_12, %c0_13], %35 {strides = array<i32>} : memref<2x14x17xf32, #tpu.memory_space<vmem>>, vector<1x14x17xf32>,
    %36 = arith.truncf %21 : vector<14x20xf32> to vector<14x20xbf16>
    %cst_14 = arith.constant dense<0.000000e+00> : vector<14x17xf32>
    %37 = tpu.matmul %36, %22, %cst_14 {dimension_numbers = #tpu.dot_dimension_numbers<[1], [0], [0], [1], [0, 0, 1, 1], [], []>} : vector<14x20xbf16>, vector<20x17xbf16>, vector<14x17xf32> -> vector<14x17xf32>
    %38 = vector.broadcast %23 : vector<1x17xf32> to vector<14x17xf32>
    %39 = arith.addf %37, %38 : vector<14x17xf32>
    %40 = arith.negf %39 : vector<14x17xf32>
    %41 = math.exp %40 : vector<14x17xf32>
    %cst_15 = arith.constant 1.000000e+00 : f32
    %42 = vector.broadcast %cst_15 : f32 to vector<14x17xf32>
    %43 = arith.addf %42, %41 : vector<14x17xf32>
    %44 = arith.divf %42, %43 : vector<14x17xf32>
    %c1_16 = arith.constant 1 : index
    %c0_17 = arith.constant 0 : index
    %c0_18 = arith.constant 0 : index
    %45 = vector.load %arg4[%c1_16, %c0_17, %c0_18] : memref<2x14x17xf32, #tpu.memory_space<vmem>>, vector<1x14x17xf32>
    %46 = vector.shape_cast %45 : vector<1x14x17xf32> to vector<14x17xf32>
    %47 = vector.shape_cast %44 : vector<14x17xf32> to vector<1x14x17xf32>
    tpu.vector_store %arg4[%c1_16, %c0_17, %c0_18], %47 {strides = array<i32>} : memref<2x14x17xf32, #tpu.memory_space<vmem>>, vector<1x14x17xf32>,
    return
  }
}

module attributes {stable_mosaic.version = 11 : i64} {
  func.func @_conv_kernel(%arg0: memref<14x208xbf16, #tpu.memory_space<vmem>>, %arg1: memref<208x72xbf16, #tpu.memory_space<vmem>>, %arg2: memref<1x72xf32, #tpu.memory_space<vmem>>, %arg3: memref<208x72xbf16, #tpu.memory_space<vmem>>, %arg4: memref<1x72xf32, #tpu.memory_space<vmem>>, %arg5: memref<1x72xf32, #tpu.memory_space<vmem>>, %arg6: memref<1x72xf32, #tpu.memory_space<vmem>>, %arg7: memref<1xf32, #tpu.memory_space<smem>>, %arg8: memref<14x72xf32, #tpu.memory_space<vmem>>) attributes {dimension_semantics = [], scalar_prefetch = 0 : i64, scratch_operands = 0 : i64, tpu.core_type = #tpu.core_type<tc>} {
    %c0 = arith.constant 0 : index
    %c0_0 = arith.constant 0 : index
    %0 = vector.load %arg0[%c0, %c0_0] : memref<14x208xbf16, #tpu.memory_space<vmem>>, vector<14x208xbf16>
    %c0_1 = arith.constant 0 : index
    %c0_2 = arith.constant 0 : index
    %1 = vector.load %arg1[%c0_1, %c0_2] : memref<208x72xbf16, #tpu.memory_space<vmem>>, vector<208x72xbf16>
    %cst = arith.constant dense<0.000000e+00> : vector<14x72xf32>
    %2 = tpu.matmul %0, %1, %cst {dimension_numbers = #tpu.dot_dimension_numbers<[1], [0], [0], [1], [0, 0, 1, 1], [], []>} : vector<14x208xbf16>, vector<208x72xbf16>, vector<14x72xf32> -> vector<14x72xf32>
    %c0_3 = arith.constant 0 : index
    %c0_4 = arith.constant 0 : index
    %3 = vector.load %arg2[%c0_3, %c0_4] : memref<1x72xf32, #tpu.memory_space<vmem>>, vector<1x72xf32>
    %4 = vector.broadcast %3 : vector<1x72xf32> to vector<14x72xf32>
    %5 = arith.addf %2, %4 : vector<14x72xf32>
    %c0_5 = arith.constant 0 : index
    %c0_6 = arith.constant 0 : index
    %6 = vector.load %arg3[%c0_5, %c0_6] : memref<208x72xbf16, #tpu.memory_space<vmem>>, vector<208x72xbf16>
    %cst_7 = arith.constant dense<0.000000e+00> : vector<14x72xf32>
    %7 = tpu.matmul %0, %6, %cst_7 {dimension_numbers = #tpu.dot_dimension_numbers<[1], [0], [0], [1], [0, 0, 1, 1], [], []>} : vector<14x208xbf16>, vector<208x72xbf16>, vector<14x72xf32> -> vector<14x72xf32>
    %c0_8 = arith.constant 0 : index
    %c0_9 = arith.constant 0 : index
    %8 = vector.load %arg4[%c0_8, %c0_9] : memref<1x72xf32, #tpu.memory_space<vmem>>, vector<1x72xf32>
    %9 = vector.broadcast %8 : vector<1x72xf32> to vector<14x72xf32>
    %10 = arith.addf %7, %9 : vector<14x72xf32>
    %11 = arith.negf %10 : vector<14x72xf32>
    %12 = math.exp %11 : vector<14x72xf32>
    %cst_10 = arith.constant 1.000000e+00 : f32
    %13 = vector.broadcast %cst_10 : f32 to vector<14x72xf32>
    %14 = arith.addf %13, %12 : vector<14x72xf32>
    %15 = arith.divf %13, %14 : vector<14x72xf32>
    %16 = arith.mulf %5, %15 : vector<14x72xf32>
    %cst_11 = arith.constant dense<0.000000e+00> : vector<14xf32>
    %17 = vector.multi_reduction <add>, %16, %cst_11 [1] : vector<14x72xf32> to vector<14xf32>
    %18 = vector.shape_cast %17 : vector<14xf32> to vector<14x1xf32>
    %cst_12 = arith.constant 7.200000e+01 : f32
    %19 = vector.broadcast %cst_12 : f32 to vector<14x1xf32>
    %20 = arith.divf %18, %19 : vector<14x1xf32>
    %21 = vector.broadcast %20 : vector<14x1xf32> to vector<14x72xf32>
    %22 = arith.subf %16, %21 : vector<14x72xf32>
    %23 = arith.mulf %22, %22 : vector<14x72xf32>
    %cst_13 = arith.constant dense<0.000000e+00> : vector<14xf32>
    %24 = vector.multi_reduction <add>, %23, %cst_13 [1] : vector<14x72xf32> to vector<14xf32>
    %25 = vector.shape_cast %24 : vector<14xf32> to vector<14x1xf32>
    %cst_14 = arith.constant 7.200000e+01 : f32
    %26 = vector.broadcast %cst_14 : f32 to vector<14x1xf32>
    %27 = arith.divf %25, %26 : vector<14x1xf32>
    %28 = vector.broadcast %20 : vector<14x1xf32> to vector<14x72xf32>
    %29 = arith.subf %16, %28 : vector<14x72xf32>
    %cst_15 = arith.constant 9.99999993E-9 : f32
    %30 = vector.broadcast %cst_15 : f32 to vector<14x1xf32>
    %31 = arith.addf %27, %30 : vector<14x1xf32>
    %32 = math.rsqrt %31 : vector<14x1xf32>
    %33 = vector.broadcast %32 : vector<14x1xf32> to vector<14x72xf32>
    %34 = arith.mulf %29, %33 : vector<14x72xf32>
    %c0_16 = arith.constant 0 : index
    %c0_17 = arith.constant 0 : index
    %35 = vector.load %arg5[%c0_16, %c0_17] : memref<1x72xf32, #tpu.memory_space<vmem>>, vector<1x72xf32>
    %36 = vector.broadcast %35 : vector<1x72xf32> to vector<14x72xf32>
    %37 = arith.mulf %34, %36 : vector<14x72xf32>
    %c0_18 = arith.constant 0 : index
    %c0_19 = arith.constant 0 : index
    %38 = vector.load %arg6[%c0_18, %c0_19] : memref<1x72xf32, #tpu.memory_space<vmem>>, vector<1x72xf32>
    %39 = vector.broadcast %38 : vector<1x72xf32> to vector<14x72xf32>
    %40 = arith.addf %37, %39 : vector<14x72xf32>
    %c0_20 = arith.constant 0 : index
    %41 = memref.load %arg7[%c0_20] : memref<1xf32, #tpu.memory_space<smem>>
    %cst_21 = arith.constant 0.000000e+00 : f32
    %42 = vector.broadcast %cst_21 : f32 to vector<14x72xf32>
    %43 = arith.cmpf oge, %40, %42 : vector<14x72xf32>
    %44 = vector.broadcast %41 : f32 to vector<14x72xf32>
    %45 = arith.mulf %44, %40 : vector<14x72xf32>
    %46 = arith.select %43, %40, %45 : vector<14x72xi1>, vector<14x72xf32>
    %c0_22 = arith.constant 0 : index
    %c0_23 = arith.constant 0 : index
    %47 = vector.load %arg8[%c0_22, %c0_23] : memref<14x72xf32, #tpu.memory_space<vmem>>, vector<14x72xf32>
    tpu.vector_store %arg8[%c0_22, %c0_23], %46 {strides = array<i32>} : memref<14x72xf32, #tpu.memory_space<vmem>>, vector<14x72xf32>,
    return
  }
}

module attributes {stable_mosaic.version = 11 : i64} {
  func.func @_refine_kernel(%arg0: memref<2x14x36xf32, #tpu.memory_space<vmem>>, %arg1: memref<4xf32, #tpu.memory_space<smem>>, %arg2: memref<36x17xbf16, #tpu.memory_space<vmem>>, %arg3: memref<1x17xf32, #tpu.memory_space<vmem>>, %arg4: memref<2x14x17xf32, #tpu.memory_space<vmem>>) attributes {dimension_semantics = [], scalar_prefetch = 0 : i64, scratch_operands = 0 : i64, tpu.core_type = #tpu.core_type<tc>} {
    %c0 = arith.constant 0 : index
    %0 = memref.load %arg1[%c0] : memref<4xf32, #tpu.memory_space<smem>>
    %c1 = arith.constant 1 : index
    %1 = memref.load %arg1[%c1] : memref<4xf32, #tpu.memory_space<smem>>
    %c2 = arith.constant 2 : index
    %2 = memref.load %arg1[%c2] : memref<4xf32, #tpu.memory_space<smem>>
    %c3 = arith.constant 3 : index
    %3 = memref.load %arg1[%c3] : memref<4xf32, #tpu.memory_space<smem>>
    %c0_0 = arith.constant 0 : index
    %c0_1 = arith.constant 0 : index
    %c0_2 = arith.constant 0 : index
    %4 = vector.load %arg0[%c0_0, %c0_1, %c0_2] : memref<2x14x36xf32, #tpu.memory_space<vmem>>, vector<1x14x36xf32>
    %5 = vector.shape_cast %4 : vector<1x14x36xf32> to vector<14x36xf32>
    %c1_3 = arith.constant 1 : index
    %c0_4 = arith.constant 0 : index
    %c0_5 = arith.constant 0 : index
    %6 = vector.load %arg0[%c1_3, %c0_4, %c0_5] : memref<2x14x36xf32, #tpu.memory_space<vmem>>, vector<1x14x36xf32>
    %7 = vector.shape_cast %6 : vector<1x14x36xf32> to vector<14x36xf32>
    %8 = vector.broadcast %0 : f32 to vector<14x36xf32>
    %9 = arith.mulf %8, %5 : vector<14x36xf32>
    %10 = vector.broadcast %1 : f32 to vector<14x36xf32>
    %11 = arith.mulf %10, %7 : vector<14x36xf32>
    %12 = arith.subf %9, %11 : vector<14x36xf32>
    %13 = vector.broadcast %2 : f32 to vector<14x36xf32>
    %14 = arith.addf %12, %13 : vector<14x36xf32>
    %15 = vector.broadcast %1 : f32 to vector<14x36xf32>
    %16 = arith.mulf %15, %5 : vector<14x36xf32>
    %17 = vector.broadcast %0 : f32 to vector<14x36xf32>
    %18 = arith.mulf %17, %7 : vector<14x36xf32>
    %19 = arith.addf %16, %18 : vector<14x36xf32>
    %20 = vector.broadcast %3 : f32 to vector<14x36xf32>
    %21 = arith.addf %19, %20 : vector<14x36xf32>
    %c0_6 = arith.constant 0 : index
    %c0_7 = arith.constant 0 : index
    %22 = vector.load %arg2[%c0_6, %c0_7] : memref<36x17xbf16, #tpu.memory_space<vmem>>, vector<36x17xbf16>
    %c0_8 = arith.constant 0 : index
    %c0_9 = arith.constant 0 : index
    %23 = vector.load %arg3[%c0_8, %c0_9] : memref<1x17xf32, #tpu.memory_space<vmem>>, vector<1x17xf32>
    %24 = arith.truncf %14 : vector<14x36xf32> to vector<14x36xbf16>
    %cst = arith.constant dense<0.000000e+00> : vector<14x17xf32>
    %25 = tpu.matmul %24, %22, %cst {dimension_numbers = #tpu.dot_dimension_numbers<[1], [0], [0], [1], [0, 0, 1, 1], [], []>} : vector<14x36xbf16>, vector<36x17xbf16>, vector<14x17xf32> -> vector<14x17xf32>
    %26 = vector.broadcast %23 : vector<1x17xf32> to vector<14x17xf32>
    %27 = arith.addf %25, %26 : vector<14x17xf32>
    %28 = arith.negf %27 : vector<14x17xf32>
    %29 = math.exp %28 : vector<14x17xf32>
    %cst_10 = arith.constant 1.000000e+00 : f32
    %30 = vector.broadcast %cst_10 : f32 to vector<14x17xf32>
    %31 = arith.addf %30, %29 : vector<14x17xf32>
    %32 = arith.divf %30, %31 : vector<14x17xf32>
    %c0_11 = arith.constant 0 : index
    %c0_12 = arith.constant 0 : index
    %c0_13 = arith.constant 0 : index
    %33 = vector.load %arg4[%c0_11, %c0_12, %c0_13] : memref<2x14x17xf32, #tpu.memory_space<vmem>>, vector<1x14x17xf32>
    %34 = vector.shape_cast %33 : vector<1x14x17xf32> to vector<14x17xf32>
    %35 = vector.shape_cast %32 : vector<14x17xf32> to vector<1x14x17xf32>
    tpu.vector_store %arg4[%c0_11, %c0_12, %c0_13], %35 {strides = array<i32>} : memref<2x14x17xf32, #tpu.memory_space<vmem>>, vector<1x14x17xf32>,
    %36 = arith.truncf %21 : vector<14x36xf32> to vector<14x36xbf16>
    %cst_14 = arith.constant dense<0.000000e+00> : vector<14x17xf32>
    %37 = tpu.matmul %36, %22, %cst_14 {dimension_numbers = #tpu.dot_dimension_numbers<[1], [0], [0], [1], [0, 0, 1, 1], [], []>} : vector<14x36xbf16>, vector<36x17xbf16>, vector<14x17xf32> -> vector<14x17xf32>
    %38 = vector.broadcast %23 : vector<1x17xf32> to vector<14x17xf32>
    %39 = arith.addf %37, %38 : vector<14x17xf32>
    %40 = arith.negf %39 : vector<14x17xf32>
    %41 = math.exp %40 : vector<14x17xf32>
    %cst_15 = arith.constant 1.000000e+00 : f32
    %42 = vector.broadcast %cst_15 : f32 to vector<14x17xf32>
    %43 = arith.addf %42, %41 : vector<14x17xf32>
    %44 = arith.divf %42, %43 : vector<14x17xf32>
    %c1_16 = arith.constant 1 : index
    %c0_17 = arith.constant 0 : index
    %c0_18 = arith.constant 0 : index
    %45 = vector.load %arg4[%c1_16, %c0_17, %c0_18] : memref<2x14x17xf32, #tpu.memory_space<vmem>>, vector<1x14x17xf32>
    %46 = vector.shape_cast %45 : vector<1x14x17xf32> to vector<14x17xf32>
    %47 = vector.shape_cast %44 : vector<14x17xf32> to vector<1x14x17xf32>
    tpu.vector_store %arg4[%c1_16, %c0_17, %c0_18], %47 {strides = array<i32>} : memref<2x14x17xf32, #tpu.memory_space<vmem>>, vector<1x14x17xf32>,
    return
  }
}

module attributes {stable_mosaic.version = 11 : i64} {
  func.func @_conv_kernel(%arg0: memref<14x336xbf16, #tpu.memory_space<vmem>>, %arg1: memref<336x34xbf16, #tpu.memory_space<vmem>>, %arg2: memref<1x34xf32, #tpu.memory_space<vmem>>, %arg3: memref<336x34xbf16, #tpu.memory_space<vmem>>, %arg4: memref<1x34xf32, #tpu.memory_space<vmem>>, %arg5: memref<14x34xf32, #tpu.memory_space<vmem>>) attributes {dimension_semantics = [], scalar_prefetch = 0 : i64, scratch_operands = 0 : i64, tpu.core_type = #tpu.core_type<tc>} {
    %c0 = arith.constant 0 : index
    %c0_0 = arith.constant 0 : index
    %0 = vector.load %arg0[%c0, %c0_0] : memref<14x336xbf16, #tpu.memory_space<vmem>>, vector<14x336xbf16>
    %c0_1 = arith.constant 0 : index
    %c0_2 = arith.constant 0 : index
    %1 = vector.load %arg1[%c0_1, %c0_2] : memref<336x34xbf16, #tpu.memory_space<vmem>>, vector<336x34xbf16>
    %cst = arith.constant dense<0.000000e+00> : vector<14x34xf32>
    %2 = tpu.matmul %0, %1, %cst {dimension_numbers = #tpu.dot_dimension_numbers<[1], [0], [0], [1], [0, 0, 1, 1], [], []>} : vector<14x336xbf16>, vector<336x34xbf16>, vector<14x34xf32> -> vector<14x34xf32>
    %c0_3 = arith.constant 0 : index
    %c0_4 = arith.constant 0 : index
    %3 = vector.load %arg2[%c0_3, %c0_4] : memref<1x34xf32, #tpu.memory_space<vmem>>, vector<1x34xf32>
    %4 = vector.broadcast %3 : vector<1x34xf32> to vector<14x34xf32>
    %5 = arith.addf %2, %4 : vector<14x34xf32>
    %c0_5 = arith.constant 0 : index
    %c0_6 = arith.constant 0 : index
    %6 = vector.load %arg3[%c0_5, %c0_6] : memref<336x34xbf16, #tpu.memory_space<vmem>>, vector<336x34xbf16>
    %cst_7 = arith.constant dense<0.000000e+00> : vector<14x34xf32>
    %7 = tpu.matmul %0, %6, %cst_7 {dimension_numbers = #tpu.dot_dimension_numbers<[1], [0], [0], [1], [0, 0, 1, 1], [], []>} : vector<14x336xbf16>, vector<336x34xbf16>, vector<14x34xf32> -> vector<14x34xf32>
    %c0_8 = arith.constant 0 : index
    %c0_9 = arith.constant 0 : index
    %8 = vector.load %arg4[%c0_8, %c0_9] : memref<1x34xf32, #tpu.memory_space<vmem>>, vector<1x34xf32>
    %9 = vector.broadcast %8 : vector<1x34xf32> to vector<14x34xf32>
    %10 = arith.addf %7, %9 : vector<14x34xf32>
    %11 = arith.negf %10 : vector<14x34xf32>
    %12 = math.exp %11 : vector<14x34xf32>
    %cst_10 = arith.constant 1.000000e+00 : f32
    %13 = vector.broadcast %cst_10 : f32 to vector<14x34xf32>
    %14 = arith.addf %13, %12 : vector<14x34xf32>
    %15 = arith.divf %13, %14 : vector<14x34xf32>
    %16 = arith.mulf %5, %15 : vector<14x34xf32>
    %c0_11 = arith.constant 0 : index
    %c0_12 = arith.constant 0 : index
    %17 = vector.load %arg5[%c0_11, %c0_12] : memref<14x34xf32, #tpu.memory_space<vmem>>, vector<14x34xf32>
    tpu.vector_store %arg5[%c0_11, %c0_12], %16 {strides = array<i32>} : memref<14x34xf32, #tpu.memory_space<vmem>>, vector<14x34xf32>,
    return
  }
}

module attributes {stable_mosaic.version = 11 : i64} {
  func.func @_refine_kernel(%arg0: memref<2x14x17xf32, #tpu.memory_space<vmem>>, %arg1: memref<4xf32, #tpu.memory_space<smem>>, %arg2: memref<17x17xbf16, #tpu.memory_space<vmem>>, %arg3: memref<1x17xf32, #tpu.memory_space<vmem>>, %arg4: memref<2x14x17xf32, #tpu.memory_space<vmem>>) attributes {dimension_semantics = [], scalar_prefetch = 0 : i64, scratch_operands = 0 : i64, tpu.core_type = #tpu.core_type<tc>} {
    %c0 = arith.constant 0 : index
    %0 = memref.load %arg1[%c0] : memref<4xf32, #tpu.memory_space<smem>>
    %c1 = arith.constant 1 : index
    %1 = memref.load %arg1[%c1] : memref<4xf32, #tpu.memory_space<smem>>
    %c2 = arith.constant 2 : index
    %2 = memref.load %arg1[%c2] : memref<4xf32, #tpu.memory_space<smem>>
    %c3 = arith.constant 3 : index
    %3 = memref.load %arg1[%c3] : memref<4xf32, #tpu.memory_space<smem>>
    %c0_0 = arith.constant 0 : index
    %c0_1 = arith.constant 0 : index
    %c0_2 = arith.constant 0 : index
    %4 = vector.load %arg0[%c0_0, %c0_1, %c0_2] : memref<2x14x17xf32, #tpu.memory_space<vmem>>, vector<1x14x17xf32>
    %5 = vector.shape_cast %4 : vector<1x14x17xf32> to vector<14x17xf32>
    %c1_3 = arith.constant 1 : index
    %c0_4 = arith.constant 0 : index
    %c0_5 = arith.constant 0 : index
    %6 = vector.load %arg0[%c1_3, %c0_4, %c0_5] : memref<2x14x17xf32, #tpu.memory_space<vmem>>, vector<1x14x17xf32>
    %7 = vector.shape_cast %6 : vector<1x14x17xf32> to vector<14x17xf32>
    %8 = vector.broadcast %0 : f32 to vector<14x17xf32>
    %9 = arith.mulf %8, %5 : vector<14x17xf32>
    %10 = vector.broadcast %1 : f32 to vector<14x17xf32>
    %11 = arith.mulf %10, %7 : vector<14x17xf32>
    %12 = arith.subf %9, %11 : vector<14x17xf32>
    %13 = vector.broadcast %2 : f32 to vector<14x17xf32>
    %14 = arith.addf %12, %13 : vector<14x17xf32>
    %15 = vector.broadcast %1 : f32 to vector<14x17xf32>
    %16 = arith.mulf %15, %5 : vector<14x17xf32>
    %17 = vector.broadcast %0 : f32 to vector<14x17xf32>
    %18 = arith.mulf %17, %7 : vector<14x17xf32>
    %19 = arith.addf %16, %18 : vector<14x17xf32>
    %20 = vector.broadcast %3 : f32 to vector<14x17xf32>
    %21 = arith.addf %19, %20 : vector<14x17xf32>
    %c0_6 = arith.constant 0 : index
    %c0_7 = arith.constant 0 : index
    %22 = vector.load %arg2[%c0_6, %c0_7] : memref<17x17xbf16, #tpu.memory_space<vmem>>, vector<17x17xbf16>
    %c0_8 = arith.constant 0 : index
    %c0_9 = arith.constant 0 : index
    %23 = vector.load %arg3[%c0_8, %c0_9] : memref<1x17xf32, #tpu.memory_space<vmem>>, vector<1x17xf32>
    %24 = arith.truncf %14 : vector<14x17xf32> to vector<14x17xbf16>
    %cst = arith.constant dense<0.000000e+00> : vector<14x17xf32>
    %25 = tpu.matmul %24, %22, %cst {dimension_numbers = #tpu.dot_dimension_numbers<[1], [0], [0], [1], [0, 0, 1, 1], [], []>} : vector<14x17xbf16>, vector<17x17xbf16>, vector<14x17xf32> -> vector<14x17xf32>
    %26 = vector.broadcast %23 : vector<1x17xf32> to vector<14x17xf32>
    %27 = arith.addf %25, %26 : vector<14x17xf32>
    %28 = arith.negf %27 : vector<14x17xf32>
    %29 = math.exp %28 : vector<14x17xf32>
    %cst_10 = arith.constant 1.000000e+00 : f32
    %30 = vector.broadcast %cst_10 : f32 to vector<14x17xf32>
    %31 = arith.addf %30, %29 : vector<14x17xf32>
    %32 = arith.divf %30, %31 : vector<14x17xf32>
    %c0_11 = arith.constant 0 : index
    %c0_12 = arith.constant 0 : index
    %c0_13 = arith.constant 0 : index
    %33 = vector.load %arg4[%c0_11, %c0_12, %c0_13] : memref<2x14x17xf32, #tpu.memory_space<vmem>>, vector<1x14x17xf32>
    %34 = vector.shape_cast %33 : vector<1x14x17xf32> to vector<14x17xf32>
    %35 = vector.shape_cast %32 : vector<14x17xf32> to vector<1x14x17xf32>
    tpu.vector_store %arg4[%c0_11, %c0_12, %c0_13], %35 {strides = array<i32>} : memref<2x14x17xf32, #tpu.memory_space<vmem>>, vector<1x14x17xf32>,
    %36 = arith.truncf %21 : vector<14x17xf32> to vector<14x17xbf16>
    %cst_14 = arith.constant dense<0.000000e+00> : vector<14x17xf32>
    %37 = tpu.matmul %36, %22, %cst_14 {dimension_numbers = #tpu.dot_dimension_numbers<[1], [0], [0], [1], [0, 0, 1, 1], [], []>} : vector<14x17xbf16>, vector<17x17xbf16>, vector<14x17xf32> -> vector<14x17xf32>
    %38 = vector.broadcast %23 : vector<1x17xf32> to vector<14x17xf32>
    %39 = arith.addf %37, %38 : vector<14x17xf32>
    %40 = arith.negf %39 : vector<14x17xf32>
    %41 = math.exp %40 : vector<14x17xf32>
    %cst_15 = arith.constant 1.000000e+00 : f32
    %42 = vector.broadcast %cst_15 : f32 to vector<14x17xf32>
    %43 = arith.addf %42, %41 : vector<14x17xf32>
    %44 = arith.divf %42, %43 : vector<14x17xf32>
    %c1_16 = arith.constant 1 : index
    %c0_17 = arith.constant 0 : index
    %c0_18 = arith.constant 0 : index
    %45 = vector.load %arg4[%c1_16, %c0_17, %c0_18] : memref<2x14x17xf32, #tpu.memory_space<vmem>>, vector<1x14x17xf32>
    %46 = vector.shape_cast %45 : vector<1x14x17xf32> to vector<14x17xf32>
    %47 = vector.shape_cast %44 : vector<14x17xf32> to vector<1x14x17xf32>
    tpu.vector_store %arg4[%c1_16, %c0_17, %c0_18], %47 {strides = array<i32>} : memref<2x14x17xf32, #tpu.memory_space<vmem>>, vector<1x14x17xf32>,
    return
  }
}

module attributes {stable_mosaic.version = 11 : i64} {
  func.func @_mask_apply_kernel(%arg0: memref<2x10x119xf32, #tpu.memory_space<vmem>>, %arg1: memref<1x10x1xf32, #tpu.memory_space<vmem>>, %arg2: memref<2x2x119xf32, #tpu.memory_space<vmem>>, %arg3: memref<2x2x119xf32, #tpu.memory_space<vmem>>) attributes {dimension_semantics = [], scalar_prefetch = 0 : i64, scratch_operands = 0 : i64, tpu.core_type = #tpu.core_type<tc>} {
    %c0 = arith.constant 0 : index
    %c0_0 = arith.constant 0 : index
    %c0_1 = arith.constant 0 : index
    %0 = vector.load %arg0[%c0, %c0_0, %c0_1] : memref<2x10x119xf32, #tpu.memory_space<vmem>>, vector<2x10x119xf32>
    %c0_2 = arith.constant 0 : index
    %c0_3 = arith.constant 0 : index
    %c0_4 = arith.constant 0 : index
    %1 = vector.load %arg1[%c0_2, %c0_3, %c0_4] : memref<1x10x1xf32, #tpu.memory_space<vmem>>, vector<1x10x1xf32>
    %2 = vector.broadcast %1 : vector<1x10x1xf32> to vector<2x10x119xf32>
    %3 = arith.mulf %0, %2 : vector<2x10x119xf32>
    %4 = vector.extract_strided_slice %3 {offsets = [0, 0, 0], sizes = [2, 5, 119], strides = [1, 1, 1]} : vector<2x10x119xf32> to vector<2x5x119xf32>
    %cst = arith.constant dense<0.000000e+00> : vector<2x119xf32>
    %5 = vector.multi_reduction <add>, %4, %cst [1] : vector<2x5x119xf32> to vector<2x119xf32>
    %6 = vector.extract_strided_slice %3 {offsets = [0, 5, 0], sizes = [2, 5, 119], strides = [1, 1, 1]} : vector<2x10x119xf32> to vector<2x5x119xf32>
    %cst_5 = arith.constant dense<0.000000e+00> : vector<2x119xf32>
    %7 = vector.multi_reduction <add>, %6, %cst_5 [1] : vector<2x5x119xf32> to vector<2x119xf32>
    %c0_6 = arith.constant 0 : index
    %c0_7 = arith.constant 0 : index
    %c0_8 = arith.constant 0 : index
    %8 = vector.load %arg2[%c0_6, %c0_7, %c0_8] : memref<2x2x119xf32, #tpu.memory_space<vmem>>, vector<2x1x119xf32>
    %9 = vector.shape_cast %8 : vector<2x1x119xf32> to vector<2x119xf32>
    %c0_9 = arith.constant 0 : index
    %c1 = arith.constant 1 : index
    %c0_10 = arith.constant 0 : index
    %10 = vector.load %arg2[%c0_9, %c1, %c0_10] : memref<2x2x119xf32, #tpu.memory_space<vmem>>, vector<2x1x119xf32>
    %11 = vector.shape_cast %10 : vector<2x1x119xf32> to vector<2x119xf32>
    %12 = arith.mulf %9, %5 : vector<2x119xf32>
    %13 = arith.mulf %11, %7 : vector<2x119xf32>
    %14 = arith.subf %12, %13 : vector<2x119xf32>
    %15 = arith.mulf %9, %7 : vector<2x119xf32>
    %16 = arith.mulf %11, %5 : vector<2x119xf32>
    %17 = arith.addf %15, %16 : vector<2x119xf32>
    %18 = vector.shape_cast %14 : vector<2x119xf32> to vector<2x1x119xf32>
    %19 = vector.shape_cast %17 : vector<2x119xf32> to vector<2x1x119xf32>
    %20 = tpu.concatenate %18, %19 in 1 : vector<2x1x119xf32>, vector<2x1x119xf32> -> vector<2x2x119xf32>
    %c0_11 = arith.constant 0 : index
    %c0_12 = arith.constant 0 : index
    %c0_13 = arith.constant 0 : index
    %21 = vector.load %arg3[%c0_11, %c0_12, %c0_13] : memref<2x2x119xf32, #tpu.memory_space<vmem>>, vector<2x2x119xf32>
    tpu.vector_store %arg3[%c0_11, %c0_12, %c0_13], %20 {strides = array<i32>} : memref<2x2x119xf32, #tpu.memory_space<vmem>>, vector<2x2x119xf32>,
    return
  }
}

module attributes {stable_mosaic.version = 11 : i64} {
  func.func @_idft_win_kernel(%arg0: memref<14x34xf32, #tpu.memory_space<vmem>>, %arg1: memref<34x32xf32, #tpu.memory_space<vmem>>, %arg2: memref<1x32xf32, #tpu.memory_space<vmem>>, %arg3: memref<14x32xf32, #tpu.memory_space<vmem>>) attributes {dimension_semantics = [], scalar_prefetch = 0 : i64, scratch_operands = 0 : i64, tpu.core_type = #tpu.core_type<tc>} {
    %c0 = arith.constant 0 : index
    %c0_0 = arith.constant 0 : index
    %0 = vector.load %arg0[%c0, %c0_0] : memref<14x34xf32, #tpu.memory_space<vmem>>, vector<14x34xf32>
    %c0_1 = arith.constant 0 : index
    %c0_2 = arith.constant 0 : index
    %1 = vector.load %arg1[%c0_1, %c0_2] : memref<34x32xf32, #tpu.memory_space<vmem>>, vector<34x32xf32>
    %cst = arith.constant dense<0.000000e+00> : vector<14x32xf32>
    %2 = tpu.matmul %0, %1, %cst {dimension_numbers = #tpu.dot_dimension_numbers<[1], [0], [0], [1], [0, 0, 1, 1], [], []>} : vector<14x34xf32>, vector<34x32xf32>, vector<14x32xf32> -> vector<14x32xf32>
    %c0_3 = arith.constant 0 : index
    %c0_4 = arith.constant 0 : index
    %3 = vector.load %arg2[%c0_3, %c0_4] : memref<1x32xf32, #tpu.memory_space<vmem>>, vector<1x32xf32>
    %4 = vector.broadcast %3 : vector<1x32xf32> to vector<14x32xf32>
    %5 = arith.mulf %2, %4 : vector<14x32xf32>
    %c0_5 = arith.constant 0 : index
    %c0_6 = arith.constant 0 : index
    %6 = vector.load %arg3[%c0_5, %c0_6] : memref<14x32xf32, #tpu.memory_space<vmem>>, vector<14x32xf32>
    tpu.vector_store %arg3[%c0_5, %c0_6], %5 {strides = array<i32>} : memref<14x32xf32, #tpu.memory_space<vmem>>, vector<14x32xf32>,
    return
  }
}

</mosaic_0001>

<bundles_post_ra>
// kernel: forward.24
= control target key start
LH: loop header
LB: loop body
LE: loop exit
PB: predicated region body
PF: predicated region fallthrough
CT: control target
= control target key end

     0   :  { %vm33_vm0 = vcmask 261120   ;;  %vm131_vm1 = vcmask 277504   ;;  %vm135_vm2 = vcmask 273408   ;;  %s239_s2 = inlined_call_operand.vmem [shape: f32[32,34], index: 2, kind: input, shape index: {}]   ;;  %s240_s0 = inlined_call_operand.vmem [shape: f32[28,32], index: 0, kind: input, shape index: {}]   ;;  %s241_s1 = inlined_call_operand.vmem [shape: f32[1,32], index: 1, kind: input, shape index: {}]   ;;  %s242_s3 = inlined_call_operand.vmem [shape: f32[28,34], index: 3, kind: output, shape index: {}]  }
   0x1   :  { %v29_v0 = vld [vmem:[%s239_s2] sm:$0xff]  ;;  %v30_v1 = vld [vmem:[%s239_s2 + $0x8] sm:$0xff]  ;;  %v31_v2 = vld [vmem:[%s239_s2 + $0x10] sm:$0xff] }
   0x2   :  { %v168_v3 = vpack.c.bf16 %v30_v1, %v29_v0  ;;  %v32_v4 = vld [vmem:[%s239_s2 + $0x18] sm:$0xff]  ;;  %v14_v5 = vld [vmem:[%s240_s0] sm:$0xff]  ;;  %v16_v9 = vld [vmem:[%s240_s0 + $0x10] sm:$0xff] }
   0x3   :  { %v141_v6 = vld [vmem:[%s241_s1] ss:$0 sm:$0xff]  ;;  %v172_v7 = vpack.c.bf16 %v32_v4, %v31_v2  ;;  %v15_v11 = vld [vmem:[%s240_s0 + $0x8] sm:$0xff]  ;;  %v17_v12 = vld [vmem:[%s240_s0 + $0x18] sm:$0xf] }
   0x4   :  { %v25_v8 = vmul.f32 %v141_v6, %v14_v5  ;;  %169 = vmatprep.subr.bf16.mxu0 %v168_v3  ;;  %176 = vmatprep.subr.bf16.mxu1 %v168_v3  ;;  %v27_v10 = vmul.f32 %v141_v6, %v16_v9  ;;  %v26_v13 = vmul.f32 %v141_v6, %v15_v11 }
   0x5   :  { %171 = vmatpush3.bf16.msra.mxu0 %v168_v3  ;;  %178 = vmatpush3.bf16.msra.mxu1 %v168_v3  ;;  %v28_v14 = vmul.f32 %v141_v6, %v17_v12 }
   0x6   :  { %173 = vmatprep.subr.bf16.mxu0 %v172_v7  ;;  %177 = vmatprep.subr.bf16.mxu1 %v172_v7 }
   0x7   :  { %162 = vmatprep.mubr.msk.f32.mxu0 %vm33_vm0, %v25_v8  ;;  %165 = vmatprep.mubr.msk.f32.mxu1 %vm33_vm0, %v27_v10 }
   0x9   :  { %175 = vmatpush3.bf16.msra.mxu0 %v172_v7  ;;  %179 = vmatpush3.bf16.msra.mxu1 %v172_v7 }
   0xc   :  { %163 = vmatmul.mubr.msk.f32.vlgmr.msra.gmra.mrb[0].mxu0 %vm33_vm0, %v26_v13  ;;  %166 = vmatmul.mubr.msk.f32.vlgmr.msra.gmra.mrb[0].mxu1 %vm33_vm0, %v28_v14 }
  0xdf   :  { %v164_v15 = vpop.f32.mrb[0].mxu0  ;;  %v167_v16 = vpop.f32.mrb[0].mxu1 }
  0xe0   :  { %133 = vst.msk [vmem:[%s242_s3 + $0x8] sm:$0xff] %vm131_vm1, %v164_v15  ;;  %v112_v17 = vpop.f32.mrb[1].mxu0  ;;  %v122_v18 = vpop.f32.mrb[1].mxu1 }
  0xe1   :  { %136 = vst.msk [vmem:[%s242_s3 + $0x18] sm:$0xf] %vm135_vm2, %v167_v16 }
  0xe2   :  { %132 = vst.msk [vmem:[%s242_s3] sm:$0xff] %vm131_vm1, %v112_v17  ;;  %134 = vst.msk [vmem:[%s242_s3 + $0x10] sm:$0xff] %vm131_vm1, %v122_v18 }

// kernel: forward.25
= control target key start
LH: loop header
LB: loop body
LE: loop exit
PB: predicated region body
PF: predicated region fallthrough
CT: control target
= control target key end

     0   :  { %vm170_vm0 = vcmask 1014784   ;;  %vm174_vm1 = vcmask 1045504   ;;  %vm219_vm2 = vcmask 588800   ;;  %vm223_vm3 = vcmask 586752   ;;  %s461_s1 = inlined_call_operand.vmem [shape: bf16[252,72], index: 1, kind: input, shape index: {}]   ;;  %s462_s0 = inlined_call_operand.vmem [shape: bf16[14,252], index: 0, kind: input, shape index: {}]   ;;  %s463_s2 = inlined_call_operand.vmem [shape: f32[1,72], index: 2, kind: input, shape index: {}, may-alias: {2,4}]   ;;  %s464_s3 = inlined_call_operand.vmem [shape: f32[1,72], index: 3, kind: input, shape index: {}]   ;;  %s465_s4 = inlined_call_operand.vmem [shape: f32[1,72], index: 4, kind: input, shape index: {}, may-alias: {2,4}]   ;;  %s466_s5 = inlined_call_operand.<no memory space> [shape: f32[1], index: 5, kind: input, shape index: {}]   ;;  %s467_s6 = inlined_call_operand.vmem [shape: f32[14,72], index: 6, kind: output, shape index: {}]  }
   0x1   :  { %v325_v0 = vld [vmem:[%s461_s1 + $0x40] sm:$0xff]   ;;  %v327_v2 = vld [vmem:[%s461_s1 + $0x48] sm:$0xff]   ;;  %v329_v4 = vld [vmem:[%s461_s1 + $0x50] sm:$0xff]   ;;  %v269_v51 = vstv %s466_s5 }
   0x2   :  { %v326_v1 = vld [vmem:[%s461_s1] sm:$0xff]   ;;  %302 = vmatprep.subr.bf16.mxu0 %v325_v0  ;;  %v328_v3 = vld [vmem:[%s461_s1 + $0x8] sm:$0xff]   ;;  %v330_v5 = vld [vmem:[%s461_s1 + $0x10] sm:$0xff]  }
   0x3   :  { %303 = vmatpush3.bf16.msra.mxu0 %v326_v1  ;;  %v331_v6 = vld [vmem:[%s461_s1 + $0x58] sm:$0xff]   ;;  %v333_v8 = vld [vmem:[%s461_s1 + $0x60] sm:$0xff]   ;;  %v335_v10 = vld [vmem:[%s461_s1 + $0x68] sm:$0xff]  }
   0x4   :  { %304 = vmatprep.subr.bf16.mxu0 %v327_v2  ;;  %v332_v7 = vld [vmem:[%s461_s1 + $0x18] sm:$0xff]   ;;  %v334_v9 = vld [vmem:[%s461_s1 + $0x20] sm:$0xff]   ;;  %v336_v12 = vld [vmem:[%s461_s1 + $0x28] sm:$0xff]  }
   0x5   :  { %v343_v11 = vld [vmem:[%s462_s0 + $0x4] ss:$8 sps:$4 sm:$0x7f]   ;;  %v337_v13 = vld [vmem:[%s461_s1 + $0x70] sm:$0xff]   ;;  %v339_v15 = vld [vmem:[%s461_s1 + $0x78] sm:$0x3f]  }
   0x6   :  { %299 = vmatprep.mubr.msk.bf16.mxu0 %vm170_vm0, %v343_v11  ;;  %v338_v14 = vld [vmem:[%s461_s1 + $0x30] sm:$0xff]   ;;  %v340_v16 = vld [vmem:[%s461_s1 + $0x38] sm:$0xff]   ;;  %v341_v17 = vld [vmem:[%s462_s0] ss:$8 sps:$4 sm:$0x7f]  }
   0x7   :  { %305 = vmatpush3.bf16.msra.mxu0 %v328_v3  ;;  %v280_v20 = vld [vmem:[%s463_s2] ss:$0 sm:$0xff] }
   0x8   :  { %306 = vmatprep.subr.bf16.mxu0 %v329_v4  ;;  %v300_v46 = vld [vmem:[%s464_s3] ss:$0 sm:$0xff] }
   0x9   :  { %v301_v48 = vld [vmem:[%s465_s4] ss:$0 sm:$0xff] }
   0xb   :  { %307 = vmatpush3.bf16.msra.mxu0 %v330_v5 }
   0xc   :  { %308 = vmatprep.subr.bf16.mxu0 %v331_v6 }
   0xf   :  { %309 = vmatpush3.bf16.msra.mxu0 %v332_v7 }
  0x10   :  { %310 = vmatprep.subr.bf16.mxu0 %v333_v8 }
  0x13   :  { %311 = vmatpush3.bf16.msra.mxu0 %v334_v9 }
  0x14   :  { %312 = vmatprep.subr.bf16.mxu0 %v335_v10 }
  0x17   :  { %313 = vmatpush3.bf16.msra.mxu0 %v336_v12 }
  0x18   :  { %314 = vmatprep.subr.bf16.mxu0 %v337_v13 }
  0x1b   :  { %315 = vmatpush3.bf16.msra.mxu0 %v338_v14 }
  0x1c   :  { %324 = vmatprep.subr.msk.bf16.mxu0 %vm174_vm1, %v339_v15 }
  0x1f   :  { %317 = vmatpush3.bf16.msra.mxu0 %v340_v16 }
  0x22   :  { %211 = vmatmul.mubr.bf16.vlgmr.msra.gmra.mrb[0].mxu0 %v341_v17 }
  0xf5   :  { %v318_v18 = vpop.f32.mrb[0].mxu0 }
  0xf6   :  { %v319_v19 = vpop.f32.mrb[1].mxu0 }
  0xf7   :  { %v320_v21 = vadd.f32 %v319_v19, %v318_v18  ;;  %v321_v22 = vpop.f32.mrb[2].mxu0 }
  0xf8   :  { %v322_v23 = vpop.f32.mrb[3].mxu0 }
  0xf9   :  { %v323_v24 = vadd.f32 %v322_v23, %v321_v22  ;;  %v213_v25 = vadd.f32 %v320_v21, %v280_v20 }
  0xfb   :  { %v220_v26 = vsel %vm219_vm2, %v213_v25, 0.0  ;;  %v216_v27 = vadd.f32 %v323_v24, %v280_v20 }
  0xfc   :  { %221 = vadd.xlane.f32.xlu0 %v220_v26 }
  0xfd   :  { %v224_v28 = vsel %vm223_vm3, %v216_v27, 0.0 }
 0x100   :  { %225 = vadd.xlane.f32.xlu0 %v224_v28 }
 0x189   :  { %v222_v29 = vpop.xlane.xlu0 %221 }
 0x18a   :  { %v228_v30 = vmul.f32 0.013888889, %v222_v29 }
 0x18c   :  { %v230_v31 = vsub.f32 %v213_v25, %v228_v30 }
 0x18d   :  { %v226_v32 = vpop.xlane.xlu0 %225 }
 0x18e   :  { %v229_v33 = vmul.f32 0.013888889, %v226_v32  ;;  %v232_v34 = vmul.f32 %v230_v31, %v230_v31 }
 0x190   :  { %v231_v35 = vsub.f32 %v216_v27, %v229_v33  ;;  %v234_v36 = vsel %vm219_vm2, %v232_v34, 0.0 }
 0x191   :  { %235 = vadd.xlane.f32.xlu1 %v234_v36 }
 0x192   :  { %v233_v37 = vmul.f32 %v231_v35, %v231_v35 }
 0x194   :  { %v237_v38 = vsel %vm223_vm3, %v233_v37, 0.0 }
 0x195   :  { %238 = vadd.xlane.f32.xlu1 %v237_v38 }
 0x21e   :  { %v236_v39 = vpop.xlane.xlu1 %235 }
 0x21f   :  { %v240_v40 = vmul.f32 0.013888889, %v236_v39 }
 0x221   :  { %v242_v41 = vadd.f32 1e-08, %v240_v40 }
 0x222   :  { %v239_v42 = vpop.xlane.xlu1 %238 }
 0x223   :  { %344 = vrsqrt.f32 %v242_v41  ;;  %v241_v43 = vmul.f32 0.013888889, %v239_v42 }
 0x225   :  { %v243_v44 = vadd.f32 1e-08, %v241_v43 }
 0x227   :  { %346 = vrsqrt.f32 %v243_v44 }
 0x22d   :  { %v345_v45 = vpop.eup %344 }
 0x22e   :  { %v246_v47 = vmul.f32 %v345_v45, %v230_v31 }
 0x230   :  { %v255_v49 = vmul.f32 %v300_v46, %v246_v47 }
 0x231   :  { %v347_v50 = vpop.eup %346 }
 0x232   :  { %v264_v52 = vadd.f32 %v301_v48, %v255_v49  ;;  %v247_v53 = vmul.f32 %v347_v50, %v231_v35 }
 0x234   :  { %vm267_vm4 = vcmp.ge.f32.partialorder %v264_v52, 0.0  ;;  %v270_v54 = vmul.f32 %v269_v51, %v264_v52  ;;  %v256_v55 = vmul.f32 %v300_v46, %v247_v53 }
 0x236   :  { %v272_v56 = vsel %vm267_vm4, %v264_v52, %v270_v54  ;;  %v265_v57 = vadd.f32 %v301_v48, %v256_v55 }
 0x237   :  { %274 = vst.msk [vmem:[%s467_s6] sm:$0xff] %vm219_vm2, %v272_v56 }
 0x238   :  { %vm268_vm5 = vcmp.ge.f32.partialorder %v265_v57, 0.0  ;;  %v271_v58 = vmul.f32 %v269_v51, %v265_v57 }
 0x23a   :  { %v273_v59 = vsel %vm268_vm5, %v265_v57, %v271_v58 }
 0x23b   :  { %275 = vst.msk [vmem:[%s467_s6 + $0x8] sm:$0x3f] %vm223_vm3, %v273_v59 }

// kernel: forward.26
= control target key start
LH: loop header
LB: loop body
LE: loop exit
PB: predicated region body
PF: predicated region fallthrough
CT: control target
= control target key end

     0   :  { %v454_v1 = vmov 0.0   ;;  %vm455_vm0 = vmmov 0   ;;  %vm211_vm1 = vcmask 1043456   ;;  %vm207_vm2 = vcmask 457728   ;;  %s584_s1 = inlined_call_operand.vmem [shape: bf16[312,40], index: 1, kind: input, shape index: {}]   ;;  %s585_s0 = inlined_call_operand.vmem [shape: bf16[14,312], index: 0, kind: input, shape index: {}]   ;;  %s586_s2 = inlined_call_operand.vmem [shape: f32[1,40], index: 2, kind: input, shape index: {}, may-alias: {2,4}]   ;;  %s587_s3 = inlined_call_operand.vmem [shape: f32[1,40], index: 3, kind: input, shape index: {}]   ;;  %s588_s4 = inlined_call_operand.vmem [shape: f32[1,40], index: 4, kind: input, shape index: {}, may-alias: {2,4}]   ;;  %s589_s5 = inlined_call_operand.<no memory space> [shape: f32[1], index: 5, kind: input, shape index: {}]   ;;  %s590_s6 = inlined_call_operand.vmem [shape: f32[14,40], index: 6, kind: output, shape index: {}]  }
   0x1   :  { %v426_v0 = vld [vmem:[%s584_s1 + $0x40] sm:$0xff]   ;;  %412 = vmatprep.subr.bf16.mxu1 %v454_v1  ;;  %420 = vmatprep.mubr.msk.bf16.mxu1 %vm455_vm0, %v454_v1  ;;  %v428_v3 = vld [vmem:[%s584_s1 + $0x48] sm:$0xff]   ;;  %v430_v5 = vld [vmem:[%s584_s1 + $0x50] sm:$0xff]   ;;  %vm297_vm3 = vcmask 326656   ;;  %vm301_vm4 = vcmask 324608  }
   0x2   :  { %v427_v2 = vld [vmem:[%s584_s1] sm:$0xff]   ;;  %385 = vmatprep.subr.bf16.mxu0 %v426_v0  ;;  %v429_v4 = vld [vmem:[%s584_s1 + $0x8] sm:$0xff]   ;;  %v431_v6 = vld [vmem:[%s584_s1 + $0x10] sm:$0xff]   ;;  %v347_v0 = vstv %s589_s5 }
   0x3   :  { %386 = vmatpush3.bf16.msra.mxu0 %v427_v2  ;;  %v432_v7 = vld [vmem:[%s584_s1 + $0x58] sm:$0xff]   ;;  %v436_v8 = vld [vmem:[%s584_s1 + $0x80] sm:$0xff]   ;;  %v439_v11 = vld [vmem:[%s584_s1 + $0x88] sm:$0xff]  }
   0x4   :  { %387 = vmatprep.subr.bf16.mxu0 %v428_v3  ;;  %v433_v9 = vld [vmem:[%s584_s1 + $0x18] sm:$0xff]   ;;  %v434_v10 = vld [vmem:[%s584_s1 + $0x60] sm:$0xff]   ;;  %413 = vmatpush3.bf16.msra.mxu1 %v436_v8  ;;  %v437_v13 = vld [vmem:[%s584_s1 + $0x68] sm:$0xff]  }
   0x5   :  { %414 = vmatprep.subr.bf16.mxu1 %v454_v1  ;;  %v435_v12 = vld [vmem:[%s584_s1 + $0x20] sm:$0xff]   ;;  %v442_v14 = vld [vmem:[%s584_s1 + $0x90] sm:$0xff]   ;;  %v438_v15 = vld [vmem:[%s584_s1 + $0x28] sm:$0xff]  }
   0x6   :  { %v440_v16 = vld [vmem:[%s584_s1 + $0x70] sm:$0xff]   ;;  %v448_v18 = vld [vmem:[%s584_s1 + $0x98] ss:$0 sps:$4 sm:$0xff]   ;;  %v445_v24 = vld [vmem:[%s585_s0] ss:$12 sps:$4 sm:$0x7f]  }
   0x7   :  { %388 = vmatpush3.bf16.msra.mxu0 %v429_v4  ;;  %v447_v17 = vld [vmem:[%s585_s0 + $0x4] ss:$12 sps:$4 sm:$0x7f]   ;;  %v213_v20 = vsel %vm211_vm1, %v448_v18, 0  ;;  %v443_v22 = vld [vmem:[%s584_s1 + $0x78] sm:$0xff]  }
   0x8   :  { %389 = vmatprep.subr.bf16.mxu0 %v430_v5  ;;  %415 = vmatpush3.bf16.msra.mxu1 %v439_v11  ;;  %v441_v19 = vld [vmem:[%s584_s1 + $0x30] sm:$0xff]   ;;  %v444_v23 = vld [vmem:[%s584_s1 + $0x38] sm:$0xff]   ;;  %v358_v31 = vld [vmem:[%s586_s2] ss:$0 sm:$0xff] }
   0x9   :  { %416 = vmatprep.subr.bf16.mxu1 %v454_v1  ;;  %247 = vmatprep.mubr.bf16.mxu0 %v447_v17  ;;  %v449_v21 = vld [vmem:[%s585_s0 + $0x8] ss:$12 sps:$4 sm:$0x7f]   ;;  %v383_v59 = vld [vmem:[%s587_s3] ss:$0 sm:$0xff] }
   0xa   :  { %v384_v61 = vld [vmem:[%s588_s4] ss:$0 sm:$0xff] }
   0xb   :  { %390 = vmatpush3.bf16.msra.mxu0 %v431_v6 }
   0xc   :  { %391 = vmatprep.subr.bf16.mxu0 %v432_v7  ;;  %417 = vmatpush3.bf16.msra.mxu1 %v442_v14 }
   0xd   :  { %418 = vmatprep.subr.bf16.mxu1 %v454_v1 }
   0xf   :  { %392 = vmatpush3.bf16.msra.mxu0 %v433_v9 }
  0x10   :  { %393 = vmatprep.subr.bf16.mxu0 %v434_v10  ;;  %419 = vmatpush3.bf16.msra.mxu1 %v213_v20 }
  0x13   :  { %394 = vmatpush3.bf16.msra.mxu0 %v435_v12  ;;  %421 = vmatmul.mubr.msk.bf16.vlgmr.msra.gmra.mrb[0].mxu1 %vm207_vm2, %v449_v21 }
  0x14   :  { %395 = vmatprep.subr.bf16.mxu0 %v437_v13 }
  0x17   :  { %396 = vmatpush3.bf16.msra.mxu0 %v438_v15 }
  0x18   :  { %397 = vmatprep.subr.bf16.mxu0 %v440_v16 }
  0x1b   :  { %398 = vmatpush3.bf16.msra.mxu0 %v441_v19 }
  0x1c   :  { %399 = vmatprep.subr.bf16.mxu0 %v443_v22 }
  0x1f   :  { %400 = vmatpush3.bf16.msra.mxu0 %v444_v23 }
  0x22   :  { %248 = vmatmul.mubr.bf16.vlgmr.msra.gmra.mrb[0].mxu0 %v445_v24 }
  0xe6   :  { %v290_v25 = vpop.f32.mrb[0].mxu1 }
  0xe7   :  { %v422_v26 = vpop.f32.mrb[1].mxu1 }
  0xe8   :  { %v293_v27 = vpop.f32.mrb[2].mxu1 }
  0xe9   :  { %v423_v28 = vpop.f32.mrb[3].mxu1 }
  0xf5   :  { %v401_v29 = vpop.f32.mrb[0].mxu0 }
  0xf6   :  { %v402_v30 = vpop.f32.mrb[1].mxu0 }
  0xf7   :  { %v403_v32 = vadd.f32 %v402_v30, %v401_v29  ;;  %v404_v33 = vpop.f32.mrb[2].mxu0 }
  0xf8   :  { %v405_v34 = vpop.f32.mrb[3].mxu0 }
  0xf9   :  { %v250_v35 = vadd.f32 %v403_v32, %v358_v31  ;;  %v406_v36 = vadd.f32 %v405_v34, %v404_v33 }
  0xfb   :  { %v291_v37 = vadd.f32 %v290_v25, %v250_v35  ;;  %v253_v38 = vadd.f32 %v406_v36, %v358_v31 }
  0xfd   :  { %v294_v39 = vadd.f32 %v293_v27, %v253_v38  ;;  %v298_v40 = vsel %vm297_vm3, %v291_v37, 0.0 }
  0xfe   :  { %299 = vadd.xlane.f32.xlu0 %v298_v40 }
  0xff   :  { %v302_v41 = vsel %vm301_vm4, %v294_v39, 0.0 }
 0x102   :  { %303 = vadd.xlane.f32.xlu0 %v302_v41 }
 0x18b   :  { %v300_v42 = vpop.xlane.xlu0 %299 }
 0x18c   :  { %v306_v43 = vmul.f32 0.025, %v300_v42 }
 0x18e   :  { %v308_v44 = vsub.f32 %v291_v37, %v306_v43 }
 0x18f   :  { %v304_v45 = vpop.xlane.xlu0 %303 }
 0x190   :  { %v307_v46 = vmul.f32 0.025, %v304_v45  ;;  %v310_v47 = vmul.f32 %v308_v44, %v308_v44 }
 0x192   :  { %v309_v48 = vsub.f32 %v294_v39, %v307_v46  ;;  %v312_v49 = vsel %vm297_vm3, %v310_v47, 0.0 }
 0x193   :  { %313 = vadd.xlane.f32.xlu1 %v312_v49 }
 0x194   :  { %v311_v50 = vmul.f32 %v309_v48, %v309_v48 }
 0x196   :  { %v315_v51 = vsel %vm301_vm4, %v311_v50, 0.0 }
 0x197   :  { %316 = vadd.xlane.f32.xlu1 %v315_v51 }
 0x220   :  { %v314_v52 = vpop.xlane.xlu1 %313 }
 0x221   :  { %v318_v53 = vmul.f32 0.025, %v314_v52 }
 0x223   :  { %v320_v54 = vadd.f32 1e-08, %v318_v53 }
 0x224   :  { %v317_v55 = vpop.xlane.xlu1 %316 }
 0x225   :  { %450 = vrsqrt.f32 %v320_v54  ;;  %v319_v56 = vmul.f32 0.025, %v317_v55 }
 0x227   :  { %v321_v57 = vadd.f32 1e-08, %v319_v56 }
 0x229   :  { %452 = vrsqrt.f32 %v321_v57 }
 0x22f   :  { %v451_v58 = vpop.eup %450 }
 0x230   :  { %v324_v60 = vmul.f32 %v451_v58, %v308_v44 }
 0x232   :  { %v333_v62 = vmul.f32 %v383_v59, %v324_v60 }
 0x233   :  { %v453_v63 = vpop.eup %452 }
 0x234   :  { %v342_v1 = vadd.f32 %v384_v61, %v333_v62  ;;  %v325_v2 = vmul.f32 %v453_v63, %v309_v48 }
 0x236   :  { %vm345_vm5 = vcmp.ge.f32.partialorder %v342_v1, 0.0  ;;  %v348_v3 = vmul.f32 %v347_v0, %v342_v1  ;;  %v334_v4 = vmul.f32 %v383_v59, %v325_v2 }
 0x238   :  { %v350_v5 = vsel %vm345_vm5, %v342_v1, %v348_v3  ;;  %v343_v6 = vadd.f32 %v384_v61, %v334_v4 }
 0x239   :  { %352 = vst.msk [vmem:[%s590_s6] sm:$0xff] %vm297_vm3, %v350_v5 }
 0x23a   :  { %vm346_vm6 = vcmp.ge.f32.partialorder %v343_v6, 0.0  ;;  %v349_v7 = vmul.f32 %v347_v0, %v343_v6 }
 0x23c   :  { %v351_v8 = vsel %vm346_vm6, %v343_v6, %v349_v7 }
 0x23d   :  { %353 = vst.msk [vmem:[%s590_s6 + $0x8] sm:$0x3f] %vm301_vm4, %v351_v8 }

// kernel: forward.27
= control target key start
LH: loop header
LB: loop body
LE: loop exit
PB: predicated region body
PF: predicated region fallthrough
CT: control target
= control target key end

     0   :  { %v303_v0 = vmov 0   ;;  %vm151_vm0 = vcmask 719872   ;;  %vm155_vm1 = vcmask 1043456   ;;  %vm200_vm2 = vcmask 392192   ;;  %s411_s1 = inlined_call_operand.vmem [shape: bf16[216,48], index: 1, kind: input, shape index: {}]   ;;  %s412_s0 = inlined_call_operand.vmem [shape: bf16[14,216], index: 0, kind: input, shape index: {}]   ;;  %s413_s2 = inlined_call_operand.vmem [shape: f32[1,48], index: 2, kind: input, shape index: {}, may-alias: {2,4}]   ;;  %s414_s3 = inlined_call_operand.vmem [shape: f32[1,48], index: 3, kind: input, shape index: {}]   ;;  %s415_s4 = inlined_call_operand.vmem [shape: f32[1,48], index: 4, kind: input, shape index: {}, may-alias: {2,4}]   ;;  %s416_s5 = inlined_call_operand.<no memory space> [shape: f32[1], index: 5, kind: input, shape index: {}]   ;;  %s417_s6 = inlined_call_operand.vmem [shape: f32[14,48], index: 6, kind: output, shape index: {}]  }
   0x1   :  { %159 = vmatprep.subr.bf16.mxu0 %v303_v0  ;;  %v282_v1 = vld [vmem:[%s411_s1] sm:$0xff]   ;;  %v283_v2 = vld [vmem:[%s411_s1 + $0x8] sm:$0xff]   ;;  %v284_v3 = vld [vmem:[%s411_s1 + $0x10] sm:$0xff]   ;;  %vm204_vm3 = vcmask 390144   ;;  %v250_v49 = vstv %s416_s5 }
   0x2   :  { %160 = vmatpush1.bf16.msra.mxu0 %v282_v1  ;;  %v285_v4 = vld [vmem:[%s411_s1 + $0x18] sm:$0xff]   ;;  %v286_v5 = vld [vmem:[%s411_s1 + $0x20] sm:$0xff]   ;;  %v287_v7 = vld [vmem:[%s411_s1 + $0x28] sm:$0xff]  }
   0x3   :  { %161 = vmatprep.subr.bf16.mxu0 %v303_v0  ;;  %v298_v6 = vld [vmem:[%s412_s0 + $0x4] ss:$8 sps:$4 sm:$0x7f]   ;;  %v288_v8 = vld [vmem:[%s411_s1 + $0x30] sm:$0xff]   ;;  %v289_v9 = vld [vmem:[%s411_s1 + $0x38] sm:$0xff]  }
   0x4   :  { %278 = vmatprep.mubr.msk.bf16.mxu0 %vm151_vm0, %v298_v6  ;;  %v290_v10 = vld [vmem:[%s411_s1 + $0x40] sm:$0xff]   ;;  %v291_v11 = vld [vmem:[%s411_s1 + $0x48] sm:$0xff]   ;;  %v292_v12 = vld [vmem:[%s411_s1 + $0x50] sm:$0xff]  }
   0x5   :  { %v293_v13 = vld [vmem:[%s411_s1 + $0x58] sm:$0xff]   ;;  %v294_v14 = vld [vmem:[%s411_s1 + $0x60] sm:$0xff]   ;;  %v295_v15 = vld [vmem:[%s411_s1 + $0x68] ss:$0 sps:$4 sm:$0xff]  }
   0x6   :  { %162 = vmatpush1.bf16.msra.mxu0 %v283_v2  ;;  %v157_v16 = vsel %vm155_vm1, %v295_v15, 0  ;;  %v296_v17 = vld [vmem:[%s412_s0] ss:$8 sps:$4 sm:$0x7f]  }
   0x7   :  { %163 = vmatprep.subr.bf16.mxu0 %v303_v0  ;;  %v261_v18 = vld [vmem:[%s413_s2] ss:$0 sm:$0xff] }
   0x8   :  { %v279_v44 = vld [vmem:[%s414_s3] ss:$0 sm:$0xff] }
   0x9   :  { %v280_v46 = vld [vmem:[%s415_s4] ss:$0 sm:$0xff] }
   0xa   :  { %164 = vmatpush1.bf16.msra.mxu0 %v284_v3 }
   0xb   :  { %165 = vmatprep.subr.bf16.mxu0 %v303_v0 }
   0xe   :  { %166 = vmatpush1.bf16.msra.mxu0 %v285_v4 }
   0xf   :  { %167 = vmatprep.subr.bf16.mxu0 %v303_v0 }
  0x12   :  { %168 = vmatpush1.bf16.msra.mxu0 %v286_v5 }
  0x13   :  { %169 = vmatprep.subr.bf16.mxu0 %v303_v0 }
  0x16   :  { %170 = vmatpush1.bf16.msra.mxu0 %v287_v7 }
  0x17   :  { %171 = vmatprep.subr.bf16.mxu0 %v303_v0 }
  0x1a   :  { %172 = vmatpush1.bf16.msra.mxu0 %v288_v8 }
  0x1b   :  { %173 = vmatprep.subr.bf16.mxu0 %v303_v0 }
  0x1e   :  { %174 = vmatpush1.bf16.msra.mxu0 %v289_v9 }
  0x1f   :  { %175 = vmatprep.subr.bf16.mxu0 %v303_v0 }
  0x22   :  { %176 = vmatpush1.bf16.msra.mxu0 %v290_v10 }
  0x23   :  { %177 = vmatprep.subr.bf16.mxu0 %v303_v0 }
  0x26   :  { %178 = vmatpush1.bf16.msra.mxu0 %v291_v11 }
  0x27   :  { %179 = vmatprep.subr.bf16.mxu0 %v303_v0 }
  0x2a   :  { %180 = vmatpush1.bf16.msra.mxu0 %v292_v12 }
  0x2b   :  { %181 = vmatprep.subr.bf16.mxu0 %v303_v0 }
  0x2e   :  { %182 = vmatpush1.bf16.msra.mxu0 %v293_v13 }
  0x2f   :  { %183 = vmatprep.subr.bf16.mxu0 %v303_v0 }
  0x32   :  { %184 = vmatpush1.bf16.msra.mxu0 %v294_v14 }
  0x33   :  { %185 = vmatprep.subr.bf16.mxu0 %v303_v0 }
  0x36   :  { %186 = vmatpush1.bf16.msra.mxu0 %v157_v16 }
  0x39   :  { %192 = vmatmul.mubr.bf16.vlgmr.msra.gmra.mrb[0].mxu0 %v296_v17 }
 0x10c   :  { %v193_v19 = vpop.f32.mrb[0].mxu0 }
 0x10d   :  { %v194_v20 = vadd.f32 %v261_v18, %v193_v19  ;;  %v195_v21 = vpop.f32.mrb[1].mxu0 }
 0x10e   :  { %v196_v22 = vpop.f32.mrb[2].mxu0 }
 0x10f   :  { %v197_v23 = vadd.f32 %v261_v18, %v196_v22  ;;  %v198_v24 = vpop.f32.mrb[3].mxu0  ;;  %v201_v25 = vsel %vm200_vm2, %v194_v20, 0.0 }
 0x110   :  { %202 = vadd.xlane.f32.xlu0 %v201_v25 }
 0x111   :  { %v205_v26 = vsel %vm204_vm3, %v197_v23, 0.0 }
 0x114   :  { %206 = vadd.xlane.f32.xlu0 %v205_v26 }
 0x19d   :  { %v203_v27 = vpop.xlane.xlu0 %202 }
 0x19e   :  { %v209_v28 = vmul.f32 0.020833334, %v203_v27 }
 0x1a0   :  { %v211_v29 = vsub.f32 %v194_v20, %v209_v28 }
 0x1a1   :  { %v207_v30 = vpop.xlane.xlu0 %206 }
 0x1a2   :  { %v210_v31 = vmul.f32 0.020833334, %v207_v30  ;;  %v213_v32 = vmul.f32 %v211_v29, %v211_v29 }
 0x1a4   :  { %v212_v33 = vsub.f32 %v197_v23, %v210_v31  ;;  %v215_v34 = vsel %vm200_vm2, %v213_v32, 0.0 }
 0x1a5   :  { %216 = vadd.xlane.f32.xlu1 %v215_v34 }
 0x1a6   :  { %v214_v35 = vmul.f32 %v212_v33, %v212_v33 }
 0x1a8   :  { %v218_v36 = vsel %vm204_vm3, %v214_v35, 0.0 }
 0x1a9   :  { %219 = vadd.xlane.f32.xlu1 %v218_v36 }
 0x232   :  { %v217_v37 = vpop.xlane.xlu1 %216 }
 0x233   :  { %v221_v38 = vmul.f32 0.020833334, %v217_v37 }
 0x235   :  { %v223_v39 = vadd.f32 1e-08, %v221_v38 }
 0x236   :  { %v220_v40 = vpop.xlane.xlu1 %219 }
 0x237   :  { %299 = vrsqrt.f32 %v223_v39  ;;  %v222_v41 = vmul.f32 0.020833334, %v220_v40 }
 0x239   :  { %v224_v42 = vadd.f32 1e-08, %v222_v41 }
 0x23b   :  { %301 = vrsqrt.f32 %v224_v42 }
 0x241   :  { %v300_v43 = vpop.eup %299 }
 0x242   :  { %v227_v45 = vmul.f32 %v300_v43, %v211_v29 }
 0x244   :  { %v236_v47 = vmul.f32 %v279_v44, %v227_v45 }
 0x245   :  { %v302_v48 = vpop.eup %301 }
 0x246   :  { %v245_v50 = vadd.f32 %v280_v46, %v236_v47  ;;  %v228_v51 = vmul.f32 %v302_v48, %v212_v33 }
 0x248   :  { %vm248_vm4 = vcmp.ge.f32.partialorder %v245_v50, 0.0  ;;  %v251_v52 = vmul.f32 %v250_v49, %v245_v50  ;;  %v237_v53 = vmul.f32 %v279_v44, %v228_v51 }
 0x24a   :  { %v253_v54 = vsel %vm248_vm4, %v245_v50, %v251_v52  ;;  %v246_v55 = vadd.f32 %v280_v46, %v237_v53 }
 0x24b   :  { %255 = vst.msk [vmem:[%s417_s6] sm:$0xff] %vm200_vm2, %v253_v54 }
 0x24c   :  { %vm249_vm5 = vcmp.ge.f32.partialorder %v246_v55, 0.0  ;;  %v252_v56 = vmul.f32 %v250_v49, %v246_v55 }
 0x24e   :  { %v254_v57 = vsel %vm249_vm5, %v246_v55, %v252_v56 }
 0x24f   :  { %256 = vst.msk [vmem:[%s417_s6 + $0x8] sm:$0x3f] %vm204_vm3, %v254_v57 }

// kernel: forward.28
= control target key start
LH: loop header
LB: loop body
LE: loop exit
PB: predicated region body
PF: predicated region fallthrough
CT: control target
= control target key end

     0   :  { %v467_v1 = vmov 0.0   ;;  %vm468_vm0 = vmmov 0   ;;  %vm219_vm1 = vcmask 654336   ;;  %vm305_vm2 = vcmask 261120   ;;  %s600_s1 = inlined_call_operand.vmem [shape: bf16[336,32], index: 1, kind: input, shape index: {}]   ;;  %s601_s0 = inlined_call_operand.vmem [shape: bf16[14,336], index: 0, kind: input, shape index: {}]   ;;  %s602_s2 = inlined_call_operand.vmem [shape: f32[1,32], index: 2, kind: input, shape index: {}, may-alias: {2,4}]   ;;  %s603_s3 = inlined_call_operand.vmem [shape: f32[1,32], index: 3, kind: input, shape index: {}]   ;;  %s604_s4 = inlined_call_operand.vmem [shape: f32[1,32], index: 4, kind: input, shape index: {}, may-alias: {2,4}]   ;;  %s605_s5 = inlined_call_operand.<no memory space> [shape: f32[1], index: 5, kind: input, shape index: {}]   ;;  %s606_s6 = inlined_call_operand.vmem [shape: f32[14,32], index: 6, kind: output, shape index: {}]  }
   0x1   :  { %v438_v0 = vld [vmem:[%s600_s1 + $0x40] sm:$0xff]   ;;  %422 = vmatprep.subr.bf16.mxu1 %v467_v1  ;;  %432 = vmatprep.mubr.msk.bf16.mxu1 %vm468_vm0, %v467_v1  ;;  %v440_v3 = vld [vmem:[%s600_s1 + $0x48] sm:$0xff]   ;;  %v442_v5 = vld [vmem:[%s600_s1 + $0x50] sm:$0xff]   ;;  %vm309_vm3 = vcmask 259072  }
   0x2   :  { %v439_v2 = vld [vmem:[%s600_s1] sm:$0xff]   ;;  %394 = vmatprep.subr.bf16.mxu0 %v438_v0  ;;  %v441_v4 = vld [vmem:[%s600_s1 + $0x8] sm:$0xff]   ;;  %v443_v6 = vld [vmem:[%s600_s1 + $0x10] sm:$0xff]   ;;  %v355_v0 = vstv %s605_s5 }
   0x3   :  { %395 = vmatpush3.bf16.msra.mxu0 %v439_v2  ;;  %v444_v7 = vld [vmem:[%s600_s1 + $0x58] sm:$0xff]   ;;  %v446_v8 = vld [vmem:[%s600_s1 + $0x80] sm:$0xff]   ;;  %v449_v10 = vld [vmem:[%s600_s1 + $0x88] sm:$0xff]  }
   0x4   :  { %396 = vmatprep.subr.bf16.mxu0 %v440_v3  ;;  %v445_v9 = vld [vmem:[%s600_s1 + $0x18] sm:$0xff]   ;;  %423 = vmatpush3.bf16.msra.mxu1 %v446_v8  ;;  %v447_v11 = vld [vmem:[%s600_s1 + $0x60] sm:$0xff]   ;;  %v452_v12 = vld [vmem:[%s600_s1 + $0x90] sm:$0xff]  }
   0x5   :  { %424 = vmatprep.subr.bf16.mxu1 %v467_v1  ;;  %v448_v13 = vld [vmem:[%s600_s1 + $0x20] sm:$0xff]   ;;  %v450_v14 = vld [vmem:[%s600_s1 + $0x68] sm:$0xff]   ;;  %v455_v15 = vld [vmem:[%s600_s1 + $0x98] sm:$0xff]  }
   0x6   :  { %v451_v16 = vld [vmem:[%s600_s1 + $0x28] sm:$0xff]   ;;  %v453_v17 = vld [vmem:[%s600_s1 + $0x70] sm:$0xff]   ;;  %v461_v19 = vld [vmem:[%s600_s1 + $0xa0] sm:$0xff]  }
   0x7   :  { %397 = vmatpush3.bf16.msra.mxu0 %v441_v4  ;;  %v460_v18 = vld [vmem:[%s601_s0 + $0x4] ss:$12 sps:$4 sm:$0x7f]   ;;  %v456_v21 = vld [vmem:[%s600_s1 + $0x78] sm:$0xff]   ;;  %v366_v31 = vld [vmem:[%s602_s2] ss:$0 sm:$0xff] }
   0x8   :  { %398 = vmatprep.subr.bf16.mxu0 %v442_v5  ;;  %425 = vmatpush3.bf16.msra.mxu1 %v449_v10  ;;  %v454_v20 = vld [vmem:[%s600_s1 + $0x30] sm:$0xff]   ;;  %v457_v23 = vld [vmem:[%s600_s1 + $0x38] sm:$0xff]   ;;  %v458_v24 = vld [vmem:[%s601_s0] ss:$12 sps:$4 sm:$0x7f]  }
   0x9   :  { %426 = vmatprep.subr.bf16.mxu1 %v467_v1  ;;  %255 = vmatprep.mubr.bf16.mxu0 %v460_v18  ;;  %v462_v22 = vld [vmem:[%s601_s0 + $0x8] ss:$12 sps:$4 sm:$0x7f]   ;;  %v392_v59 = vld [vmem:[%s603_s3] ss:$0 sm:$0xff] }
   0xa   :  { %v393_v61 = vld [vmem:[%s604_s4] ss:$0 sm:$0xff] }
   0xb   :  { %399 = vmatpush3.bf16.msra.mxu0 %v443_v6 }
   0xc   :  { %400 = vmatprep.subr.bf16.mxu0 %v444_v7  ;;  %427 = vmatpush3.bf16.msra.mxu1 %v452_v12 }
   0xd   :  { %428 = vmatprep.subr.bf16.mxu1 %v467_v1 }
   0xf   :  { %401 = vmatpush3.bf16.msra.mxu0 %v445_v9 }
  0x10   :  { %402 = vmatprep.subr.bf16.mxu0 %v447_v11  ;;  %429 = vmatpush3.bf16.msra.mxu1 %v455_v15 }
  0x11   :  { %430 = vmatprep.subr.bf16.mxu1 %v467_v1 }
  0x13   :  { %403 = vmatpush3.bf16.msra.mxu0 %v448_v13 }
  0x14   :  { %404 = vmatprep.subr.bf16.mxu0 %v450_v14  ;;  %431 = vmatpush3.bf16.msra.mxu1 %v461_v19 }
  0x17   :  { %405 = vmatpush3.bf16.msra.mxu0 %v451_v16  ;;  %433 = vmatmul.mubr.msk.bf16.vlgmr.msra.gmra.mrb[0].mxu1 %vm219_vm1, %v462_v22 }
  0x18   :  { %406 = vmatprep.subr.bf16.mxu0 %v453_v17 }
  0x1b   :  { %407 = vmatpush3.bf16.msra.mxu0 %v454_v20 }
  0x1c   :  { %408 = vmatprep.subr.bf16.mxu0 %v456_v21 }
  0x1f   :  { %409 = vmatpush3.bf16.msra.mxu0 %v457_v23 }
  0x22   :  { %256 = vmatmul.mubr.bf16.vlgmr.msra.gmra.mrb[0].mxu0 %v458_v24 }
  0xea   :  { %v298_v25 = vpop.f32.mrb[0].mxu1 }
  0xeb   :  { %v434_v26 = vpop.f32.mrb[1].mxu1 }
  0xec   :  { %v301_v27 = vpop.f32.mrb[2].mxu1 }
  0xed   :  { %v435_v28 = vpop.f32.mrb[3].mxu1 }
  0xf5   :  { %v410_v29 = vpop.f32.mrb[0].mxu0 }
  0xf6   :  { %v411_v30 = vpop.f32.mrb[1].mxu0 }
  0xf7   :  { %v412_v32 = vadd.f32 %v411_v30, %v410_v29  ;;  %v413_v33 = vpop.f32.mrb[2].mxu0 }
  0xf8   :  { %v414_v34 = vpop.f32.mrb[3].mxu0 }
  0xf9   :  { %v258_v35 = vadd.f32 %v412_v32, %v366_v31  ;;  %v415_v36 = vadd.f32 %v414_v34, %v413_v33 }
  0xfb   :  { %v299_v37 = vadd.f32 %v298_v25, %v258_v35  ;;  %v261_v38 = vadd.f32 %v415_v36, %v366_v31 }
  0xfd   :  { %v302_v39 = vadd.f32 %v301_v27, %v261_v38  ;;  %v306_v40 = vsel %vm305_vm2, %v299_v37, 0.0 }
  0xfe   :  { %307 = vadd.xlane.f32.xlu0 %v306_v40 }
  0xff   :  { %v310_v41 = vsel %vm309_vm3, %v302_v39, 0.0 }
 0x102   :  { %311 = vadd.xlane.f32.xlu0 %v310_v41 }
 0x18b   :  { %v308_v42 = vpop.xlane.xlu0 %307 }
 0x18c   :  { %v314_v43 = vmul.f32 0.03125, %v308_v42 }
 0x18e   :  { %v316_v44 = vsub.f32 %v299_v37, %v314_v43 }
 0x18f   :  { %v312_v45 = vpop.xlane.xlu0 %311 }
 0x190   :  { %v315_v46 = vmul.f32 0.03125, %v312_v45  ;;  %v318_v47 = vmul.f32 %v316_v44, %v316_v44 }
 0x192   :  { %v317_v48 = vsub.f32 %v302_v39, %v315_v46  ;;  %v320_v49 = vsel %vm305_vm2, %v318_v47, 0.0 }
 0x193   :  { %321 = vadd.xlane.f32.xlu1 %v320_v49 }
 0x194   :  { %v319_v50 = vmul.f32 %v317_v48, %v317_v48 }
 0x196   :  { %v323_v51 = vsel %vm309_vm3, %v319_v50, 0.0 }
 0x197   :  { %324 = vadd.xlane.f32.xlu1 %v323_v51 }
 0x220   :  { %v322_v52 = vpop.xlane.xlu1 %321 }
 0x221   :  { %v326_v53 = vmul.f32 0.03125, %v322_v52 }
 0x223   :  { %v328_v54 = vadd.f32 1e-08, %v326_v53 }
 0x224   :  { %v325_v55 = vpop.xlane.xlu1 %324 }
 0x225   :  { %463 = vrsqrt.f32 %v328_v54  ;;  %v327_v56 = vmul.f32 0.03125, %v325_v55 }
 0x227   :  { %v329_v57 = vadd.f32 1e-08, %v327_v56 }
 0x229   :  { %465 = vrsqrt.f32 %v329_v57 }
 0x22f   :  { %v464_v58 = vpop.eup %463 }
 0x230   :  { %v332_v60 = vmul.f32 %v464_v58, %v316_v44 }
 0x232   :  { %v341_v62 = vmul.f32 %v392_v59, %v332_v60 }
 0x233   :  { %v466_v63 = vpop.eup %465 }
 0x234   :  { %v350_v1 = vadd.f32 %v393_v61, %v341_v62  ;;  %v333_v2 = vmul.f32 %v466_v63, %v317_v48 }
 0x236   :  { %vm353_vm4 = vcmp.ge.f32.partialorder %v350_v1, 0.0  ;;  %v356_v3 = vmul.f32 %v355_v0, %v350_v1  ;;  %v342_v4 = vmul.f32 %v392_v59, %v333_v2 }
 0x238   :  { %v358_v5 = vsel %vm353_vm4, %v350_v1, %v356_v3  ;;  %v351_v6 = vadd.f32 %v393_v61, %v342_v4 }
 0x239   :  { %360 = vst.msk [vmem:[%s606_s6] sm:$0xff] %vm305_vm2, %v358_v5 }
 0x23a   :  { %vm354_vm5 = vcmp.ge.f32.partialorder %v351_v6, 0.0  ;;  %v357_v7 = vmul.f32 %v355_v0, %v351_v6 }
 0x23c   :  { %v359_v8 = vsel %vm354_vm5, %v351_v6, %v357_v7 }
 0x23d   :  { %361 = vst.msk [vmem:[%s606_s6 + $0x8] sm:$0x3f] %vm309_vm3, %v359_v8 }

// kernel: squeeze.22
= control target key start
LH: loop header
LB: loop body
LE: loop exit
PB: predicated region body
PF: predicated region fallthrough
CT: control target
= control target key end

     0   :  { %vm3_vm0 = vcmask 64512   ;;  %s229_s0 = inlined_call_operand.vmem [shape: f32[1,28,8], index: 0, kind: input, shape index: {}]   ;;  %s230_s1 = inlined_call_operand.vmem [shape: f32[2,7,2,8], index: 1, kind: output, shape index: {}]  }
   0x1   :  { %v2_v0 = vld [vmem:[%s229_s0] sm:$0xff]   ;;  %v135_v1 = vld [vmem:[%s229_s0 + $0x8] sm:$0xff]   ;;  %v136_v2 = vld [vmem:[%s229_s0 + $0x10] sm:$0xff]  }
   0x2   :  { %4 = vst.msk [vmem:[#allocation0] sm:$0x3] %vm3_vm0, %v2_v0   ;;  %6 = vst.msk [vmem:[#allocation0 + $0x6] sm:$0xc] %vm3_vm0, %v2_v0   ;;  %v137_v3 = vld [vmem:[%s229_s0 + $0x18] sm:$0xf]  }
   0x3   :  { %8 = vst.msk [vmem:[#allocation0 + $0xc] sm:$0x30] %vm3_vm0, %v2_v0   ;;  %10 = vst.msk [vmem:[#allocation0 + $0x12] sm:$0xc0] %vm3_vm0, %v2_v0  }
   0x4   :  { %15 = vst.msk [vmem:[#allocation0 + $0x20] sm:$0x3] %vm3_vm0, %v135_v1   ;;  %17 = vst.msk [vmem:[#allocation0 + $0x26] sm:$0xc] %vm3_vm0, %v135_v1  }
   0x5   :  { %19 = vst.msk [vmem:[#allocation0 + $0x2c] sm:$0x30] %vm3_vm0, %v135_v1   ;;  %21 = vst.msk [vmem:[#allocation0 + $0x32] sm:$0xc0] %vm3_vm0, %v135_v1  }
   0x6   :  { %26 = vst.msk [vmem:[#allocation0 + $0x40] sm:$0x3] %vm3_vm0, %v136_v2   ;;  %28 = vst.msk [vmem:[#allocation0 + $0x46] sm:$0xc] %vm3_vm0, %v136_v2  }
   0x7   :  { %30 = vst.msk [vmem:[#allocation0 + $0x4c] sm:$0x30] %vm3_vm0, %v136_v2   ;;  %32 = vst.msk [vmem:[#allocation0 + $0x52] sm:$0xc0] %vm3_vm0, %v136_v2  }
   0x8   :  { %37 = vst.msk [vmem:[#allocation0 + $0x60] sm:$0x3] %vm3_vm0, %v137_v3   ;;  %39 = vst.msk [vmem:[#allocation0 + $0x66] sm:$0xc] %vm3_vm0, %v137_v3  }
   0x9   :  { %v43_v4 = vld [vmem:[#allocation0] sm:$0x3]  ;;  %v47_v5 = vld [vmem:[#allocation0 + $0x8] sm:$0x3] }
   0xa   :  { %v52_v6 = vld [vmem:[#allocation0 + $0x10] sm:$0x3]  ;;  %45 = vst [vmem:[%s230_s1] sm:$0x3] %v43_v4  ;;  %138 = vst [vmem:[%s230_s1 + $0x2] sm:$0x3] %v47_v5 }
   0xb   :  { %139 = vst [vmem:[%s230_s1 + $0x4] sm:$0x3] %v52_v6  ;;  %v58_v7 = vld [vmem:[#allocation0 + $0x18] sm:$0x3]  ;;  %v64_v8 = vld [vmem:[#allocation0 + $0x20] sm:$0x3] }
   0xc   :  { %v70_v9 = vld [vmem:[#allocation0 + $0x28] sm:$0x3]  ;;  %140 = vst [vmem:[%s230_s1 + $0x6] sm:$0x3] %v58_v7  ;;  %141 = vst [vmem:[%s230_s1 + $0x8] sm:$0x3] %v64_v8 }
   0xd   :  { %142 = vst [vmem:[%s230_s1 + $0xa] sm:$0x3] %v70_v9  ;;  %v76_v10 = vld [vmem:[#allocation0 + $0x30] sm:$0x3]  ;;  %v82_v11 = vld [vmem:[#allocation0 + $0x38] sm:$0x3] }
   0xe   :  { %v88_v12 = vld [vmem:[#allocation0 + $0x40] sm:$0x3]  ;;  %143 = vst [vmem:[%s230_s1 + $0xc] sm:$0x3] %v76_v10  ;;  %144 = vst [vmem:[%s230_s1 + $0xe] sm:$0x3] %v82_v11 }
   0xf   :  { %145 = vst [vmem:[%s230_s1 + $0x10] sm:$0x3] %v88_v12  ;;  %v94_v13 = vld [vmem:[#allocation0 + $0x48] sm:$0x3]  ;;  %v100_v14 = vld [vmem:[#allocation0 + $0x50] sm:$0x3] }
  0x10   :  { %v106_v15 = vld [vmem:[#allocation0 + $0x58] sm:$0x3]  ;;  %146 = vst [vmem:[%s230_s1 + $0x12] sm:$0x3] %v94_v13  ;;  %147 = vst [vmem:[%s230_s1 + $0x14] sm:$0x3] %v100_v14 }
  0x11   :  { %148 = vst [vmem:[%s230_s1 + $0x16] sm:$0x3] %v106_v15  ;;  %v112_v16 = vld [vmem:[#allocation0 + $0x60] sm:$0x3]  ;;  %v118_v17 = vld [vmem:[#allocation0 + $0x68] sm:$0x3] }
  0x12   :  { %149 = vst [vmem:[%s230_s1 + $0x18] sm:$0x3] %v112_v16  ;;  %150 = vst [vmem:[%s230_s1 + $0x1a] sm:$0x3] %v118_v17 }

// kernel: forward.29
= control target key start
LH: loop header
LB: loop body
LE: loop exit
PB: predicated region body
PF: predicated region fallthrough
CT: control target
= control target key end

     0   :  { %v577_v1 = vmov 0   ;;  %vm68_vm0 = vcmask 261120   ;;  %v28_v14 = vlaneseq  ;;  %vm354_vm1 = vcmask 1045504   ;;  %s727_s1 = inlined_call_operand.vmem [shape: bf16[32,256], index: 1, kind: input, shape index: {}]   ;;  %s728_s2 = inlined_call_operand.vmem [shape: bf16[64,256], index: 2, kind: input, shape index: {}]   ;;  %s729_s0 = inlined_call_operand.vmem [shape: bf16[28,32], index: 0, kind: input, shape index: {}]   ;;  %s730_s3 = inlined_call_operand.vmem [shape: f32[1,256], index: 3, kind: input, shape index: {}]   ;;  %s731_s4 = inlined_call_operand.vmem [shape: f32[28,64], index: 4, kind: output, shape index: {}]  }
   0x1   :  { %v497_v0 = vld [vmem:[%s727_s1 + $0x4] ss:$8 sps:$4 sm:$0xff]   ;;  %107 = vmatprep.mubr.bf16.mxu0 %v577_v1  ;;  %224 = vmatprep.mubr.bf16.mxu1 %v577_v1  ;;  %v501_v3 = vld [vmem:[%s727_s1] ss:$8 sps:$4 sm:$0xff]   ;;  %v503_v5 = vld [vmem:[%s727_s1 + $0x14] ss:$8 sps:$4 sm:$0xff]  }
   0x2   :  { %v499_v2 = vld [vmem:[%s728_s2 + $0x4] ss:$8 sps:$4 sm:$0xff]   ;;  %75 = vmatprep.subr.bf16.mxu0 %v497_v0  ;;  %v502_v4 = vld [vmem:[%s728_s2] ss:$8 sps:$4 sm:$0xff]   ;;  %v505_v6 = vld [vmem:[%s728_s2 + $0x14] ss:$8 sps:$4 sm:$0xff]  }
   0x3   :  { %192 = vmatprep.subr.bf16.mxu1 %v499_v2  ;;  %76 = vmatpush1.bf16.msra.mxu0 %v501_v3  ;;  %v507_v7 = vld [vmem:[%s727_s1 + $0x10] ss:$8 sps:$4 sm:$0xff]   ;;  %v509_v9 = vld [vmem:[%s729_s0] sm:$0xff]   ;;  %v513_v12 = vld [vmem:[%s728_s2 + $0x34] ss:$8 sps:$4 sm:$0xff]   ;;  %v29_v15 = vshrl.u32 %v28_v14, 7 }
   0x4   :  { %193 = vmatpush1.bf16.msra.mxu1 %v502_v4  ;;  %77 = vmatprep.subr.bf16.mxu0 %v503_v5  ;;  %v508_v8 = vld [vmem:[%s728_s2 + $0x10] ss:$8 sps:$4 sm:$0xff]   ;;  %v510_v10 = vld [vmem:[%s728_s2 + $0x24] ss:$8 sps:$4 sm:$0xff]   ;;  %v512_v11 = vld [vmem:[%s728_s2 + $0x20] ss:$8 sps:$4 sm:$0xff]  }
   0x5   :  { %194 = vmatprep.subr.bf16.mxu1 %v505_v6  ;;  %v515_v13 = vld [vmem:[%s728_s2 + $0x30] ss:$8 sps:$4 sm:$0xff]   ;;  %v30_v16 = vsub.s32 0, %v29_v15  ;;  %v26_v17 = vld [vmem:[%s730_s3] sm:$0x3]  ;;  %v34_v18 = vsub.s32 1, %v29_v15 }
   0x6   :  { %s578_s2 = smov 64   ;;  %v516_v51 = vld [vmem:[%s729_s0 + $0x8] sm:$0x3f]   ;;  %vm188_vm2 = vcmask 523264   ;;  %vm292_vm3 = vcmask 521216   ;;  %vm459_vm4 = vcmask 523270  }
   0x7   :  { %78 = vmatpush1.bf16.msra.mxu0 %v507_v7  ;;  %v651_v19 = vrot.slane %v26_v17, %v30_v16  ;;  %v653_v20 = vrot.slane %v26_v17, %v34_v18  ;;  %vm462_vm5 = vcmask 519168  }
   0x8   :  { %195 = vmatpush1.bf16.msra.mxu1 %v508_v8  ;;  %307 = vmatprep.subr.bf16.mxu0 %v499_v2 }
   0x9   :  { %196 = vmatprep.subr.bf16.mxu1 %v510_v10 }
   0xa   :  { %474 = vmatmul.mubr.msk.bf16.vlgmr.msra.gmra.mrb[0].mxu0 %vm68_vm0, %v509_v9 }
   0xb   :  { %308 = vmatpush1.bf16.msra.mxu0 %v502_v4  ;;  %117 = vmatprep.mubr.bf16.mxu0 %v577_v1 }
   0xc   :  { %197 = vmatpush1.bf16.msra.mxu1 %v512_v11  ;;  %309 = vmatprep.subr.bf16.mxu0 %v505_v6 }
   0xd   :  { %198 = vmatprep.subr.bf16.mxu1 %v513_v12 }
   0xf   :  { %310 = vmatpush1.bf16.msra.mxu0 %v508_v8 }
  0x10   :  { %199 = vmatpush1.bf16.msra.mxu1 %v515_v13  ;;  %311 = vmatprep.subr.bf16.mxu0 %v510_v10 }
  0x12   :  { %475 = vmatmul.mubr.msk.bf16.gmra.mrb[4].mxu0 %vm68_vm0, %v516_v51 }
  0x13   :  { %225 = vmatmul.mubr.bf16.vlgmr.msra.gmra.mrb[0].mxu1 %v577_v1  ;;  %312 = vmatpush1.bf16.msra.mxu0 %v512_v11 }
  0x14   :  { %313 = vmatprep.subr.bf16.mxu0 %v513_v12  ;;  %339 = vmatprep.mubr.bf16.mxu0 %v577_v1 }
  0x17   :  { %314 = vmatpush1.bf16.msra.mxu0 %v515_v13 }
  0xdd   :  { %v109_v21 = vpop.f32.mrb[0].mxu0 }
  0xde   :  { %v110_v22 = vadd.f32 %v109_v21, %v651_v19  ;;  %v111_v23 = vpop.f32.mrb[1].mxu0 }
  0xdf   :  { %v112_v24 = vadd.f32 %v111_v23, %v653_v20  ;;  %v113_v25 = vpop.f32.mrb[2].mxu0 }
  0xe0   :  { %v114_v26 = vadd.f32 %v113_v25, %v651_v19  ;;  %v115_v27 = vpop.f32.mrb[3].mxu0 }
  0xe1   :  { %v116_v28 = vadd.f32 %v115_v27, %v653_v20 }
  0xe2   :  { %130 = vst [vmem:[#allocation2 + $0x10] sm:$0xff] %v114_v26 }
  0xe3   :  { %131 = vst [vmem:[#allocation2 + $0x18] sm:$0xff] %v116_v28 }
  0xe5   :  { %v119_v10 = vpop.f32.mrb[4].mxu0 }
  0xe6   :  { %v226_v29 = vpop.f32.mrb[0].mxu1  ;;  %v120_v11 = vadd.f32 %v119_v10, %v651_v19  ;;  %v121_v12 = vpop.f32.mrb[5].mxu0 }
  0xe7   :  { %v235_v30 = vadd.f32 %v226_v29, %v110_v22  ;;  %v228_v31 = vpop.f32.mrb[1].mxu1  ;;  %v122_v13 = vadd.f32 %v121_v12, %v653_v20  ;;  %v123_v14 = vpop.f32.mrb[6].mxu0 }
  0xe8   :  { %v236_v32 = vadd.f32 %v228_v31, %v112_v24  ;;  %v230_v33 = vpop.f32.mrb[2].mxu1  ;;  %v124_v15 = vadd.f32 %v123_v14, %v651_v19  ;;  %v125_v16 = vpop.f32.mrb[7].mxu0 }
  0xe9   :  { %v484_v34 = vmul.f32 -1.442695, %v235_v30  ;;  %v232_v35 = vpop.f32.mrb[3].mxu1  ;;  %v146_v36 = vld [vmem:[#allocation2 + $0x10] sm:$0x3f]  ;;  %v126_v17 = vadd.f32 %v125_v16, %v653_v20 }
  0xea   :  { %v237_v37 = vadd.f32 %v230_v33, %v146_v36  ;;  %v147_v39 = vld [vmem:[#allocation2 + $0x18] sm:$0x3f]  ;;  %v486_v52 = vmul.f32 -1.442695, %v236_v32  ;;  %134 = vst [vmem:[#allocation2 + $0x30] sm:$0xf] %v124_v15 }
  0xeb   :  { %517 = vpow2.f32 %v484_v34  ;;  %v238_v42 = vadd.f32 %v232_v35, %v147_v39  ;;  %135 = vst [vmem:[#allocation2 + $0x38] sm:$0xf] %v126_v17  ;;  %v294_v24 = vld [vmem:[#allocation2 + $0x10] sm:$0xc0] }
  0xec   :  { %v485_v38 = vmul.f32 -1.442695, %v237_v37  ;;  %v295_v37 = vld [vmem:[#allocation2 + $0x18] sm:$0xc0] }
  0xed   :  { %v487_v53 = vmul.f32 -1.442695, %v238_v42 }
  0xee   :  { %519 = vpow2.f32 %v485_v38 }
  0xef   :  { %521 = vtanh.f32 %v236_v32 }
  0xf1   :  { %v298_v30 = vld [vmem:[#allocation2 + $0x30] sm:$0xf] }
  0xf5   :  { %v518_v40 = vpop.eup %517 }
  0xf6   :  { %v245_v41 = vadd.f32 1.0, %v518_v40  ;;  %v299_v40 = vld [vmem:[#allocation2 + $0x38] sm:$0xf] }
  0xf8   :  { %523 = vrcp.f32 %v245_v41  ;;  %v520_v43 = vpop.eup %519 }
  0xf9   :  { %v246_v44 = vadd.f32 1.0, %v520_v43  ;;  %525 = vtanh.f32 %v238_v42  ;;  %v522_v45 = vpop.eup %521 }
  0xfb   :  { %527 = vrcp.f32 %v246_v44 }
  0xfc   :  { %529 = vpow2.f32 %v486_v52 }
  0xfd   :  { %531 = vpow2.f32 %v487_v53 }
 0x102   :  { %v524_v46 = vpop.eup %523 }
 0x103   :  { %v267_v47 = vmul.f32 %v524_v46, %v522_v45  ;;  %v526_v48 = vpop.eup %525  ;;  %v265_v57 = vmul.f32 0.0, %v524_v46 }
 0x105   :  { %271 = vrot.lane.b32.xlu0 %v267_v47, %s578_s2  ;;  %v528_v49 = vpop.eup %527 }
 0x106   :  { %v268_v50 = vmul.f32 %v528_v49, %v526_v48  ;;  %v530_v54 = vpop.eup %529  ;;  %v266_v61 = vmul.f32 0.0, %v528_v49 }
 0x107   :  { %v259_v55 = vadd.f32 1.0, %v530_v54  ;;  %v532_v56 = vpop.eup %531 }
 0x108   :  { %v260_v60 = vadd.f32 1.0, %v532_v56 }
 0x109   :  { %273 = vrot.lane.b32.xlu0 %v268_v50, %s578_s2  ;;  %533 = vrcp.f32 %v259_v55 }
 0x113   :  { %v534_v3 = vpop.eup %533 }
 0x177   :  { %v272_v58 = vpop.permute.xlu0 %271 }
 0x178   :  { %v666_v59 = vadd.f32 %v272_v58, %v265_v57 }
 0x17a   :  { %535 = vtanh.f32 %v666_v59  ;;  %v414_v0 = vrot.slane %v666_v59, 2 }
 0x17b   :  { %v274_v62 = vpop.permute.xlu0 %273  ;;  %537 = vrcp.f32 %v260_v60 }
 0x17c   :  { %v669_v63 = vadd.f32 %v274_v62, %v266_v61 }
 0x17e   :  { %539 = vtanh.f32 %v669_v63  ;;  %v415_v1 = vrot.slane %v669_v63, 2 }
 0x180   :  { %v679_v2 = vsel %vm354_vm1, %v414_v0, %v415_v1 }
 0x184   :  { %v536_v4 = vpop.eup %535 }
 0x185   :  { %v681_v5 = vmul.f32 %v536_v4, %v534_v3  ;;  %v538_v6 = vpop.eup %537 }
 0x188   :  { %v540_v7 = vpop.eup %539 }
 0x189   :  { %v683_v8 = vmul.f32 %v540_v7, %v538_v6 }
 0x18b   :  { %v300_v9 = vpack.c.bf16 %v683_v8, %v681_v5 }
 0x18d   :  { %302 = vrot.lane.b32.xlu1 %v300_v9, %s578_s2 }
 0x1ff   :  { %v303_v18 = vpop.permute.xlu1 %302 }
 0x200   :  { %488 = vmatmul.mubr.msk.bf16.vlgmr.msra.gmra.mrb[8].mxu0 %vm188_vm2, %v303_v18 }
 0x2d3   :  { %v341_v21 = vpop.f32.mrb[8].mxu0 }
 0x2d4   :  { %v355_v22 = vrot.slane %v341_v21, 2  ;;  %v343_v23 = vpop.f32.mrb[9].mxu0 }
 0x2d5   :  { %v345_v25 = vpop.f32.mrb[10].mxu0  ;;  %v356_v29 = vrot.slane %v343_v23, 2 }
 0x2d6   :  { %v367_v26 = vadd.f32 %v355_v22, %v294_v24  ;;  %v357_v27 = vrot.slane %v345_v25, 2  ;;  %v347_v28 = vpop.f32.mrb[11].mxu0 }
 0x2d7   :  { %v359_v19 = vrot.slane %v347_v28, 2  ;;  %v368_v38 = vadd.f32 %v356_v29, %v295_v37 }
 0x2d8   :  { %v489_v31 = vmul.f32 -1.442695, %v367_v26  ;;  %v358_v20 = vsel %vm354_vm1, %v355_v22, %v357_v27  ;;  %v371_v32 = vadd.f32 %v357_v27, %v298_v30 }
 0x2d9   :  { %v369_v33 = vadd.f32 %v358_v20, %v120_v11  ;;  %v360_v34 = vsel %vm354_vm1, %v356_v29, %v359_v19  ;;  %v372_v42 = vadd.f32 %v359_v19, %v299_v40  ;;  %v492_v59 = vmul.f32 -1.442695, %v368_v38 }
 0x2da   :  { %541 = vpow2.f32 %v489_v31  ;;  %v491_v35 = vmul.f32 -1.442695, %v371_v32  ;;  %v370_v39 = vadd.f32 %v360_v34, %v122_v13 }
 0x2db   :  { %v490_v36 = vmul.f32 -1.442695, %v369_v33  ;;  %v494_v62 = vmul.f32 -1.442695, %v372_v42 }
 0x2dc   :  { %543 = vpow2.f32 %v491_v35  ;;  %v493_v61 = vmul.f32 -1.442695, %v370_v39 }
 0x2dd   :  { %545 = vpow2.f32 %v490_v36 }
 0x2de   :  { %547 = vtanh.f32 %v368_v38 }
 0x2df   :  { %549 = vtanh.f32 %v370_v39 }
 0x2e4   :  { %v542_v41 = vpop.eup %541 }
 0x2e5   :  { %v382_v43 = vadd.f32 1.0, %v542_v41 }
 0x2e6   :  { %v544_v44 = vpop.eup %543 }
 0x2e7   :  { %v546_v45 = vpop.eup %545  ;;  %551 = vrcp.f32 %v382_v43  ;;  %v384_v46 = vadd.f32 1.0, %v544_v44 }
 0x2e8   :  { %v383_v47 = vadd.f32 1.0, %v546_v45  ;;  %553 = vtanh.f32 %v372_v42  ;;  %v548_v48 = vpop.eup %547 }
 0x2e9   :  { %555 = vrcp.f32 %v384_v46  ;;  %v550_v49 = vpop.eup %549 }
 0x2ea   :  { %557 = vrcp.f32 %v383_v47 }
 0x2eb   :  { %559 = vpow2.f32 %v492_v59 }
 0x2ec   :  { %561 = vpow2.f32 %v493_v61 }
 0x2ed   :  { %563 = vpow2.f32 %v494_v62 }
 0x2f1   :  { %v552_v50 = vpop.eup %551 }
 0x2f2   :  { %v554_v51 = vpop.eup %553  ;;  %v423_v52 = vmul.f32 %v552_v50, %v548_v48  ;;  %v420_v53 = vmul.f32 %v552_v50, %v414_v0 }
 0x2f3   :  { %v556_v54 = vpop.eup %555 }
 0x2f4   :  { %v558_v55 = vpop.eup %557  ;;  %429 = vrot.lane.b32.xlu1 %v423_v52, %s578_s2  ;;  %v425_v56 = vmul.f32 %v556_v54, %v554_v51  ;;  %v422_v57 = vmul.f32 %v556_v54, %v415_v1 }
 0x2f5   :  { %v424_v58 = vmul.f32 %v558_v55, %v550_v49  ;;  %v421_v60 = vmul.f32 %v558_v55, %v679_v2  ;;  %v560_v63 = vpop.eup %559 }
 0x2f6   :  { %v562_v0 = vpop.eup %561  ;;  %v403_v2 = vadd.f32 1.0, %v560_v63 }
 0x2f7   :  { %431 = vrot.lane.b32.xlu0 %v424_v58, %s578_s2  ;;  %v564_v1 = vpop.eup %563  ;;  %v404_v3 = vadd.f32 1.0, %v562_v0 }
 0x2f8   :  { %433 = vrot.lane.b32.xlu1 %v425_v56, %s578_s2  ;;  %v405_v6 = vadd.f32 1.0, %v564_v1  ;;  %565 = vrcp.f32 %v403_v2 }
 0x2fb   :  { %285 = vrot.lane.b32.xlu0 %v681_v5, %s578_s2 }
 0x2fc   :  { %287 = vrot.lane.b32.xlu1 %v683_v8, %s578_s2 }
 0x302   :  { %v566_v13 = vpop.eup %565 }
 0x366   :  { %v430_v4 = vpop.permute.xlu1 %429 }
 0x367   :  { %v438_v7 = vadd.f32 %v430_v4, %v420_v53 }
 0x369   :  { %567 = vtanh.f32 %v438_v7  ;;  %v432_v5 = vpop.permute.xlu0 %431 }
 0x36a   :  { %569 = vrcp.f32 %v404_v3  ;;  %v439_v9 = vadd.f32 %v432_v5, %v421_v60  ;;  %v434_v8 = vpop.permute.xlu1 %433 }
 0x36b   :  { %571 = vrcp.f32 %v405_v6  ;;  %v440_v10 = vadd.f32 %v434_v8, %v422_v57 }
 0x36c   :  { %573 = vtanh.f32 %v439_v9 }
 0x36d   :  { %575 = vtanh.f32 %v440_v10  ;;  %v286_v11 = vpop.permute.xlu0 %285 }
 0x36e   :  { %291 = vst.msk [vmem:[%s731_s4] sm:$0xff] %vm188_vm2, %v286_v11  ;;  %v288_v12 = vpop.permute.xlu1 %287 }
 0x36f   :  { %293 = vst.msk [vmem:[%s731_s4 + $0x8] sm:$0x3f] %vm292_vm3, %v288_v12 }
 0x373   :  { %v568_v14 = vpop.eup %567 }
 0x374   :  { %v570_v15 = vpop.eup %569  ;;  %v444_v16 = vmul.f32 %v568_v14, %v566_v13 }
 0x375   :  { %v572_v17 = vpop.eup %571 }
 0x376   :  { %v574_v18 = vpop.eup %573  ;;  %450 = vrot.lane.b32.xlu0 %v444_v16, %s578_s2 }
 0x377   :  { %v576_v21 = vpop.eup %575  ;;  %v445_v22 = vmul.f32 %v574_v18, %v570_v15 }
 0x378   :  { %v446_v23 = vmul.f32 %v576_v21, %v572_v17 }
 0x379   :  { %452 = vrot.lane.b32.xlu1 %v445_v22, %s578_s2 }
 0x37a   :  { %454 = vrot.lane.b32.xlu0 %v446_v23, %s578_s2 }
 0x3e8   :  { %v451_v24 = vpop.permute.xlu0 %450 }
 0x3e9   :  { %460 = vst.msk [vmem:[%s731_s4 + $0x8] sm:$0xc0] %vm459_vm4, %v451_v24 }
 0x3eb   :  { %v453_v25 = vpop.permute.xlu1 %452 }
 0x3ec   :  { %461 = vst.msk [vmem:[%s731_s4 + $0x10] sm:$0xff] %vm188_vm2, %v453_v25  ;;  %v455_v26 = vpop.permute.xlu0 %454 }
 0x3ed   :  { %463 = vst.msk [vmem:[%s731_s4 + $0x18] sm:$0xf] %vm462_vm5, %v455_v26 }

// kernel: forward.30
= control target key start
LH: loop header
LB: loop body
LE: loop exit
PB: predicated region body
PF: predicated region fallthrough
CT: control target
= control target key end

     0   :  { %vm61_vm0 = vcmask 261120   ;;  %vm117_vm1 = vcmask 64512   ;;  %vm127_vm2 = vcmask 60416   ;;  %s669_s1 = inlined_call_operand.vmem [shape: bf16[2,32,8], index: 1, kind: input, shape index: {}]   ;;  %s670_s0 = inlined_call_operand.vmem [shape: bf16[2,28,32], index: 0, kind: input, shape index: {}]   ;;  %s671_s2 = inlined_call_operand.vmem [shape: f32[2,1,8], index: 2, kind: input, shape index: {}, may-alias: {2,4}]   ;;  %s672_s3 = inlined_call_operand.vmem [shape: f32[2,1,8], index: 3, kind: input, shape index: {}]   ;;  %s673_s4 = inlined_call_operand.vmem [shape: f32[2,1,8], index: 4, kind: input, shape index: {}, may-alias: {2,4}]   ;;  %s674_s5 = inlined_call_operand.vmem [shape: f32[2,28,8], index: 5, kind: input, shape index: {}]   ;;  %s675_s6 = inlined_call_operand.vmem [shape: f32[2,28,8], index: 6, kind: output, shape index: {}]  }
   0x1   :  { %v456_v0 = vld [vmem:[%s669_s1] sm:$0xff]   ;;  %v457_v1 = vld [vmem:[%s669_s1 + $0x10] sm:$0xff]   ;;  %v458_v2 = vld [vmem:[%s669_s1 + $0x8] sm:$0xff]  }
   0x2   :  { %440 = vmatprep.subr.bf16.mxu0 %v456_v0  ;;  %448 = vmatprep.subr.bf16.mxu1 %v457_v1  ;;  %v459_v3 = vld [vmem:[%s669_s1 + $0x18] sm:$0xff]   ;;  %v460_v4 = vld [vmem:[%s670_s0] sm:$0xff]   ;;  %v461_v5 = vld [vmem:[%s670_s0 + $0x8] sm:$0x3f]  }
   0x3   :  { %441 = vmatpush3.bf16.msra.mxu0 %v456_v0  ;;  %449 = vmatpush3.bf16.msra.mxu1 %v457_v1  ;;  %v462_v6 = vld [vmem:[%s670_s0 + $0x10] sm:$0xff]   ;;  %v463_v7 = vld [vmem:[%s670_s0 + $0x18] sm:$0x3f]   ;;  %v395_v8 = vld [vmem:[%s671_s2] ss:$0 sm:$0xff] }
   0x4   :  { %442 = vmatprep.subr.bf16.mxu0 %v458_v2  ;;  %450 = vmatprep.subr.bf16.mxu1 %v459_v3  ;;  %v413_v10 = vld [vmem:[%s671_s2 + $0x1] ss:$0 sm:$0xff] }
   0x5   :  { %444 = vmatprep.mubr.msk.bf16.mxu0 %vm61_vm0, %v460_v4  ;;  %452 = vmatprep.mubr.msk.bf16.mxu1 %vm61_vm0, %v462_v6 }
   0x7   :  { %443 = vmatpush3.bf16.msra.mxu0 %v458_v2  ;;  %451 = vmatpush3.bf16.msra.mxu1 %v459_v3 }
   0xa   :  { %445 = vmatmul.mubr.msk.bf16.vlgmr.msra.gmra.mrb[0].mxu0 %vm61_vm0, %v461_v5  ;;  %453 = vmatmul.mubr.msk.bf16.vlgmr.msra.gmra.mrb[0].mxu1 %vm61_vm0, %v463_v7 }
  0xdd   :  { %v446_v9 = vpop.f32.mrb[0].mxu0  ;;  %v454_v13 = vpop.f32.mrb[0].mxu1 }
  0xde   :  { %v111_v11 = vadd.f32 %v446_v9, %v395_v8  ;;  %v102_v12 = vpop.f32.mrb[1].mxu0  ;;  %v286_v16 = vpop.f32.mrb[1].mxu1  ;;  %v295_v30 = vadd.f32 %v454_v13, %v413_v10 }
  0xdf   :  { %v103_v14 = vadd.f32 %v395_v8, %v102_v12  ;;  %v447_v15 = vpop.f32.mrb[2].mxu0  ;;  %v287_v18 = vadd.f32 %v413_v10, %v286_v16  ;;  %v455_v20 = vpop.f32.mrb[2].mxu1 }
  0xe0   :  { %v114_v17 = vadd.f32 %v447_v15, %v395_v8  ;;  %v105_v19 = vpop.f32.mrb[3].mxu0  ;;  %v124_v21 = vsel %vm117_vm1, %v111_v11, 0.0  ;;  %v289_v22 = vpop.f32.mrb[3].mxu1  ;;  %v298_v28 = vadd.f32 %v455_v20, %v413_v10  ;;  %v307_v33 = vsel %vm117_vm1, %v295_v30, 0.0 }
  0xe1   :  { %125 = vadd.xlane.f32.xlu1 %v124_v21  ;;  %v118_v23 = vsel %vm117_vm1, %v103_v14, 0.0  ;;  %v301_v24 = vsel %vm117_vm1, %v287_v18, 0.0  ;;  %v290_v25 = vadd.f32 %v413_v10, %v289_v22  ;;  %v106_v27 = vadd.f32 %v395_v8, %v105_v19 }
  0xe2   :  { %119 = vadd.xlane.f32.xlu0 %v118_v23  ;;  %v128_v26 = vsel %vm127_vm2, %v114_v17, 0.0  ;;  %v310_v32 = vsel %vm127_vm2, %v298_v28, 0.0 }
  0xe3   :  { %v304_v29 = vsel %vm117_vm1, %v290_v25, 0.0  ;;  %v121_v31 = vsel %vm117_vm1, %v106_v27, 0.0 }
  0xe5   :  { %129 = vadd.xlane.f32.xlu1 %v128_v26 }
  0xe6   :  { %302 = vadd.xlane.f32.xlu0 %v301_v24 }
  0xe9   :  { %305 = vadd.xlane.f32.xlu1 %v304_v29 }
  0xea   :  { %122 = vadd.xlane.f32.xlu0 %v121_v31 }
  0xed   :  { %311 = vadd.xlane.f32.xlu1 %v310_v32 }
  0xee   :  { %308 = vadd.xlane.f32.xlu0 %v307_v33 }
 0x16e   :  { %v126_v34 = vpop.xlane.xlu1 %125 }
 0x16f   :  { %v134_v35 = vmul.f32 0.125, %v126_v34  ;;  %v120_v36 = vpop.xlane.xlu0 %119  ;;  %v403_v34 = vld [vmem:[%s673_s4] ss:$0 sm:$0xff] }
 0x170   :  { %v132_v37 = vmul.f32 0.125, %v120_v36 }
 0x171   :  { %v553_v38 = vsub.f32 %v111_v11, %v134_v35 }
 0x172   :  { %v555_v39 = vsub.f32 %v103_v14, %v132_v37  ;;  %v130_v40 = vpop.xlane.xlu1 %129 }
 0x173   :  { %v135_v41 = vmul.f32 0.125, %v130_v40  ;;  %v303_v42 = vpop.xlane.xlu0 %302  ;;  %v142_v43 = vmul.f32 %v553_v38, %v553_v38 }
 0x174   :  { %v313_v44 = vmul.f32 0.125, %v303_v42  ;;  %v140_v47 = vmul.f32 %v555_v39, %v555_v39 }
 0x175   :  { %v559_v45 = vsub.f32 %v114_v17, %v135_v41  ;;  %v150_v46 = vsel %vm117_vm1, %v142_v43, 0.0  ;;  %v196_v41 = vld [vmem:[%s674_s5 + $0x10] sm:$0xff] }
 0x176   :  { %v564_v48 = vsub.f32 %v287_v18, %v313_v44  ;;  %v306_v49 = vpop.xlane.xlu1 %305  ;;  %151 = vadd.xlane.f32.xlu0 %v150_v46  ;;  %v144_v55 = vsel %vm117_vm1, %v140_v47, 0.0 }
 0x177   :  { %v314_v50 = vmul.f32 0.125, %v306_v49  ;;  %v123_v51 = vpop.xlane.xlu0 %122  ;;  %v143_v52 = vmul.f32 %v559_v45, %v559_v45 }
 0x178   :  { %v133_v53 = vmul.f32 0.125, %v123_v51  ;;  %v321_v56 = vmul.f32 %v564_v48, %v564_v48  ;;  %v197_v51 = vld [vmem:[%s674_s5 + $0x18] sm:$0xf] }
 0x179   :  { %v153_v54 = vsel %vm127_vm2, %v143_v52, 0.0  ;;  %v572_v57 = vsub.f32 %v290_v25, %v314_v50 }
 0x17a   :  { %v574_v58 = vsub.f32 %v106_v27, %v133_v53  ;;  %154 = vadd.xlane.f32.xlu1 %v153_v54  ;;  %v312_v59 = vpop.xlane.xlu1 %311  ;;  %145 = vadd.xlane.f32.xlu0 %v144_v55  ;;  %v325_v0 = vsel %vm117_vm1, %v321_v56, 0.0  ;;  %v421_v53 = vld [vmem:[%s672_s3 + $0x1] ss:$0 sm:$0xff] }
 0x17b   :  { %v316_v60 = vmul.f32 0.125, %v312_v59  ;;  %v309_v61 = vpop.xlane.xlu0 %308  ;;  %v322_v4 = vmul.f32 %v572_v57, %v572_v57  ;;  %v423_v59 = vld [vmem:[%s673_s4 + $0x1] ss:$0 sm:$0xff] }
 0x17c   :  { %v315_v62 = vmul.f32 0.125, %v309_v61  ;;  %v141_v63 = vmul.f32 %v574_v58, %v574_v58 }
 0x17d   :  { %v579_v1 = vsub.f32 %v298_v28, %v316_v60  ;;  %v328_v6 = vsel %vm117_vm1, %v322_v4, 0.0 }
 0x17e   :  { %v581_v2 = vsub.f32 %v295_v30, %v315_v62  ;;  %326 = vadd.xlane.f32.xlu0 %v325_v0  ;;  %v147_v3 = vsel %vm117_vm1, %v141_v63, 0.0  ;;  %v402_v30 = vld [vmem:[%s672_s3] ss:$0 sm:$0xff] }
 0x17f   :  { %148 = vadd.xlane.f32.xlu1 %v147_v3  ;;  %v324_v8 = vmul.f32 %v579_v1, %v579_v1  ;;  %v424_v0 = vld [vmem:[%s674_s5 + $0x20] sm:$0xff] }
 0x180   :  { %v323_v5 = vmul.f32 %v581_v2, %v581_v2 }
 0x181   :  { %v334_v9 = vsel %vm127_vm2, %v324_v8, 0.0 }
 0x182   :  { %v331_v7 = vsel %vm117_vm1, %v323_v5, 0.0  ;;  %v195_v5 = vld [vmem:[%s674_s5 + $0x8] sm:$0xff] }
 0x183   :  { %329 = vadd.xlane.f32.xlu1 %v328_v6  ;;  %332 = vadd.xlane.f32.xlu0 %v331_v7 }
 0x187   :  { %335 = vadd.xlane.f32.xlu1 %v334_v9 }
 0x203   :  { %v152_v10 = vpop.xlane.xlu0 %151 }
 0x204   :  { %v158_v11 = vmul.f32 0.125, %v152_v10 }
 0x206   :  { %v162_v12 = vadd.f32 1e-05, %v158_v11 }
 0x207   :  { %v155_v13 = vpop.xlane.xlu1 %154  ;;  %v146_v14 = vpop.xlane.xlu0 %145 }
 0x208   :  { %464 = vrsqrt.f32 %v162_v12  ;;  %v159_v15 = vmul.f32 0.125, %v155_v13  ;;  %v156_v16 = vmul.f32 0.125, %v146_v14  ;;  %v425_v13 = vld [vmem:[%s674_s5 + $0x28] sm:$0xff] }
 0x20a   :  { %v163_v17 = vadd.f32 1e-05, %v159_v15  ;;  %v160_v18 = vadd.f32 1e-05, %v156_v16 }
 0x20b   :  { %v327_v19 = vpop.xlane.xlu0 %326 }
 0x20c   :  { %466 = vrsqrt.f32 %v163_v17  ;;  %v337_v20 = vmul.f32 0.125, %v327_v19  ;;  %v149_v21 = vpop.xlane.xlu1 %148 }
 0x20d   :  { %468 = vrsqrt.f32 %v160_v18  ;;  %v157_v22 = vmul.f32 0.125, %v149_v21 }
 0x20e   :  { %v341_v23 = vadd.f32 1e-05, %v337_v20  ;;  %v427_v20 = vld [vmem:[%s674_s5 + $0x38] sm:$0xf] }
 0x20f   :  { %v161_v24 = vadd.f32 1e-05, %v157_v22 }
 0x210   :  { %470 = vrsqrt.f32 %v341_v23  ;;  %v330_v25 = vpop.xlane.xlu1 %329  ;;  %v333_v26 = vpop.xlane.xlu0 %332 }
 0x211   :  { %472 = vrsqrt.f32 %v161_v24  ;;  %v338_v27 = vmul.f32 0.125, %v330_v25  ;;  %v339_v28 = vmul.f32 0.125, %v333_v26 }
 0x212   :  { %v465_v29 = vpop.eup %464 }
 0x213   :  { %v170_v31 = vmul.f32 %v465_v29, %v553_v38  ;;  %v342_v32 = vadd.f32 1e-05, %v338_v27  ;;  %v343_v33 = vadd.f32 1e-05, %v339_v28 }
 0x214   :  { %v336_v35 = vpop.xlane.xlu1 %335 }
 0x215   :  { %v181_v36 = vmul.f32 %v402_v30, %v170_v31  ;;  %474 = vrsqrt.f32 %v342_v32  ;;  %v340_v37 = vmul.f32 0.125, %v336_v35 }
 0x216   :  { %v467_v40 = vpop.eup %466  ;;  %476 = vrsqrt.f32 %v343_v33 }
 0x217   :  { %v469_v42 = vpop.eup %468  ;;  %v192_v43 = vadd.f32 %v403_v34, %v181_v36  ;;  %v171_v38 = vmul.f32 %v467_v40, %v559_v45  ;;  %v344_v44 = vadd.f32 1e-05, %v340_v37  ;;  %v194_v45 = vld [vmem:[%s674_s5] sm:$0xff] }
 0x218   :  { %v168_v46 = vmul.f32 %v469_v42, %v555_v39 }
 0x219   :  { %v200_v47 = vadd.f32 %v196_v41, %v192_v43  ;;  %v182_v49 = vmul.f32 %v402_v30, %v171_v38  ;;  %478 = vrsqrt.f32 %v344_v44 }
 0x21a   :  { %v471_v50 = vpop.eup %470  ;;  %v179_v52 = vmul.f32 %v402_v30, %v168_v46 }
 0x21b   :  { %v473_v54 = vpop.eup %472  ;;  %204 = vst.msk [vmem:[%s675_s6 + $0x10] sm:$0xff] %vm117_vm1, %v200_v47  ;;  %v193_v39 = vadd.f32 %v403_v34, %v182_v49  ;;  %v349_v55 = vmul.f32 %v471_v50, %v564_v48 }
 0x21c   :  { %v190_v56 = vadd.f32 %v403_v34, %v179_v52  ;;  %v169_v60 = vmul.f32 %v473_v54, %v574_v58 }
 0x21d   :  { %v201_v61 = vadd.f32 %v197_v51, %v193_v39  ;;  %v361_v62 = vmul.f32 %v421_v53, %v349_v55 }
 0x21e   :  { %v198_v63 = vadd.f32 %v194_v45, %v190_v56  ;;  %v180_v3 = vmul.f32 %v402_v30, %v169_v60 }
 0x21f   :  { %v475_v4 = vpop.eup %474  ;;  %205 = vst.msk [vmem:[%s675_s6 + $0x18] sm:$0xf] %vm127_vm2, %v201_v61  ;;  %v373_v48 = vadd.f32 %v423_v59, %v361_v62 }
 0x220   :  { %v477_v58 = vpop.eup %476  ;;  %202 = vst.msk [vmem:[%s675_s6] sm:$0xff] %vm117_vm1, %v198_v63  ;;  %v191_v6 = vadd.f32 %v403_v34, %v180_v3  ;;  %v350_v7 = vmul.f32 %v475_v4, %v572_v57 }
 0x221   :  { %v382_v8 = vadd.f32 %v424_v0, %v373_v48  ;;  %v351_v9 = vmul.f32 %v477_v58, %v581_v2  ;;  %v426_v2 = vld [vmem:[%s674_s5 + $0x30] sm:$0xff] }
 0x222   :  { %v199_v10 = vadd.f32 %v195_v5, %v191_v6  ;;  %v362_v11 = vmul.f32 %v421_v53, %v350_v7 }
 0x223   :  { %v479_v12 = vpop.eup %478  ;;  %428 = vst.msk [vmem:[%s675_s6 + $0x20] sm:$0xff] %vm117_vm1, %v382_v8  ;;  %v363_v14 = vmul.f32 %v421_v53, %v351_v9 }
 0x224   :  { %203 = vst.msk [vmem:[%s675_s6 + $0x8] sm:$0xff] %vm117_vm1, %v199_v10  ;;  %v374_v57 = vadd.f32 %v423_v59, %v362_v11  ;;  %v352_v15 = vmul.f32 %v479_v12, %v579_v1 }
 0x225   :  { %v375_v16 = vadd.f32 %v423_v59, %v363_v14 }
 0x226   :  { %v383_v17 = vadd.f32 %v425_v13, %v374_v57  ;;  %v364_v18 = vmul.f32 %v421_v53, %v352_v15 }
 0x227   :  { %v384_v19 = vadd.f32 %v426_v2, %v375_v16 }
 0x228   :  { %429 = vst.msk [vmem:[%s675_s6 + $0x28] sm:$0xff] %vm117_vm1, %v383_v17  ;;  %v376_v21 = vadd.f32 %v423_v59, %v364_v18 }
 0x229   :  { %430 = vst.msk [vmem:[%s675_s6 + $0x30] sm:$0xff] %vm117_vm1, %v384_v19 }
 0x22a   :  { %v385_v1 = vadd.f32 %v427_v20, %v376_v21 }
 0x22c   :  { %431 = vst.msk [vmem:[%s675_s6 + $0x38] sm:$0xf] %vm127_vm2, %v385_v1 }

// kernel: squeeze.24
= control target key start
LH: loop header
LB: loop body
LE: loop exit
PB: predicated region body
PF: predicated region fallthrough
CT: control target
= control target key end

     0   :  { %vm3_vm0 = vcmask 56320   ;;  %s172_s8 = smov 107   ;;  %s173_s9 = smov 114   ;;  %s251_s0 = inlined_call_operand.vmem [shape: f32[1,28,8], index: 0, kind: input, shape index: {}]   ;;  %s252_s1 = inlined_call_operand.vmem [shape: f32[2,2,7,8], index: 1, kind: output, shape index: {}]  }
   0x1   :  { %v8_v0 = vld [vmem:[%s251_s0] sm:$0xff]   ;;  %s171_s0 = smov 121  }
   0x2   :  { %9 = vrot.lane.b32.xlu0 %v8_v0, %s171_s0  ;;  %33 = vrot.lane.b32.xlu1 %v8_v0, %s172_s8  ;;  %4 = vst.msk [vmem:[#allocation0] ss:$16 sm:$0x3] %vm3_vm0, %v8_v0   ;;  %5 = vst.msk [vmem:[#allocation0] ss:$16 sm:$0xc] %vm3_vm0, %v8_v0  }
   0x3   :  { %6 = vst.msk [vmem:[#allocation0] ss:$16 sm:$0x30] %vm3_vm0, %v8_v0   ;;  %7 = vst.msk [vmem:[#allocation0] ss:$16 sm:$0xc0] %vm3_vm0, %v8_v0  }
   0x6   :  { %21 = vrot.lane.b32.xlu0 %v8_v0, %s173_s9 }
  0x74   :  { %v10_v1 = vpop.permute.xlu0 %9   ;;  %v34_v2 = vpop.permute.xlu1 %33  }
  0x75   :  { %13 = vst.msk [vmem:[#allocation0 + $0x1] ss:$16 sm:$0x3] %vm3_vm0, %v10_v1   ;;  %15 = vst.msk [vmem:[#allocation0 + $0x1] ss:$16 sm:$0xc] %vm3_vm0, %v10_v1  }
  0x76   :  { %17 = vst.msk [vmem:[#allocation0 + $0x1] ss:$16 sm:$0x30] %vm3_vm0, %v10_v1   ;;  %19 = vst.msk [vmem:[#allocation0 + $0x1] ss:$16 sm:$0xc0] %vm3_vm0, %v10_v1  }
  0x77   :  { %37 = vst.msk [vmem:[#allocation0 + $0x9] ss:$16 sm:$0x3] %vm3_vm0, %v34_v2   ;;  %39 = vst.msk [vmem:[#allocation0 + $0x9] ss:$16 sm:$0xc] %vm3_vm0, %v34_v2  }
  0x78   :  { %41 = vst.msk [vmem:[#allocation0 + $0x9] ss:$16 sm:$0x30] %vm3_vm0, %v34_v2   ;;  %43 = vst.msk [vmem:[#allocation0 + $0x9] ss:$16 sm:$0xc0] %vm3_vm0, %v34_v2   ;;  %v22_v3 = vpop.permute.xlu0 %21  }
  0x79   :  { %25 = vst.msk [vmem:[#allocation0 + $0x8] ss:$16 sm:$0x3] %vm3_vm0, %v22_v3   ;;  %27 = vst.msk [vmem:[#allocation0 + $0x8] ss:$16 sm:$0xc] %vm3_vm0, %v22_v3  }
  0x7a   :  { %29 = vst.msk [vmem:[#allocation0 + $0x8] ss:$16 sm:$0x30] %vm3_vm0, %v22_v3   ;;  %31 = vst.msk [vmem:[#allocation0 + $0x8] ss:$16 sm:$0xc0] %vm3_vm0, %v22_v3  }
  0x7c   :  { %v47_v4 = vld [vmem:[#allocation0] sm:$0x3]  ;;  %v56_v5 = vld [vmem:[#allocation0 + $0x10] sm:$0x3] }
  0x7d   :  { %v68_v6 = vld [vmem:[#allocation0 + $0x20] sm:$0x3]  ;;  %49 = vst [vmem:[%s252_s1] sm:$0x3] %v47_v4  ;;  %154 = vst [vmem:[%s252_s1 + $0x4] sm:$0x3] %v56_v5 }
  0x7e   :  { %156 = vst [vmem:[%s252_s1 + $0x8] sm:$0x3] %v68_v6  ;;  %v80_v7 = vld [vmem:[#allocation0 + $0x30] sm:$0x3]  ;;  %v92_v8 = vld [vmem:[#allocation0 + $0x40] sm:$0x3] }
  0x7f   :  { %v104_v9 = vld [vmem:[#allocation0 + $0x50] sm:$0x3]  ;;  %158 = vst [vmem:[%s252_s1 + $0xc] sm:$0x3] %v80_v7  ;;  %160 = vst [vmem:[%s252_s1 + $0x10] sm:$0x3] %v92_v8 }
  0x80   :  { %162 = vst [vmem:[%s252_s1 + $0x14] sm:$0x3] %v104_v9  ;;  %v116_v10 = vld [vmem:[#allocation0 + $0x60] sm:$0x3]  ;;  %v128_v11 = vld [vmem:[#allocation0 + $0x70] sm:$0x3] }
  0x81   :  { %164 = vst [vmem:[%s252_s1 + $0x18] sm:$0x3] %v116_v10  ;;  %166 = vst [vmem:[%s252_s1 + $0x1c] sm:$0x3] %v128_v11  ;;  %v51_v12 = vld [vmem:[#allocation0 + $0x8] sm:$0x3] }
  0x82   :  { %v62_v13 = vld [vmem:[#allocation0 + $0x18] sm:$0x3]  ;;  %v74_v14 = vld [vmem:[#allocation0 + $0x28] sm:$0x3]  ;;  %153 = vst [vmem:[%s252_s1 + $0x2] sm:$0x3] %v51_v12 }
  0x83   :  { %155 = vst [vmem:[%s252_s1 + $0x6] sm:$0x3] %v62_v13  ;;  %157 = vst [vmem:[%s252_s1 + $0xa] sm:$0x3] %v74_v14  ;;  %v86_v15 = vld [vmem:[#allocation0 + $0x38] sm:$0x3] }
  0x84   :  { %v98_v16 = vld [vmem:[#allocation0 + $0x48] sm:$0x3]  ;;  %v110_v17 = vld [vmem:[#allocation0 + $0x58] sm:$0x3]  ;;  %159 = vst [vmem:[%s252_s1 + $0xe] sm:$0x3] %v86_v15 }
  0x85   :  { %161 = vst [vmem:[%s252_s1 + $0x12] sm:$0x3] %v98_v16  ;;  %163 = vst [vmem:[%s252_s1 + $0x16] sm:$0x3] %v110_v17  ;;  %v122_v18 = vld [vmem:[#allocation0 + $0x68] sm:$0x3] }
  0x86   :  { %v134_v19 = vld [vmem:[#allocation0 + $0x78] sm:$0x3]  ;;  %165 = vst [vmem:[%s252_s1 + $0x1a] sm:$0x3] %v122_v18 }
  0x87   :  { %167 = vst [vmem:[%s252_s1 + $0x1e] sm:$0x3] %v134_v19 }

// kernel: forward.31
= control target key start
LH: loop header
LB: loop body
LE: loop exit
PB: predicated region body
PF: predicated region fallthrough
CT: control target
= control target key end

     0   :  { %vm47_vm0 = vcmask 130048   ;;  %v844_v1 = vmov 0.0   ;;  %vm845_vm1 = vmmov 0   ;;  %v846_v6 = vmov 0   ;;  %s848_s24 = smov 32   ;;  %s1026_s1 = inlined_call_operand.vmem [shape: bf16[16,128], index: 1, kind: input, shape index: {}]   ;;  %s1027_s0 = inlined_call_operand.vmem [shape: bf16[28,16], index: 0, kind: input, shape index: {}]   ;;  %s1028_s2 = inlined_call_operand.vmem [shape: bf16[32,128], index: 2, kind: input, shape index: {}]   ;;  %s1029_s3 = inlined_call_operand.vmem [shape: f32[1,128], index: 3, kind: input, shape index: {}]   ;;  %s1030_s4 = inlined_call_operand.vmem [shape: f32[28,32], index: 4, kind: output, shape index: {}]  }
   0x1   :  { %v783_v0 = vld [vmem:[%s1026_s1] sm:$0xff]   ;;  %722 = vmatprep.subr.bf16.mxu1 %v844_v1  ;;  %726 = vmatprep.mubr.msk.bf16.mxu1 %vm845_vm1, %v844_v1  ;;  %v785_v3 = vld [vmem:[%s1027_s0 + $0x8] sm:$0x3f]   ;;  %vm124_vm2 = vcmask 261120   ;;  %vm197_vm3 = vcmask 257024  }
   0x2   :  { %v784_v2 = vld [vmem:[%s1027_s0] sm:$0xff]   ;;  %716 = vmatprep.subr.bf16.mxu0 %v783_v0  ;;  %v896_v5 = vld [vmem:[%s1028_s2 + $0x8] sm:$0xff]  }
   0x3   :  { %717 = vmatpush3.bf16.msra.mxu0 %v783_v0  ;;  %718 = vmatprep.mubr.msk.bf16.mxu0 %vm47_vm0, %v784_v2  ;;  %v889_v4 = vld [vmem:[%s1028_s2] sm:$0xff]  }
   0x4   :  { %730 = vmatprep.subr.bf16.mxu0 %v844_v1  ;;  %723 = vmatpush3.bf16.msra.mxu1 %v889_v4  ;;  %v671_v7 = vld [vmem:[%s1029_s3] ss:$0 sm:$0xff]  ;;  %s847_s3 = smov 64  }
   0x5   :  { %724 = vmatprep.subr.bf16.mxu1 %v844_v1 }
   0x6   :  { %719 = vmatmul.mubr.msk.bf16.vlgmr.msra.gmra.mrb[0].mxu0 %vm47_vm0, %v785_v3 }
   0x7   :  { %731 = vmatpush3.bf16.msra.mxu0 %v889_v4  ;;  %734 = vmatprep.mubr.msk.bf16.mxu0 %vm845_vm1, %v844_v1 }
   0x8   :  { %732 = vmatprep.subr.bf16.mxu0 %v844_v1  ;;  %725 = vmatpush3.bf16.msra.mxu1 %v896_v5 }
   0x9   :  { %738 = vmatprep.subr.bf16.mxu1 %v844_v1 }
   0xb   :  { %733 = vmatpush3.bf16.msra.mxu0 %v896_v5  ;;  %727 = vmatmul.mubr.bf16.vlgmr.msra.gmra.mrb[0].mxu1 %v846_v6 }
   0xc   :  { %746 = vmatprep.subr.bf16.mxu0 %v844_v1  ;;  %739 = vmatpush3.bf16.msra.mxu1 %v889_v4 }
   0xd   :  { %742 = vmatprep.mubr.msk.bf16.mxu1 %vm845_vm1, %v844_v1  ;;  %740 = vmatprep.subr.bf16.mxu1 %v844_v1 }
  0x10   :  { %741 = vmatpush3.bf16.msra.mxu1 %v896_v5 }
  0x11   :  { %754 = vmatprep.subr.bf16.mxu1 %v844_v1 }
  0xd9   :  { %v720_v8 = vpop.f32.mrb[0].mxu0 }
  0xda   :  { %v97_v9 = vadd.f32 %v720_v8, %v671_v7  ;;  %v88_v10 = vpop.f32.mrb[1].mxu0 }
  0xdb   :  { %v89_v11 = vadd.f32 %v671_v7, %v88_v10  ;;  %v721_v12 = vpop.f32.mrb[2].mxu0 }
  0xdc   :  { %105 = vst [vmem:[#allocation2 + $0x10] sm:$0xff] %v97_v9  ;;  %v100_v13 = vadd.f32 %v721_v12, %v671_v7  ;;  %v91_v14 = vpop.f32.mrb[3].mxu0 }
  0xdd   :  { %103 = vst [vmem:[#allocation2] sm:$0xff] %v89_v11  ;;  %v92_v15 = vadd.f32 %v671_v7, %v91_v14 }
  0xde   :  { %106 = vst [vmem:[#allocation2 + $0x18] sm:$0xf] %v100_v13  ;;  %v162_v16 = vpop.f32.mrb[0].mxu1 }
  0xdf   :  { %104 = vst [vmem:[#allocation2 + $0x8] sm:$0xff] %v92_v15  ;;  %v728_v17 = vpop.f32.mrb[1].mxu1 }
  0xe0   :  { %v165_v18 = vpop.f32.mrb[2].mxu1 }
  0xe1   :  { %v729_v19 = vpop.f32.mrb[3].mxu1 }
  0xe4   :  { %v111_v20 = vld [vmem:[#allocation2] sm:$0xf]  ;;  %v199_v37 = vld [vmem:[#allocation2 + $0x4] sm:$0xf] }
  0xe5   :  { %v168_v21 = vadd.f32 %v162_v16, %v111_v20 }
  0xe6   :  { %v277_v58 = vld [vmem:[#allocation2 + $0x8] sm:$0xf]  ;;  %v355_v18 = vld [vmem:[#allocation2 + $0xc] sm:$0xf] }
  0xe7   :  { %788 = vtanh.f32 %v168_v21  ;;  %v679_v23 = vmul.f32 -1.442695, %v168_v21 }
  0xe9   :  { %790 = vpow2.f32 %v679_v23 }
  0xf1   :  { %v789_v22 = vpop.eup %788 }
  0xf2   :  { %178 = vrot.lane.b32.xlu0 %v789_v22, %s847_s3 }
  0xf3   :  { %v791_v24 = vpop.eup %790 }
  0xf4   :  { %v172_v25 = vadd.f32 1.0, %v791_v24 }
  0xf6   :  { %792 = vrcp.f32 %v172_v25 }
 0x100   :  { %v793_v26 = vpop.eup %792 }
 0x101   :  { %v176_v29 = vmul.f32 0.0, %v793_v26 }
 0x164   :  { %v179_v27 = vpop.permute.xlu0 %178 }
 0x165   :  { %v181_v28 = vmul.f32 %v793_v26, %v179_v27 }
 0x167   :  { %183 = vrot.lane.b32.xlu0 %v181_v28, %s848_s24 }
 0x1d9   :  { %v184_v30 = vpop.permute.xlu0 %183 }
 0x1da   :  { %v186_v31 = vadd.f32 %v184_v30, %v176_v29 }
 0x1dc   :  { %794 = vtanh.f32 %v186_v31 }
 0x1e6   :  { %v795_v32 = vpop.eup %794 }
 0x1e7   :  { %189 = vrot.lane.b32.xlu1 %v795_v32, %s847_s3 }
 0x259   :  { %v190_v33 = vpop.permute.xlu1 %189 }
 0x25a   :  { %v919_v34 = vmul.f32 %v793_v26, %v190_v33 }
 0x25c   :  { %v200_v35 = vpack.c.bf16 %v919_v34, %v919_v34 }
 0x25e   :  { %202 = vrot.lane.b32.xlu1 %v200_v35, %s848_s24 }
 0x2d0   :  { %v203_v36 = vpop.permute.xlu1 %202 }
 0x2d1   :  { %735 = vmatmul.mubr.msk.bf16.vlgmr.msra.gmra.mrb[4].mxu0 %vm124_vm2, %v203_v36 }
 0x2d2   :  { %747 = vmatpush3.bf16.msra.mxu0 %v889_v4  ;;  %750 = vmatprep.mubr.msk.bf16.mxu0 %vm845_vm1, %v844_v1 }
 0x2d3   :  { %748 = vmatprep.subr.bf16.mxu0 %v844_v1 }
 0x2d6   :  { %749 = vmatpush3.bf16.msra.mxu0 %v896_v5 }
 0x2d7   :  { %762 = vmatprep.subr.bf16.mxu0 %v844_v1 }
 0x3a4   :  { %v241_v38 = vpop.f32.mrb[4].mxu0 }
 0x3a5   :  { %v247_v39 = vadd.f32 %v241_v38, %v199_v37  ;;  %v736_v40 = vpop.f32.mrb[5].mxu0 }
 0x3a6   :  { %v244_v41 = vpop.f32.mrb[6].mxu0  ;;  %v433_v40 = vld [vmem:[#allocation2 + $0x10] sm:$0xf] }
 0x3a7   :  { %796 = vtanh.f32 %v247_v39  ;;  %v737_v42 = vpop.f32.mrb[7].mxu0  ;;  %v681_v44 = vmul.f32 -1.442695, %v247_v39 }
 0x3a9   :  { %798 = vpow2.f32 %v681_v44 }
 0x3b1   :  { %v797_v43 = vpop.eup %796 }
 0x3b2   :  { %257 = vrot.lane.b32.xlu0 %v797_v43, %s847_s3 }
 0x3b3   :  { %v799_v45 = vpop.eup %798 }
 0x3b4   :  { %v251_v46 = vadd.f32 1.0, %v799_v45 }
 0x3b6   :  { %800 = vrcp.f32 %v251_v46 }
 0x3c0   :  { %v801_v47 = vpop.eup %800 }
 0x3c1   :  { %v255_v50 = vmul.f32 %v801_v47, %v186_v31 }
 0x424   :  { %v258_v48 = vpop.permute.xlu0 %257 }
 0x425   :  { %v260_v49 = vmul.f32 %v801_v47, %v258_v48 }
 0x427   :  { %262 = vrot.lane.b32.xlu1 %v260_v49, %s848_s24 }
 0x499   :  { %v263_v51 = vpop.permute.xlu1 %262 }
 0x49a   :  { %v265_v52 = vadd.f32 %v263_v51, %v255_v50 }
 0x49c   :  { %802 = vtanh.f32 %v265_v52 }
 0x4a6   :  { %v803_v53 = vpop.eup %802 }
 0x4a7   :  { %268 = vrot.lane.b32.xlu0 %v803_v53, %s847_s3 }
 0x519   :  { %v269_v54 = vpop.permute.xlu0 %268 }
 0x51a   :  { %v934_v55 = vmul.f32 %v801_v47, %v269_v54 }
 0x51c   :  { %v278_v56 = vpack.c.bf16 %v934_v55, %v934_v55 }
 0x51e   :  { %280 = vrot.lane.b32.xlu1 %v278_v56, %s848_s24 }
 0x590   :  { %v281_v57 = vpop.permute.xlu1 %280 }
 0x591   :  { %743 = vmatmul.mubr.msk.bf16.vlgmr.msra.gmra.mrb[4].mxu1 %vm124_vm2, %v281_v57 }
 0x592   :  { %755 = vmatpush3.bf16.msra.mxu1 %v889_v4  ;;  %758 = vmatprep.mubr.msk.bf16.mxu1 %vm845_vm1, %v844_v1 }
 0x593   :  { %756 = vmatprep.subr.bf16.mxu1 %v844_v1 }
 0x596   :  { %757 = vmatpush3.bf16.msra.mxu1 %v896_v5 }
 0x597   :  { %770 = vmatprep.subr.bf16.mxu1 %v844_v1 }
 0x664   :  { %v319_v59 = vpop.f32.mrb[4].mxu1 }
 0x665   :  { %v325_v60 = vadd.f32 %v319_v59, %v277_v58  ;;  %v744_v61 = vpop.f32.mrb[5].mxu1  ;;  %v511_v59 = vld [vmem:[#allocation2 + $0x14] sm:$0xf] }
 0x666   :  { %v322_v62 = vpop.f32.mrb[6].mxu1 }
 0x667   :  { %804 = vtanh.f32 %v325_v60  ;;  %v745_v63 = vpop.f32.mrb[7].mxu1  ;;  %v683_v2 = vmul.f32 -1.442695, %v325_v60 }
 0x669   :  { %806 = vpow2.f32 %v683_v2 }
 0x671   :  { %v805_v0 = vpop.eup %804 }
 0x672   :  { %335 = vrot.lane.b32.xlu0 %v805_v0, %s847_s3 }
 0x673   :  { %v807_v3 = vpop.eup %806 }
 0x674   :  { %v329_v6 = vadd.f32 1.0, %v807_v3 }
 0x676   :  { %808 = vrcp.f32 %v329_v6 }
 0x680   :  { %v809_v7 = vpop.eup %808 }
 0x681   :  { %v333_v10 = vmul.f32 %v809_v7, %v265_v52 }
 0x6e4   :  { %v336_v8 = vpop.permute.xlu0 %335 }
 0x6e5   :  { %v338_v9 = vmul.f32 %v809_v7, %v336_v8 }
 0x6e7   :  { %340 = vrot.lane.b32.xlu1 %v338_v9, %s848_s24 }
 0x759   :  { %v341_v11 = vpop.permute.xlu1 %340 }
 0x75a   :  { %v343_v12 = vadd.f32 %v341_v11, %v333_v10 }
 0x75c   :  { %810 = vtanh.f32 %v343_v12 }
 0x766   :  { %v811_v13 = vpop.eup %810 }
 0x767   :  { %346 = vrot.lane.b32.xlu0 %v811_v13, %s847_s3 }
 0x7d9   :  { %v347_v14 = vpop.permute.xlu0 %346 }
 0x7da   :  { %v949_v15 = vmul.f32 %v809_v7, %v347_v14 }
 0x7dc   :  { %v356_v16 = vpack.c.bf16 %v949_v15, %v949_v15 }
 0x7de   :  { %358 = vrot.lane.b32.xlu1 %v356_v16, %s848_s24 }
 0x850   :  { %v359_v17 = vpop.permute.xlu1 %358 }
 0x851   :  { %751 = vmatmul.mubr.msk.bf16.vlgmr.msra.gmra.mrb[8].mxu0 %vm124_vm2, %v359_v17 }
 0x852   :  { %763 = vmatpush3.bf16.msra.mxu0 %v889_v4  ;;  %766 = vmatprep.mubr.msk.bf16.mxu0 %vm845_vm1, %v844_v1 }
 0x853   :  { %764 = vmatprep.subr.bf16.mxu0 %v844_v1 }
 0x856   :  { %765 = vmatpush3.bf16.msra.mxu0 %v896_v5 }
 0x924   :  { %v397_v19 = vpop.f32.mrb[8].mxu0 }
 0x925   :  { %v403_v20 = vadd.f32 %v397_v19, %v355_v18  ;;  %v752_v21 = vpop.f32.mrb[9].mxu0 }
 0x926   :  { %v400_v22 = vpop.f32.mrb[10].mxu0 }
 0x927   :  { %812 = vtanh.f32 %v403_v20  ;;  %v753_v23 = vpop.f32.mrb[11].mxu0  ;;  %v685_v25 = vmul.f32 -1.442695, %v403_v20  ;;  %v589_v20 = vld [vmem:[#allocation2 + $0x18] sm:$0xf] }
 0x929   :  { %814 = vpow2.f32 %v685_v25 }
 0x931   :  { %v813_v24 = vpop.eup %812 }
 0x932   :  { %413 = vrot.lane.b32.xlu0 %v813_v24, %s847_s3 }
 0x933   :  { %v815_v26 = vpop.eup %814 }
 0x934   :  { %v407_v27 = vadd.f32 1.0, %v815_v26 }
 0x936   :  { %816 = vrcp.f32 %v407_v27 }
 0x940   :  { %v817_v28 = vpop.eup %816 }
 0x941   :  { %v411_v31 = vmul.f32 %v817_v28, %v343_v12 }
 0x9a4   :  { %v414_v29 = vpop.permute.xlu0 %413 }
 0x9a5   :  { %v416_v30 = vmul.f32 %v817_v28, %v414_v29 }
 0x9a7   :  { %418 = vrot.lane.b32.xlu1 %v416_v30, %s848_s24 }
 0xa19   :  { %v419_v32 = vpop.permute.xlu1 %418 }
 0xa1a   :  { %v421_v33 = vadd.f32 %v419_v32, %v411_v31 }
 0xa1c   :  { %818 = vtanh.f32 %v421_v33 }
 0xa26   :  { %v819_v35 = vpop.eup %818 }
 0xa27   :  { %424 = vrot.lane.b32.xlu0 %v819_v35, %s847_s3 }
 0xa99   :  { %v425_v36 = vpop.permute.xlu0 %424 }
 0xa9a   :  { %v963_v37 = vmul.f32 %v817_v28, %v425_v36 }
 0xa9c   :  { %v434_v38 = vpack.c.bf16 %v963_v37, %v963_v37 }
 0xa9e   :  { %436 = vrot.lane.b32.xlu1 %v434_v38, %s848_s24 }
 0xb10   :  { %v437_v39 = vpop.permute.xlu1 %436 }
 0xb11   :  { %759 = vmatmul.mubr.msk.bf16.vlgmr.msra.gmra.mrb[8].mxu1 %vm124_vm2, %v437_v39 }
 0xb12   :  { %771 = vmatpush3.bf16.msra.mxu1 %v889_v4  ;;  %774 = vmatprep.mubr.msk.bf16.mxu1 %vm845_vm1, %v844_v1 }
 0xb13   :  { %772 = vmatprep.subr.bf16.mxu1 %v844_v1 }
 0xb16   :  { %773 = vmatpush3.bf16.msra.mxu1 %v896_v5 }
 0xbe4   :  { %v475_v41 = vpop.f32.mrb[8].mxu1 }
 0xbe5   :  { %v481_v42 = vadd.f32 %v475_v41, %v433_v40  ;;  %v760_v43 = vpop.f32.mrb[9].mxu1 }
 0xbe6   :  { %v478_v44 = vpop.f32.mrb[10].mxu1 }
 0xbe7   :  { %820 = vtanh.f32 %v481_v42  ;;  %v761_v45 = vpop.f32.mrb[11].mxu1  ;;  %v687_v47 = vmul.f32 -1.442695, %v481_v42 }
 0xbe9   :  { %822 = vpow2.f32 %v687_v47 }
 0xbf1   :  { %v821_v46 = vpop.eup %820 }
 0xbf2   :  { %491 = vrot.lane.b32.xlu0 %v821_v46, %s847_s3 }
 0xbf3   :  { %v823_v4 = vpop.eup %822 }
 0xbf4   :  { %v485_v48 = vadd.f32 1.0, %v823_v4 }
 0xbf6   :  { %824 = vrcp.f32 %v485_v48 }
 0xc00   :  { %v825_v49 = vpop.eup %824 }
 0xc01   :  { %v489_v5 = vmul.f32 %v825_v49, %v421_v33 }
 0xc64   :  { %v492_v50 = vpop.permute.xlu0 %491 }
 0xc65   :  { %v494_v1 = vmul.f32 %v825_v49, %v492_v50 }
 0xc67   :  { %496 = vrot.lane.b32.xlu1 %v494_v1, %s848_s24 }
 0xcd9   :  { %v497_v51 = vpop.permute.xlu1 %496 }
 0xcda   :  { %v499_v52 = vadd.f32 %v497_v51, %v489_v5 }
 0xcdc   :  { %826 = vtanh.f32 %v499_v52 }
 0xce6   :  { %v827_v53 = vpop.eup %826 }
 0xce7   :  { %502 = vrot.lane.b32.xlu0 %v827_v53, %s847_s3 }
 0xd59   :  { %v503_v54 = vpop.permute.xlu0 %502 }
 0xd5a   :  { %v505_v56 = vmul.f32 %v825_v49, %v503_v54 }
 0xd5c   :  { %v512_v57 = vpack.c.bf16 %v505_v56, %v505_v56 }
 0xd5e   :  { %514 = vrot.lane.b32.xlu1 %v512_v57, %s848_s24 }
 0xdd0   :  { %v515_v58 = vpop.permute.xlu1 %514 }
 0xdd1   :  { %767 = vmatmul.mubr.msk.bf16.vlgmr.msra.gmra.mrb[12].mxu0 %vm124_vm2, %v515_v58 }
 0xea4   :  { %v553_v60 = vpop.f32.mrb[12].mxu0 }
 0xea5   :  { %v559_v61 = vadd.f32 %v553_v60, %v511_v59  ;;  %v768_v62 = vpop.f32.mrb[13].mxu0 }
 0xea6   :  { %v556_v63 = vpop.f32.mrb[14].mxu0 }
 0xea7   :  { %828 = vtanh.f32 %v559_v61  ;;  %v769_v0 = vpop.f32.mrb[15].mxu0  ;;  %v689_v3 = vmul.f32 -1.442695, %v559_v61 }
 0xea9   :  { %830 = vpow2.f32 %v689_v3 }
 0xeb1   :  { %v829_v2 = vpop.eup %828 }
 0xeb2   :  { %569 = vrot.lane.b32.xlu0 %v829_v2, %s847_s3 }
 0xeb3   :  { %v831_v6 = vpop.eup %830 }
 0xeb4   :  { %v563_v7 = vadd.f32 1.0, %v831_v6 }
 0xeb6   :  { %832 = vrcp.f32 %v563_v7 }
 0xec0   :  { %v833_v8 = vpop.eup %832 }
 0xec1   :  { %v567_v11 = vmul.f32 %v833_v8, %v499_v52 }
 0xf24   :  { %v570_v9 = vpop.permute.xlu0 %569 }
 0xf25   :  { %v572_v10 = vmul.f32 %v833_v8, %v570_v9 }
 0xf27   :  { %574 = vrot.lane.b32.xlu1 %v572_v10, %s848_s24 }
 0xf99   :  { %v575_v12 = vpop.permute.xlu1 %574 }
 0xf9a   :  { %v577_v13 = vadd.f32 %v575_v12, %v567_v11 }
 0xf9c   :  { %834 = vtanh.f32 %v577_v13 }
 0xfa6   :  { %v835_v14 = vpop.eup %834 }
 0xfa7   :  { %580 = vrot.lane.b32.xlu0 %v835_v14, %s847_s3 }
0x1019   :  { %v581_v16 = vpop.permute.xlu0 %580 }
0x101a   :  { %v583_v17 = vmul.f32 %v833_v8, %v581_v16 }
0x101c   :  { %v590_v18 = vpack.c.bf16 %v583_v17, %v583_v17 }
0x101e   :  { %592 = vrot.lane.b32.xlu1 %v590_v18, %s848_s24 }
0x1090   :  { %v593_v19 = vpop.permute.xlu1 %592 }
0x1091   :  { %775 = vmatmul.mubr.msk.bf16.vlgmr.msra.gmra.mrb[12].mxu1 %vm124_vm2, %v593_v19 }
0x1164   :  { %v631_v21 = vpop.f32.mrb[12].mxu1 }
0x1165   :  { %v637_v22 = vadd.f32 %v631_v21, %v589_v20  ;;  %v776_v23 = vpop.f32.mrb[13].mxu1 }
0x1166   :  { %v634_v24 = vpop.f32.mrb[14].mxu1 }
0x1167   :  { %836 = vtanh.f32 %v637_v22  ;;  %v777_v25 = vpop.f32.mrb[15].mxu1  ;;  %v691_v27 = vmul.f32 -1.442695, %v637_v22 }
0x1169   :  { %838 = vpow2.f32 %v691_v27 }
0x1171   :  { %v837_v26 = vpop.eup %836 }
0x1172   :  { %647 = vrot.lane.b32.xlu0 %v837_v26, %s847_s3 }
0x1173   :  { %v839_v28 = vpop.eup %838 }
0x1174   :  { %v641_v29 = vadd.f32 1.0, %v839_v28 }
0x1176   :  { %840 = vrcp.f32 %v641_v29 }
0x1180   :  { %v841_v30 = vpop.eup %840 }
0x1181   :  { %v645_v33 = vmul.f32 %v841_v30, %v577_v13 }
0x11e4   :  { %v648_v31 = vpop.permute.xlu0 %647 }
0x11e5   :  { %v650_v32 = vmul.f32 %v841_v30, %v648_v31 }
0x11e7   :  { %652 = vrot.lane.b32.xlu1 %v650_v32, %s848_s24 }
0x11eb   :  { %194 = vrot.lane.b32.xlu1 %v919_v34, %s848_s24 }
0x11ef   :  { %351 = vrot.lane.b32.xlu1 %v949_v15, %s848_s24 }
0x11f3   :  { %507 = vrot.lane.b32.xlu1 %v505_v56, %s848_s24 }
0x1259   :  { %v653_v35 = vpop.permute.xlu1 %652 }
0x125a   :  { %v655_v36 = vadd.f32 %v653_v35, %v645_v33 }
0x125c   :  { %842 = vtanh.f32 %v655_v36 }
0x125d   :  { %v195_v38 = vpop.permute.xlu1 %194 }
0x125e   :  { %198 = vst.msk [vmem:[%s1030_s4] sm:$0xf] %vm197_vm3, %v195_v38 }
0x1261   :  { %v352_v39 = vpop.permute.xlu1 %351 }
0x1262   :  { %354 = vst.msk [vmem:[%s1030_s4 + $0x8] sm:$0xf] %vm197_vm3, %v352_v39 }
0x1265   :  { %v508_v34 = vpop.permute.xlu1 %507 }
0x1266   :  { %v843_v15 = vpop.eup %842  ;;  %510 = vst.msk [vmem:[%s1030_s4 + $0x10] sm:$0xf] %vm197_vm3, %v508_v34 }
0x1267   :  { %658 = vrot.lane.b32.xlu0 %v843_v15, %s847_s3 }
0x126b   :  { %273 = vrot.lane.b32.xlu0 %v934_v55, %s848_s24 }
0x126f   :  { %429 = vrot.lane.b32.xlu0 %v963_v37, %s848_s24 }
0x1273   :  { %585 = vrot.lane.b32.xlu0 %v583_v17, %s848_s24 }
0x12d9   :  { %v659_v40 = vpop.permute.xlu0 %658 }
0x12da   :  { %v661_v41 = vmul.f32 %v841_v30, %v659_v40 }
0x12dc   :  { %663 = vrot.lane.b32.xlu1 %v661_v41, %s848_s24 }
0x12dd   :  { %v274_v42 = vpop.permute.xlu0 %273 }
0x12de   :  { %276 = vst.msk [vmem:[%s1030_s4 + $0x4] sm:$0xf] %vm197_vm3, %v274_v42 }
0x12e1   :  { %v430_v43 = vpop.permute.xlu0 %429 }
0x12e2   :  { %432 = vst.msk [vmem:[%s1030_s4 + $0xc] sm:$0xf] %vm197_vm3, %v430_v43 }
0x12e5   :  { %v586_v55 = vpop.permute.xlu0 %585 }
0x12e6   :  { %588 = vst.msk [vmem:[%s1030_s4 + $0x14] sm:$0xf] %vm197_vm3, %v586_v55 }
0x134e   :  { %v664_v37 = vpop.permute.xlu1 %663 }
0x134f   :  { %666 = vst.msk [vmem:[%s1030_s4 + $0x18] sm:$0xf] %vm197_vm3, %v664_v37 }

// kernel: forward.32
= control target key start
LH: loop header
LB: loop body
LE: loop exit
PB: predicated region body
PF: predicated region fallthrough
CT: control target
= control target key end

     0   :  { %vm53_vm0 = vcmask 130048   ;;  %vm109_vm1 = vcmask 64512   ;;  %vm119_vm2 = vcmask 60416   ;;  %s635_s1 = inlined_call_operand.vmem [shape: bf16[2,16,8], index: 1, kind: input, shape index: {}]   ;;  %s636_s0 = inlined_call_operand.vmem [shape: bf16[2,28,16], index: 0, kind: input, shape index: {}]   ;;  %s637_s2 = inlined_call_operand.vmem [shape: f32[2,1,8], index: 2, kind: input, shape index: {}, may-alias: {2,4}]   ;;  %s638_s3 = inlined_call_operand.vmem [shape: f32[2,1,8], index: 3, kind: input, shape index: {}]   ;;  %s639_s4 = inlined_call_operand.vmem [shape: f32[2,1,8], index: 4, kind: input, shape index: {}, may-alias: {2,4}]   ;;  %s640_s5 = inlined_call_operand.vmem [shape: f32[2,28,8], index: 5, kind: input, shape index: {}]   ;;  %s641_s6 = inlined_call_operand.vmem [shape: f32[2,28,8], index: 6, kind: output, shape index: {}]  }
   0x1   :  { %v430_v0 = vld [vmem:[%s635_s1] sm:$0xff]   ;;  %v431_v1 = vld [vmem:[%s635_s1 + $0x8] sm:$0xff]   ;;  %v434_v4 = vld [vmem:[%s636_s0 + $0x10] sm:$0xff]  }
   0x2   :  { %418 = vmatprep.subr.bf16.mxu0 %v430_v0  ;;  %v432_v2 = vld [vmem:[%s636_s0] sm:$0xff]   ;;  %424 = vmatprep.subr.bf16.mxu1 %v431_v1  ;;  %v433_v3 = vld [vmem:[%s636_s0 + $0x8] sm:$0x3f]   ;;  %v435_v5 = vld [vmem:[%s636_s0 + $0x18] sm:$0x3f]  }
   0x3   :  { %419 = vmatpush3.bf16.msra.mxu0 %v430_v0  ;;  %425 = vmatpush3.bf16.msra.mxu1 %v431_v1  ;;  %v379_v6 = vld [vmem:[%s637_s2] ss:$0 sm:$0xff]  ;;  %v394_v8 = vld [vmem:[%s637_s2 + $0x1] ss:$0 sm:$0xff] }
   0x4   :  { %420 = vmatprep.mubr.msk.bf16.mxu0 %vm53_vm0, %v432_v2  ;;  %426 = vmatprep.mubr.msk.bf16.mxu1 %vm53_vm0, %v434_v4 }
   0x6   :  { %421 = vmatmul.mubr.msk.bf16.vlgmr.msra.gmra.mrb[0].mxu0 %vm53_vm0, %v433_v3  ;;  %427 = vmatmul.mubr.msk.bf16.vlgmr.msra.gmra.mrb[0].mxu1 %vm53_vm0, %v435_v5 }
  0xd9   :  { %v422_v7 = vpop.f32.mrb[0].mxu0  ;;  %v428_v11 = vpop.f32.mrb[0].mxu1 }
  0xda   :  { %v103_v9 = vadd.f32 %v422_v7, %v379_v6  ;;  %v94_v10 = vpop.f32.mrb[1].mxu0  ;;  %v270_v14 = vpop.f32.mrb[1].mxu1  ;;  %v279_v28 = vadd.f32 %v428_v11, %v394_v8 }
  0xdb   :  { %v95_v12 = vadd.f32 %v379_v6, %v94_v10  ;;  %v423_v13 = vpop.f32.mrb[2].mxu0  ;;  %v271_v16 = vadd.f32 %v394_v8, %v270_v14  ;;  %v429_v18 = vpop.f32.mrb[2].mxu1 }
  0xdc   :  { %v106_v15 = vadd.f32 %v423_v13, %v379_v6  ;;  %v97_v17 = vpop.f32.mrb[3].mxu0  ;;  %v116_v19 = vsel %vm109_vm1, %v103_v9, 0.0  ;;  %v273_v20 = vpop.f32.mrb[3].mxu1  ;;  %v282_v26 = vadd.f32 %v429_v18, %v394_v8  ;;  %v291_v31 = vsel %vm109_vm1, %v279_v28, 0.0 }
  0xdd   :  { %117 = vadd.xlane.f32.xlu1 %v116_v19  ;;  %v110_v21 = vsel %vm109_vm1, %v95_v12, 0.0  ;;  %v285_v22 = vsel %vm109_vm1, %v271_v16, 0.0  ;;  %v274_v23 = vadd.f32 %v394_v8, %v273_v20  ;;  %v98_v25 = vadd.f32 %v379_v6, %v97_v17 }
  0xde   :  { %111 = vadd.xlane.f32.xlu0 %v110_v21  ;;  %v120_v24 = vsel %vm119_vm2, %v106_v15, 0.0  ;;  %v294_v30 = vsel %vm119_vm2, %v282_v26, 0.0 }
  0xdf   :  { %v288_v27 = vsel %vm109_vm1, %v274_v23, 0.0  ;;  %v113_v29 = vsel %vm109_vm1, %v98_v25, 0.0 }
  0xe1   :  { %121 = vadd.xlane.f32.xlu1 %v120_v24 }
  0xe2   :  { %286 = vadd.xlane.f32.xlu0 %v285_v22 }
  0xe5   :  { %289 = vadd.xlane.f32.xlu1 %v288_v27 }
  0xe6   :  { %114 = vadd.xlane.f32.xlu0 %v113_v29 }
  0xe9   :  { %295 = vadd.xlane.f32.xlu1 %v294_v30 }
  0xea   :  { %292 = vadd.xlane.f32.xlu0 %v291_v31 }
 0x16a   :  { %v118_v32 = vpop.xlane.xlu1 %117 }
 0x16b   :  { %v126_v33 = vmul.f32 0.125, %v118_v32  ;;  %v112_v34 = vpop.xlane.xlu0 %111  ;;  %v386_v32 = vld [vmem:[%s639_s4] ss:$0 sm:$0xff] }
 0x16c   :  { %v124_v35 = vmul.f32 0.125, %v112_v34 }
 0x16d   :  { %v519_v36 = vsub.f32 %v103_v9, %v126_v33 }
 0x16e   :  { %v521_v37 = vsub.f32 %v95_v12, %v124_v35  ;;  %v122_v38 = vpop.xlane.xlu1 %121 }
 0x16f   :  { %v127_v39 = vmul.f32 0.125, %v122_v38  ;;  %v287_v40 = vpop.xlane.xlu0 %286  ;;  %v134_v41 = vmul.f32 %v519_v36, %v519_v36 }
 0x170   :  { %v297_v42 = vmul.f32 0.125, %v287_v40  ;;  %v132_v45 = vmul.f32 %v521_v37, %v521_v37 }
 0x171   :  { %v525_v43 = vsub.f32 %v106_v15, %v127_v39  ;;  %v142_v44 = vsel %vm109_vm1, %v134_v41, 0.0  ;;  %v188_v39 = vld [vmem:[%s640_s5 + $0x10] sm:$0xff] }
 0x172   :  { %v530_v46 = vsub.f32 %v271_v16, %v297_v42  ;;  %v290_v47 = vpop.xlane.xlu1 %289  ;;  %143 = vadd.xlane.f32.xlu0 %v142_v44  ;;  %v136_v53 = vsel %vm109_vm1, %v132_v45, 0.0 }
 0x173   :  { %v298_v48 = vmul.f32 0.125, %v290_v47  ;;  %v115_v49 = vpop.xlane.xlu0 %114  ;;  %v135_v50 = vmul.f32 %v525_v43, %v525_v43 }
 0x174   :  { %v125_v51 = vmul.f32 0.125, %v115_v49  ;;  %v305_v54 = vmul.f32 %v530_v46, %v530_v46  ;;  %v189_v49 = vld [vmem:[%s640_s5 + $0x18] sm:$0xf] }
 0x175   :  { %v145_v52 = vsel %vm119_vm2, %v135_v50, 0.0  ;;  %v538_v55 = vsub.f32 %v274_v23, %v298_v48 }
 0x176   :  { %v540_v56 = vsub.f32 %v98_v25, %v125_v51  ;;  %146 = vadd.xlane.f32.xlu1 %v145_v52  ;;  %v296_v57 = vpop.xlane.xlu1 %295  ;;  %137 = vadd.xlane.f32.xlu0 %v136_v53  ;;  %v309_v62 = vsel %vm109_vm1, %v305_v54, 0.0  ;;  %v401_v51 = vld [vmem:[%s638_s3 + $0x1] ss:$0 sm:$0xff] }
 0x177   :  { %v300_v58 = vmul.f32 0.125, %v296_v57  ;;  %v293_v59 = vpop.xlane.xlu0 %292  ;;  %v306_v2 = vmul.f32 %v538_v55, %v538_v55  ;;  %v403_v57 = vld [vmem:[%s639_s4 + $0x1] ss:$0 sm:$0xff] }
 0x178   :  { %v299_v60 = vmul.f32 0.125, %v293_v59  ;;  %v133_v61 = vmul.f32 %v540_v56, %v540_v56 }
 0x179   :  { %v545_v63 = vsub.f32 %v282_v26, %v300_v58  ;;  %v312_v4 = vsel %vm109_vm1, %v306_v2, 0.0 }
 0x17a   :  { %v547_v0 = vsub.f32 %v279_v28, %v299_v60  ;;  %310 = vadd.xlane.f32.xlu0 %v309_v62  ;;  %v139_v1 = vsel %vm109_vm1, %v133_v61, 0.0  ;;  %v385_v28 = vld [vmem:[%s638_s3] ss:$0 sm:$0xff] }
 0x17b   :  { %140 = vadd.xlane.f32.xlu1 %v139_v1  ;;  %v308_v6 = vmul.f32 %v545_v63, %v545_v63  ;;  %v404_v62 = vld [vmem:[%s640_s5 + $0x20] sm:$0xff] }
 0x17c   :  { %v307_v3 = vmul.f32 %v547_v0, %v547_v0 }
 0x17d   :  { %v318_v7 = vsel %vm119_vm2, %v308_v6, 0.0 }
 0x17e   :  { %v315_v5 = vsel %vm109_vm1, %v307_v3, 0.0  ;;  %v187_v3 = vld [vmem:[%s640_s5 + $0x8] sm:$0xff] }
 0x17f   :  { %313 = vadd.xlane.f32.xlu1 %v312_v4  ;;  %316 = vadd.xlane.f32.xlu0 %v315_v5 }
 0x183   :  { %319 = vadd.xlane.f32.xlu1 %v318_v7 }
 0x1ff   :  { %v144_v8 = vpop.xlane.xlu0 %143 }
 0x200   :  { %v150_v9 = vmul.f32 0.125, %v144_v8 }
 0x202   :  { %v154_v10 = vadd.f32 1e-05, %v150_v9 }
 0x203   :  { %v147_v11 = vpop.xlane.xlu1 %146  ;;  %v138_v12 = vpop.xlane.xlu0 %137 }
 0x204   :  { %436 = vrsqrt.f32 %v154_v10  ;;  %v151_v13 = vmul.f32 0.125, %v147_v11  ;;  %v148_v14 = vmul.f32 0.125, %v138_v12  ;;  %v405_v11 = vld [vmem:[%s640_s5 + $0x28] sm:$0xff] }
 0x206   :  { %v155_v15 = vadd.f32 1e-05, %v151_v13  ;;  %v152_v16 = vadd.f32 1e-05, %v148_v14 }
 0x207   :  { %v311_v17 = vpop.xlane.xlu0 %310 }
 0x208   :  { %438 = vrsqrt.f32 %v155_v15  ;;  %v321_v18 = vmul.f32 0.125, %v311_v17  ;;  %v141_v19 = vpop.xlane.xlu1 %140 }
 0x209   :  { %440 = vrsqrt.f32 %v152_v16  ;;  %v149_v20 = vmul.f32 0.125, %v141_v19 }
 0x20a   :  { %v325_v21 = vadd.f32 1e-05, %v321_v18  ;;  %v407_v18 = vld [vmem:[%s640_s5 + $0x38] sm:$0xf] }
 0x20b   :  { %v153_v22 = vadd.f32 1e-05, %v149_v20 }
 0x20c   :  { %442 = vrsqrt.f32 %v325_v21  ;;  %v314_v23 = vpop.xlane.xlu1 %313  ;;  %v317_v24 = vpop.xlane.xlu0 %316 }
 0x20d   :  { %444 = vrsqrt.f32 %v153_v22  ;;  %v322_v25 = vmul.f32 0.125, %v314_v23  ;;  %v323_v26 = vmul.f32 0.125, %v317_v24 }
 0x20e   :  { %v437_v27 = vpop.eup %436 }
 0x20f   :  { %v162_v29 = vmul.f32 %v437_v27, %v519_v36  ;;  %v326_v30 = vadd.f32 1e-05, %v322_v25  ;;  %v327_v31 = vadd.f32 1e-05, %v323_v26 }
 0x210   :  { %v320_v33 = vpop.xlane.xlu1 %319 }
 0x211   :  { %v173_v34 = vmul.f32 %v385_v28, %v162_v29  ;;  %446 = vrsqrt.f32 %v326_v30  ;;  %v324_v35 = vmul.f32 0.125, %v320_v33 }
 0x212   :  { %v439_v38 = vpop.eup %438  ;;  %448 = vrsqrt.f32 %v327_v31 }
 0x213   :  { %v441_v40 = vpop.eup %440  ;;  %v184_v41 = vadd.f32 %v386_v32, %v173_v34  ;;  %v163_v36 = vmul.f32 %v439_v38, %v525_v43  ;;  %v328_v42 = vadd.f32 1e-05, %v324_v35  ;;  %v186_v43 = vld [vmem:[%s640_s5] sm:$0xff] }
 0x214   :  { %v160_v44 = vmul.f32 %v441_v40, %v521_v37 }
 0x215   :  { %v192_v45 = vadd.f32 %v188_v39, %v184_v41  ;;  %v174_v47 = vmul.f32 %v385_v28, %v163_v36  ;;  %450 = vrsqrt.f32 %v328_v42 }
 0x216   :  { %v443_v48 = vpop.eup %442  ;;  %v171_v50 = vmul.f32 %v385_v28, %v160_v44 }
 0x217   :  { %v445_v52 = vpop.eup %444  ;;  %196 = vst.msk [vmem:[%s641_s6 + $0x10] sm:$0xff] %vm109_vm1, %v192_v45  ;;  %v185_v37 = vadd.f32 %v386_v32, %v174_v47  ;;  %v333_v53 = vmul.f32 %v443_v48, %v530_v46 }
 0x218   :  { %v182_v54 = vadd.f32 %v386_v32, %v171_v50  ;;  %v161_v58 = vmul.f32 %v445_v52, %v540_v56 }
 0x219   :  { %v193_v59 = vadd.f32 %v189_v49, %v185_v37  ;;  %v345_v60 = vmul.f32 %v401_v51, %v333_v53 }
 0x21a   :  { %v190_v61 = vadd.f32 %v186_v43, %v182_v54  ;;  %v172_v1 = vmul.f32 %v385_v28, %v161_v58 }
 0x21b   :  { %v447_v2 = vpop.eup %446  ;;  %197 = vst.msk [vmem:[%s641_s6 + $0x18] sm:$0xf] %vm119_vm2, %v193_v59  ;;  %v357_v46 = vadd.f32 %v403_v57, %v345_v60 }
 0x21c   :  { %v449_v56 = vpop.eup %448  ;;  %194 = vst.msk [vmem:[%s641_s6] sm:$0xff] %vm109_vm1, %v190_v61  ;;  %v183_v4 = vadd.f32 %v386_v32, %v172_v1  ;;  %v334_v5 = vmul.f32 %v447_v2, %v538_v55 }
 0x21d   :  { %v366_v6 = vadd.f32 %v404_v62, %v357_v46  ;;  %v335_v7 = vmul.f32 %v449_v56, %v547_v0  ;;  %v406_v0 = vld [vmem:[%s640_s5 + $0x30] sm:$0xff] }
 0x21e   :  { %v191_v8 = vadd.f32 %v187_v3, %v183_v4  ;;  %v346_v9 = vmul.f32 %v401_v51, %v334_v5 }
 0x21f   :  { %v451_v10 = vpop.eup %450  ;;  %408 = vst.msk [vmem:[%s641_s6 + $0x20] sm:$0xff] %vm109_vm1, %v366_v6  ;;  %v347_v12 = vmul.f32 %v401_v51, %v335_v7 }
 0x220   :  { %195 = vst.msk [vmem:[%s641_s6 + $0x8] sm:$0xff] %vm109_vm1, %v191_v8  ;;  %v358_v55 = vadd.f32 %v403_v57, %v346_v9  ;;  %v336_v13 = vmul.f32 %v451_v10, %v545_v63 }
 0x221   :  { %v359_v14 = vadd.f32 %v403_v57, %v347_v12 }
 0x222   :  { %v367_v15 = vadd.f32 %v405_v11, %v358_v55  ;;  %v348_v16 = vmul.f32 %v401_v51, %v336_v13 }
 0x223   :  { %v368_v17 = vadd.f32 %v406_v0, %v359_v14 }
 0x224   :  { %409 = vst.msk [vmem:[%s641_s6 + $0x28] sm:$0xff] %vm109_vm1, %v367_v15  ;;  %v360_v19 = vadd.f32 %v403_v57, %v348_v16 }
 0x225   :  { %410 = vst.msk [vmem:[%s641_s6 + $0x30] sm:$0xff] %vm109_vm1, %v368_v17 }
 0x226   :  { %v369_v63 = vadd.f32 %v407_v18, %v360_v19 }
 0x228   :  { %411 = vst.msk [vmem:[%s641_s6 + $0x38] sm:$0xf] %vm119_vm2, %v369_v63 }

// kernel: forward.38
= control target key start
LH: loop header
LB: loop body
LE: loop exit
PB: predicated region body
PF: predicated region fallthrough
CT: control target
= control target key end

     0   :  { %v523_v0 = vmov 0   ;;  %vm161_vm0 = vcmask 785408   ;;  %vm380_vm1 = vcmask 392192   ;;  %vm384_vm2 = vcmask 390144   ;;  %s714_s3 = inlined_call_operand.vmem [shape: bf16[224,48], index: 3, kind: input, shape index: {}]   ;;  %s715_s1 = inlined_call_operand.vmem [shape: bf16[224,48], index: 1, kind: input, shape index: {}]   ;;  %s716_s0 = inlined_call_operand.vmem [shape: bf16[14,224], index: 0, kind: input, shape index: {}]   ;;  %s717_s4 = inlined_call_operand.vmem [shape: f32[1,48], index: 4, kind: input, shape index: {}, may-alias: {2,4,6}]   ;;  %s718_s2 = inlined_call_operand.vmem [shape: f32[1,48], index: 2, kind: input, shape index: {}, may-alias: {2,4,6}]   ;;  %s719_s5 = inlined_call_operand.vmem [shape: f32[1,48], index: 5, kind: input, shape index: {}]   ;;  %s720_s6 = inlined_call_operand.vmem [shape: f32[1,48], index: 6, kind: input, shape index: {}, may-alias: {2,4,6}]   ;;  %s721_s7 = inlined_call_operand.<no memory space> [shape: f32[1], index: 7, kind: input, shape index: {}]   ;;  %s722_s8 = inlined_call_operand.vmem [shape: f32[14,48], index: 8, kind: output, shape index: {}]  }
   0x1   :  { %325 = vmatprep.subr.bf16.mxu1 %v523_v0  ;;  %v480_v1 = vld [vmem:[%s714_s3] sm:$0xff]   ;;  %165 = vmatprep.subr.bf16.mxu0 %v523_v0  ;;  %v481_v2 = vld [vmem:[%s714_s3 + $0x8] sm:$0xff]   ;;  %v482_v3 = vld [vmem:[%s714_s3 + $0x10] sm:$0xff]  }
   0x2   :  { %326 = vmatpush1.bf16.msra.mxu1 %v480_v1  ;;  %v486_v4 = vld [vmem:[%s715_s1] sm:$0xff]   ;;  %v488_v5 = vld [vmem:[%s715_s1 + $0x8] sm:$0xff]   ;;  %v483_v6 = vld [vmem:[%s714_s3 + $0x18] sm:$0xff]  }
   0x3   :  { %327 = vmatprep.subr.bf16.mxu1 %v523_v0  ;;  %166 = vmatpush1.bf16.msra.mxu0 %v486_v4  ;;  %v490_v7 = vld [vmem:[%s715_s1 + $0x10] sm:$0xff]   ;;  %v484_v8 = vld [vmem:[%s714_s3 + $0x20] sm:$0xff]   ;;  %v492_v9 = vld [vmem:[%s715_s1 + $0x18] sm:$0xff]  }
   0x4   :  { %167 = vmatprep.subr.bf16.mxu0 %v523_v0  ;;  %v485_v10 = vld [vmem:[%s714_s3 + $0x28] sm:$0xff]   ;;  %v494_v11 = vld [vmem:[%s715_s1 + $0x20] sm:$0xff]   ;;  %v487_v12 = vld [vmem:[%s714_s3 + $0x30] sm:$0xff]  }
   0x5   :  { %v496_v13 = vld [vmem:[%s715_s1 + $0x28] sm:$0xff]   ;;  %v489_v15 = vld [vmem:[%s714_s3 + $0x38] sm:$0xff]   ;;  %v498_v16 = vld [vmem:[%s715_s1 + $0x30] sm:$0xff]  }
   0x6   :  { %328 = vmatpush1.bf16.msra.mxu1 %v481_v2  ;;  %v504_v14 = vld [vmem:[%s716_s0 + $0x4] ss:$8 sps:$4 sm:$0x7f]   ;;  %v500_v18 = vld [vmem:[%s715_s1 + $0x38] sm:$0xff]   ;;  %v495_v21 = vld [vmem:[%s714_s3 + $0x50] sm:$0xff]  }
   0x7   :  { %329 = vmatprep.subr.bf16.mxu1 %v523_v0  ;;  %168 = vmatpush1.bf16.msra.mxu0 %v488_v5  ;;  %v491_v17 = vld [vmem:[%s714_s3 + $0x40] sm:$0xff]   ;;  %v493_v19 = vld [vmem:[%s714_s3 + $0x48] sm:$0xff]   ;;  %v497_v23 = vld [vmem:[%s714_s3 + $0x58] sm:$0xff]  }
   0x8   :  { %169 = vmatprep.subr.bf16.mxu0 %v523_v0  ;;  %474 = vmatprep.mubr.msk.bf16.mxu1 %vm161_vm0, %v504_v14  ;;  %v505_v20 = vld [vmem:[%s715_s1 + $0x40] sm:$0xff]   ;;  %v506_v22 = vld [vmem:[%s715_s1 + $0x48] sm:$0xff]   ;;  %v507_v24 = vld [vmem:[%s715_s1 + $0x50] sm:$0xff]  }
   0x9   :  { %458 = vmatprep.mubr.msk.bf16.mxu0 %vm161_vm0, %v504_v14  ;;  %v499_v25 = vld [vmem:[%s714_s3 + $0x60] sm:$0xff]   ;;  %v508_v26 = vld [vmem:[%s715_s1 + $0x58] sm:$0xff]   ;;  %v501_v27 = vld [vmem:[%s714_s3 + $0x68] sm:$0xff]  }
   0xa   :  { %330 = vmatpush1.bf16.msra.mxu1 %v482_v3  ;;  %v509_v28 = vld [vmem:[%s715_s1 + $0x60] sm:$0xff]   ;;  %v510_v30 = vld [vmem:[%s715_s1 + $0x68] sm:$0xff]  }
   0xb   :  { %331 = vmatprep.subr.bf16.mxu1 %v523_v0  ;;  %170 = vmatpush1.bf16.msra.mxu0 %v490_v7  ;;  %v502_v29 = vld [vmem:[%s716_s0] ss:$8 sps:$4 sm:$0x7f]  }
   0xc   :  { %171 = vmatprep.subr.bf16.mxu0 %v523_v0  ;;  %v459_v31 = vld [vmem:[%s717_s4] ss:$0 sm:$0xff] }
   0xd   :  { %v441_v48 = vld [vmem:[%s718_s2] ss:$0 sm:$0xff] }
   0xe   :  { %332 = vmatpush1.bf16.msra.mxu1 %v483_v6 }
   0xf   :  { %333 = vmatprep.subr.bf16.mxu1 %v523_v0  ;;  %172 = vmatpush1.bf16.msra.mxu0 %v492_v9 }
  0x10   :  { %173 = vmatprep.subr.bf16.mxu0 %v523_v0 }
  0x12   :  { %334 = vmatpush1.bf16.msra.mxu1 %v484_v8 }
  0x13   :  { %335 = vmatprep.subr.bf16.mxu1 %v523_v0  ;;  %174 = vmatpush1.bf16.msra.mxu0 %v494_v11 }
  0x14   :  { %175 = vmatprep.subr.bf16.mxu0 %v523_v0 }
  0x16   :  { %336 = vmatpush1.bf16.msra.mxu1 %v485_v10  ;;  %v477_v10 = vld [vmem:[%s719_s5] ss:$0 sm:$0xff] }
  0x17   :  { %337 = vmatprep.subr.bf16.mxu1 %v523_v0  ;;  %176 = vmatpush1.bf16.msra.mxu0 %v496_v13 }
  0x18   :  { %177 = vmatprep.subr.bf16.mxu0 %v523_v0 }
  0x1a   :  { %338 = vmatpush1.bf16.msra.mxu1 %v487_v12  ;;  %v478_v12 = vld [vmem:[%s720_s6] ss:$0 sm:$0xff] }
  0x1b   :  { %339 = vmatprep.subr.bf16.mxu1 %v523_v0  ;;  %178 = vmatpush1.bf16.msra.mxu0 %v498_v16 }
  0x1c   :  { %179 = vmatprep.subr.bf16.mxu0 %v523_v0 }
  0x1e   :  { %340 = vmatpush1.bf16.msra.mxu1 %v489_v15  ;;  %v430_v15 = vstv %s721_s7 }
  0x1f   :  { %341 = vmatprep.subr.bf16.mxu1 %v523_v0  ;;  %180 = vmatpush1.bf16.msra.mxu0 %v500_v18 }
  0x20   :  { %181 = vmatprep.subr.bf16.mxu0 %v523_v0 }
  0x22   :  { %342 = vmatpush1.bf16.msra.mxu1 %v491_v17 }
  0x23   :  { %343 = vmatprep.subr.bf16.mxu1 %v523_v0  ;;  %182 = vmatpush1.bf16.msra.mxu0 %v505_v20 }
  0x24   :  { %183 = vmatprep.subr.bf16.mxu0 %v523_v0 }
  0x26   :  { %344 = vmatpush1.bf16.msra.mxu1 %v493_v19 }
  0x27   :  { %345 = vmatprep.subr.bf16.mxu1 %v523_v0  ;;  %184 = vmatpush1.bf16.msra.mxu0 %v506_v22 }
  0x28   :  { %185 = vmatprep.subr.bf16.mxu0 %v523_v0 }
  0x2a   :  { %346 = vmatpush1.bf16.msra.mxu1 %v495_v21 }
  0x2b   :  { %347 = vmatprep.subr.bf16.mxu1 %v523_v0  ;;  %186 = vmatpush1.bf16.msra.mxu0 %v507_v24 }
  0x2c   :  { %187 = vmatprep.subr.bf16.mxu0 %v523_v0 }
  0x2e   :  { %348 = vmatpush1.bf16.msra.mxu1 %v497_v23 }
  0x2f   :  { %349 = vmatprep.subr.bf16.mxu1 %v523_v0  ;;  %188 = vmatpush1.bf16.msra.mxu0 %v508_v26 }
  0x30   :  { %189 = vmatprep.subr.bf16.mxu0 %v523_v0 }
  0x32   :  { %350 = vmatpush1.bf16.msra.mxu1 %v499_v25 }
  0x33   :  { %351 = vmatprep.subr.bf16.mxu1 %v523_v0  ;;  %190 = vmatpush1.bf16.msra.mxu0 %v509_v28 }
  0x34   :  { %191 = vmatprep.subr.bf16.mxu0 %v523_v0 }
  0x36   :  { %352 = vmatpush1.bf16.msra.mxu1 %v501_v27 }
  0x37   :  { %192 = vmatpush1.bf16.msra.mxu0 %v510_v30 }
  0x39   :  { %358 = vmatmul.mubr.bf16.vlgmr.msra.gmra.mrb[0].mxu1 %v502_v29 }
  0x3a   :  { %198 = vmatmul.mubr.bf16.vlgmr.msra.gmra.mrb[0].mxu0 %v502_v29 }
 0x10c   :  { %v359_v32 = vpop.f32.mrb[0].mxu1 }
 0x10d   :  { %v360_v33 = vadd.f32 %v459_v31, %v359_v32  ;;  %v361_v34 = vpop.f32.mrb[1].mxu1  ;;  %v199_v40 = vpop.f32.mrb[0].mxu0 }
 0x10e   :  { %v362_v35 = vpop.f32.mrb[2].mxu1  ;;  %v201_v41 = vpop.f32.mrb[1].mxu0  ;;  %v200_v49 = vadd.f32 %v441_v48, %v199_v40 }
 0x10f   :  { %v475_v36 = vmul.f32 -1.442695, %v360_v33  ;;  %v363_v37 = vadd.f32 %v459_v31, %v362_v35  ;;  %v364_v38 = vpop.f32.mrb[3].mxu1  ;;  %v202_v42 = vpop.f32.mrb[2].mxu0 }
 0x110   :  { %v204_v43 = vpop.f32.mrb[3].mxu0  ;;  %v203_v51 = vadd.f32 %v441_v48, %v202_v42 }
 0x111   :  { %511 = vpow2.f32 %v475_v36  ;;  %v476_v39 = vmul.f32 -1.442695, %v363_v37 }
 0x113   :  { %513 = vpow2.f32 %v476_v39 }
 0x11b   :  { %v512_v44 = vpop.eup %511 }
 0x11c   :  { %v372_v45 = vadd.f32 1.0, %v512_v44 }
 0x11d   :  { %v514_v46 = vpop.eup %513 }
 0x11e   :  { %515 = vrcp.f32 %v372_v45  ;;  %v373_v47 = vadd.f32 1.0, %v514_v46 }
 0x120   :  { %517 = vrcp.f32 %v373_v47 }
 0x128   :  { %v516_v50 = vpop.eup %515 }
 0x129   :  { %v378_v52 = vmul.f32 %v516_v50, %v200_v49 }
 0x12a   :  { %v518_v53 = vpop.eup %517 }
 0x12b   :  { %v381_v54 = vsel %vm380_vm1, %v378_v52, 0.0  ;;  %v379_v55 = vmul.f32 %v518_v53, %v203_v51 }
 0x12c   :  { %382 = vadd.xlane.f32.xlu0 %v381_v54 }
 0x12d   :  { %v385_v56 = vsel %vm384_vm2, %v379_v55, 0.0 }
 0x130   :  { %386 = vadd.xlane.f32.xlu0 %v385_v56 }
 0x1b9   :  { %v383_v57 = vpop.xlane.xlu0 %382 }
 0x1ba   :  { %v389_v58 = vmul.f32 0.020833334, %v383_v57 }
 0x1bc   :  { %v391_v59 = vsub.f32 %v378_v52, %v389_v58 }
 0x1bd   :  { %v387_v60 = vpop.xlane.xlu0 %386 }
 0x1be   :  { %v390_v61 = vmul.f32 0.020833334, %v387_v60  ;;  %v393_v62 = vmul.f32 %v391_v59, %v391_v59 }
 0x1c0   :  { %v392_v63 = vsub.f32 %v379_v55, %v390_v61  ;;  %v395_v0 = vsel %vm380_vm1, %v393_v62, 0.0 }
 0x1c1   :  { %396 = vadd.xlane.f32.xlu1 %v395_v0 }
 0x1c2   :  { %v394_v1 = vmul.f32 %v392_v63, %v392_v63 }
 0x1c4   :  { %v398_v2 = vsel %vm384_vm2, %v394_v1, 0.0 }
 0x1c5   :  { %399 = vadd.xlane.f32.xlu1 %v398_v2 }
 0x24e   :  { %v397_v3 = vpop.xlane.xlu1 %396 }
 0x24f   :  { %v401_v4 = vmul.f32 0.020833334, %v397_v3 }
 0x251   :  { %v403_v5 = vadd.f32 1e-08, %v401_v4 }
 0x252   :  { %v400_v6 = vpop.xlane.xlu1 %399 }
 0x253   :  { %519 = vrsqrt.f32 %v403_v5  ;;  %v402_v7 = vmul.f32 0.020833334, %v400_v6 }
 0x255   :  { %v404_v8 = vadd.f32 1e-08, %v402_v7 }
 0x257   :  { %521 = vrsqrt.f32 %v404_v8 }
 0x25d   :  { %v520_v9 = vpop.eup %519 }
 0x25e   :  { %v407_v11 = vmul.f32 %v520_v9, %v391_v59 }
 0x260   :  { %v416_v13 = vmul.f32 %v477_v10, %v407_v11 }
 0x261   :  { %v522_v14 = vpop.eup %521 }
 0x262   :  { %v425_v16 = vadd.f32 %v478_v12, %v416_v13  ;;  %v408_v17 = vmul.f32 %v522_v14, %v392_v63 }
 0x264   :  { %vm428_vm3 = vcmp.ge.f32.partialorder %v425_v16, 0.0  ;;  %v431_v18 = vmul.f32 %v430_v15, %v425_v16  ;;  %v417_v19 = vmul.f32 %v477_v10, %v408_v17 }
 0x266   :  { %v433_v20 = vsel %vm428_vm3, %v425_v16, %v431_v18  ;;  %v426_v21 = vadd.f32 %v478_v12, %v417_v19 }
 0x267   :  { %435 = vst.msk [vmem:[%s722_s8] sm:$0xff] %vm380_vm1, %v433_v20 }
 0x268   :  { %vm429_vm4 = vcmp.ge.f32.partialorder %v426_v21, 0.0  ;;  %v432_v22 = vmul.f32 %v430_v15, %v426_v21 }
 0x26a   :  { %v434_v23 = vsel %vm429_vm4, %v426_v21, %v432_v22 }
 0x26b   :  { %436 = vst.msk [vmem:[%s722_s8 + $0x8] sm:$0x3f] %vm384_vm2, %v434_v23 }

// kernel: forward.40
= control target key start
LH: loop header
LB: loop body
LE: loop exit
PB: predicated region body
PF: predicated region fallthrough
CT: control target
= control target key end

     0   :  { %v762_v0 = vmov 0.0   ;;  %vm763_vm0 = vmmov 0   ;;  %vm201_vm1 = vcmask 261120   ;;  %vm534_vm2 = vcmask 326656   ;;  %s967_s1 = inlined_call_operand.vmem [shape: bf16[288,40], index: 1, kind: input, shape index: {}]   ;;  %s968_s0 = inlined_call_operand.vmem [shape: bf16[14,288], index: 0, kind: input, shape index: {}]   ;;  %s969_s3 = inlined_call_operand.vmem [shape: bf16[288,40], index: 3, kind: input, shape index: {}]   ;;  %s970_s2 = inlined_call_operand.vmem [shape: f32[1,40], index: 2, kind: input, shape index: {}, may-alias: {2,4,6}]   ;;  %s971_s4 = inlined_call_operand.vmem [shape: f32[1,40], index: 4, kind: input, shape index: {}, may-alias: {2,4,6}]   ;;  %s972_s5 = inlined_call_operand.vmem [shape: f32[1,40], index: 5, kind: input, shape index: {}]   ;;  %s973_s6 = inlined_call_operand.vmem [shape: f32[1,40], index: 6, kind: input, shape index: {}, may-alias: {2,4,6}]   ;;  %s974_s7 = inlined_call_operand.<no memory space> [shape: f32[1], index: 7, kind: input, shape index: {}]   ;;  %s975_s8 = inlined_call_operand.vmem [shape: f32[14,40], index: 8, kind: output, shape index: {}]  }
   0x1   :  { %692 = vmatprep.subr.bf16.mxu1 %v762_v0  ;;  %v710_v1 = vld [vmem:[%s967_s1 + $0x40] sm:$0xff]   ;;  %696 = vmatprep.mubr.msk.bf16.mxu1 %vm763_vm0, %v762_v0  ;;  %v713_v4 = vld [vmem:[%s967_s1 + $0x48] sm:$0xff]   ;;  %v718_v9 = vld [vmem:[%s967_s1 + $0x50] sm:$0xff]   ;;  %vm538_vm3 = vcmask 324608  }
   0x2   :  { %v711_v2 = vld [vmem:[%s967_s1 + $0x80] sm:$0xff]   ;;  %642 = vmatprep.subr.bf16.mxu0 %v710_v1  ;;  %v714_v5 = vld [vmem:[%s967_s1 + $0x88] sm:$0xff]   ;;  %v720_v11 = vld [vmem:[%s967_s1 + $0x10] sm:$0xff]  }
   0x3   :  { %v712_v3 = vld [vmem:[%s967_s1] sm:$0xff]   ;;  %693 = vmatpush3.bf16.msra.mxu1 %v711_v2  ;;  %v715_v6 = vld [vmem:[%s967_s1 + $0x8] sm:$0xff]   ;;  %v722_v13 = vld [vmem:[%s967_s1 + $0x58] sm:$0xff]  }
   0x4   :  { %643 = vmatpush3.bf16.msra.mxu0 %v712_v3  ;;  %694 = vmatprep.subr.bf16.mxu1 %v762_v0  ;;  %v834_v7 = vld [vmem:[%s968_s0 + $0x8] ss:$12 sps:$4 sm:$0x7f]   ;;  %v717_v8 = vld [vmem:[%s969_s3 + $0x40] sm:$0xff]   ;;  %v724_v15 = vld [vmem:[%s967_s1 + $0x18] sm:$0xff]  }
   0x5   :  { %644 = vmatprep.subr.bf16.mxu0 %v713_v4  ;;  %v719_v10 = vld [vmem:[%s969_s3] sm:$0xff]   ;;  %v721_v12 = vld [vmem:[%s969_s3 + $0x48] sm:$0xff]   ;;  %v725_v16 = vld [vmem:[%s969_s3 + $0x50] sm:$0xff]  }
   0x6   :  { %v723_v14 = vld [vmem:[%s969_s3 + $0x8] sm:$0xff]   ;;  %v726_v17 = vld [vmem:[%s967_s1 + $0x60] sm:$0xff]   ;;  %v727_v18 = vld [vmem:[%s969_s3 + $0x10] sm:$0xff]  }
   0x7   :  { %695 = vmatpush3.bf16.msra.mxu1 %v714_v5  ;;  %v728_v19 = vld [vmem:[%s967_s1 + $0x20] sm:$0xff]   ;;  %v729_v20 = vld [vmem:[%s969_s3 + $0x58] sm:$0xff]   ;;  %v730_v21 = vld [vmem:[%s967_s1 + $0x68] sm:$0xff]  }
   0x8   :  { %645 = vmatpush3.bf16.msra.mxu0 %v715_v6  ;;  %667 = vmatprep.subr.bf16.mxu1 %v717_v8  ;;  %v731_v22 = vld [vmem:[%s969_s3 + $0x18] sm:$0xff]   ;;  %v732_v23 = vld [vmem:[%s967_s1 + $0x28] sm:$0xff]   ;;  %v733_v24 = vld [vmem:[%s969_s3 + $0x60] sm:$0xff]  }
   0x9   :  { %646 = vmatprep.subr.bf16.mxu0 %v718_v9  ;;  %v734_v25 = vld [vmem:[%s967_s1 + $0x70] sm:$0xff]   ;;  %v735_v26 = vld [vmem:[%s969_s3 + $0x20] sm:$0xff]   ;;  %v737_v28 = vld [vmem:[%s969_s3 + $0x68] sm:$0xff]  }
   0xa   :  { %697 = vmatmul.mubr.msk.bf16.vlgmr.msra.gmra.mrb[0].mxu1 %vm201_vm1, %v834_v7  ;;  %v736_v27 = vld [vmem:[%s967_s1 + $0x30] sm:$0xff]   ;;  %v738_v29 = vld [vmem:[%s967_s1 + $0x78] sm:$0xff]   ;;  %v739_v30 = vld [vmem:[%s969_s3 + $0x28] sm:$0xff]  }
   0xb   :  { %668 = vmatpush3.bf16.msra.mxu1 %v719_v10  ;;  %v740_v31 = vld [vmem:[%s967_s1 + $0x38] sm:$0xff]   ;;  %v741_v32 = vld [vmem:[%s968_s0] ss:$12 sps:$4 sm:$0x7f]   ;;  %v744_v34 = vld [vmem:[%s969_s3 + $0x70] sm:$0xff]  }
   0xc   :  { %647 = vmatpush3.bf16.msra.mxu0 %v720_v11  ;;  %669 = vmatprep.subr.bf16.mxu1 %v721_v12  ;;  %v743_v33 = vld [vmem:[%s968_s0 + $0x4] ss:$12 sps:$4 sm:$0x7f]   ;;  %v747_v37 = vld [vmem:[%s969_s3 + $0x78] sm:$0xff]   ;;  %v749_v39 = vld [vmem:[%s969_s3 + $0x88] sm:$0xff]  }
   0xd   :  { %648 = vmatprep.subr.bf16.mxu0 %v722_v13  ;;  %237 = vmatprep.mubr.bf16.mxu0 %v743_v33  ;;  %v745_v35 = vld [vmem:[%s969_s3 + $0x30] sm:$0xff]   ;;  %v746_v36 = vld [vmem:[%s969_s3 + $0x80] sm:$0xff]   ;;  %v748_v38 = vld [vmem:[%s969_s3 + $0x38] sm:$0xff]  }
   0xe   :  { %470 = vmatprep.mubr.bf16.mxu1 %v743_v33  ;;  %v595_v45 = vld [vmem:[%s970_s2] ss:$0 sm:$0xff] }
   0xf   :  { %670 = vmatpush3.bf16.msra.mxu1 %v723_v14  ;;  %v618_v57 = vld [vmem:[%s971_s4] ss:$0 sm:$0xff] }
  0x10   :  { %649 = vmatpush3.bf16.msra.mxu0 %v724_v15  ;;  %671 = vmatprep.subr.bf16.mxu1 %v725_v16 }
  0x11   :  { %650 = vmatprep.subr.bf16.mxu0 %v726_v17 }
  0x13   :  { %672 = vmatpush3.bf16.msra.mxu1 %v727_v18 }
  0x14   :  { %651 = vmatpush3.bf16.msra.mxu0 %v728_v19  ;;  %673 = vmatprep.subr.bf16.mxu1 %v729_v20 }
  0x15   :  { %652 = vmatprep.subr.bf16.mxu0 %v730_v21 }
  0x17   :  { %674 = vmatpush3.bf16.msra.mxu1 %v731_v22 }
  0x18   :  { %653 = vmatpush3.bf16.msra.mxu0 %v732_v23  ;;  %675 = vmatprep.subr.bf16.mxu1 %v733_v24 }
  0x19   :  { %654 = vmatprep.subr.bf16.mxu0 %v734_v25 }
  0x1b   :  { %676 = vmatpush3.bf16.msra.mxu1 %v735_v26 }
  0x1c   :  { %655 = vmatpush3.bf16.msra.mxu0 %v736_v27  ;;  %677 = vmatprep.subr.bf16.mxu1 %v737_v28 }
  0x1d   :  { %656 = vmatprep.subr.bf16.mxu0 %v738_v29 }
  0x1f   :  { %678 = vmatpush3.bf16.msra.mxu1 %v739_v30 }
  0x20   :  { %657 = vmatpush3.bf16.msra.mxu0 %v740_v31  ;;  %679 = vmatprep.subr.bf16.mxu1 %v744_v34 }
  0x21   :  { %700 = vmatprep.subr.bf16.mxu0 %v762_v0 }
  0x23   :  { %238 = vmatmul.mubr.bf16.vlgmr.msra.gmra.mrb[0].mxu0 %v741_v32  ;;  %680 = vmatpush3.bf16.msra.mxu1 %v745_v35  ;;  %v640_v35 = vld [vmem:[%s972_s5] ss:$0 sm:$0xff] }
  0x24   :  { %704 = vmatprep.mubr.msk.bf16.mxu0 %vm763_vm0, %v762_v0  ;;  %701 = vmatpush3.bf16.msra.mxu0 %v746_v36 }
  0x25   :  { %681 = vmatprep.subr.bf16.mxu1 %v747_v37  ;;  %702 = vmatprep.subr.bf16.mxu0 %v762_v0  ;;  %v641_v37 = vld [vmem:[%s973_s6] ss:$0 sm:$0xff] }
  0x27   :  { %682 = vmatpush3.bf16.msra.mxu1 %v748_v38 }
  0x28   :  { %703 = vmatpush3.bf16.msra.mxu0 %v749_v39 }
  0x2a   :  { %471 = vmatmul.mubr.bf16.vlgmr.msra.gmra.mrb[4].mxu1 %v741_v32 }
  0x2b   :  { %705 = vmatmul.mubr.msk.bf16.vlgmr.msra.gmra.mrb[4].mxu0 %vm201_vm1, %v834_v7 }
  0xdd   :  { %v280_v40 = vpop.f32.mrb[0].mxu1 }
  0xde   :  { %v698_v41 = vpop.f32.mrb[1].mxu1 }
  0xdf   :  { %v283_v42 = vpop.f32.mrb[2].mxu1 }
  0xe0   :  { %v699_v43 = vpop.f32.mrb[3].mxu1 }
  0xf6   :  { %v658_v44 = vpop.f32.mrb[0].mxu0 }
  0xf7   :  { %v659_v46 = vpop.f32.mrb[1].mxu0 }
  0xf8   :  { %v660_v47 = vadd.f32 %v659_v46, %v658_v44  ;;  %v661_v48 = vpop.f32.mrb[2].mxu0 }
  0xf9   :  { %v662_v49 = vpop.f32.mrb[3].mxu0 }
  0xfa   :  { %v240_v50 = vadd.f32 %v660_v47, %v595_v45  ;;  %v663_v51 = vadd.f32 %v662_v49, %v661_v48 }
  0xfc   :  { %v243_v52 = vadd.f32 %v663_v51, %v595_v45  ;;  %v281_v53 = vadd.f32 %v280_v40, %v240_v50  ;;  %v584_v40 = vstv %s974_s7 }
  0xfd   :  { %v683_v54 = vpop.f32.mrb[4].mxu1 }
  0xfe   :  { %v284_v55 = vadd.f32 %v283_v42, %v243_v52  ;;  %v684_v56 = vpop.f32.mrb[5].mxu1  ;;  %v513_v58 = vpop.f32.mrb[4].mxu0 }
  0xff   :  { %v685_v59 = vadd.f32 %v684_v56, %v683_v54  ;;  %v686_v60 = vpop.f32.mrb[6].mxu1  ;;  %v706_v61 = vpop.f32.mrb[5].mxu0 }
 0x100   :  { %v687_v62 = vpop.f32.mrb[7].mxu1  ;;  %v516_v63 = vpop.f32.mrb[6].mxu0 }
 0x101   :  { %v473_v0 = vadd.f32 %v685_v59, %v618_v57  ;;  %v688_v1 = vadd.f32 %v687_v62, %v686_v60  ;;  %v707_v2 = vpop.f32.mrb[7].mxu0 }
 0x103   :  { %v514_v3 = vadd.f32 %v513_v58, %v473_v0  ;;  %v476_v4 = vadd.f32 %v688_v1, %v618_v57 }
 0x105   :  { %v638_v5 = vmul.f32 -1.442695, %v514_v3  ;;  %v517_v6 = vadd.f32 %v516_v63, %v476_v4 }
 0x107   :  { %750 = vpow2.f32 %v638_v5  ;;  %v639_v7 = vmul.f32 -1.442695, %v517_v6 }
 0x109   :  { %752 = vpow2.f32 %v639_v7 }
 0x111   :  { %v751_v8 = vpop.eup %750 }
 0x112   :  { %v526_v9 = vadd.f32 1.0, %v751_v8 }
 0x113   :  { %v753_v10 = vpop.eup %752 }
 0x114   :  { %754 = vrcp.f32 %v526_v9  ;;  %v527_v11 = vadd.f32 1.0, %v753_v10 }
 0x116   :  { %756 = vrcp.f32 %v527_v11 }
 0x11e   :  { %v755_v12 = vpop.eup %754 }
 0x11f   :  { %v532_v13 = vmul.f32 %v755_v12, %v281_v53 }
 0x120   :  { %v757_v14 = vpop.eup %756 }
 0x121   :  { %v535_v15 = vsel %vm534_vm2, %v532_v13, 0.0  ;;  %v533_v16 = vmul.f32 %v757_v14, %v284_v55 }
 0x122   :  { %536 = vadd.xlane.f32.xlu0 %v535_v15 }
 0x123   :  { %v539_v17 = vsel %vm538_vm3, %v533_v16, 0.0 }
 0x126   :  { %540 = vadd.xlane.f32.xlu0 %v539_v17 }
 0x1af   :  { %v537_v18 = vpop.xlane.xlu0 %536 }
 0x1b0   :  { %v543_v19 = vmul.f32 0.025, %v537_v18 }
 0x1b2   :  { %v545_v20 = vsub.f32 %v532_v13, %v543_v19 }
 0x1b3   :  { %v541_v21 = vpop.xlane.xlu0 %540 }
 0x1b4   :  { %v544_v22 = vmul.f32 0.025, %v541_v21  ;;  %v547_v23 = vmul.f32 %v545_v20, %v545_v20 }
 0x1b6   :  { %v546_v24 = vsub.f32 %v533_v16, %v544_v22  ;;  %v549_v25 = vsel %vm534_vm2, %v547_v23, 0.0 }
 0x1b7   :  { %550 = vadd.xlane.f32.xlu1 %v549_v25 }
 0x1b8   :  { %v548_v26 = vmul.f32 %v546_v24, %v546_v24 }
 0x1ba   :  { %v552_v27 = vsel %vm538_vm3, %v548_v26, 0.0 }
 0x1bb   :  { %553 = vadd.xlane.f32.xlu1 %v552_v27 }
 0x244   :  { %v551_v28 = vpop.xlane.xlu1 %550 }
 0x245   :  { %v555_v29 = vmul.f32 0.025, %v551_v28 }
 0x247   :  { %v557_v30 = vadd.f32 1e-08, %v555_v29 }
 0x248   :  { %v554_v31 = vpop.xlane.xlu1 %553 }
 0x249   :  { %758 = vrsqrt.f32 %v557_v30  ;;  %v556_v32 = vmul.f32 0.025, %v554_v31 }
 0x24b   :  { %v558_v33 = vadd.f32 1e-08, %v556_v32 }
 0x24d   :  { %760 = vrsqrt.f32 %v558_v33 }
 0x253   :  { %v759_v34 = vpop.eup %758 }
 0x254   :  { %v561_v36 = vmul.f32 %v759_v34, %v545_v20 }
 0x256   :  { %v570_v38 = vmul.f32 %v640_v35, %v561_v36 }
 0x257   :  { %v761_v39 = vpop.eup %760 }
 0x258   :  { %v579_v41 = vadd.f32 %v641_v37, %v570_v38  ;;  %v562_v42 = vmul.f32 %v761_v39, %v546_v24 }
 0x25a   :  { %vm582_vm4 = vcmp.ge.f32.partialorder %v579_v41, 0.0  ;;  %v585_v43 = vmul.f32 %v584_v40, %v579_v41  ;;  %v571_v44 = vmul.f32 %v640_v35, %v562_v42 }
 0x25c   :  { %v587_v45 = vsel %vm582_vm4, %v579_v41, %v585_v43  ;;  %v580_v46 = vadd.f32 %v641_v37, %v571_v44 }
 0x25d   :  { %589 = vst.msk [vmem:[%s975_s8] sm:$0xff] %vm534_vm2, %v587_v45 }
 0x25e   :  { %vm583_vm5 = vcmp.ge.f32.partialorder %v580_v46, 0.0  ;;  %v586_v47 = vmul.f32 %v584_v40, %v580_v46 }
 0x260   :  { %v588_v48 = vsel %vm583_vm5, %v580_v46, %v586_v47 }
 0x261   :  { %590 = vst.msk [vmem:[%s975_s8 + $0x8] sm:$0x3f] %vm538_vm3, %v588_v48 }

// kernel: forward.37
= control target key start
LH: loop header
LB: loop body
LE: loop exit
PB: predicated region body
PF: predicated region fallthrough
CT: control target
= control target key end

     0   :  { %vm31_vm0 = vcmask 130048   ;;  %vm111_vm1 = vcmask 138240   ;;  %vm115_vm2 = vcmask 134144   ;;  %s206_s1 = inlined_call_operand.vmem [shape: f32[16,17], index: 1, kind: input, shape index: {}]   ;;  %s207_s0 = inlined_call_operand.vmem [shape: f32[28,16], index: 0, kind: input, shape index: {}]   ;;  %s208_s2 = inlined_call_operand.vmem [shape: f32[1,17], index: 2, kind: input, shape index: {}]   ;;  %s209_s3 = inlined_call_operand.vmem [shape: f32[28,17], index: 3, kind: output, shape index: {}]  }
   0x1   :  { %v21_v0 = vld [vmem:[%s206_s1] sm:$0xff]  ;;  %v22_v1 = vld [vmem:[%s206_s1 + $0x8] sm:$0xff]  ;;  %v17_v5 = vld [vmem:[%s207_s0 + $0x10] sm:$0xff] }
   0x2   :  { %v15_v2 = vld [vmem:[%s207_s0] sm:$0xff]  ;;  %v23_v3 = vpack.c.bf16 %v22_v1, %v21_v0  ;;  %v16_v4 = vld [vmem:[%s207_s0 + $0x8] sm:$0xff]  ;;  %v18_v6 = vld [vmem:[%s207_s0 + $0x18] sm:$0xf] }
   0x3   :  { %v19_v7 = vpack.c.bf16 %v16_v4, %v15_v2  ;;  %v20_v8 = vpack.c.bf16 %v18_v6, %v17_v5  ;;  %v121_v9 = vld [vmem:[%s208_s2] ss:$0 sm:$0xff] }
   0x4   :  { %131 = vmatprep.subr.bf16.mxu0 %v23_v3 }
   0x5   :  { %132 = vmatpush3.bf16.msra.mxu0 %v23_v3  ;;  %133 = vmatprep.mubr.msk.bf16.mxu0 %vm31_vm0, %v19_v7 }
   0x8   :  { %134 = vmatmul.mubr.msk.bf16.vlgmr.msra.gmra.mrb[0].mxu0 %vm31_vm0, %v20_v8 }
  0xdb   :  { %v135_v10 = vpop.f32.mrb[0].mxu0 }
  0xdc   :  { %v81_v11 = vadd.f32 %v135_v10, %v121_v9  ;;  %v72_v12 = vpop.f32.mrb[1].mxu0 }
  0xdd   :  { %v73_v13 = vadd.f32 %v121_v9, %v72_v12  ;;  %v136_v14 = vpop.f32.mrb[2].mxu0 }
  0xde   :  { %v126_v15 = vmul.f32 -1.442695, %v81_v11  ;;  %v84_v16 = vadd.f32 %v136_v14, %v121_v9  ;;  %v75_v17 = vpop.f32.mrb[3].mxu0 }
  0xdf   :  { %v124_v18 = vmul.f32 -1.442695, %v73_v13  ;;  %v76_v19 = vadd.f32 %v121_v9, %v75_v17 }
  0xe0   :  { %137 = vpow2.f32 %v126_v15  ;;  %v127_v20 = vmul.f32 -1.442695, %v84_v16 }
  0xe1   :  { %139 = vpow2.f32 %v124_v18  ;;  %v125_v21 = vmul.f32 -1.442695, %v76_v19 }
  0xe2   :  { %141 = vpow2.f32 %v127_v20 }
  0xe3   :  { %143 = vpow2.f32 %v125_v21 }
  0xea   :  { %v138_v22 = vpop.eup %137 }
  0xeb   :  { %v140_v23 = vpop.eup %139  ;;  %v101_v24 = vadd.f32 1.0, %v138_v22 }
  0xec   :  { %v142_v25 = vpop.eup %141  ;;  %v99_v26 = vadd.f32 1.0, %v140_v23 }
  0xed   :  { %v144_v27 = vpop.eup %143  ;;  %145 = vrcp.f32 %v101_v24  ;;  %v102_v28 = vadd.f32 1.0, %v142_v25 }
  0xee   :  { %147 = vrcp.f32 %v99_v26  ;;  %v100_v29 = vadd.f32 1.0, %v144_v27 }
  0xef   :  { %149 = vrcp.f32 %v102_v28 }
  0xf0   :  { %151 = vrcp.f32 %v100_v29 }
  0xf7   :  { %v146_v30 = vpop.eup %145 }
  0xf8   :  { %v148_v31 = vpop.eup %147  ;;  %114 = vst.msk [vmem:[%s209_s3 + $0x10] sm:$0xff] %vm111_vm1, %v146_v30 }
  0xf9   :  { %v150_v32 = vpop.eup %149  ;;  %112 = vst.msk [vmem:[%s209_s3] sm:$0xff] %vm111_vm1, %v148_v31 }
  0xfa   :  { %v152_v33 = vpop.eup %151  ;;  %116 = vst.msk [vmem:[%s209_s3 + $0x18] sm:$0xf] %vm115_vm2, %v150_v32 }
  0xfb   :  { %113 = vst.msk [vmem:[%s209_s3 + $0x8] sm:$0xff] %vm111_vm1, %v152_v33 }

// kernel: forward.39
= control target key start
LH: loop header
LB: loop body
LE: loop exit
PB: predicated region body
PF: predicated region fallthrough
CT: control target
= control target key end

     0   :  { %9 = vsyncpa [#allocation3], 0  ;;  %s347_s0 = inlined_call_operand.vmem [shape: f32[2,14,24], index: 0, kind: input, shape index: {}]   ;;  %s348_s1 = inlined_call_operand.vmem [shape: f32[4], index: 1, kind: input, shape index: {}]   ;;  %s349_s2 = inlined_call_operand.vmem [shape: bf16[24,17], index: 2, kind: input, shape index: {}]   ;;  %s350_s3 = inlined_call_operand.vmem [shape: f32[1,17], index: 3, kind: input, shape index: {}]   ;;  %s351_s4 = inlined_call_operand.vmem [shape: f32[2,14,17], index: 4, kind: output, shape index: {}]  }
   0x1   :  { %s18_s17 = sshll.u32 %s348_s1, 4  ;;  %s19_s17 = int_to_ptr.vmem [resolvable:$true] %s18_s17 }
   0x2   :  { %s269_s18 = scalar_lea.vmem %s19_s17, 16  ;;  %p274_p1 = scmp.lt.s32.totalorder %s19_s17, %s19_s17 }
   0x3   :  { %p270_p0 = scmp.ne.s32.totalorder %s19_s17, %s269_s18  ;;  %p275_p2 = scmp.lt.s32.totalorder %s269_s18, %s269_s18 }
   0x5   :  { %p276_p3 = por %p275_p2, %p274_p1 }
   0x7   :  { %p277_p4 = pnand %p276_p3, %p270_p0 }
   0x9   :  { %280 = shalt.err (!%p277_p4)
}
   0xa   :  { %s283_s19 = smov [#allocation2]  }
   0xb   :  { %21 = dma.vmem_to_smem %s19_s17, 16, %s283_s19, [#allocation3]  }
   0xc   :  { %281 = dma.done.wait [#allocation3], 16  }
   0xd   :  { %282 = vsyncadd [#allocation3], 4294967280 }
   0xe   :  { %29 = sfence }
   0xf   :  { %v251_v0 = vld [vmem:[%s349_s2] sm:$0xff]   ;;  %v284_v1 = vmov 0.0   ;;  %v252_v2 = vld [vmem:[%s349_s2 + $0x8] ss:$0 sps:$4 sm:$0xff]   ;;  %vm84_vm0 = vcmask 1043456   ;;  %s31_s23 = sld [smem:[#allocation2]] }
  0x10   :  { %232 = vmatprep.subr.bf16.mxu0 %v284_v1  ;;  %240 = vmatprep.subr.bf16.mxu1 %v284_v1  ;;  %s210_s24 = sld [smem:[#allocation2 + $0x1]]  ;;  %v86_v3 = vsel %vm84_vm0, %v252_v2, 0  ;;  %s211_s25 = sld [smem:[#allocation2 + $0x2]]  ;;  %vm285_vm1 = vmmov 0   ;;  %v35_v4 = vld [vmem:[%s347_s0] sm:$0xff]  ;;  %v213_v6 = vld [vmem:[%s347_s0 + $0x10] sm:$0xff] }
  0x11   :  { %233 = vmatpush3.bf16.msra.mxu0 %v251_v0  ;;  %241 = vmatpush3.bf16.msra.mxu1 %v251_v0  ;;  %s212_s26 = sld [smem:[#allocation2 + $0x3]]  ;;  %v36_v5 = vld [vmem:[%s347_s0 + $0x8] sm:$0x3f]  ;;  %v214_v7 = vld [vmem:[%s347_s0 + $0x18] sm:$0x3f]  ;;  %vm80_vm2 = vcmask 195584  }
  0x12   :  { %234 = vmatprep.subr.bf16.mxu0 %v284_v1  ;;  %242 = vmatprep.subr.bf16.mxu1 %v284_v1  ;;  %v215_v30 = vld [vmem:[%s350_s3] ss:$0 sm:$0xff]  ;;  %vm141_vm3 = vcmask 138240   ;;  %vm143_vm4 = vcmask 136192  }
  0x13   :  { %236 = vmatprep.mubr.msk.bf16.mxu0 %vm285_vm1, %v284_v1  ;;  %244 = vmatprep.mubr.msk.bf16.mxu1 %vm285_vm1, %v284_v1 }
  0x15   :  { %235 = vmatpush3.bf16.msra.mxu0 %v86_v3  ;;  %243 = vmatpush3.bf16.msra.mxu1 %v86_v3  ;;  %v40_v8 = vstv %s31_s23 }
  0x16   :  { %v43_v9 = vstv %s210_s24  ;;  %v41_v10 = vmul.f32 %v40_v8, %v35_v4  ;;  %v42_v11 = vmul.f32 %v40_v8, %v36_v5  ;;  %v48_v14 = vstv %s211_s25 }
  0x17   :  { %v44_v12 = vmul.f32 %v213_v6, %v43_v9  ;;  %v45_v13 = vmul.f32 %v214_v7, %v43_v9  ;;  %v51_v15 = vmul.f32 %v43_v9, %v35_v4  ;;  %v52_v16 = vmul.f32 %v43_v9, %v36_v5 }
  0x18   :  { %v53_v17 = vmul.f32 %v213_v6, %v40_v8  ;;  %v54_v20 = vmul.f32 %v214_v7, %v40_v8  ;;  %v57_v21 = vstv %s212_s26 }
  0x19   :  { %v46_v18 = vsub.f32 %v41_v10, %v44_v12  ;;  %v47_v19 = vsub.f32 %v42_v11, %v45_v13 }
  0x1a   :  { %v55_v22 = vadd.f32 %v53_v17, %v51_v15  ;;  %v56_v25 = vadd.f32 %v54_v20, %v52_v16 }
  0x1b   :  { %v49_v23 = vadd.f32 %v48_v14, %v46_v18  ;;  %v50_v24 = vadd.f32 %v48_v14, %v47_v19 }
  0x1c   :  { %v58_v26 = vadd.f32 %v57_v21, %v55_v22  ;;  %v59_v28 = vadd.f32 %v57_v21, %v56_v25 }
  0x1d   :  { %v64_v27 = vpack.c.bf16 %v50_v24, %v49_v23 }
  0x1e   :  { %v145_v29 = vpack.c.bf16 %v59_v28, %v58_v26 }
  0x1f   :  { %237 = vmatmul.mubr.msk.bf16.vlgmr.msra.gmra.mrb[0].mxu0 %vm80_vm2, %v64_v27 }
  0x20   :  { %245 = vmatmul.mubr.msk.bf16.vlgmr.msra.gmra.mrb[0].mxu1 %vm80_vm2, %v145_v29 }
  0xf2   :  { %v122_v31 = vpop.f32.mrb[0].mxu0 }
  0xf3   :  { %v123_v32 = vadd.f32 %v215_v30, %v122_v31  ;;  %v238_v33 = vpop.f32.mrb[1].mxu0  ;;  %v183_v34 = vpop.f32.mrb[0].mxu1 }
  0xf4   :  { %v125_v35 = vpop.f32.mrb[2].mxu0  ;;  %v184_v37 = vadd.f32 %v215_v30, %v183_v34  ;;  %v246_v38 = vpop.f32.mrb[1].mxu1 }
  0xf5   :  { %v219_v36 = vmul.f32 -1.442695, %v123_v32  ;;  %v126_v39 = vadd.f32 %v215_v30, %v125_v35  ;;  %v239_v40 = vpop.f32.mrb[3].mxu0  ;;  %v186_v41 = vpop.f32.mrb[2].mxu1 }
  0xf6   :  { %v222_v42 = vmul.f32 -1.442695, %v184_v37  ;;  %v187_v44 = vadd.f32 %v215_v30, %v186_v41  ;;  %v247_v45 = vpop.f32.mrb[3].mxu1 }
  0xf7   :  { %253 = vpow2.f32 %v219_v36  ;;  %v220_v43 = vmul.f32 -1.442695, %v126_v39 }
  0xf8   :  { %255 = vpow2.f32 %v222_v42  ;;  %v223_v46 = vmul.f32 -1.442695, %v187_v44 }
  0xf9   :  { %257 = vpow2.f32 %v220_v43 }
  0xfa   :  { %259 = vpow2.f32 %v223_v46 }
 0x101   :  { %v254_v47 = vpop.eup %253 }
 0x102   :  { %v135_v48 = vadd.f32 1.0, %v254_v47  ;;  %v256_v49 = vpop.eup %255 }
 0x103   :  { %v258_v50 = vpop.eup %257  ;;  %v196_v51 = vadd.f32 1.0, %v256_v49 }
 0x104   :  { %261 = vrcp.f32 %v135_v48  ;;  %v260_v52 = vpop.eup %259  ;;  %v136_v53 = vadd.f32 1.0, %v258_v50 }
 0x105   :  { %263 = vrcp.f32 %v196_v51  ;;  %v197_v54 = vadd.f32 1.0, %v260_v52 }
 0x106   :  { %265 = vrcp.f32 %v136_v53 }
 0x107   :  { %267 = vrcp.f32 %v197_v54 }
 0x10e   :  { %v262_v55 = vpop.eup %261 }
 0x10f   :  { %142 = vst.msk [vmem:[%s351_s4] sm:$0xff] %vm141_vm3, %v262_v55  ;;  %v264_v56 = vpop.eup %263 }
 0x110   :  { %v266_v57 = vpop.eup %265  ;;  %224 = vst.msk [vmem:[%s351_s4 + $0x10] sm:$0xff] %vm141_vm3, %v264_v56 }
 0x111   :  { %v268_v58 = vpop.eup %267  ;;  %144 = vst.msk [vmem:[%s351_s4 + $0x8] sm:$0x3f] %vm143_vm4, %v266_v57 }
 0x112   :  { %225 = vst.msk [vmem:[%s351_s4 + $0x18] sm:$0x3f] %vm143_vm4, %v268_v58 }
 0x113   :  { %209 = vsyncpa [#allocation3], 1 }

// kernel: forward.41
= control target key start
LH: loop header
LB: loop body
LE: loop exit
PB: predicated region body
PF: predicated region fallthrough
CT: control target
= control target key end

     0   :  { %9 = vsyncpa [#allocation3], 0  ;;  %s347_s0 = inlined_call_operand.vmem [shape: f32[2,14,20], index: 0, kind: input, shape index: {}]   ;;  %s348_s1 = inlined_call_operand.vmem [shape: f32[4], index: 1, kind: input, shape index: {}]   ;;  %s349_s2 = inlined_call_operand.vmem [shape: bf16[20,17], index: 2, kind: input, shape index: {}]   ;;  %s350_s3 = inlined_call_operand.vmem [shape: f32[1,17], index: 3, kind: input, shape index: {}]   ;;  %s351_s4 = inlined_call_operand.vmem [shape: f32[2,14,17], index: 4, kind: output, shape index: {}]  }
   0x1   :  { %s18_s17 = sshll.u32 %s348_s1, 4  ;;  %s19_s17 = int_to_ptr.vmem [resolvable:$true] %s18_s17 }
   0x2   :  { %s269_s18 = scalar_lea.vmem %s19_s17, 16  ;;  %p274_p1 = scmp.lt.s32.totalorder %s19_s17, %s19_s17 }
   0x3   :  { %p270_p0 = scmp.ne.s32.totalorder %s19_s17, %s269_s18  ;;  %p275_p2 = scmp.lt.s32.totalorder %s269_s18, %s269_s18 }
   0x5   :  { %p276_p3 = por %p275_p2, %p274_p1 }
   0x7   :  { %p277_p4 = pnand %p276_p3, %p270_p0 }
   0x9   :  { %280 = shalt.err (!%p277_p4)
}
   0xa   :  { %s283_s19 = smov [#allocation2]  }
   0xb   :  { %21 = dma.vmem_to_smem %s19_s17, 16, %s283_s19, [#allocation3]  }
   0xc   :  { %281 = dma.done.wait [#allocation3], 16  }
   0xd   :  { %282 = vsyncadd [#allocation3], 4294967280 }
   0xe   :  { %29 = sfence }
   0xf   :  { %v251_v0 = vld [vmem:[%s349_s2] sm:$0xff]   ;;  %v284_v1 = vmov 0.0   ;;  %v252_v2 = vld [vmem:[%s349_s2 + $0x8] ss:$0 sps:$4 sm:$0x33]   ;;  %vm84_vm0 = vcmask 1041408  }
  0x10   :  { %232 = vmatprep.subr.bf16.mxu0 %v284_v1  ;;  %240 = vmatprep.subr.bf16.mxu1 %v284_v1  ;;  %s31_s23 = sld [smem:[#allocation2]]  ;;  %s210_s24 = sld [smem:[#allocation2 + $0x1]]  ;;  %v86_v3 = vsel %vm84_vm0, %v252_v2, 0  ;;  %vm285_vm1 = vmmov 0   ;;  %v35_v4 = vld [vmem:[%s347_s0] sm:$0xff]  ;;  %v213_v6 = vld [vmem:[%s347_s0 + $0x10] sm:$0xff] }
  0x11   :  { %233 = vmatpush3.bf16.msra.mxu0 %v251_v0  ;;  %241 = vmatpush3.bf16.msra.mxu1 %v251_v0  ;;  %s211_s25 = sld [smem:[#allocation2 + $0x2]]  ;;  %s212_s26 = sld [smem:[#allocation2 + $0x3]]  ;;  %v36_v5 = vld [vmem:[%s347_s0 + $0x8] sm:$0x3f]  ;;  %v214_v7 = vld [vmem:[%s347_s0 + $0x18] sm:$0x3f] }
  0x12   :  { %234 = vmatprep.subr.bf16.mxu0 %v284_v1  ;;  %242 = vmatprep.subr.bf16.mxu1 %v284_v1  ;;  %vm80_vm2 = vcmask 162816   ;;  %v215_v30 = vld [vmem:[%s350_s3] ss:$0 sm:$0xff]  ;;  %vm141_vm3 = vcmask 138240   ;;  %vm143_vm4 = vcmask 136192  }
  0x13   :  { %236 = vmatprep.mubr.msk.bf16.mxu0 %vm285_vm1, %v284_v1  ;;  %244 = vmatprep.mubr.msk.bf16.mxu1 %vm285_vm1, %v284_v1 }
  0x15   :  { %235 = vmatpush3.bf16.msra.mxu0 %v86_v3  ;;  %243 = vmatpush3.bf16.msra.mxu1 %v86_v3 }
  0x16   :  { %v40_v8 = vstv %s31_s23  ;;  %v43_v9 = vstv %s210_s24 }
  0x17   :  { %v41_v10 = vmul.f32 %v40_v8, %v35_v4  ;;  %v42_v11 = vmul.f32 %v40_v8, %v36_v5  ;;  %v44_v12 = vmul.f32 %v213_v6, %v43_v9  ;;  %v45_v13 = vmul.f32 %v214_v7, %v43_v9 }
  0x18   :  { %v48_v14 = vstv %s211_s25  ;;  %v51_v15 = vmul.f32 %v43_v9, %v35_v4  ;;  %v52_v16 = vmul.f32 %v43_v9, %v36_v5  ;;  %v53_v17 = vmul.f32 %v213_v6, %v40_v8 }
  0x19   :  { %v46_v18 = vsub.f32 %v41_v10, %v44_v12  ;;  %v47_v19 = vsub.f32 %v42_v11, %v45_v13  ;;  %v54_v20 = vmul.f32 %v214_v7, %v40_v8  ;;  %v57_v21 = vstv %s212_s26 }
  0x1a   :  { %v55_v22 = vadd.f32 %v53_v17, %v51_v15 }
  0x1b   :  { %v49_v23 = vadd.f32 %v48_v14, %v46_v18  ;;  %v50_v24 = vadd.f32 %v48_v14, %v47_v19  ;;  %v56_v25 = vadd.f32 %v54_v20, %v52_v16 }
  0x1c   :  { %v58_v26 = vadd.f32 %v57_v21, %v55_v22 }
  0x1d   :  { %v64_v27 = vpack.c.bf16 %v50_v24, %v49_v23  ;;  %v59_v28 = vadd.f32 %v57_v21, %v56_v25 }
  0x1f   :  { %237 = vmatmul.mubr.msk.bf16.vlgmr.msra.gmra.mrb[0].mxu0 %vm80_vm2, %v64_v27  ;;  %v145_v29 = vpack.c.bf16 %v59_v28, %v58_v26 }
  0x21   :  { %245 = vmatmul.mubr.msk.bf16.vlgmr.msra.gmra.mrb[0].mxu1 %vm80_vm2, %v145_v29 }
  0xf2   :  { %v122_v31 = vpop.f32.mrb[0].mxu0 }
  0xf3   :  { %v123_v32 = vadd.f32 %v215_v30, %v122_v31  ;;  %v238_v33 = vpop.f32.mrb[1].mxu0 }
  0xf4   :  { %v183_v34 = vpop.f32.mrb[0].mxu1  ;;  %v125_v35 = vpop.f32.mrb[2].mxu0 }
  0xf5   :  { %v219_v36 = vmul.f32 -1.442695, %v123_v32  ;;  %v184_v37 = vadd.f32 %v215_v30, %v183_v34  ;;  %v246_v38 = vpop.f32.mrb[1].mxu1  ;;  %v126_v39 = vadd.f32 %v215_v30, %v125_v35  ;;  %v239_v40 = vpop.f32.mrb[3].mxu0 }
  0xf6   :  { %v186_v41 = vpop.f32.mrb[2].mxu1 }
  0xf7   :  { %253 = vpow2.f32 %v219_v36  ;;  %v222_v42 = vmul.f32 -1.442695, %v184_v37  ;;  %v220_v43 = vmul.f32 -1.442695, %v126_v39  ;;  %v187_v44 = vadd.f32 %v215_v30, %v186_v41  ;;  %v247_v45 = vpop.f32.mrb[3].mxu1 }
  0xf9   :  { %255 = vpow2.f32 %v222_v42  ;;  %v223_v46 = vmul.f32 -1.442695, %v187_v44 }
  0xfa   :  { %257 = vpow2.f32 %v220_v43 }
  0xfb   :  { %259 = vpow2.f32 %v223_v46 }
 0x101   :  { %v254_v47 = vpop.eup %253 }
 0x102   :  { %v135_v48 = vadd.f32 1.0, %v254_v47 }
 0x103   :  { %v256_v49 = vpop.eup %255 }
 0x104   :  { %v258_v50 = vpop.eup %257  ;;  %261 = vrcp.f32 %v135_v48  ;;  %v196_v51 = vadd.f32 1.0, %v256_v49 }
 0x105   :  { %v260_v52 = vpop.eup %259  ;;  %v136_v53 = vadd.f32 1.0, %v258_v50 }
 0x106   :  { %263 = vrcp.f32 %v196_v51  ;;  %v197_v54 = vadd.f32 1.0, %v260_v52 }
 0x107   :  { %265 = vrcp.f32 %v136_v53 }
 0x108   :  { %267 = vrcp.f32 %v197_v54 }
 0x10e   :  { %v262_v55 = vpop.eup %261 }
 0x10f   :  { %142 = vst.msk [vmem:[%s351_s4] sm:$0xff] %vm141_vm3, %v262_v55 }
 0x110   :  { %v264_v56 = vpop.eup %263 }
 0x111   :  { %v266_v57 = vpop.eup %265  ;;  %224 = vst.msk [vmem:[%s351_s4 + $0x10] sm:$0xff] %vm141_vm3, %v264_v56 }
 0x112   :  { %v268_v58 = vpop.eup %267  ;;  %144 = vst.msk [vmem:[%s351_s4 + $0x8] sm:$0x3f] %vm143_vm4, %v266_v57 }
 0x113   :  { %225 = vst.msk [vmem:[%s351_s4 + $0x18] sm:$0x3f] %vm143_vm4, %v268_v58 }
 0x114   :  { %209 = vsyncpa [#allocation3], 1 }

// kernel: forward.42
= control target key start
LH: loop header
LB: loop body
LE: loop exit
PB: predicated region body
PF: predicated region fallthrough
CT: control target
= control target key end

     0   :  { %v503_v0 = vmov 0   ;;  %vm153_vm0 = vcmask 654336   ;;  %vm364_vm1 = vcmask 588800   ;;  %vm368_vm2 = vcmask 586752   ;;  %s686_s3 = inlined_call_operand.vmem [shape: bf16[208,72], index: 3, kind: input, shape index: {}]   ;;  %s687_s1 = inlined_call_operand.vmem [shape: bf16[208,72], index: 1, kind: input, shape index: {}]   ;;  %s688_s0 = inlined_call_operand.vmem [shape: bf16[14,208], index: 0, kind: input, shape index: {}]   ;;  %s689_s4 = inlined_call_operand.vmem [shape: f32[1,72], index: 4, kind: input, shape index: {}, may-alias: {2,4,6}]   ;;  %s690_s2 = inlined_call_operand.vmem [shape: f32[1,72], index: 2, kind: input, shape index: {}, may-alias: {2,4,6}]   ;;  %s691_s5 = inlined_call_operand.vmem [shape: f32[1,72], index: 5, kind: input, shape index: {}]   ;;  %s692_s6 = inlined_call_operand.vmem [shape: f32[1,72], index: 6, kind: input, shape index: {}, may-alias: {2,4,6}]   ;;  %s693_s7 = inlined_call_operand.<no memory space> [shape: f32[1], index: 7, kind: input, shape index: {}]   ;;  %s694_s8 = inlined_call_operand.vmem [shape: f32[14,72], index: 8, kind: output, shape index: {}]  }
   0x1   :  { %309 = vmatprep.subr.bf16.mxu1 %v503_v0  ;;  %v462_v1 = vld [vmem:[%s686_s3] sm:$0xff]   ;;  %157 = vmatprep.subr.bf16.mxu0 %v503_v0  ;;  %v463_v2 = vld [vmem:[%s686_s3 + $0x8] sm:$0xff]   ;;  %v464_v3 = vld [vmem:[%s686_s3 + $0x10] sm:$0xff]  }
   0x2   :  { %310 = vmatpush1.bf16.msra.mxu1 %v462_v1  ;;  %v468_v4 = vld [vmem:[%s687_s1] sm:$0xff]   ;;  %v470_v5 = vld [vmem:[%s687_s1 + $0x8] sm:$0xff]   ;;  %v465_v6 = vld [vmem:[%s686_s3 + $0x18] sm:$0xff]  }
   0x3   :  { %311 = vmatprep.subr.bf16.mxu1 %v503_v0  ;;  %158 = vmatpush1.bf16.msra.mxu0 %v468_v4  ;;  %v472_v7 = vld [vmem:[%s687_s1 + $0x10] sm:$0xff]   ;;  %v466_v8 = vld [vmem:[%s686_s3 + $0x20] sm:$0xff]   ;;  %v474_v9 = vld [vmem:[%s687_s1 + $0x18] sm:$0xff]  }
   0x4   :  { %159 = vmatprep.subr.bf16.mxu0 %v503_v0  ;;  %v467_v10 = vld [vmem:[%s686_s3 + $0x28] sm:$0xff]   ;;  %v476_v11 = vld [vmem:[%s687_s1 + $0x20] sm:$0xff]   ;;  %v469_v12 = vld [vmem:[%s686_s3 + $0x30] sm:$0xff]  }
   0x5   :  { %v484_v13 = vld [vmem:[%s688_s0 + $0x4] ss:$8 sps:$4 sm:$0x7f]   ;;  %v471_v15 = vld [vmem:[%s686_s3 + $0x38] sm:$0xff]   ;;  %v480_v16 = vld [vmem:[%s687_s1 + $0x30] sm:$0xff]  }
   0x6   :  { %312 = vmatpush1.bf16.msra.mxu1 %v463_v2  ;;  %456 = vmatprep.mubr.msk.bf16.mxu1 %vm153_vm0, %v484_v13  ;;  %v478_v14 = vld [vmem:[%s687_s1 + $0x28] sm:$0xff]   ;;  %v473_v17 = vld [vmem:[%s686_s3 + $0x40] sm:$0xff]   ;;  %v485_v18 = vld [vmem:[%s687_s1 + $0x38] sm:$0xff]  }
   0x7   :  { %313 = vmatprep.subr.bf16.mxu1 %v503_v0  ;;  %160 = vmatpush1.bf16.msra.mxu0 %v470_v5  ;;  %v475_v19 = vld [vmem:[%s686_s3 + $0x48] sm:$0xff]   ;;  %v486_v20 = vld [vmem:[%s687_s1 + $0x40] sm:$0xff]   ;;  %v477_v21 = vld [vmem:[%s686_s3 + $0x50] sm:$0xff]  }
   0x8   :  { %161 = vmatprep.subr.bf16.mxu0 %v503_v0  ;;  %441 = vmatprep.mubr.msk.bf16.mxu0 %vm153_vm0, %v484_v13  ;;  %v487_v22 = vld [vmem:[%s687_s1 + $0x48] sm:$0xff]   ;;  %v479_v23 = vld [vmem:[%s686_s3 + $0x58] sm:$0xff]   ;;  %v488_v24 = vld [vmem:[%s687_s1 + $0x50] sm:$0xff]   ;;  %v414_v13 = vstv %s693_s7 }
   0x9   :  { %v481_v25 = vld [vmem:[%s686_s3 + $0x60] sm:$0xff]   ;;  %v489_v26 = vld [vmem:[%s687_s1 + $0x58] sm:$0xff]  }
   0xa   :  { %314 = vmatpush1.bf16.msra.mxu1 %v464_v3  ;;  %v482_v27 = vld [vmem:[%s688_s0] ss:$8 sps:$4 sm:$0x7f]  }
   0xb   :  { %315 = vmatprep.subr.bf16.mxu1 %v503_v0  ;;  %162 = vmatpush1.bf16.msra.mxu0 %v472_v7  ;;  %v490_v28 = vld [vmem:[%s687_s1 + $0x60] sm:$0xff]  }
   0xc   :  { %163 = vmatprep.subr.bf16.mxu0 %v503_v0  ;;  %v442_v29 = vld [vmem:[%s689_s4] ss:$0 sm:$0xff] }
   0xd   :  { %v425_v46 = vld [vmem:[%s690_s2] ss:$0 sm:$0xff] }
   0xe   :  { %316 = vmatpush1.bf16.msra.mxu1 %v465_v6 }
   0xf   :  { %317 = vmatprep.subr.bf16.mxu1 %v503_v0  ;;  %164 = vmatpush1.bf16.msra.mxu0 %v474_v9 }
  0x10   :  { %165 = vmatprep.subr.bf16.mxu0 %v503_v0 }
  0x12   :  { %318 = vmatpush1.bf16.msra.mxu1 %v466_v8  ;;  %v459_v8 = vld [vmem:[%s691_s5] ss:$0 sm:$0xff] }
  0x13   :  { %319 = vmatprep.subr.bf16.mxu1 %v503_v0  ;;  %166 = vmatpush1.bf16.msra.mxu0 %v476_v11 }
  0x14   :  { %167 = vmatprep.subr.bf16.mxu0 %v503_v0 }
  0x16   :  { %320 = vmatpush1.bf16.msra.mxu1 %v467_v10  ;;  %v460_v10 = vld [vmem:[%s692_s6] ss:$0 sm:$0xff] }
  0x17   :  { %321 = vmatprep.subr.bf16.mxu1 %v503_v0  ;;  %168 = vmatpush1.bf16.msra.mxu0 %v478_v14 }
  0x18   :  { %169 = vmatprep.subr.bf16.mxu0 %v503_v0 }
  0x1a   :  { %322 = vmatpush1.bf16.msra.mxu1 %v469_v12 }
  0x1b   :  { %323 = vmatprep.subr.bf16.mxu1 %v503_v0  ;;  %170 = vmatpush1.bf16.msra.mxu0 %v480_v16 }
  0x1c   :  { %171 = vmatprep.subr.bf16.mxu0 %v503_v0 }
  0x1e   :  { %324 = vmatpush1.bf16.msra.mxu1 %v471_v15 }
  0x1f   :  { %325 = vmatprep.subr.bf16.mxu1 %v503_v0  ;;  %172 = vmatpush1.bf16.msra.mxu0 %v485_v18 }
  0x20   :  { %173 = vmatprep.subr.bf16.mxu0 %v503_v0 }
  0x22   :  { %326 = vmatpush1.bf16.msra.mxu1 %v473_v17 }
  0x23   :  { %327 = vmatprep.subr.bf16.mxu1 %v503_v0  ;;  %174 = vmatpush1.bf16.msra.mxu0 %v486_v20 }
  0x24   :  { %175 = vmatprep.subr.bf16.mxu0 %v503_v0 }
  0x26   :  { %328 = vmatpush1.bf16.msra.mxu1 %v475_v19 }
  0x27   :  { %329 = vmatprep.subr.bf16.mxu1 %v503_v0  ;;  %176 = vmatpush1.bf16.msra.mxu0 %v487_v22 }
  0x28   :  { %177 = vmatprep.subr.bf16.mxu0 %v503_v0 }
  0x2a   :  { %330 = vmatpush1.bf16.msra.mxu1 %v477_v21 }
  0x2b   :  { %331 = vmatprep.subr.bf16.mxu1 %v503_v0  ;;  %178 = vmatpush1.bf16.msra.mxu0 %v488_v24 }
  0x2c   :  { %179 = vmatprep.subr.bf16.mxu0 %v503_v0 }
  0x2e   :  { %332 = vmatpush1.bf16.msra.mxu1 %v479_v23 }
  0x2f   :  { %333 = vmatprep.subr.bf16.mxu1 %v503_v0  ;;  %180 = vmatpush1.bf16.msra.mxu0 %v489_v26 }
  0x30   :  { %181 = vmatprep.subr.bf16.mxu0 %v503_v0 }
  0x32   :  { %334 = vmatpush1.bf16.msra.mxu1 %v481_v25 }
  0x33   :  { %182 = vmatpush1.bf16.msra.mxu0 %v490_v28 }
  0x35   :  { %342 = vmatmul.mubr.bf16.vlgmr.msra.gmra.mrb[0].mxu1 %v482_v27 }
  0x36   :  { %190 = vmatmul.mubr.bf16.vlgmr.msra.gmra.mrb[0].mxu0 %v482_v27 }
 0x108   :  { %v343_v30 = vpop.f32.mrb[0].mxu1 }
 0x109   :  { %v344_v31 = vadd.f32 %v442_v29, %v343_v30  ;;  %v345_v32 = vpop.f32.mrb[1].mxu1  ;;  %v191_v38 = vpop.f32.mrb[0].mxu0 }
 0x10a   :  { %v346_v33 = vpop.f32.mrb[2].mxu1  ;;  %v193_v39 = vpop.f32.mrb[1].mxu0  ;;  %v192_v47 = vadd.f32 %v425_v46, %v191_v38 }
 0x10b   :  { %v457_v34 = vmul.f32 -1.442695, %v344_v31  ;;  %v347_v35 = vadd.f32 %v442_v29, %v346_v33  ;;  %v348_v36 = vpop.f32.mrb[3].mxu1  ;;  %v194_v40 = vpop.f32.mrb[2].mxu0 }
 0x10c   :  { %v196_v41 = vpop.f32.mrb[3].mxu0  ;;  %v195_v49 = vadd.f32 %v425_v46, %v194_v40 }
 0x10d   :  { %491 = vpow2.f32 %v457_v34  ;;  %v458_v37 = vmul.f32 -1.442695, %v347_v35 }
 0x10f   :  { %493 = vpow2.f32 %v458_v37 }
 0x117   :  { %v492_v42 = vpop.eup %491 }
 0x118   :  { %v356_v43 = vadd.f32 1.0, %v492_v42 }
 0x119   :  { %v494_v44 = vpop.eup %493 }
 0x11a   :  { %495 = vrcp.f32 %v356_v43  ;;  %v357_v45 = vadd.f32 1.0, %v494_v44 }
 0x11c   :  { %497 = vrcp.f32 %v357_v45 }
 0x124   :  { %v496_v48 = vpop.eup %495 }
 0x125   :  { %v362_v50 = vmul.f32 %v496_v48, %v192_v47 }
 0x126   :  { %v498_v51 = vpop.eup %497 }
 0x127   :  { %v365_v52 = vsel %vm364_vm1, %v362_v50, 0.0  ;;  %v363_v53 = vmul.f32 %v498_v51, %v195_v49 }
 0x128   :  { %366 = vadd.xlane.f32.xlu0 %v365_v52 }
 0x129   :  { %v369_v54 = vsel %vm368_vm2, %v363_v53, 0.0 }
 0x12c   :  { %370 = vadd.xlane.f32.xlu0 %v369_v54 }
 0x1b5   :  { %v367_v55 = vpop.xlane.xlu0 %366 }
 0x1b6   :  { %v373_v56 = vmul.f32 0.013888889, %v367_v55 }
 0x1b8   :  { %v375_v57 = vsub.f32 %v362_v50, %v373_v56 }
 0x1b9   :  { %v371_v58 = vpop.xlane.xlu0 %370 }
 0x1ba   :  { %v374_v59 = vmul.f32 0.013888889, %v371_v58  ;;  %v377_v60 = vmul.f32 %v375_v57, %v375_v57 }
 0x1bc   :  { %v376_v61 = vsub.f32 %v363_v53, %v374_v59  ;;  %v379_v62 = vsel %vm364_vm1, %v377_v60, 0.0 }
 0x1bd   :  { %380 = vadd.xlane.f32.xlu1 %v379_v62 }
 0x1be   :  { %v378_v63 = vmul.f32 %v376_v61, %v376_v61 }
 0x1c0   :  { %v382_v0 = vsel %vm368_vm2, %v378_v63, 0.0 }
 0x1c1   :  { %383 = vadd.xlane.f32.xlu1 %v382_v0 }
 0x24a   :  { %v381_v1 = vpop.xlane.xlu1 %380 }
 0x24b   :  { %v385_v2 = vmul.f32 0.013888889, %v381_v1 }
 0x24d   :  { %v387_v3 = vadd.f32 1e-08, %v385_v2 }
 0x24e   :  { %v384_v4 = vpop.xlane.xlu1 %383 }
 0x24f   :  { %499 = vrsqrt.f32 %v387_v3  ;;  %v386_v5 = vmul.f32 0.013888889, %v384_v4 }
 0x251   :  { %v388_v6 = vadd.f32 1e-08, %v386_v5 }
 0x253   :  { %501 = vrsqrt.f32 %v388_v6 }
 0x259   :  { %v500_v7 = vpop.eup %499 }
 0x25a   :  { %v391_v9 = vmul.f32 %v500_v7, %v375_v57 }
 0x25c   :  { %v400_v11 = vmul.f32 %v459_v8, %v391_v9 }
 0x25d   :  { %v502_v12 = vpop.eup %501 }
 0x25e   :  { %v409_v14 = vadd.f32 %v460_v10, %v400_v11  ;;  %v392_v15 = vmul.f32 %v502_v12, %v376_v61 }
 0x260   :  { %vm412_vm3 = vcmp.ge.f32.partialorder %v409_v14, 0.0  ;;  %v415_v16 = vmul.f32 %v414_v13, %v409_v14  ;;  %v401_v17 = vmul.f32 %v459_v8, %v392_v15 }
 0x262   :  { %v417_v18 = vsel %vm412_vm3, %v409_v14, %v415_v16  ;;  %v410_v19 = vadd.f32 %v460_v10, %v401_v17 }
 0x263   :  { %419 = vst.msk [vmem:[%s694_s8] sm:$0xff] %vm364_vm1, %v417_v18 }
 0x264   :  { %vm413_vm4 = vcmp.ge.f32.partialorder %v410_v19, 0.0  ;;  %v416_v20 = vmul.f32 %v414_v13, %v410_v19 }
 0x266   :  { %v418_v21 = vsel %vm413_vm4, %v410_v19, %v416_v20 }
 0x267   :  { %420 = vst.msk [vmem:[%s694_s8 + $0x8] sm:$0x3f] %vm368_vm2, %v418_v21 }

// kernel: forward.43
= control target key start
LH: loop header
LB: loop body
LE: loop exit
PB: predicated region body
PF: predicated region fallthrough
CT: control target
= control target key end

     0   :  { %9 = vsyncpa [#allocation3], 0  ;;  %s369_s0 = inlined_call_operand.vmem [shape: f32[2,14,36], index: 0, kind: input, shape index: {}]   ;;  %s370_s1 = inlined_call_operand.vmem [shape: f32[4], index: 1, kind: input, shape index: {}]   ;;  %s371_s2 = inlined_call_operand.vmem [shape: bf16[36,17], index: 2, kind: input, shape index: {}]   ;;  %s372_s3 = inlined_call_operand.vmem [shape: f32[1,17], index: 3, kind: input, shape index: {}]   ;;  %s373_s4 = inlined_call_operand.vmem [shape: f32[2,14,17], index: 4, kind: output, shape index: {}]  }
   0x1   :  { %s18_s17 = sshll.u32 %s370_s1, 4  ;;  %s19_s17 = int_to_ptr.vmem [resolvable:$true] %s18_s17 }
   0x2   :  { %s285_s18 = scalar_lea.vmem %s19_s17, 16  ;;  %p290_p1 = scmp.lt.s32.totalorder %s19_s17, %s19_s17 }
   0x3   :  { %p286_p0 = scmp.ne.s32.totalorder %s19_s17, %s285_s18  ;;  %p291_p2 = scmp.lt.s32.totalorder %s285_s18, %s285_s18 }
   0x5   :  { %p292_p3 = por %p291_p2, %p290_p1 }
   0x7   :  { %p293_p4 = pnand %p292_p3, %p286_p0 }
   0x9   :  { %296 = shalt.err (!%p293_p4)
}
   0xa   :  { %s299_s19 = smov [#allocation2]  }
   0xb   :  { %21 = dma.vmem_to_smem %s19_s17, 16, %s299_s19, [#allocation3]  }
   0xc   :  { %297 = dma.done.wait [#allocation3], 16  }
   0xd   :  { %298 = vsyncadd [#allocation3], 4294967280 }
   0xe   :  { %29 = sfence }
   0xf   :  { %v266_v0 = vld [vmem:[%s371_s2] sm:$0xff]   ;;  %v300_v1 = vmov 0.0   ;;  %v267_v2 = vld [vmem:[%s371_s2 + $0x8] sm:$0xff]   ;;  %v268_v3 = vld [vmem:[%s371_s2 + $0x10] ss:$0 sps:$4 sm:$0x33]  }
  0x10   :  { %243 = vmatprep.subr.bf16.mxu0 %v300_v1  ;;  %253 = vmatprep.subr.bf16.mxu1 %v300_v1  ;;  %s31_s25 = sld [smem:[#allocation2]]  ;;  %s218_s26 = sld [smem:[#allocation2 + $0x1]]  ;;  %vm92_vm0 = vcmask 1041408   ;;  %vm301_vm1 = vmmov 0   ;;  %v35_v5 = vld [vmem:[%s369_s0] sm:$0xff]  ;;  %v221_v7 = vld [vmem:[%s369_s0 + $0x10] sm:$0xff] }
  0x11   :  { %244 = vmatpush3.bf16.msra.mxu0 %v266_v0  ;;  %254 = vmatpush3.bf16.msra.mxu1 %v266_v0  ;;  %s219_s27 = sld [smem:[#allocation2 + $0x2]]  ;;  %s339_s28 = sld [smem:[#allocation2 + $0x3]]  ;;  %v94_v4 = vsel %vm92_vm0, %v268_v3, 0  ;;  %v36_v6 = vld [vmem:[%s369_s0 + $0x8] sm:$0x3f]  ;;  %vm88_vm2 = vcmask 293888  }
  0x12   :  { %245 = vmatprep.subr.bf16.mxu0 %v300_v1  ;;  %255 = vmatprep.subr.bf16.mxu1 %v300_v1  ;;  %v222_v8 = vld [vmem:[%s369_s0 + $0x18] sm:$0x3f]  ;;  %v223_v31 = vld [vmem:[%s372_s3] ss:$0 sm:$0xff]  ;;  %vm149_vm3 = vcmask 138240   ;;  %vm151_vm4 = vcmask 136192  }
  0x13   :  { %249 = vmatprep.mubr.msk.bf16.mxu0 %vm301_vm1, %v300_v1  ;;  %259 = vmatprep.mubr.msk.bf16.mxu1 %vm301_vm1, %v300_v1 }
  0x15   :  { %246 = vmatpush3.bf16.msra.mxu0 %v267_v2  ;;  %256 = vmatpush3.bf16.msra.mxu1 %v267_v2 }
  0x16   :  { %247 = vmatprep.subr.bf16.mxu0 %v300_v1  ;;  %257 = vmatprep.subr.bf16.mxu1 %v300_v1  ;;  %v40_v9 = vstv %s31_s25  ;;  %v43_v10 = vstv %s218_s26 }
  0x17   :  { %v41_v11 = vmul.f32 %v40_v9, %v35_v5  ;;  %v42_v12 = vmul.f32 %v40_v9, %v36_v6  ;;  %v44_v13 = vmul.f32 %v221_v7, %v43_v10  ;;  %v48_v14 = vstv %s219_s27 }
  0x18   :  { %v45_v15 = vmul.f32 %v222_v8, %v43_v10  ;;  %v51_v16 = vmul.f32 %v43_v10, %v35_v5  ;;  %v52_v17 = vmul.f32 %v43_v10, %v36_v6  ;;  %v53_v18 = vmul.f32 %v221_v7, %v40_v9 }
  0x19   :  { %248 = vmatpush3.bf16.msra.mxu0 %v94_v4  ;;  %258 = vmatpush3.bf16.msra.mxu1 %v94_v4  ;;  %v46_v19 = vsub.f32 %v41_v11, %v44_v13  ;;  %v54_v20 = vmul.f32 %v222_v8, %v40_v9  ;;  %v57_v21 = vstv %s339_s28 }
  0x1a   :  { %v47_v22 = vsub.f32 %v42_v12, %v45_v15  ;;  %v55_v23 = vadd.f32 %v53_v18, %v51_v16 }
  0x1b   :  { %v49_v24 = vadd.f32 %v48_v14, %v46_v19  ;;  %v56_v25 = vadd.f32 %v54_v20, %v52_v17 }
  0x1c   :  { %v50_v26 = vadd.f32 %v48_v14, %v47_v22  ;;  %v58_v27 = vadd.f32 %v57_v21, %v55_v23 }
  0x1d   :  { %v59_v28 = vadd.f32 %v57_v21, %v56_v25 }
  0x1e   :  { %v66_v29 = vpack.c.bf16 %v50_v26, %v49_v24 }
  0x1f   :  { %v153_v30 = vpack.c.bf16 %v59_v28, %v58_v27 }
  0x20   :  { %250 = vmatmul.mubr.msk.bf16.vlgmr.msra.gmra.mrb[0].mxu0 %vm88_vm2, %v66_v29 }
  0x21   :  { %260 = vmatmul.mubr.msk.bf16.vlgmr.msra.gmra.mrb[0].mxu1 %vm88_vm2, %v153_v30 }
  0xf3   :  { %v130_v32 = vpop.f32.mrb[0].mxu0 }
  0xf4   :  { %v131_v33 = vadd.f32 %v223_v31, %v130_v32  ;;  %v191_v34 = vpop.f32.mrb[0].mxu1  ;;  %v251_v35 = vpop.f32.mrb[1].mxu0 }
  0xf5   :  { %v192_v36 = vadd.f32 %v223_v31, %v191_v34  ;;  %v261_v37 = vpop.f32.mrb[1].mxu1  ;;  %v133_v38 = vpop.f32.mrb[2].mxu0 }
  0xf6   :  { %v228_v39 = vmul.f32 -1.442695, %v131_v33  ;;  %v134_v40 = vadd.f32 %v223_v31, %v133_v38  ;;  %v194_v41 = vpop.f32.mrb[2].mxu1  ;;  %v252_v42 = vpop.f32.mrb[3].mxu0 }
  0xf7   :  { %v231_v43 = vmul.f32 -1.442695, %v192_v36  ;;  %v195_v44 = vadd.f32 %v223_v31, %v194_v41  ;;  %v262_v45 = vpop.f32.mrb[3].mxu1 }
  0xf8   :  { %269 = vpow2.f32 %v228_v39  ;;  %v229_v46 = vmul.f32 -1.442695, %v134_v40 }
  0xf9   :  { %271 = vpow2.f32 %v231_v43  ;;  %v232_v47 = vmul.f32 -1.442695, %v195_v44 }
  0xfa   :  { %273 = vpow2.f32 %v229_v46 }
  0xfb   :  { %275 = vpow2.f32 %v232_v47 }
 0x102   :  { %v270_v48 = vpop.eup %269 }
 0x103   :  { %v272_v49 = vpop.eup %271  ;;  %v143_v50 = vadd.f32 1.0, %v270_v48 }
 0x104   :  { %v274_v51 = vpop.eup %273  ;;  %v204_v52 = vadd.f32 1.0, %v272_v49 }
 0x105   :  { %v276_v53 = vpop.eup %275  ;;  %277 = vrcp.f32 %v143_v50  ;;  %v144_v54 = vadd.f32 1.0, %v274_v51 }
 0x106   :  { %279 = vrcp.f32 %v204_v52  ;;  %v205_v55 = vadd.f32 1.0, %v276_v53 }
 0x107   :  { %281 = vrcp.f32 %v144_v54 }
 0x108   :  { %283 = vrcp.f32 %v205_v55 }
 0x10f   :  { %v278_v56 = vpop.eup %277 }
 0x110   :  { %v280_v57 = vpop.eup %279  ;;  %150 = vst.msk [vmem:[%s373_s4] sm:$0xff] %vm149_vm3, %v278_v56 }
 0x111   :  { %v282_v58 = vpop.eup %281  ;;  %233 = vst.msk [vmem:[%s373_s4 + $0x10] sm:$0xff] %vm149_vm3, %v280_v57 }
 0x112   :  { %v284_v59 = vpop.eup %283  ;;  %152 = vst.msk [vmem:[%s373_s4 + $0x8] sm:$0x3f] %vm151_vm4, %v282_v58 }
 0x113   :  { %234 = vst.msk [vmem:[%s373_s4 + $0x18] sm:$0x3f] %vm151_vm4, %v284_v59 }
 0x114   :  { %217 = vsyncpa [#allocation3], 1 }

// kernel: squeeze.37
= control target key start
LH: loop header
LB: loop body
LE: loop exit
PB: predicated region body
PF: predicated region fallthrough
CT: control target
= control target key end

     0   :  { %s79_s8 = smov 102   ;;  %s80_s11 = smov 68   ;;  %vm3_vm0 = vcmask 138240   ;;  %vm11_vm1 = vcmask 974640   ;;  %vm19_vm2 = vcmask 835240   ;;  %vm27_vm3 = vcmask 695840   ;;  %s122_s0 = inlined_call_operand.vmem [shape: f32[1,2,2,7,17], index: 0, kind: input, shape index: {}]   ;;  %s123_s1 = inlined_call_operand.vmem [shape: f32[2,2,119], index: 1, kind: output, shape index: {}]  }
   0x1   :  { %v66_v0 = vld [vmem:[%s122_s0 + $0x6] ss:$8 sm:$0xf]   ;;  %v68_v1 = vld [vmem:[%s122_s0 + $0x4] ss:$8 sm:$0xf]  }
   0x2   :  { %9 = vrot.lane.b32.xlu0 %v66_v0, %s79_s8  ;;  %25 = vrot.lane.b32.xlu1 %v68_v1, %s80_s11  ;;  %v67_v2 = vld [vmem:[%s122_s0 + $0x5] ss:$8 sm:$0xf]   ;;  %v69_v3 = vld [vmem:[%s122_s0 + $0x3] ss:$8 sm:$0xf]  }
   0x3   :  { %v2_v4 = vld [vmem:[%s122_s0] ss:$8 sm:$0xf]   ;;  %s81_s18 = smov 85   ;;  %s82_s19 = smov 51   ;;  %vm35_vm4 = vcmask 556440  }
   0x4   :  { %4 = vst.msk [vmem:[#allocation0] sm:$0x3] %vm3_vm0, %v2_v4   ;;  %6 = vst.msk [vmem:[#allocation0 + $0x6] sm:$0xc] %vm3_vm0, %v2_v4   ;;  %s84_s24 = smov 17   ;;  %vm43_vm5 = vcmask 417040  }
   0x5   :  { %v70_v5 = vld [vmem:[%s122_s0 + $0x2] ss:$8 sm:$0xf]   ;;  %v71_v6 = vld [vmem:[%s122_s0 + $0x1] ss:$8 sm:$0xf]  }
   0x6   :  { %17 = vrot.lane.b32.xlu0 %v67_v2, %s81_s18  ;;  %33 = vrot.lane.b32.xlu1 %v69_v3, %s82_s19  ;;  %s83_s0 = smov 34   ;;  %vm51_vm6 = vcmask 277640  }
   0xa   :  { %41 = vrot.lane.b32.xlu0 %v70_v5, %s83_s0  ;;  %49 = vrot.lane.b32.xlu1 %v71_v6, %s84_s24 }
  0x74   :  { %v10_v7 = vpop.permute.xlu0 %9   ;;  %v26_v8 = vpop.permute.xlu1 %25  }
  0x75   :  { %12 = vst.msk [vmem:[#allocation0] sm:$0x3] %vm11_vm1, %v10_v7   ;;  %14 = vst.msk [vmem:[#allocation0 + $0x6] sm:$0xc] %vm11_vm1, %v10_v7  }
  0x78   :  { %v18_v9 = vpop.permute.xlu0 %17   ;;  %v34_v10 = vpop.permute.xlu1 %33  }
  0x79   :  { %20 = vst.msk [vmem:[#allocation0] sm:$0x3] %vm19_vm2, %v18_v9   ;;  %22 = vst.msk [vmem:[#allocation0 + $0x6] sm:$0xc] %vm19_vm2, %v18_v9  }
  0x7a   :  { %28 = vst.msk [vmem:[#allocation0] sm:$0x3] %vm27_vm3, %v26_v8   ;;  %30 = vst.msk [vmem:[#allocation0 + $0x6] sm:$0xc] %vm27_vm3, %v26_v8  }
  0x7b   :  { %36 = vst.msk [vmem:[#allocation0] sm:$0x3] %vm35_vm4, %v34_v10   ;;  %38 = vst.msk [vmem:[#allocation0 + $0x6] sm:$0xc] %vm35_vm4, %v34_v10  }
  0x7c   :  { %v42_v11 = vpop.permute.xlu0 %41   ;;  %v50_v12 = vpop.permute.xlu1 %49  }
  0x7d   :  { %44 = vst.msk [vmem:[#allocation0] sm:$0x3] %vm43_vm5, %v42_v11   ;;  %46 = vst.msk [vmem:[#allocation0 + $0x6] sm:$0xc] %vm43_vm5, %v42_v11  }
  0x7e   :  { %52 = vst.msk [vmem:[#allocation0] sm:$0x3] %vm51_vm6, %v50_v12   ;;  %54 = vst.msk [vmem:[#allocation0 + $0x6] sm:$0xc] %vm51_vm6, %v50_v12  }
  0x85   :  { %v58_v13 = vld [vmem:[#allocation0] sm:$0x3]  ;;  %v62_v14 = vld [vmem:[#allocation0 + $0x8] sm:$0x3] }
  0x86   :  { %60 = vst [vmem:[%s123_s1] sm:$0x3] %v58_v13  ;;  %72 = vst [vmem:[%s123_s1 + $0x2] sm:$0x3] %v62_v14 }

// kernel: forward.44
= control target key start
LH: loop header
LB: loop body
LE: loop exit
PB: predicated region body
PF: predicated region fallthrough
CT: control target
= control target key end

     0   :  { %v771_v0 = vmov 0.0   ;;  %vm772_vm0 = vmmov 0   ;;  %vm215_vm1 = vcmask 654336   ;;  %vm572_vm2 = vcmask 277504   ;;  %s970_s1 = inlined_call_operand.vmem [shape: bf16[336,34], index: 1, kind: input, shape index: {}]   ;;  %s971_s0 = inlined_call_operand.vmem [shape: bf16[14,336], index: 0, kind: input, shape index: {}]   ;;  %s972_s3 = inlined_call_operand.vmem [shape: bf16[336,34], index: 3, kind: input, shape index: {}]   ;;  %s973_s2 = inlined_call_operand.vmem [shape: f32[1,34], index: 2, kind: input, shape index: {}, may-alias: {2,4}]   ;;  %s974_s4 = inlined_call_operand.vmem [shape: f32[1,34], index: 4, kind: input, shape index: {}, may-alias: {2,4}]   ;;  %s975_s5 = inlined_call_operand.vmem [shape: f32[14,34], index: 5, kind: output, shape index: {}]  }
   0x1   :  { %687 = vmatprep.subr.bf16.mxu1 %v771_v0  ;;  %v717_v1 = vld [vmem:[%s970_s1 + $0x40] sm:$0xff]   ;;  %697 = vmatprep.mubr.msk.bf16.mxu1 %vm772_vm0, %v771_v0  ;;  %v720_v4 = vld [vmem:[%s970_s1 + $0x48] sm:$0xff]   ;;  %v723_v7 = vld [vmem:[%s970_s1 + $0x50] sm:$0xff]   ;;  %vm574_vm3 = vcmask 275456  }
   0x2   :  { %v718_v2 = vld [vmem:[%s970_s1 + $0x80] sm:$0xff]   ;;  %631 = vmatprep.subr.bf16.mxu0 %v717_v1  ;;  %v721_v5 = vld [vmem:[%s970_s1 + $0x88] sm:$0xff]   ;;  %v724_v8 = vld [vmem:[%s970_s1 + $0x90] sm:$0xff]  }
   0x3   :  { %v719_v3 = vld [vmem:[%s970_s1] sm:$0xff]   ;;  %688 = vmatpush3.bf16.msra.mxu1 %v718_v2  ;;  %v722_v6 = vld [vmem:[%s970_s1 + $0x8] sm:$0xff]   ;;  %v725_v9 = vld [vmem:[%s970_s1 + $0x10] sm:$0xff]  }
   0x4   :  { %632 = vmatpush3.bf16.msra.mxu0 %v719_v3  ;;  %689 = vmatprep.subr.bf16.mxu1 %v771_v0  ;;  %v726_v10 = vld [vmem:[%s970_s1 + $0x58] sm:$0xff]   ;;  %v729_v13 = vld [vmem:[%s970_s1 + $0x60] sm:$0xff]   ;;  %v858_v16 = vld [vmem:[%s971_s0 + $0x8] ss:$12 sps:$4 sm:$0x7f]  }
   0x5   :  { %633 = vmatprep.subr.bf16.mxu0 %v720_v4  ;;  %v727_v11 = vld [vmem:[%s970_s1 + $0x98] sm:$0xff]   ;;  %v730_v14 = vld [vmem:[%s970_s1 + $0xa0] sm:$0xff]   ;;  %v734_v18 = vld [vmem:[%s970_s1 + $0x68] sm:$0xff]  }
   0x6   :  { %v728_v12 = vld [vmem:[%s970_s1 + $0x18] sm:$0xff]   ;;  %v731_v15 = vld [vmem:[%s970_s1 + $0x20] sm:$0xff]   ;;  %v736_v20 = vld [vmem:[%s970_s1 + $0x28] sm:$0xff]  }
   0x7   :  { %690 = vmatpush3.bf16.msra.mxu1 %v721_v5  ;;  %v733_v17 = vld [vmem:[%s972_s3 + $0x40] sm:$0xff]   ;;  %v737_v21 = vld [vmem:[%s972_s3 + $0x48] sm:$0xff]   ;;  %v738_v22 = vld [vmem:[%s970_s1 + $0x70] sm:$0xff]  }
   0x8   :  { %634 = vmatpush3.bf16.msra.mxu0 %v722_v6  ;;  %691 = vmatprep.subr.bf16.mxu1 %v771_v0  ;;  %v735_v19 = vld [vmem:[%s972_s3] sm:$0xff]   ;;  %v739_v23 = vld [vmem:[%s972_s3 + $0x8] sm:$0xff]   ;;  %v740_v24 = vld [vmem:[%s970_s1 + $0x30] sm:$0xff]  }
   0x9   :  { %635 = vmatprep.subr.bf16.mxu0 %v723_v7  ;;  %v741_v25 = vld [vmem:[%s972_s3 + $0x50] sm:$0xff]   ;;  %v742_v26 = vld [vmem:[%s970_s1 + $0x78] sm:$0xff]   ;;  %v745_v29 = vld [vmem:[%s971_s0] ss:$12 sps:$4 sm:$0x7f]  }
   0xa   :  { %v743_v27 = vld [vmem:[%s972_s3 + $0x10] sm:$0xff]   ;;  %v744_v28 = vld [vmem:[%s970_s1 + $0x38] sm:$0xff]   ;;  %v750_v33 = vld [vmem:[%s972_s3 + $0x80] sm:$0xff]  }
   0xb   :  { %692 = vmatpush3.bf16.msra.mxu1 %v724_v8  ;;  %v747_v30 = vld [vmem:[%s971_s0 + $0x4] ss:$12 sps:$4 sm:$0x7f]   ;;  %v748_v31 = vld [vmem:[%s972_s3 + $0x58] sm:$0xff]   ;;  %v753_v36 = vld [vmem:[%s972_s3 + $0x88] sm:$0xff]  }
   0xc   :  { %636 = vmatpush3.bf16.msra.mxu0 %v725_v9  ;;  %693 = vmatprep.subr.bf16.mxu1 %v771_v0  ;;  %v749_v32 = vld [vmem:[%s972_s3 + $0x18] sm:$0xff]   ;;  %v751_v34 = vld [vmem:[%s972_s3 + $0x60] sm:$0xff]   ;;  %v754_v37 = vld [vmem:[%s972_s3 + $0x68] sm:$0xff]  }
   0xd   :  { %637 = vmatprep.subr.bf16.mxu0 %v726_v10  ;;  %251 = vmatprep.mubr.bf16.mxu0 %v747_v30  ;;  %v752_v35 = vld [vmem:[%s972_s3 + $0x20] sm:$0xff]   ;;  %v755_v38 = vld [vmem:[%s972_s3 + $0x28] sm:$0xff]   ;;  %v756_v39 = vld [vmem:[%s972_s3 + $0x90] sm:$0xff]  }
   0xe   :  { %v757_v40 = vld [vmem:[%s972_s3 + $0x70] sm:$0xff]   ;;  %v759_v42 = vld [vmem:[%s972_s3 + $0x98] sm:$0xff]   ;;  %v762_v45 = vld [vmem:[%s972_s3 + $0xa0] sm:$0xff]  }
   0xf   :  { %694 = vmatpush3.bf16.msra.mxu1 %v727_v11  ;;  %v758_v41 = vld [vmem:[%s972_s3 + $0x30] sm:$0xff]   ;;  %v760_v43 = vld [vmem:[%s972_s3 + $0x78] sm:$0xff]   ;;  %v580_v51 = vld [vmem:[%s973_s2] ss:$0 sm:$0xff] }
  0x10   :  { %638 = vmatpush3.bf16.msra.mxu0 %v728_v12  ;;  %695 = vmatprep.subr.bf16.mxu1 %v771_v0  ;;  %v761_v44 = vld [vmem:[%s972_s3 + $0x38] sm:$0xff]   ;;  %v606_v63 = vld [vmem:[%s974_s4] ss:$0 sm:$0xff] }
  0x11   :  { %639 = vmatprep.subr.bf16.mxu0 %v729_v13 }
  0x13   :  { %696 = vmatpush3.bf16.msra.mxu1 %v730_v14 }
  0x14   :  { %640 = vmatpush3.bf16.msra.mxu0 %v731_v15  ;;  %659 = vmatprep.subr.bf16.mxu1 %v733_v17 }
  0x15   :  { %641 = vmatprep.subr.bf16.mxu0 %v734_v18 }
  0x16   :  { %698 = vmatmul.mubr.msk.bf16.vlgmr.msra.gmra.mrb[0].mxu1 %vm215_vm1, %v858_v16 }
  0x17   :  { %660 = vmatpush3.bf16.msra.mxu1 %v735_v19  ;;  %508 = vmatprep.mubr.bf16.mxu1 %v747_v30 }
  0x18   :  { %642 = vmatpush3.bf16.msra.mxu0 %v736_v20  ;;  %661 = vmatprep.subr.bf16.mxu1 %v737_v21 }
  0x19   :  { %643 = vmatprep.subr.bf16.mxu0 %v738_v22 }
  0x1b   :  { %662 = vmatpush3.bf16.msra.mxu1 %v739_v23 }
  0x1c   :  { %644 = vmatpush3.bf16.msra.mxu0 %v740_v24  ;;  %663 = vmatprep.subr.bf16.mxu1 %v741_v25 }
  0x1d   :  { %645 = vmatprep.subr.bf16.mxu0 %v742_v26 }
  0x1f   :  { %664 = vmatpush3.bf16.msra.mxu1 %v743_v27 }
  0x20   :  { %646 = vmatpush3.bf16.msra.mxu0 %v744_v28  ;;  %665 = vmatprep.subr.bf16.mxu1 %v748_v31 }
  0x21   :  { %701 = vmatprep.subr.bf16.mxu0 %v771_v0 }
  0x23   :  { %252 = vmatmul.mubr.bf16.vlgmr.msra.gmra.mrb[0].mxu0 %v745_v29  ;;  %666 = vmatpush3.bf16.msra.mxu1 %v749_v32 }
  0x24   :  { %702 = vmatpush3.bf16.msra.mxu0 %v750_v33  ;;  %667 = vmatprep.subr.bf16.mxu1 %v751_v34 }
  0x25   :  { %703 = vmatprep.subr.bf16.mxu0 %v771_v0  ;;  %711 = vmatprep.mubr.msk.bf16.mxu0 %vm772_vm0, %v771_v0 }
  0x27   :  { %668 = vmatpush3.bf16.msra.mxu1 %v752_v35 }
  0x28   :  { %704 = vmatpush3.bf16.msra.mxu0 %v753_v36  ;;  %669 = vmatprep.subr.bf16.mxu1 %v754_v37 }
  0x29   :  { %705 = vmatprep.subr.bf16.mxu0 %v771_v0 }
  0x2b   :  { %670 = vmatpush3.bf16.msra.mxu1 %v755_v38 }
  0x2c   :  { %706 = vmatpush3.bf16.msra.mxu0 %v756_v39  ;;  %671 = vmatprep.subr.bf16.mxu1 %v757_v40 }
  0x2d   :  { %707 = vmatprep.subr.bf16.mxu0 %v771_v0 }
  0x2f   :  { %672 = vmatpush3.bf16.msra.mxu1 %v758_v41 }
  0x30   :  { %708 = vmatpush3.bf16.msra.mxu0 %v759_v42  ;;  %673 = vmatprep.subr.bf16.mxu1 %v760_v43 }
  0x31   :  { %709 = vmatprep.subr.bf16.mxu0 %v771_v0 }
  0x33   :  { %674 = vmatpush3.bf16.msra.mxu1 %v761_v44 }
  0x34   :  { %710 = vmatpush3.bf16.msra.mxu0 %v762_v45 }
  0x36   :  { %509 = vmatmul.mubr.bf16.vlgmr.msra.gmra.mrb[4].mxu1 %v745_v29 }
  0x37   :  { %712 = vmatmul.mubr.msk.bf16.vlgmr.msra.gmra.mrb[4].mxu0 %vm215_vm1, %v858_v16 }
  0xe9   :  { %v294_v46 = vpop.f32.mrb[0].mxu1 }
  0xea   :  { %v699_v47 = vpop.f32.mrb[1].mxu1 }
  0xeb   :  { %v297_v48 = vpop.f32.mrb[2].mxu1 }
  0xec   :  { %v700_v49 = vpop.f32.mrb[3].mxu1 }
  0xf6   :  { %v647_v50 = vpop.f32.mrb[0].mxu0 }
  0xf7   :  { %v648_v52 = vpop.f32.mrb[1].mxu0 }
  0xf8   :  { %v649_v53 = vadd.f32 %v648_v52, %v647_v50  ;;  %v650_v54 = vpop.f32.mrb[2].mxu0 }
  0xf9   :  { %v651_v55 = vpop.f32.mrb[3].mxu0 }
  0xfa   :  { %v254_v56 = vadd.f32 %v649_v53, %v580_v51  ;;  %v652_v57 = vadd.f32 %v651_v55, %v650_v54 }
  0xfc   :  { %v295_v58 = vadd.f32 %v294_v46, %v254_v56  ;;  %v257_v59 = vadd.f32 %v652_v57, %v580_v51 }
  0xfe   :  { %v298_v60 = vadd.f32 %v297_v48, %v257_v59 }
 0x109   :  { %v675_v61 = vpop.f32.mrb[4].mxu1 }
 0x10a   :  { %v676_v62 = vpop.f32.mrb[5].mxu1  ;;  %v551_v0 = vpop.f32.mrb[4].mxu0 }
 0x10b   :  { %v677_v1 = vadd.f32 %v676_v62, %v675_v61  ;;  %v678_v2 = vpop.f32.mrb[6].mxu1  ;;  %v713_v3 = vpop.f32.mrb[5].mxu0 }
 0x10c   :  { %v679_v4 = vpop.f32.mrb[7].mxu1  ;;  %v554_v5 = vpop.f32.mrb[6].mxu0 }
 0x10d   :  { %v511_v6 = vadd.f32 %v677_v1, %v606_v63  ;;  %v680_v7 = vadd.f32 %v679_v4, %v678_v2  ;;  %v714_v8 = vpop.f32.mrb[7].mxu0 }
 0x10f   :  { %v552_v9 = vadd.f32 %v551_v0, %v511_v6  ;;  %v514_v10 = vadd.f32 %v680_v7, %v606_v63 }
 0x111   :  { %v629_v11 = vmul.f32 -1.442695, %v552_v9  ;;  %v555_v12 = vadd.f32 %v554_v5, %v514_v10 }
 0x113   :  { %763 = vpow2.f32 %v629_v11  ;;  %v630_v13 = vmul.f32 -1.442695, %v555_v12 }
 0x115   :  { %765 = vpow2.f32 %v630_v13 }
 0x11d   :  { %v764_v14 = vpop.eup %763 }
 0x11e   :  { %v564_v15 = vadd.f32 1.0, %v764_v14 }
 0x11f   :  { %v766_v16 = vpop.eup %765 }
 0x120   :  { %767 = vrcp.f32 %v564_v15  ;;  %v565_v17 = vadd.f32 1.0, %v766_v16 }
 0x122   :  { %769 = vrcp.f32 %v565_v17 }
 0x12a   :  { %v768_v18 = vpop.eup %767 }
 0x12b   :  { %v570_v19 = vmul.f32 %v768_v18, %v295_v58 }
 0x12c   :  { %v770_v20 = vpop.eup %769 }
 0x12d   :  { %573 = vst.msk [vmem:[%s975_s5] sm:$0xff] %vm572_vm2, %v570_v19  ;;  %v571_v21 = vmul.f32 %v770_v20, %v298_v60 }
 0x12f   :  { %575 = vst.msk [vmem:[%s975_s5 + $0x8] sm:$0x3f] %vm574_vm3, %v571_v21 }

// kernel: forward.45
= control target key start
LH: loop header
LB: loop body
LE: loop exit
PB: predicated region body
PF: predicated region fallthrough
CT: control target
= control target key end

     0   :  { %9 = vsyncpa [#allocation3], 0  ;;  %s354_s0 = inlined_call_operand.vmem [shape: f32[2,14,17], index: 0, kind: input, shape index: {}]   ;;  %s355_s1 = inlined_call_operand.vmem [shape: f32[4], index: 1, kind: input, shape index: {}]   ;;  %s356_s2 = inlined_call_operand.vmem [shape: bf16[17,17], index: 2, kind: input, shape index: {}]   ;;  %s357_s3 = inlined_call_operand.vmem [shape: f32[1,17], index: 3, kind: input, shape index: {}]   ;;  %s358_s4 = inlined_call_operand.vmem [shape: f32[2,14,17], index: 4, kind: output, shape index: {}]  }
   0x1   :  { %s18_s17 = sshll.u32 %s355_s1, 4  ;;  %s19_s17 = int_to_ptr.vmem [resolvable:$true] %s18_s17 }
   0x2   :  { %s271_s18 = scalar_lea.vmem %s19_s17, 16  ;;  %p276_p1 = scmp.lt.s32.totalorder %s19_s17, %s19_s17 }
   0x3   :  { %p272_p0 = scmp.ne.s32.totalorder %s19_s17, %s271_s18  ;;  %p277_p2 = scmp.lt.s32.totalorder %s271_s18, %s271_s18 }
   0x5   :  { %p278_p3 = por %p277_p2, %p276_p1 }
   0x7   :  { %p279_p4 = pnand %p278_p3, %p272_p0 }
   0x9   :  { %282 = shalt.err (!%p279_p4)
}
   0xa   :  { %s285_s19 = smov [#allocation2]  }
   0xb   :  { %21 = dma.vmem_to_smem %s19_s17, 16, %s285_s19, [#allocation3]  }
   0xc   :  { %283 = dma.done.wait [#allocation3], 16  }
   0xd   :  { %284 = vsyncadd [#allocation3], 4294967280 }
   0xe   :  { %29 = sfence }
   0xf   :  { %v253_v0 = vld [vmem:[%s356_s2] sm:$0xff]   ;;  %v286_v1 = vmov 0.0   ;;  %v254_v2 = vld [vmem:[%s356_s2 + $0x8] ss:$0 sps:$4 sm:$0x11]   ;;  %vm84_vm0 = vcmask 1040384  }
  0x10   :  { %233 = vmatprep.subr.bf16.mxu0 %v286_v1  ;;  %241 = vmatprep.subr.bf16.mxu1 %v286_v1  ;;  %s31_s23 = sld [smem:[#allocation2]]  ;;  %s211_s24 = sld [smem:[#allocation2 + $0x1]]  ;;  %v287_v3 = vmov 0   ;;  %vm288_vm1 = vmmov 0   ;;  %v35_v6 = vld [vmem:[%s354_s0] sm:$0xff]  ;;  %v214_v8 = vld [vmem:[%s354_s0 + $0x10] sm:$0xff] }
  0x11   :  { %234 = vmatpush3.bf16.msra.mxu0 %v253_v0  ;;  %242 = vmatpush3.bf16.msra.mxu1 %v253_v0  ;;  %v86_v4 = vsel %vm84_vm0, 65535, %v287_v3  ;;  %s212_s25 = sld [smem:[#allocation2 + $0x2]]  ;;  %s213_s26 = sld [smem:[#allocation2 + $0x3]]  ;;  %v36_v7 = vld [vmem:[%s354_s0 + $0x8] sm:$0x3f]  ;;  %vm80_vm2 = vcmask 138240  }
  0x12   :  { %235 = vmatprep.subr.bf16.mxu0 %v286_v1  ;;  %243 = vmatprep.subr.bf16.mxu1 %v286_v1  ;;  %v88_v5 = vand.u32 %v254_v2, %v86_v4  ;;  %v215_v9 = vld [vmem:[%s354_s0 + $0x18] sm:$0x3f]  ;;  %v216_v32 = vld [vmem:[%s357_s3] ss:$0 sm:$0xff]  ;;  %vm144_vm3 = vcmask 136192  }
  0x13   :  { %237 = vmatprep.mubr.msk.bf16.mxu0 %vm288_vm1, %v286_v1  ;;  %245 = vmatprep.mubr.msk.bf16.mxu1 %vm288_vm1, %v286_v1 }
  0x15   :  { %236 = vmatpush3.bf16.msra.mxu0 %v88_v5  ;;  %244 = vmatpush3.bf16.msra.mxu1 %v88_v5 }
  0x16   :  { %v40_v10 = vstv %s31_s23  ;;  %v43_v11 = vstv %s211_s24 }
  0x17   :  { %v41_v12 = vmul.f32 %v40_v10, %v35_v6  ;;  %v42_v13 = vmul.f32 %v40_v10, %v36_v7  ;;  %v44_v14 = vmul.f32 %v214_v8, %v43_v11  ;;  %v45_v15 = vmul.f32 %v215_v9, %v43_v11 }
  0x18   :  { %v48_v16 = vstv %s212_s25  ;;  %v51_v17 = vmul.f32 %v43_v11, %v35_v6  ;;  %v52_v18 = vmul.f32 %v43_v11, %v36_v7  ;;  %v53_v19 = vmul.f32 %v214_v8, %v40_v10 }
  0x19   :  { %v46_v20 = vsub.f32 %v41_v12, %v44_v14  ;;  %v47_v21 = vsub.f32 %v42_v13, %v45_v15  ;;  %v54_v22 = vmul.f32 %v215_v9, %v40_v10  ;;  %v57_v23 = vstv %s213_s26 }
  0x1a   :  { %v55_v24 = vadd.f32 %v53_v19, %v51_v17 }
  0x1b   :  { %v49_v25 = vadd.f32 %v48_v16, %v46_v20  ;;  %v50_v26 = vadd.f32 %v48_v16, %v47_v21  ;;  %v56_v27 = vadd.f32 %v54_v22, %v52_v18 }
  0x1c   :  { %v58_v28 = vadd.f32 %v57_v23, %v55_v24 }
  0x1d   :  { %v64_v29 = vpack.c.bf16 %v50_v26, %v49_v25  ;;  %v59_v30 = vadd.f32 %v57_v23, %v56_v27 }
  0x1f   :  { %238 = vmatmul.mubr.msk.bf16.vlgmr.msra.gmra.mrb[0].mxu0 %vm80_vm2, %v64_v29  ;;  %v146_v31 = vpack.c.bf16 %v59_v30, %v58_v28 }
  0x21   :  { %246 = vmatmul.mubr.msk.bf16.vlgmr.msra.gmra.mrb[0].mxu1 %vm80_vm2, %v146_v31 }
  0xf2   :  { %v124_v33 = vpop.f32.mrb[0].mxu0 }
  0xf3   :  { %v125_v34 = vadd.f32 %v216_v32, %v124_v33  ;;  %v239_v35 = vpop.f32.mrb[1].mxu0 }
  0xf4   :  { %v184_v36 = vpop.f32.mrb[0].mxu1  ;;  %v127_v37 = vpop.f32.mrb[2].mxu0 }
  0xf5   :  { %v220_v38 = vmul.f32 -1.442695, %v125_v34  ;;  %v185_v39 = vadd.f32 %v216_v32, %v184_v36  ;;  %v247_v40 = vpop.f32.mrb[1].mxu1  ;;  %v128_v41 = vadd.f32 %v216_v32, %v127_v37  ;;  %v240_v42 = vpop.f32.mrb[3].mxu0 }
  0xf6   :  { %v187_v43 = vpop.f32.mrb[2].mxu1 }
  0xf7   :  { %255 = vpow2.f32 %v220_v38  ;;  %v223_v44 = vmul.f32 -1.442695, %v185_v39  ;;  %v221_v45 = vmul.f32 -1.442695, %v128_v41  ;;  %v188_v46 = vadd.f32 %v216_v32, %v187_v43  ;;  %v248_v47 = vpop.f32.mrb[3].mxu1 }
  0xf9   :  { %257 = vpow2.f32 %v223_v44  ;;  %v224_v48 = vmul.f32 -1.442695, %v188_v46 }
  0xfa   :  { %259 = vpow2.f32 %v221_v45 }
  0xfb   :  { %261 = vpow2.f32 %v224_v48 }
 0x101   :  { %v256_v49 = vpop.eup %255 }
 0x102   :  { %v137_v50 = vadd.f32 1.0, %v256_v49 }
 0x103   :  { %v258_v51 = vpop.eup %257 }
 0x104   :  { %v260_v52 = vpop.eup %259  ;;  %263 = vrcp.f32 %v137_v50  ;;  %v197_v53 = vadd.f32 1.0, %v258_v51 }
 0x105   :  { %v262_v54 = vpop.eup %261  ;;  %v138_v55 = vadd.f32 1.0, %v260_v52 }
 0x106   :  { %265 = vrcp.f32 %v197_v53  ;;  %v198_v56 = vadd.f32 1.0, %v262_v54 }
 0x107   :  { %267 = vrcp.f32 %v138_v55 }
 0x108   :  { %269 = vrcp.f32 %v198_v56 }
 0x10e   :  { %v264_v57 = vpop.eup %263 }
 0x10f   :  { %143 = vst.msk [vmem:[%s358_s4] sm:$0xff] %vm80_vm2, %v264_v57 }
 0x110   :  { %v266_v58 = vpop.eup %265 }
 0x111   :  { %v268_v59 = vpop.eup %267  ;;  %225 = vst.msk [vmem:[%s358_s4 + $0x10] sm:$0xff] %vm80_vm2, %v266_v58 }
 0x112   :  { %v270_v60 = vpop.eup %269  ;;  %145 = vst.msk [vmem:[%s358_s4 + $0x8] sm:$0x3f] %vm144_vm3, %v268_v59 }
 0x113   :  { %226 = vst.msk [vmem:[%s358_s4 + $0x18] sm:$0x3f] %vm144_vm3, %v270_v60 }
 0x114   :  { %210 = vsyncpa [#allocation3], 1 }

// kernel: forward.46
= control target key start
LH: loop header
LB: loop body
LE: loop exit
PB: predicated region body
PF: predicated region fallthrough
CT: control target
= control target key end

     0   :  { %v110_v0 = vmov 0   ;;  %vm34_vm0 = vcmask 970752   ;;  %vm53_vm1 = vcmask 1042432   ;;  %vm98_vm2 = vcmask 1040384   ;;  %s171_s1 = inlined_call_operand.vmem [shape: f32[1,10,1], index: 1, kind: input, shape index: {}]   ;;  %s172_s0 = inlined_call_operand.vmem [shape: f32[2,10,119], index: 0, kind: input, shape index: {}]   ;;  %s173_s2 = inlined_call_operand.vmem [shape: f32[2,2,119], index: 2, kind: input, shape index: {}]   ;;  %s174_s3 = inlined_call_operand.vmem [shape: f32[2,2,119], index: 3, kind: output, shape index: {}]  }
   0x1   :  { %109 = vset.pattern.permute.xlu0 %v110_v0  ;;  %v18_v1 = vld [vmem:[%s171_s1] sm:$0xff]  ;;  %v19_v2 = vld [vmem:[%s171_s1 + $0x8] sm:$0x3]  ;;  %v16_v4 = vld [vmem:[%s172_s0 + $0x10] sm:$0xff]  ;;  %vm101_vm3 = vcmask 967680  }
   0x2   :  { %22 = vperm.xlu0 %109, %v18_v1   ;;  %v14_v3 = vld [vmem:[%s172_s0] sm:$0xff]  ;;  %v15_v8 = vld [vmem:[%s172_s0 + $0x8] sm:$0x3]  ;;  %v17_v9 = vld [vmem:[%s172_s0 + $0x18] sm:$0x3] }
   0x3   :  { %v78_v43 = vld [vmem:[%s173_s2 + $0x1] sm:$0x1]  ;;  %v79_v44 = vld [vmem:[%s173_s2 + $0x3] sm:$0x1]  ;;  %v76_v49 = vld [vmem:[%s173_s2] sm:$0x1] }
   0x4   :  { %v77_v50 = vld [vmem:[%s173_s2 + $0x2] sm:$0x1] }
   0x6   :  { %27 = vperm.xlu0 %109, %v19_v2  }
  0x81   :  { %v23_v5 = vpop.permute.xlu0 %22 }
  0x82   :  { %v30_v6 = vmul.f32 %v23_v5, %v14_v3  ;;  %v32_v7 = vmul.f32 %v23_v5, %v16_v4 }
  0x84   :  { %v35_v10 = vsel %vm34_vm0, %v30_v6, 0.0  ;;  %v42_v11 = vsel %vm34_vm0, %v32_v7, 0.0  ;;  %v54_v19 = vrot.slane %v30_v6, 5  ;;  %v57_v20 = vrot.slane %v32_v7, 5 }
  0x85   :  { %v36_v12 = vrot.slane %v35_v10, 4  ;;  %v43_v13 = vrot.slane %v42_v11, 4  ;;  %v28_v14 = vpop.permute.xlu0 %27 }
  0x86   :  { %v31_v15 = vmul.f32 %v28_v14, %v15_v8  ;;  %v33_v16 = vmul.f32 %v28_v14, %v17_v9 }
  0x87   :  { %v37_v17 = vadd.f32 %v36_v12, %v35_v10  ;;  %v44_v18 = vadd.f32 %v43_v13, %v42_v11 }
  0x88   :  { %v55_v21 = vrot.slane %v31_v15, 5  ;;  %v58_v22 = vrot.slane %v33_v16, 5 }
  0x89   :  { %v38_v23 = vrot.slane %v37_v17, 2  ;;  %v45_v24 = vrot.slane %v44_v18, 2 }
  0x8a   :  { %v56_v25 = vsel %vm53_vm1, %v54_v19, %v55_v21  ;;  %v59_v26 = vsel %vm53_vm1, %v57_v20, %v58_v22 }
  0x8b   :  { %v39_v27 = vadd.f32 %v38_v23, %v37_v17  ;;  %v46_v28 = vadd.f32 %v45_v24, %v44_v18  ;;  %v62_v29 = vsel %vm34_vm0, %v56_v25, 0.0  ;;  %v69_v30 = vsel %vm34_vm0, %v59_v26, 0.0 }
  0x8c   :  { %v63_v31 = vrot.slane %v62_v29, 4  ;;  %v70_v32 = vrot.slane %v69_v30, 4 }
  0x8d   :  { %v40_v35 = vrot.slane %v39_v27, 1  ;;  %v47_v36 = vrot.slane %v46_v28, 1 }
  0x8e   :  { %v64_v33 = vadd.f32 %v63_v31, %v62_v29  ;;  %v71_v34 = vadd.f32 %v70_v32, %v69_v30 }
  0x8f   :  { %v41_v41 = vadd.f32 %v40_v35, %v39_v27  ;;  %v48_v42 = vadd.f32 %v47_v36, %v46_v28 }
  0x90   :  { %v65_v37 = vrot.slane %v64_v33, 2  ;;  %v72_v38 = vrot.slane %v71_v34, 2 }
  0x91   :  { %v88_v51 = vmul.f32 %v78_v43, %v41_v41  ;;  %v89_v52 = vmul.f32 %v79_v44, %v48_v42  ;;  %v80_v57 = vmul.f32 %v76_v49, %v41_v41  ;;  %v81_v58 = vmul.f32 %v77_v50, %v48_v42 }
  0x92   :  { %v66_v39 = vadd.f32 %v65_v37, %v64_v33  ;;  %v73_v40 = vadd.f32 %v72_v38, %v71_v34 }
  0x94   :  { %v67_v45 = vrot.slane %v66_v39, 1  ;;  %v74_v46 = vrot.slane %v73_v40, 1 }
  0x96   :  { %v68_v47 = vadd.f32 %v67_v45, %v66_v39  ;;  %v75_v48 = vadd.f32 %v74_v46, %v73_v40 }
  0x98   :  { %v82_v53 = vmul.f32 %v78_v43, %v68_v47  ;;  %v83_v54 = vmul.f32 %v79_v44, %v75_v48  ;;  %v86_v55 = vmul.f32 %v76_v49, %v68_v47  ;;  %v87_v56 = vmul.f32 %v77_v50, %v75_v48 }
  0x9a   :  { %v90_v59 = vadd.f32 %v88_v51, %v86_v55  ;;  %v91_v60 = vadd.f32 %v89_v52, %v87_v56  ;;  %v84_v61 = vsub.f32 %v80_v57, %v82_v53  ;;  %v85_v62 = vsub.f32 %v81_v58, %v83_v54 }
  0x9c   :  { %v94_v63 = vrot.slane %v90_v59, 7  ;;  %v95_v0 = vrot.slane %v91_v60, 7 }
  0x9e   :  { %v99_v1 = vsel %vm98_vm2, %v84_v61, %v94_v63  ;;  %v100_v2 = vsel %vm98_vm2, %v85_v62, %v95_v0 }
  0x9f   :  { %102 = vst.msk [vmem:[%s174_s3] sm:$0x3] %vm101_vm3, %v99_v1  ;;  %103 = vst.msk [vmem:[%s174_s3 + $0x2] sm:$0x3] %vm101_vm3, %v100_v2 }

// kernel: forward.47
= control target key start
LH: loop header
LB: loop body
LE: loop exit
PB: predicated region body
PF: predicated region fallthrough
CT: control target
= control target key end

     0   :  { %vm21_vm0 = vcmask 277504   ;;  %vm28_vm1 = vcmask 1041408   ;;  %vm118_vm2 = vcmask 259072   ;;  %vm116_vm3 = vcmask 261120   ;;  %s208_s1 = inlined_call_operand.vmem [shape: f32[34,32], index: 1, kind: input, shape index: {}]   ;;  %s209_s0 = inlined_call_operand.vmem [shape: f32[14,34], index: 0, kind: input, shape index: {}]   ;;  %s210_s2 = inlined_call_operand.vmem [shape: f32[1,32], index: 2, kind: input, shape index: {}]   ;;  %s211_s3 = inlined_call_operand.vmem [shape: f32[14,32], index: 3, kind: output, shape index: {}]  }
   0x1   :  { %v16_v0 = vld [vmem:[%s208_s1] sm:$0xff]  ;;  %v17_v1 = vld [vmem:[%s208_s1 + $0x8] sm:$0xff]  ;;  %v18_v2 = vld [vmem:[%s208_s1 + $0x10] sm:$0xff] }
   0x2   :  { %v148_v3 = vpack.c.bf16 %v17_v1, %v16_v0  ;;  %v19_v4 = vld [vmem:[%s208_s1 + $0x18] sm:$0xff]  ;;  %v14_v5 = vld [vmem:[%s209_s0] sm:$0xff]  ;;  %v15_v8 = vld [vmem:[%s209_s0 + $0x8] sm:$0x3f] }
   0x3   :  { %v152_v6 = vpack.c.bf16 %v19_v4, %v18_v2  ;;  %145 = vmatprep.mubr.msk.f32.mxu0 %vm21_vm0, %v14_v5  ;;  %v20_v7 = vld [vmem:[%s208_s1 + $0x20] sm:$0x3] }
   0x4   :  { %149 = vmatprep.subr.bf16.mxu0 %v148_v3  ;;  %v127_v9 = vld [vmem:[%s210_s2] ss:$0 sm:$0xff] }
   0x5   :  { %151 = vmatpush3.bf16.msra.mxu0 %v148_v3 }
   0x6   :  { %153 = vmatprep.subr.bf16.mxu0 %v152_v6 }
   0x9   :  { %155 = vmatpush3.bf16.msra.mxu0 %v152_v6 }
   0xa   :  { %143 = vmatprep.subr.msk.mxu0 %vm28_vm1, %v20_v7 }
   0xd   :  { %144 = vmatpush3.msk.msra.mxu0 %vm28_vm1, %v20_v7 }
   0xe   :  { %146 = vmatmul.mubr.msk.f32.vlgmr.msra.gmra.mrb[0].mxu0 %vm21_vm0, %v15_v8 }
  0xe1   :  { %v147_v10 = vpop.f32.mrb[0].mxu0 }
  0xe2   :  { %v115_v11 = vmul.f32 %v147_v10, %v127_v9  ;;  %v98_v12 = vpop.f32.mrb[1].mxu0 }
  0xe3   :  { %v114_v13 = vmul.f32 %v127_v9, %v98_v12 }
  0xe4   :  { %119 = vst.msk [vmem:[%s211_s3 + $0x8] sm:$0x3f] %vm118_vm2, %v115_v11 }
  0xe5   :  { %117 = vst.msk [vmem:[%s211_s3] sm:$0xff] %vm116_vm3, %v114_v13 }

</bundles_post_ra>
